<compile_context>
chip_gen: v7x
topology: tpu7x:2x2x1
jax: 0.10.0
libtpu: 0.0.40
codegen_flags: <defaults>
</compile_context>

<pallas_src>
import jax
import jax.numpy as jnp
import numpy as np
from jax import lax
from jax.experimental import pallas as pl
from jax.experimental.pallas import tpu as pltpu

LANE = 128
EPS = 1e-5


def _rup(n, m=LANE):
    return ((n + m - 1) // m) * m


def _pick_tile(n, prefs=(16, 8, 4, 2, 1)):
    for t in prefs:
        if n % t == 0:
            return t
    return 1


def _cparams(block_elems, scratch_elems):
    # double-buffered blocks + scratch + headroom; never below the 32 MiB default.
    est = 4 * (2 * int(block_elems) + int(scratch_elems)) + (8 << 20)
    return pltpu.CompilerParams(
        dimension_semantics=("parallel", "parallel"),
        vmem_limit_bytes=int(max(est, 32 << 20)))


# ----------------------------------------------------------------------------
# Kernel 1: ConvTranspose2d(k=2, s=2) as a tiled matmul with the 2x2
# pixel-shuffle fused into the output layout.
#   x tile [1, THa, W, Cin_p] @ w [Cin_p, 4*Cp] (+ bias) -> y [THa*W, 4*Cp]
#   (columns ordered (kh, kw, c)); the two kh halves are written to the
#   kh dimension of the [1, THa, 2, W, 2*Cp] output block, so the wrapper-side
#   reshape to [B, 2H, 2W, Cp] is a pure bitcast (no extra HBM round trip).
# ----------------------------------------------------------------------------
def _up_kernel(x_ref, w_ref, b_ref, o_ref):
    _, th, wd, cin = x_ref.shape
    c2 = o_ref.shape[-1]                       # 2*Cp, packed as (kw, c)
    x2 = x_ref[0].reshape(th * wd, cin)
    y = jnp.dot(x2, w_ref[...], preferred_element_type=jnp.float32) + b_ref[...]
    o_ref[0, :, 0, :, :] = y[:, :c2].reshape(th, wd, c2)
    o_ref[0, :, 1, :, :] = y[:, c2:].reshape(th, wd, c2)


def _upsample_stage(x_p, w_up, b_up, Cp):
    B, H, W, Cin_p = x_p.shape
    C4 = w_up.shape[1]                         # 4*Cp
    THa = _pick_tile(H)
    nH = H // THa
    blk = THa * W * Cin_p + Cin_p * C4 + C4 + THa * 2 * W * 2 * Cp
    out = pl.pallas_call(
        _up_kernel,
        grid_spec=pltpu.PrefetchScalarGridSpec(
            num_scalar_prefetch=0,
            grid=(B, nH),
            in_specs=[
                pl.BlockSpec((1, THa, W, Cin_p), lambda b, i: (b, i, 0, 0)),
                pl.BlockSpec((Cin_p, C4), lambda b, i: (0, 0)),
                pl.BlockSpec((1, C4), lambda b, i: (0, 0)),
            ],
            out_specs=pl.BlockSpec((1, THa, 2, W, 2 * Cp),
                                   lambda b, i: (b, i, 0, 0, 0)),
        ),
        out_shape=jax.ShapeDtypeStruct((B, H, 2, W, 2 * Cp), jnp.float32),
        compiler_params=_cparams(blk, 0),
    )(x_p, w_up, b_up)
    # [B, H, 2, W, 2*Cp] -> [B, 2H, 2W, Cp]: element-order preserving (bitcast).
    return out.reshape(B, 2 * H, 2 * W, Cp)


# ----------------------------------------------------------------------------
# Kernel 2/3: conv3x3 (+bias) over a row tile with a 1-row halo, optional fused
# "BN+ReLU of the previous layer" on the load path, and per-tile BN sum /
# sum-of-squares in the epilogue.  Sources are unpadded [B, H2, W2, Cp]; the
# 1-px zero column margins are written directly into the VMEM scratch tile.
# ----------------------------------------------------------------------------
def _make_conv_kernel(n_src, prenorm, TH, W2, Cp):
    Ctot = n_src * Cp
    n_in = 3 * n_src + 2 + (2 if prenorm else 0)

    def kernel(*refs):
        srcs = refs[:3 * n_src]
        w_ref = refs[3 * n_src]
        b_ref = refs[3 * n_src + 1]
        if prenorm:
            scale_ref = refs[3 * n_src + 2]
            shift_ref = refs[3 * n_src + 3]
        z_ref = refs[n_in]
        stats_ref = refs[n_in + 1]
        xpad_ref = refs[n_in + 2]
        acc_ref = refs[n_in + 3]

        i = pl.program_id(1)
        n_row_tiles = pl.num_programs(1)
        top_keep = i > 0
        bot_keep = i < n_row_tiles - 1

        if prenorm:
            sc = scale_ref[...].reshape(1, 1, Cp)
            sh = shift_ref[...].reshape(1, 1, Cp)

        def prep(v, keep=None):
            # fuse BN+ReLU of the previous layer into the load path; halo rows
            # beyond the image boundary are zeroed via `keep`.
            if prenorm:
                v = jnp.maximum(v * sc + sh, 0.0)
            if keep is not None:
                v = v * keep.astype(v.dtype)
            return v

        # 1-px zero column margins (conv "SAME" zero padding)
        zcol = jnp.zeros((TH + 2, 1, Ctot), jnp.float32)
        xpad_ref[:, 0:1, :] = zcol
        xpad_ref[:, W2 + 1:W2 + 2, :] = zcol

        # assemble the halo'd, spatially zero-padded input tile in VMEM
        # (the channel concat of the n_src sources is fused here)
        for s in range(n_src):
            cur, prv, nxt = srcs[3 * s], srcs[3 * s + 1], srcs[3 * s + 2]
            lo, hi = s * Cp, (s + 1) * Cp
            xpad_ref[1:TH + 1, 1:W2 + 1, lo:hi] = prep(cur[0])
            xpad_ref[0:1, 1:W2 + 1, lo:hi] = prep(prv[0], top_keep)
            xpad_ref[TH + 1:TH + 2, 1:W2 + 1, lo:hi] = prep(nxt[0], bot_keep)

        # conv3x3 = 9 accumulating matmuls into a VMEM accumulator (init = bias)
        acc_ref[...] = jnp.broadcast_to(b_ref[...], (TH * W2, Cp))
        for k in range(9):
            kh, kw = k // 3, k % 3
            win = xpad_ref[kh:kh + TH, kw:kw + W2, :].reshape(TH * W2, Ctot)
            acc_ref[...] += jnp.dot(win, w_ref[k],
                                    preferred_element_type=jnp.float32)

        z2 = acc_ref[...]
        # per-tile BN statistics (summed across tiles outside the kernel)
        stats_ref[0, 0, 0:1, :] = jnp.sum(z2, axis=0, keepdims=True)
        stats_ref[0, 0, 1:2, :] = jnp.sum(z2 * z2, axis=0, keepdims=True)
        z_ref[0] = z2.reshape(TH, W2, Cp)

    return kernel


def _conv_stage(sources, w, b, *, prenorm=False, scale=None, shift=None, TH):
    B, H2, W2, Cp = sources[0].shape
    nH = H2 // TH
    n_src = len(sources)
    Ctot = n_src * Cp
    Wp = W2 + 2

    in_specs, call_args = [], []
    for src in sources:
        in_specs += [
            pl.BlockSpec((1, TH, W2, Cp), lambda b_, i_: (b_, i_, 0, 0)),
            pl.BlockSpec((1, 1, W2, Cp),
                         lambda b_, i_: (b_, jnp.maximum(i_ * TH - 1, 0), 0, 0)),
            pl.BlockSpec((1, 1, W2, Cp),
                         lambda b_, i_: (b_, jnp.minimum(i_ * TH + TH, H2 - 1), 0, 0)),
        ]
        call_args += [src, src, src]
    in_specs += [
        pl.BlockSpec((9, Ctot, Cp), lambda b_, i_: (0, 0, 0)),
        pl.BlockSpec((1, Cp), lambda b_, i_: (0, 0)),
    ]
    call_args += [w, b]
    if prenorm:
        in_specs += [pl.BlockSpec((1, Cp), lambda b_, i_: (0, 0)),
                     pl.BlockSpec((1, Cp), lambda b_, i_: (0, 0))]
        call_args += [scale, shift]

    out_shape = (
        jax.ShapeDtypeStruct((B, H2, W2, Cp), jnp.float32),
        jax.ShapeDtypeStruct((B, nH, 2, Cp), jnp.float32),
    )
    out_specs = [
        pl.BlockSpec((1, TH, W2, Cp), lambda b_, i_: (b_, i_, 0, 0)),
        pl.BlockSpec((1, 1, 2, Cp), lambda b_, i_: (b_, i_, 0, 0)),
    ]
    scratch = [
        pltpu.VMEM((TH + 2, Wp, Ctot), jnp.float32),   # halo'd input tile
        pltpu.VMEM((TH * W2, Cp), jnp.float32),        # conv accumulator
    ]
    blk_elems = (n_src * (TH + 2) * W2 * Cp + 9 * Ctot * Cp + 3 * Cp
                 + TH * W2 * Cp + 2 * Cp)
    scratch_elems = (TH + 2) * Wp * Ctot + TH * W2 * Cp

    kernel = _make_conv_kernel(n_src, prenorm, TH, W2, Cp)
    z, stats = pl.pallas_call(
        kernel,
        grid_spec=pltpu.PrefetchScalarGridSpec(
            num_scalar_prefetch=0,
            grid=(B, nH),
            in_specs=in_specs,
            out_specs=out_specs,
            scratch_shapes=scratch),
        out_shape=out_shape,
        compiler_params=_cparams(blk_elems, scratch_elems),
    )(*call_args)
    return z, stats


# ----------------------------------------------------------------------------
# Kernel 4: final BN2 + ReLU (elementwise, tiled).
# ----------------------------------------------------------------------------
def _bnrelu_kernel(z_ref, scale_ref, shift_ref, o_ref):
    C = o_ref.shape[-1]
    sc = scale_ref[...].reshape(1, 1, C)
    sh = shift_ref[...].reshape(1, 1, C)
    o_ref[0] = jnp.maximum(z_ref[0] * sc + sh, 0.0)


def _bnrelu_stage(z, scale, shift, TH):
    B, H2, W2, Cp = z.shape
    nH = H2 // TH
    blk = 2 * TH * W2 * Cp + 2 * Cp
    return pl.pallas_call(
        _bnrelu_kernel,
        grid_spec=pltpu.PrefetchScalarGridSpec(
            num_scalar_prefetch=0,
            grid=(B, nH),
            in_specs=[pl.BlockSpec((1, TH, W2, Cp), lambda b, i: (b, i, 0, 0)),
                      pl.BlockSpec((1, Cp), lambda b, i: (0, 0)),
                      pl.BlockSpec((1, Cp), lambda b, i: (0, 0))],
            out_specs=pl.BlockSpec((1, TH, W2, Cp), lambda b, i: (b, i, 0, 0))),
        out_shape=jax.ShapeDtypeStruct((B, H2, W2, Cp), jnp.float32),
        compiler_params=_cparams(blk, 0),
    )(z, scale, shift)


def _bn_scale_shift(stats, gamma_p, beta_p, count):
    sums = jnp.sum(stats, axis=(0, 1))                       # [2, Cp]
    mean = sums[0:1] / count                                 # [1, Cp]
    var = jnp.maximum(sums[1:2] / count - mean * mean, 0.0)  # biased (train mode)
    scale = gamma_p.reshape(1, -1) * lax.rsqrt(var + EPS)
    shift = beta_p.reshape(1, -1) - mean * scale
    return scale, shift


# ----------------------------------------------------------------------------
# Wrapper: NCHW in / NCHW out, PyTorch-shaped parameters.
# ----------------------------------------------------------------------------
@jax.jit
def decoder_block_forward(x_nchw, skip_nchw, params):
    B, in_c, H, W = x_nchw.shape
    out_c = params["b_up"].shape[0]
    H2, W2 = 2 * H, 2 * W
    Cin_p = _rup(in_c)
    Cp = _rup(out_c)

    # ---- pack parameters into padded, lane-dense layouts ----
    wq = jnp.transpose(params["w_up"], (0, 2, 3, 1))            # [in_c, kh, kw, oc]
    wq = jnp.pad(wq, ((0, Cin_p - in_c), (0, 0), (0, 0), (0, Cp - out_c)))
    w_up_pk = wq.reshape(Cin_p, 4 * Cp)                         # cols = (kh, kw, c)
    b_up_pk = jnp.tile(jnp.pad(params["b_up"], (0, Cp - out_c)), 4).reshape(1, 4 * Cp)

    def pack_conv(wt, n_groups):
        # torch conv weight [oc, n_groups*oc, 3, 3] -> [9, n_groups*Cp, Cp]
        w_ = jnp.transpose(wt, (2, 3, 1, 0))                    # [3, 3, ci, oc]
        parts = []
        for g in range(n_groups):
            blkw = w_[:, :, g * out_c:(g + 1) * out_c, :]
            parts.append(jnp.pad(blkw, ((0, 0), (0, 0),
                                        (0, Cp - out_c), (0, Cp - out_c))))
        return jnp.concatenate(parts, axis=2).reshape(9, n_groups * Cp, Cp)

    w1_pk = pack_conv(params["w1"], 2)
    w2_pk = pack_conv(params["w2"], 1)
    b1_pk = jnp.pad(params["b1"], (0, Cp - out_c)).reshape(1, Cp)
    b2_pk = jnp.pad(params["b2"], (0, Cp - out_c)).reshape(1, Cp)
    g1_p = jnp.pad(params["bn1_gamma"], (0, Cp - out_c))
    be1_p = jnp.pad(params["bn1_beta"], (0, Cp - out_c))
    g2_p = jnp.pad(params["bn2_gamma"], (0, Cp - out_c))
    be2_p = jnp.pad(params["bn2_beta"], (0, Cp - out_c))

    # ---- inputs to NHWC, channel-padded (PyTorch layout boundary) ----
    # TODO(synk): for very small out_c the 128-lane channel pad inflates HBM
    # traffic; a W-minor layout would avoid it but needs a different conv tiling.
    x_p = jnp.pad(jnp.transpose(x_nchw, (0, 2, 3, 1)),
                  ((0, 0), (0, 0), (0, 0), (0, Cin_p - in_c)))
    skip_p = jnp.pad(jnp.transpose(skip_nchw, (0, 2, 3, 1)),
                     ((0, 0), (0, 0), (0, 0), (0, Cp - out_c)))

    # ---- stage 1: ConvTranspose2d(k=2, s=2), pixel-shuffle fused in-kernel ----
    up = _upsample_stage(x_p, w_up_pk, b_up_pk, Cp)             # [B, H2, W2, Cp]

    TH = _pick_tile(H2)
    count = B * H2 * W2

    # ---- stage 2: conv1 + bias + BN1 partial stats (concat fused: 2 sources) ----
    z1, st1 = _conv_stage([up, skip_p], w1_pk, b1_pk, prenorm=False, TH=TH)
    scale1, shift1 = _bn_scale_shift(st1, g1_p, be1_p, count)

    # ---- stage 3: (BN1+ReLU fused into load) + conv2 + bias + BN2 partial stats ----
    z2, st2 = _conv_stage([z1], w2_pk, b2_pk, prenorm=True,
                          scale=scale1, shift=shift1, TH=TH)
    scale2, shift2 = _bn_scale_shift(st2, g2_p, be2_p, count)

    # ---- stage 4: BN2 + ReLU ----
    out_nhwc = _bnrelu_stage(z2, scale2, shift2, TH)

    # ---- back to NCHW, drop channel padding ----
    return jnp.transpose(out_nhwc[..., :out_c], (0, 3, 1, 2))


# ----------------------------------------------------------------------------
# Pure-JAX reference (same math, NCHW, via lax.conv_general_dilated)
# ----------------------------------------------------------------------------
def reference(x_nchw, skip_nchw, params):
    B, Cin, H, W = x_nchw.shape
    Cout = params["b_up"].shape[0]
    y = jnp.einsum("bihw,iokl->bohwkl", x_nchw, params["w_up"])
    y = jnp.transpose(y, (0, 1, 2, 4, 3, 5)).reshape(B, Cout, 2 * H, 2 * W)
    y = y + params["b_up"][None, :, None, None]
    xcat = jnp.concatenate([y, skip_nchw], axis=1)

    def conv_bn_relu(z, Wc, bc, g, be):
        z = lax.conv_general_dilated(
            z, Wc, (1, 1), "SAME", dimension_numbers=("NCHW", "OIHW", "NCHW"))
        z = z + bc[None, :, None, None]
        m = jnp.mean(z, axis=(0, 2, 3), keepdims=True)
        v = jnp.mean((z - m) ** 2, axis=(0, 2, 3), keepdims=True)
        z = (z - m) / jnp.sqrt(v + 1e-5) * g[None, :, None, None] + be[None, :, None, None]
        return jnp.maximum(z, 0.0)

    h = conv_bn_relu(xcat, params["w1"], params["b1"],
                     params["bn1_gamma"], params["bn1_beta"])
    h = conv_bn_relu(h, params["w2"], params["b2"],
                     params["bn2_gamma"], params["bn2_beta"])
    return h


if __name__ == "__main__":
    B, in_c, out_c, H, W = 2, 8, 4, 8, 8  # skip is [B, out_c, 2H, 2W]

    key = jax.random.PRNGKey(0)
    ks = jax.random.split(key, 12)
    f32 = jnp.float32

    x = jax.random.normal(ks[0], (B, in_c, H, W), f32)
    skip = jax.random.normal(ks[1], (B, out_c, 2 * H, 2 * W), f32)

    params = {
        # ConvTranspose2d(in_c, out_c, 2, stride=2): weight [in_c, out_c, 2, 2]
        "w_up": 0.2 * jax.random.normal(ks[2], (in_c, out_c, 2, 2), f32),
        "b_up": 0.1 * jax.random.normal(ks[3], (out_c,), f32),
        # Conv2d(2*out_c, out_c, 3, padding=1): weight [out_c, 2*out_c, 3, 3]
        "w1": 0.2 * jax.random.normal(ks[4], (out_c, 2 * out_c, 3, 3), f32),
        "b1": 0.1 * jax.random.normal(ks[5], (out_c,), f32),
        "bn1_gamma": 1.0 + 0.1 * jax.random.normal(ks[6], (out_c,), f32),
        "bn1_beta": 0.1 * jax.random.normal(ks[7], (out_c,), f32),
        # Conv2d(out_c, out_c, 3, padding=1): weight [out_c, out_c, 3, 3]
        "w2": 0.2 * jax.random.normal(ks[8], (out_c, out_c, 3, 3), f32),
        "b2": 0.1 * jax.random.normal(ks[9], (out_c,), f32),
        "bn2_gamma": 1.0 + 0.1 * jax.random.normal(ks[10], (out_c,), f32),
        "bn2_beta": 0.1 * jax.random.normal(ks[11], (out_c,), f32),
    }

    out = decoder_block_forward(x, skip, params)
    out = jax.block_until_ready(out)
    assert out.shape == (B, out_c, 2 * H, 2 * W), out.shape

    ref = jax.block_until_ready(reference(x, skip, params))
    if not np.allclose(np.asarray(out), np.asarray(ref), atol=2e-3, rtol=2e-3):
        raise AssertionError("Pallas kernel mismatch vs reference")

    print("KERNEL_OK")
</pallas_src>

<mosaic_0001>
module attributes {stable_mosaic.version = 11 : i64} {
  func.func @_up_kernel(%arg0: i32, %arg1: i32, %arg2: memref<1x8x8x128xf32, #tpu.memory_space<vmem>>, %arg3: memref<128x512xf32, #tpu.memory_space<vmem>>, %arg4: memref<1x512xf32, #tpu.memory_space<vmem>>, %arg5: memref<1x8x2x8x256xf32, #tpu.memory_space<vmem>>) attributes {dimension_semantics = [#tpu.dimension_semantics<parallel>, #tpu.dimension_semantics<parallel>], iteration_bounds = array<i64: 2, 1>, scalar_prefetch = 0 : i64, scratch_operands = 0 : i64, tpu.core_type = #tpu.core_type<tc>, window_params = [{transform_indices = @transform_0, window_bounds = array<i64: 1, 8, 8, 128>}, {pipeline_mode = #tpu.pipeline_mode<synchronous>, transform_indices = @transform_1, window_bounds = array<i64: 128, 512>}, {pipeline_mode = #tpu.pipeline_mode<synchronous>, transform_indices = @transform_2, window_bounds = array<i64: 1, 512>}, {transform_indices = @transform_3, window_bounds = array<i64: 1, 8, 2, 8, 256>}]} {
    %c0 = arith.constant 0 : index
    %c0_0 = arith.constant 0 : index
    %c0_1 = arith.constant 0 : index
    %c0_2 = arith.constant 0 : index
    %0 = vector.load %arg2[%c0, %c0_0, %c0_1, %c0_2] : memref<1x8x8x128xf32, #tpu.memory_space<vmem>>, vector<1x8x8x128xf32>
    %1 = vector.shape_cast %0 : vector<1x8x8x128xf32> to vector<8x8x128xf32>
    %2 = vector.shape_cast %1 : vector<8x8x128xf32> to vector<64x128xf32>
    %c0_3 = arith.constant 0 : index
    %c0_4 = arith.constant 0 : index
    %3 = vector.load %arg3[%c0_3, %c0_4] : memref<128x512xf32, #tpu.memory_space<vmem>>, vector<128x512xf32>
    %cst = arith.constant dense<0.000000e+00> : vector<64x512xf32>
    %4 = tpu.matmul %2, %3, %cst {dimension_numbers = #tpu.dot_dimension_numbers<[1], [0], [0], [1], [0, 0, 1, 1], [], []>} : vector<64x128xf32>, vector<128x512xf32>, vector<64x512xf32> -> vector<64x512xf32>
    %c0_5 = arith.constant 0 : index
    %c0_6 = arith.constant 0 : index
    %5 = vector.load %arg4[%c0_5, %c0_6] : memref<1x512xf32, #tpu.memory_space<vmem>>, vector<1x512xf32>
    %6 = vector.broadcast %5 : vector<1x512xf32> to vector<64x512xf32>
    %7 = arith.addf %4, %6 : vector<64x512xf32>
    %8 = vector.extract_strided_slice %7 {offsets = [0, 0], sizes = [64, 256], strides = [1, 1]} : vector<64x512xf32> to vector<64x256xf32>
    %9 = vector.shape_cast %8 : vector<64x256xf32> to vector<8x8x256xf32>
    %c0_7 = arith.constant 0 : index
    %c0_8 = arith.constant 0 : index
    %c0_9 = arith.constant 0 : index
    %c0_10 = arith.constant 0 : index
    %c0_11 = arith.constant 0 : index
    %10 = vector.load %arg5[%c0_7, %c0_8, %c0_9, %c0_10, %c0_11] : memref<1x8x2x8x256xf32, #tpu.memory_space<vmem>>, vector<1x8x1x8x256xf32>
    %11 = vector.shape_cast %10 : vector<1x8x1x8x256xf32> to vector<8x8x256xf32>
    %12 = vector.shape_cast %9 : vector<8x8x256xf32> to vector<1x8x1x8x256xf32>
    tpu.vector_store %arg5[%c0_7, %c0_8, %c0_9, %c0_10, %c0_11], %12 {strides = array<i32>} : memref<1x8x2x8x256xf32, #tpu.memory_space<vmem>>, vector<1x8x1x8x256xf32>,
    %13 = vector.extract_strided_slice %7 {offsets = [0, 256], sizes = [64, 256], strides = [1, 1]} : vector<64x512xf32> to vector<64x256xf32>
    %14 = vector.shape_cast %13 : vector<64x256xf32> to vector<8x8x256xf32>
    %c0_12 = arith.constant 0 : index
    %c0_13 = arith.constant 0 : index
    %c1 = arith.constant 1 : index
    %c0_14 = arith.constant 0 : index
    %c0_15 = arith.constant 0 : index
    %15 = vector.load %arg5[%c0_12, %c0_13, %c1, %c0_14, %c0_15] : memref<1x8x2x8x256xf32, #tpu.memory_space<vmem>>, vector<1x8x1x8x256xf32>
    %16 = vector.shape_cast %15 : vector<1x8x1x8x256xf32> to vector<8x8x256xf32>
    %17 = vector.shape_cast %14 : vector<8x8x256xf32> to vector<1x8x1x8x256xf32>
    tpu.vector_store %arg5[%c0_12, %c0_13, %c1, %c0_14, %c0_15], %17 {strides = array<i32>} : memref<1x8x2x8x256xf32, #tpu.memory_space<vmem>>, vector<1x8x1x8x256xf32>,
    return
  }
  func.func @transform_0(%arg0: i32, %arg1: i32) -> (i32, i32, i32, i32) {
    %c0_i32 = arith.constant 0 : i32
    %c0_i32_0 = arith.constant 0 : i32
    %c0_i32_1 = arith.constant 0 : i32
    return %arg0, %arg1, %c0_i32, %c0_i32_0 : i32, i32, i32, i32
  }
  func.func @transform_1(%arg0: i32, %arg1: i32) -> (i32, i32) {
    %c0_i32 = arith.constant 0 : i32
    %c0_i32_0 = arith.constant 0 : i32
    %c0_i32_1 = arith.constant 0 : i32
    return %c0_i32, %c0_i32_0 : i32, i32
  }
  func.func @transform_2(%arg0: i32, %arg1: i32) -> (i32, i32) {
    %c0_i32 = arith.constant 0 : i32
    %c0_i32_0 = arith.constant 0 : i32
    %c0_i32_1 = arith.constant 0 : i32
    return %c0_i32, %c0_i32_0 : i32, i32
  }
  func.func @transform_3(%arg0: i32, %arg1: i32) -> (i32, i32, i32, i32, i32) {
    %c0_i32 = arith.constant 0 : i32
    %c0_i32_0 = arith.constant 0 : i32
    %c0_i32_1 = arith.constant 0 : i32
    %c0_i32_2 = arith.constant 0 : i32
    return %arg0, %arg1, %c0_i32, %c0_i32_0, %c0_i32_1 : i32, i32, i32, i32, i32
  }
}

module attributes {stable_mosaic.version = 11 : i64} {
  func.func @kernel(%arg0: i32, %arg1: i32, %arg2: memref<1x16x16x128xf32, #tpu.memory_space<vmem>>, %arg3: memref<1x1x16x128xf32, #tpu.memory_space<vmem>>, %arg4: memref<1x1x16x128xf32, #tpu.memory_space<vmem>>, %arg5: memref<1x16x16x128xf32, #tpu.memory_space<vmem>>, %arg6: memref<1x1x16x128xf32, #tpu.memory_space<vmem>>, %arg7: memref<1x1x16x128xf32, #tpu.memory_space<vmem>>, %arg8: memref<9x256x128xf32, #tpu.memory_space<vmem>>, %arg9: memref<1x128xf32, #tpu.memory_space<vmem>>, %arg10: memref<1x16x16x128xf32, #tpu.memory_space<vmem>>, %arg11: memref<1x1x2x128xf32, #tpu.memory_space<vmem>>, %arg12: memref<18x18x256xf32, #tpu.memory_space<vmem>>, %arg13: memref<256x128xf32, #tpu.memory_space<vmem>>) attributes {dimension_semantics = [#tpu.dimension_semantics<parallel>, #tpu.dimension_semantics<parallel>], iteration_bounds = array<i64: 2, 1>, scalar_prefetch = 0 : i64, scratch_operands = 2 : i64, tpu.core_type = #tpu.core_type<tc>, window_params = [{transform_indices = @transform_0, window_bounds = array<i64: 1, 16, 16, 128>}, {transform_indices = @transform_1, window_bounds = array<i64: 1, 1, 16, 128>}, {transform_indices = @transform_2, window_bounds = array<i64: 1, 1, 16, 128>}, {transform_indices = @transform_3, window_bounds = array<i64: 1, 16, 16, 128>}, {transform_indices = @transform_4, window_bounds = array<i64: 1, 1, 16, 128>}, {transform_indices = @transform_5, window_bounds = array<i64: 1, 1, 16, 128>}, {pipeline_mode = #tpu.pipeline_mode<synchronous>, transform_indices = @transform_6, window_bounds = array<i64: 9, 256, 128>}, {pipeline_mode = #tpu.pipeline_mode<synchronous>, transform_indices = @transform_7, window_bounds = array<i64: 1, 128>}, {transform_indices = @transform_8, window_bounds = array<i64: 1, 16, 16, 128>}, {transform_indices = @transform_9, window_bounds = array<i64: 1, 1, 2, 128>}]} {
    %c0_i32 = arith.constant 0 : i32
    %0 = arith.cmpi sgt, %arg1, %c0_i32 : i32
    %c0_i32_0 = arith.constant 0 : i32
    %1 = arith.cmpi slt, %arg1, %c0_i32_0 : i32
    %cst = arith.constant 0.000000e+00 : f32
    %2 = vector.broadcast %cst : f32 to vector<18x1x256xf32>
    %c0 = arith.constant 0 : index
    %c0_1 = arith.constant 0 : index
    %c0_2 = arith.constant 0 : index
    %3 = vector.load %arg12[%c0, %c0_1, %c0_2] : memref<18x18x256xf32, #tpu.memory_space<vmem>>, vector<18x1x256xf32>
    tpu.vector_store %arg12[%c0, %c0_1, %c0_2], %2 {strides = array<i32>} : memref<18x18x256xf32, #tpu.memory_space<vmem>>, vector<18x1x256xf32>,
    %c0_3 = arith.constant 0 : index
    %c17 = arith.constant 17 : index
    %c0_4 = arith.constant 0 : index
    %4 = vector.load %arg12[%c0_3, %c17, %c0_4] : memref<18x18x256xf32, #tpu.memory_space<vmem>>, vector<18x1x256xf32>
    tpu.vector_store %arg12[%c0_3, %c17, %c0_4], %2 {strides = array<i32>} : memref<18x18x256xf32, #tpu.memory_space<vmem>>, vector<18x1x256xf32>,
    %c0_5 = arith.constant 0 : index
    %c0_6 = arith.constant 0 : index
    %c0_7 = arith.constant 0 : index
    %c0_8 = arith.constant 0 : index
    %5 = vector.load %arg2[%c0_5, %c0_6, %c0_7, %c0_8] : memref<1x16x16x128xf32, #tpu.memory_space<vmem>>, vector<1x16x16x128xf32>
    %6 = vector.shape_cast %5 : vector<1x16x16x128xf32> to vector<16x16x128xf32>
    %c1 = arith.constant 1 : index
    %c1_9 = arith.constant 1 : index
    %c0_10 = arith.constant 0 : index
    %7 = vector.load %arg12[%c1, %c1_9, %c0_10] : memref<18x18x256xf32, #tpu.memory_space<vmem>>, vector<16x16x128xf32>
    tpu.vector_store %arg12[%c1, %c1_9, %c0_10], %6 {strides = array<i32>} : memref<18x18x256xf32, #tpu.memory_space<vmem>>, vector<16x16x128xf32>,
    %c0_11 = arith.constant 0 : index
    %c0_12 = arith.constant 0 : index
    %c0_13 = arith.constant 0 : index
    %c0_14 = arith.constant 0 : index
    %8 = vector.load %arg3[%c0_11, %c0_12, %c0_13, %c0_14] : memref<1x1x16x128xf32, #tpu.memory_space<vmem>>, vector<1x1x16x128xf32>
    %9 = vector.shape_cast %8 : vector<1x1x16x128xf32> to vector<1x16x128xf32>
    %10 = arith.extui %0 : i1 to i32
    %11 = arith.sitofp %10 : i32 to f32
    %12 = vector.broadcast %11 : f32 to vector<1x16x128xf32>
    %13 = arith.mulf %9, %12 : vector<1x16x128xf32>
    %c0_15 = arith.constant 0 : index
    %c1_16 = arith.constant 1 : index
    %c0_17 = arith.constant 0 : index
    %14 = vector.load %arg12[%c0_15, %c1_16, %c0_17] : memref<18x18x256xf32, #tpu.memory_space<vmem>>, vector<1x16x128xf32>
    tpu.vector_store %arg12[%c0_15, %c1_16, %c0_17], %13 {strides = array<i32>} : memref<18x18x256xf32, #tpu.memory_space<vmem>>, vector<1x16x128xf32>,
    %c0_18 = arith.constant 0 : index
    %c0_19 = arith.constant 0 : index
    %c0_20 = arith.constant 0 : index
    %c0_21 = arith.constant 0 : index
    %15 = vector.load %arg4[%c0_18, %c0_19, %c0_20, %c0_21] : memref<1x1x16x128xf32, #tpu.memory_space<vmem>>, vector<1x1x16x128xf32>
    %16 = vector.shape_cast %15 : vector<1x1x16x128xf32> to vector<1x16x128xf32>
    %17 = arith.extui %1 : i1 to i32
    %18 = arith.sitofp %17 : i32 to f32
    %19 = vector.broadcast %18 : f32 to vector<1x16x128xf32>
    %20 = arith.mulf %16, %19 : vector<1x16x128xf32>
    %c17_22 = arith.constant 17 : index
    %c1_23 = arith.constant 1 : index
    %c0_24 = arith.constant 0 : index
    %21 = vector.load %arg12[%c17_22, %c1_23, %c0_24] : memref<18x18x256xf32, #tpu.memory_space<vmem>>, vector<1x16x128xf32>
    tpu.vector_store %arg12[%c17_22, %c1_23, %c0_24], %20 {strides = array<i32>} : memref<18x18x256xf32, #tpu.memory_space<vmem>>, vector<1x16x128xf32>,
    %c0_25 = arith.constant 0 : index
    %c0_26 = arith.constant 0 : index
    %c0_27 = arith.constant 0 : index
    %c0_28 = arith.constant 0 : index
    %22 = vector.load %arg5[%c0_25, %c0_26, %c0_27, %c0_28] : memref<1x16x16x128xf32, #tpu.memory_space<vmem>>, vector<1x16x16x128xf32>
    %23 = vector.shape_cast %22 : vector<1x16x16x128xf32> to vector<16x16x128xf32>
    %c1_29 = arith.constant 1 : index
    %c1_30 = arith.constant 1 : index
    %c128 = arith.constant 128 : index
    %24 = vector.load %arg12[%c1_29, %c1_30, %c128] : memref<18x18x256xf32, #tpu.memory_space<vmem>>, vector<16x16x128xf32>
    tpu.vector_store %arg12[%c1_29, %c1_30, %c128], %23 {strides = array<i32>} : memref<18x18x256xf32, #tpu.memory_space<vmem>>, vector<16x16x128xf32>,
    %c0_31 = arith.constant 0 : index
    %c0_32 = arith.constant 0 : index
    %c0_33 = arith.constant 0 : index
    %c0_34 = arith.constant 0 : index
    %25 = vector.load %arg6[%c0_31, %c0_32, %c0_33, %c0_34] : memref<1x1x16x128xf32, #tpu.memory_space<vmem>>, vector<1x1x16x128xf32>
    %26 = vector.shape_cast %25 : vector<1x1x16x128xf32> to vector<1x16x128xf32>
    %27 = arith.extui %0 : i1 to i32
    %28 = arith.sitofp %27 : i32 to f32
    %29 = vector.broadcast %28 : f32 to vector<1x16x128xf32>
    %30 = arith.mulf %26, %29 : vector<1x16x128xf32>
    %c0_35 = arith.constant 0 : index
    %c1_36 = arith.constant 1 : index
    %c128_37 = arith.constant 128 : index
    %31 = vector.load %arg12[%c0_35, %c1_36, %c128_37] : memref<18x18x256xf32, #tpu.memory_space<vmem>>, vector<1x16x128xf32>
    tpu.vector_store %arg12[%c0_35, %c1_36, %c128_37], %30 {strides = array<i32>} : memref<18x18x256xf32, #tpu.memory_space<vmem>>, vector<1x16x128xf32>,
    %c0_38 = arith.constant 0 : index
    %c0_39 = arith.constant 0 : index
    %c0_40 = arith.constant 0 : index
    %c0_41 = arith.constant 0 : index
    %32 = vector.load %arg7[%c0_38, %c0_39, %c0_40, %c0_41] : memref<1x1x16x128xf32, #tpu.memory_space<vmem>>, vector<1x1x16x128xf32>
    %33 = vector.shape_cast %32 : vector<1x1x16x128xf32> to vector<1x16x128xf32>
    %34 = arith.extui %1 : i1 to i32
    %35 = arith.sitofp %34 : i32 to f32
    %36 = vector.broadcast %35 : f32 to vector<1x16x128xf32>
    %37 = arith.mulf %33, %36 : vector<1x16x128xf32>
    %c17_42 = arith.constant 17 : index
    %c1_43 = arith.constant 1 : index
    %c128_44 = arith.constant 128 : index
    %38 = vector.load %arg12[%c17_42, %c1_43, %c128_44] : memref<18x18x256xf32, #tpu.memory_space<vmem>>, vector<1x16x128xf32>
    tpu.vector_store %arg12[%c17_42, %c1_43, %c128_44], %37 {strides = array<i32>} : memref<18x18x256xf32, #tpu.memory_space<vmem>>, vector<1x16x128xf32>,
    %c0_45 = arith.constant 0 : index
    %c0_46 = arith.constant 0 : index
    %39 = vector.load %arg9[%c0_45, %c0_46] : memref<1x128xf32, #tpu.memory_space<vmem>>, vector<1x128xf32>
    %40 = vector.shape_cast %39 : vector<1x128xf32> to vector<1x128xf32>
    %41 = vector.broadcast %40 : vector<1x128xf32> to vector<256x128xf32>
    %c0_47 = arith.constant 0 : index
    %c0_48 = arith.constant 0 : index
    %42 = vector.load %arg13[%c0_47, %c0_48] : memref<256x128xf32, #tpu.memory_space<vmem>>, vector<256x128xf32>
    tpu.vector_store %arg13[%c0_47, %c0_48], %41 {strides = array<i32>} : memref<256x128xf32, #tpu.memory_space<vmem>>, vector<256x128xf32>,
    %c0_49 = arith.constant 0 : index
    %c0_50 = arith.constant 0 : index
    %c0_51 = arith.constant 0 : index
    %43 = vector.load %arg12[%c0_49, %c0_50, %c0_51] : memref<18x18x256xf32, #tpu.memory_space<vmem>>, vector<16x16x256xf32>
    %44 = vector.shape_cast %43 : vector<16x16x256xf32> to vector<256x256xf32>
    %c0_52 = arith.constant 0 : index
    %c0_53 = arith.constant 0 : index
    %45 = vector.load %arg13[%c0_52, %c0_53] : memref<256x128xf32, #tpu.memory_space<vmem>>, vector<256x128xf32>
    %c0_54 = arith.constant 0 : index
    %c0_55 = arith.constant 0 : index
    %c0_56 = arith.constant 0 : index
    %46 = vector.load %arg8[%c0_54, %c0_55, %c0_56] : memref<9x256x128xf32, #tpu.memory_space<vmem>>, vector<1x256x128xf32>
    %47 = vector.shape_cast %46 : vector<1x256x128xf32> to vector<256x128xf32>
    %cst_57 = arith.constant dense<0.000000e+00> : vector<256x128xf32>
    %48 = tpu.matmul %44, %47, %cst_57 {dimension_numbers = #tpu.dot_dimension_numbers<[1], [0], [0], [1], [0, 0, 1, 1], [], []>} : vector<256x256xf32>, vector<256x128xf32>, vector<256x128xf32> -> vector<256x128xf32>
    %49 = arith.addf %45, %48 : vector<256x128xf32>
    %c0_58 = arith.constant 0 : index
    %c0_59 = arith.constant 0 : index
    %50 = vector.load %arg13[%c0_58, %c0_59] : memref<256x128xf32, #tpu.memory_space<vmem>>, vector<256x128xf32>
    tpu.vector_store %arg13[%c0_58, %c0_59], %49 {strides = array<i32>} : memref<256x128xf32, #tpu.memory_space<vmem>>, vector<256x128xf32>,
    %c0_60 = arith.constant 0 : index
    %c1_61 = arith.constant 1 : index
    %c0_62 = arith.constant 0 : index
    %51 = vector.load %arg12[%c0_60, %c1_61, %c0_62] : memref<18x18x256xf32, #tpu.memory_space<vmem>>, vector<16x16x256xf32>
    %52 = vector.shape_cast %51 : vector<16x16x256xf32> to vector<256x256xf32>
    %c0_63 = arith.constant 0 : index
    %c0_64 = arith.constant 0 : index
    %53 = vector.load %arg13[%c0_63, %c0_64] : memref<256x128xf32, #tpu.memory_space<vmem>>, vector<256x128xf32>
    %c1_65 = arith.constant 1 : index
    %c0_66 = arith.constant 0 : index
    %c0_67 = arith.constant 0 : index
    %54 = vector.load %arg8[%c1_65, %c0_66, %c0_67] : memref<9x256x128xf32, #tpu.memory_space<vmem>>, vector<1x256x128xf32>
    %55 = vector.shape_cast %54 : vector<1x256x128xf32> to vector<256x128xf32>
    %cst_68 = arith.constant dense<0.000000e+00> : vector<256x128xf32>
    %56 = tpu.matmul %52, %55, %cst_68 {dimension_numbers = #tpu.dot_dimension_numbers<[1], [0], [0], [1], [0, 0, 1, 1], [], []>} : vector<256x256xf32>, vector<256x128xf32>, vector<256x128xf32> -> vector<256x128xf32>
    %57 = arith.addf %53, %56 : vector<256x128xf32>
    %c0_69 = arith.constant 0 : index
    %c0_70 = arith.constant 0 : index
    %58 = vector.load %arg13[%c0_69, %c0_70] : memref<256x128xf32, #tpu.memory_space<vmem>>, vector<256x128xf32>
    tpu.vector_store %arg13[%c0_69, %c0_70], %57 {strides = array<i32>} : memref<256x128xf32, #tpu.memory_space<vmem>>, vector<256x128xf32>,
    %c0_71 = arith.constant 0 : index
    %c2 = arith.constant 2 : index
    %c0_72 = arith.constant 0 : index
    %59 = vector.load %arg12[%c0_71, %c2, %c0_72] : memref<18x18x256xf32, #tpu.memory_space<vmem>>, vector<16x16x256xf32>
    %60 = vector.shape_cast %59 : vector<16x16x256xf32> to vector<256x256xf32>
    %c0_73 = arith.constant 0 : index
    %c0_74 = arith.constant 0 : index
    %61 = vector.load %arg13[%c0_73, %c0_74] : memref<256x128xf32, #tpu.memory_space<vmem>>, vector<256x128xf32>
    %c2_75 = arith.constant 2 : index
    %c0_76 = arith.constant 0 : index
    %c0_77 = arith.constant 0 : index
    %62 = vector.load %arg8[%c2_75, %c0_76, %c0_77] : memref<9x256x128xf32, #tpu.memory_space<vmem>>, vector<1x256x128xf32>
    %63 = vector.shape_cast %62 : vector<1x256x128xf32> to vector<256x128xf32>
    %cst_78 = arith.constant dense<0.000000e+00> : vector<256x128xf32>
    %64 = tpu.matmul %60, %63, %cst_78 {dimension_numbers = #tpu.dot_dimension_numbers<[1], [0], [0], [1], [0, 0, 1, 1], [], []>} : vector<256x256xf32>, vector<256x128xf32>, vector<256x128xf32> -> vector<256x128xf32>
    %65 = arith.addf %61, %64 : vector<256x128xf32>
    %c0_79 = arith.constant 0 : index
    %c0_80 = arith.constant 0 : index
    %66 = vector.load %arg13[%c0_79, %c0_80] : memref<256x128xf32, #tpu.memory_space<vmem>>, vector<256x128xf32>
    tpu.vector_store %arg13[%c0_79, %c0_80], %65 {strides = array<i32>} : memref<256x128xf32, #tpu.memory_space<vmem>>, vector<256x128xf32>,
    %c1_81 = arith.constant 1 : index
    %c0_82 = arith.constant 0 : index
    %c0_83 = arith.constant 0 : index
    %67 = vector.load %arg12[%c1_81, %c0_82, %c0_83] : memref<18x18x256xf32, #tpu.memory_space<vmem>>, vector<16x16x256xf32>
    %68 = vector.shape_cast %67 : vector<16x16x256xf32> to vector<256x256xf32>
    %c0_84 = arith.constant 0 : index
    %c0_85 = arith.constant 0 : index
    %69 = vector.load %arg13[%c0_84, %c0_85] : memref<256x128xf32, #tpu.memory_space<vmem>>, vector<256x128xf32>
    %c3 = arith.constant 3 : index
    %c0_86 = arith.constant 0 : index
    %c0_87 = arith.constant 0 : index
    %70 = vector.load %arg8[%c3, %c0_86, %c0_87] : memref<9x256x128xf32, #tpu.memory_space<vmem>>, vector<1x256x128xf32>
    %71 = vector.shape_cast %70 : vector<1x256x128xf32> to vector<256x128xf32>
    %cst_88 = arith.constant dense<0.000000e+00> : vector<256x128xf32>
    %72 = tpu.matmul %68, %71, %cst_88 {dimension_numbers = #tpu.dot_dimension_numbers<[1], [0], [0], [1], [0, 0, 1, 1], [], []>} : vector<256x256xf32>, vector<256x128xf32>, vector<256x128xf32> -> vector<256x128xf32>
    %73 = arith.addf %69, %72 : vector<256x128xf32>
    %c0_89 = arith.constant 0 : index
    %c0_90 = arith.constant 0 : index
    %74 = vector.load %arg13[%c0_89, %c0_90] : memref<256x128xf32, #tpu.memory_space<vmem>>, vector<256x128xf32>
    tpu.vector_store %arg13[%c0_89, %c0_90], %73 {strides = array<i32>} : memref<256x128xf32, #tpu.memory_space<vmem>>, vector<256x128xf32>,
    %c1_91 = arith.constant 1 : index
    %c1_92 = arith.constant 1 : index
    %c0_93 = arith.constant 0 : index
    %75 = vector.load %arg12[%c1_91, %c1_92, %c0_93] : memref<18x18x256xf32, #tpu.memory_space<vmem>>, vector<16x16x256xf32>
    %76 = vector.shape_cast %75 : vector<16x16x256xf32> to vector<256x256xf32>
    %c0_94 = arith.constant 0 : index
    %c0_95 = arith.constant 0 : index
    %77 = vector.load %arg13[%c0_94, %c0_95] : memref<256x128xf32, #tpu.memory_space<vmem>>, vector<256x128xf32>
    %c4 = arith.constant 4 : index
    %c0_96 = arith.constant 0 : index
    %c0_97 = arith.constant 0 : index
    %78 = vector.load %arg8[%c4, %c0_96, %c0_97] : memref<9x256x128xf32, #tpu.memory_space<vmem>>, vector<1x256x128xf32>
    %79 = vector.shape_cast %78 : vector<1x256x128xf32> to vector<256x128xf32>
    %cst_98 = arith.constant dense<0.000000e+00> : vector<256x128xf32>
    %80 = tpu.matmul %76, %79, %cst_98 {dimension_numbers = #tpu.dot_dimension_numbers<[1], [0], [0], [1], [0, 0, 1, 1], [], []>} : vector<256x256xf32>, vector<256x128xf32>, vector<256x128xf32> -> vector<256x128xf32>
    %81 = arith.addf %77, %80 : vector<256x128xf32>
    %c0_99 = arith.constant 0 : index
    %c0_100 = arith.constant 0 : index
    %82 = vector.load %arg13[%c0_99, %c0_100] : memref<256x128xf32, #tpu.memory_space<vmem>>, vector<256x128xf32>
    tpu.vector_store %arg13[%c0_99, %c0_100], %81 {strides = array<i32>} : memref<256x128xf32, #tpu.memory_space<vmem>>, vector<256x128xf32>,
    %c1_101 = arith.constant 1 : index
    %c2_102 = arith.constant 2 : index
    %c0_103 = arith.constant 0 : index
    %83 = vector.load %arg12[%c1_101, %c2_102, %c0_103] : memref<18x18x256xf32, #tpu.memory_space<vmem>>, vector<16x16x256xf32>
    %84 = vector.shape_cast %83 : vector<16x16x256xf32> to vector<256x256xf32>
    %c0_104 = arith.constant 0 : index
    %c0_105 = arith.constant 0 : index
    %85 = vector.load %arg13[%c0_104, %c0_105] : memref<256x128xf32, #tpu.memory_space<vmem>>, vector<256x128xf32>
    %c5 = arith.constant 5 : index
    %c0_106 = arith.constant 0 : index
    %c0_107 = arith.constant 0 : index
    %86 = vector.load %arg8[%c5, %c0_106, %c0_107] : memref<9x256x128xf32, #tpu.memory_space<vmem>>, vector<1x256x128xf32>
    %87 = vector.shape_cast %86 : vector<1x256x128xf32> to vector<256x128xf32>
    %cst_108 = arith.constant dense<0.000000e+00> : vector<256x128xf32>
    %88 = tpu.matmul %84, %87, %cst_108 {dimension_numbers = #tpu.dot_dimension_numbers<[1], [0], [0], [1], [0, 0, 1, 1], [], []>} : vector<256x256xf32>, vector<256x128xf32>, vector<256x128xf32> -> vector<256x128xf32>
    %89 = arith.addf %85, %88 : vector<256x128xf32>
    %c0_109 = arith.constant 0 : index
    %c0_110 = arith.constant 0 : index
    %90 = vector.load %arg13[%c0_109, %c0_110] : memref<256x128xf32, #tpu.memory_space<vmem>>, vector<256x128xf32>
    tpu.vector_store %arg13[%c0_109, %c0_110], %89 {strides = array<i32>} : memref<256x128xf32, #tpu.memory_space<vmem>>, vector<256x128xf32>,
    %c2_111 = arith.constant 2 : index
    %c0_112 = arith.constant 0 : index
    %c0_113 = arith.constant 0 : index
    %91 = vector.load %arg12[%c2_111, %c0_112, %c0_113] : memref<18x18x256xf32, #tpu.memory_space<vmem>>, vector<16x16x256xf32>
    %92 = vector.shape_cast %91 : vector<16x16x256xf32> to vector<256x256xf32>
    %c0_114 = arith.constant 0 : index
    %c0_115 = arith.constant 0 : index
    %93 = vector.load %arg13[%c0_114, %c0_115] : memref<256x128xf32, #tpu.memory_space<vmem>>, vector<256x128xf32>
    %c6 = arith.constant 6 : index
    %c0_116 = arith.constant 0 : index
    %c0_117 = arith.constant 0 : index
    %94 = vector.load %arg8[%c6, %c0_116, %c0_117] : memref<9x256x128xf32, #tpu.memory_space<vmem>>, vector<1x256x128xf32>
    %95 = vector.shape_cast %94 : vector<1x256x128xf32> to vector<256x128xf32>
    %cst_118 = arith.constant dense<0.000000e+00> : vector<256x128xf32>
    %96 = tpu.matmul %92, %95, %cst_118 {dimension_numbers = #tpu.dot_dimension_numbers<[1], [0], [0], [1], [0, 0, 1, 1], [], []>} : vector<256x256xf32>, vector<256x128xf32>, vector<256x128xf32> -> vector<256x128xf32>
    %97 = arith.addf %93, %96 : vector<256x128xf32>
    %c0_119 = arith.constant 0 : index
    %c0_120 = arith.constant 0 : index
    %98 = vector.load %arg13[%c0_119, %c0_120] : memref<256x128xf32, #tpu.memory_space<vmem>>, vector<256x128xf32>
    tpu.vector_store %arg13[%c0_119, %c0_120], %97 {strides = array<i32>} : memref<256x128xf32, #tpu.memory_space<vmem>>, vector<256x128xf32>,
    %c2_121 = arith.constant 2 : index
    %c1_122 = arith.constant 1 : index
    %c0_123 = arith.constant 0 : index
    %99 = vector.load %arg12[%c2_121, %c1_122, %c0_123] : memref<18x18x256xf32, #tpu.memory_space<vmem>>, vector<16x16x256xf32>
    %100 = vector.shape_cast %99 : vector<16x16x256xf32> to vector<256x256xf32>
    %c0_124 = arith.constant 0 : index
    %c0_125 = arith.constant 0 : index
    %101 = vector.load %arg13[%c0_124, %c0_125] : memref<256x128xf32, #tpu.memory_space<vmem>>, vector<256x128xf32>
    %c7 = arith.constant 7 : index
    %c0_126 = arith.constant 0 : index
    %c0_127 = arith.constant 0 : index
    %102 = vector.load %arg8[%c7, %c0_126, %c0_127] : memref<9x256x128xf32, #tpu.memory_space<vmem>>, vector<1x256x128xf32>
    %103 = vector.shape_cast %102 : vector<1x256x128xf32> to vector<256x128xf32>
    %cst_128 = arith.constant dense<0.000000e+00> : vector<256x128xf32>
    %104 = tpu.matmul %100, %103, %cst_128 {dimension_numbers = #tpu.dot_dimension_numbers<[1], [0], [0], [1], [0, 0, 1, 1], [], []>} : vector<256x256xf32>, vector<256x128xf32>, vector<256x128xf32> -> vector<256x128xf32>
    %105 = arith.addf %101, %104 : vector<256x128xf32>
    %c0_129 = arith.constant 0 : index
    %c0_130 = arith.constant 0 : index
    %106 = vector.load %arg13[%c0_129, %c0_130] : memref<256x128xf32, #tpu.memory_space<vmem>>, vector<256x128xf32>
    tpu.vector_store %arg13[%c0_129, %c0_130], %105 {strides = array<i32>} : memref<256x128xf32, #tpu.memory_space<vmem>>, vector<256x128xf32>,
    %c2_131 = arith.constant 2 : index
    %c2_132 = arith.constant 2 : index
    %c0_133 = arith.constant 0 : index
    %107 = vector.load %arg12[%c2_131, %c2_132, %c0_133] : memref<18x18x256xf32, #tpu.memory_space<vmem>>, vector<16x16x256xf32>
    %108 = vector.shape_cast %107 : vector<16x16x256xf32> to vector<256x256xf32>
    %c0_134 = arith.constant 0 : index
    %c0_135 = arith.constant 0 : index
    %109 = vector.load %arg13[%c0_134, %c0_135] : memref<256x128xf32, #tpu.memory_space<vmem>>, vector<256x128xf32>
    %c8 = arith.constant 8 : index
    %c0_136 = arith.constant 0 : index
    %c0_137 = arith.constant 0 : index
    %110 = vector.load %arg8[%c8, %c0_136, %c0_137] : memref<9x256x128xf32, #tpu.memory_space<vmem>>, vector<1x256x128xf32>
    %111 = vector.shape_cast %110 : vector<1x256x128xf32> to vector<256x128xf32>
    %cst_138 = arith.constant dense<0.000000e+00> : vector<256x128xf32>
    %112 = tpu.matmul %108, %111, %cst_138 {dimension_numbers = #tpu.dot_dimension_numbers<[1], [0], [0], [1], [0, 0, 1, 1], [], []>} : vector<256x256xf32>, vector<256x128xf32>, vector<256x128xf32> -> vector<256x128xf32>
    %113 = arith.addf %109, %112 : vector<256x128xf32>
    %c0_139 = arith.constant 0 : index
    %c0_140 = arith.constant 0 : index
    %114 = vector.load %arg13[%c0_139, %c0_140] : memref<256x128xf32, #tpu.memory_space<vmem>>, vector<256x128xf32>
    tpu.vector_store %arg13[%c0_139, %c0_140], %113 {strides = array<i32>} : memref<256x128xf32, #tpu.memory_space<vmem>>, vector<256x128xf32>,
    %c0_141 = arith.constant 0 : index
    %c0_142 = arith.constant 0 : index
    %115 = vector.load %arg13[%c0_141, %c0_142] : memref<256x128xf32, #tpu.memory_space<vmem>>, vector<256x128xf32>
    %cst_143 = arith.constant dense<0.000000e+00> : vector<128xf32>
    %116 = vector.multi_reduction <add>, %115, %cst_143 [0] : vector<256x128xf32> to vector<128xf32>
    %117 = vector.shape_cast %116 : vector<128xf32> to vector<1x128xf32>
    %c0_144 = arith.constant 0 : index
    %c0_145 = arith.constant 0 : index
    %c0_146 = arith.constant 0 : index
    %c0_147 = arith.constant 0 : index
    %118 = vector.load %arg11[%c0_144, %c0_145, %c0_146, %c0_147] : memref<1x1x2x128xf32, #tpu.memory_space<vmem>>, vector<1x1x1x128xf32>
    %119 = vector.shape_cast %118 : vector<1x1x1x128xf32> to vector<1x128xf32>
    %120 = vector.shape_cast %117 : vector<1x128xf32> to vector<1x1x1x128xf32>
    tpu.vector_store %arg11[%c0_144, %c0_145, %c0_146, %c0_147], %120 {strides = array<i32>} : memref<1x1x2x128xf32, #tpu.memory_space<vmem>>, vector<1x1x1x128xf32>,
    %121 = arith.mulf %115, %115 : vector<256x128xf32>
    %cst_148 = arith.constant dense<0.000000e+00> : vector<128xf32>
    %122 = vector.multi_reduction <add>, %121, %cst_148 [0] : vector<256x128xf32> to vector<128xf32>
    %123 = vector.shape_cast %122 : vector<128xf32> to vector<1x128xf32>
    %c0_149 = arith.constant 0 : index
    %c0_150 = arith.constant 0 : index
    %c1_151 = arith.constant 1 : index
    %c0_152 = arith.constant 0 : index
    %124 = vector.load %arg11[%c0_149, %c0_150, %c1_151, %c0_152] : memref<1x1x2x128xf32, #tpu.memory_space<vmem>>, vector<1x1x1x128xf32>
    %125 = vector.shape_cast %124 : vector<1x1x1x128xf32> to vector<1x128xf32>
    %126 = vector.shape_cast %123 : vector<1x128xf32> to vector<1x1x1x128xf32>
    tpu.vector_store %arg11[%c0_149, %c0_150, %c1_151, %c0_152], %126 {strides = array<i32>} : memref<1x1x2x128xf32, #tpu.memory_space<vmem>>, vector<1x1x1x128xf32>,
    %127 = vector.shape_cast %115 : vector<256x128xf32> to vector<16x16x128xf32>
    %c0_153 = arith.constant 0 : index
    %c0_154 = arith.constant 0 : index
    %c0_155 = arith.constant 0 : index
    %c0_156 = arith.constant 0 : index
    %128 = vector.load %arg10[%c0_153, %c0_154, %c0_155, %c0_156] : memref<1x16x16x128xf32, #tpu.memory_space<vmem>>, vector<1x16x16x128xf32>
    %129 = vector.shape_cast %128 : vector<1x16x16x128xf32> to vector<16x16x128xf32>
    %130 = vector.shape_cast %127 : vector<16x16x128xf32> to vector<1x16x16x128xf32>
    tpu.vector_store %arg10[%c0_153, %c0_154, %c0_155, %c0_156], %130 {strides = array<i32>} : memref<1x16x16x128xf32, #tpu.memory_space<vmem>>, vector<1x16x16x128xf32>,
    return
  }
  func.func @transform_0(%arg0: i32, %arg1: i32) -> (i32, i32, i32, i32) {
    %c0_i32 = arith.constant 0 : i32
    %c0_i32_0 = arith.constant 0 : i32
    %c0_i32_1 = arith.constant 0 : i32
    return %arg0, %arg1, %c0_i32, %c0_i32_0 : i32, i32, i32, i32
  }
  func.func @transform_1(%arg0: i32, %arg1: i32) -> (i32, i32, i32, i32) {
    %c16_i32 = arith.constant 16 : i32
    %0 = arith.muli %arg1, %c16_i32 : i32
    %c1_i32 = arith.constant 1 : i32
    %1 = arith.subi %0, %c1_i32 : i32
    %c0_i32 = arith.constant 0 : i32
    %2 = arith.maxsi %1, %c0_i32 : i32
    %c0_i32_0 = arith.constant 0 : i32
    %c0_i32_1 = arith.constant 0 : i32
    %c0_i32_2 = arith.constant 0 : i32
    return %arg0, %2, %c0_i32_0, %c0_i32_1 : i32, i32, i32, i32
  }
  func.func @transform_2(%arg0: i32, %arg1: i32) -> (i32, i32, i32, i32) {
    %c16_i32 = arith.constant 16 : i32
    %0 = arith.muli %arg1, %c16_i32 : i32
    %c16_i32_0 = arith.constant 16 : i32
    %1 = arith.addi %0, %c16_i32_0 : i32
    %c15_i32 = arith.constant 15 : i32
    %2 = arith.minsi %1, %c15_i32 : i32
    %c0_i32 = arith.constant 0 : i32
    %c0_i32_1 = arith.constant 0 : i32
    %c0_i32_2 = arith.constant 0 : i32
    return %arg0, %2, %c0_i32, %c0_i32_1 : i32, i32, i32, i32
  }
  func.func @transform_3(%arg0: i32, %arg1: i32) -> (i32, i32, i32, i32) {
    %c0_i32 = arith.constant 0 : i32
    %c0_i32_0 = arith.constant 0 : i32
    %c0_i32_1 = arith.constant 0 : i32
    return %arg0, %arg1, %c0_i32, %c0_i32_0 : i32, i32, i32, i32
  }
  func.func @transform_4(%arg0: i32, %arg1: i32) -> (i32, i32, i32, i32) {
    %c16_i32 = arith.constant 16 : i32
    %0 = arith.muli %arg1, %c16_i32 : i32
    %c1_i32 = arith.constant 1 : i32
    %1 = arith.subi %0, %c1_i32 : i32
    %c0_i32 = arith.constant 0 : i32
    %2 = arith.maxsi %1, %c0_i32 : i32
    %c0_i32_0 = arith.constant 0 : i32
    %c0_i32_1 = arith.constant 0 : i32
    %c0_i32_2 = arith.constant 0 : i32
    return %arg0, %2, %c0_i32_0, %c0_i32_1 : i32, i32, i32, i32
  }
  func.func @transform_5(%arg0: i32, %arg1: i32) -> (i32, i32, i32, i32) {
    %c16_i32 = arith.constant 16 : i32
    %0 = arith.muli %arg1, %c16_i32 : i32
    %c16_i32_0 = arith.constant 16 : i32
    %1 = arith.addi %0, %c16_i32_0 : i32
    %c15_i32 = arith.constant 15 : i32
    %2 = arith.minsi %1, %c15_i32 : i32
    %c0_i32 = arith.constant 0 : i32
    %c0_i32_1 = arith.constant 0 : i32
    %c0_i32_2 = arith.constant 0 : i32
    return %arg0, %2, %c0_i32, %c0_i32_1 : i32, i32, i32, i32
  }
  func.func @transform_6(%arg0: i32, %arg1: i32) -> (i32, i32, i32) {
    %c0_i32 = arith.constant 0 : i32
    %c0_i32_0 = arith.constant 0 : i32
    %c0_i32_1 = arith.constant 0 : i32
    %c0_i32_2 = arith.constant 0 : i32
    return %c0_i32, %c0_i32_0, %c0_i32_1 : i32, i32, i32
  }
  func.func @transform_7(%arg0: i32, %arg1: i32) -> (i32, i32) {
    %c0_i32 = arith.constant 0 : i32
    %c0_i32_0 = arith.constant 0 : i32
    %c0_i32_1 = arith.constant 0 : i32
    return %c0_i32, %c0_i32_0 : i32, i32
  }
  func.func @transform_8(%arg0: i32, %arg1: i32) -> (i32, i32, i32, i32) {
    %c0_i32 = arith.constant 0 : i32
    %c0_i32_0 = arith.constant 0 : i32
    %c0_i32_1 = arith.constant 0 : i32
    return %arg0, %arg1, %c0_i32, %c0_i32_0 : i32, i32, i32, i32
  }
  func.func @transform_9(%arg0: i32, %arg1: i32) -> (i32, i32, i32, i32) {
    %c0_i32 = arith.constant 0 : i32
    %c0_i32_0 = arith.constant 0 : i32
    %c0_i32_1 = arith.constant 0 : i32
    return %arg0, %arg1, %c0_i32, %c0_i32_0 : i32, i32, i32, i32
  }
}

module attributes {stable_mosaic.version = 11 : i64} {
  func.func @kernel(%arg0: i32, %arg1: i32, %arg2: memref<1x16x16x128xf32, #tpu.memory_space<vmem>>, %arg3: memref<1x1x16x128xf32, #tpu.memory_space<vmem>>, %arg4: memref<1x1x16x128xf32, #tpu.memory_space<vmem>>, %arg5: memref<9x128x128xf32, #tpu.memory_space<vmem>>, %arg6: memref<1x128xf32, #tpu.memory_space<vmem>>, %arg7: memref<1x128xf32, #tpu.memory_space<vmem>>, %arg8: memref<1x128xf32, #tpu.memory_space<vmem>>, %arg9: memref<1x16x16x128xf32, #tpu.memory_space<vmem>>, %arg10: memref<1x1x2x128xf32, #tpu.memory_space<vmem>>, %arg11: memref<18x18x128xf32, #tpu.memory_space<vmem>>, %arg12: memref<256x128xf32, #tpu.memory_space<vmem>>) attributes {dimension_semantics = [#tpu.dimension_semantics<parallel>, #tpu.dimension_semantics<parallel>], iteration_bounds = array<i64: 2, 1>, scalar_prefetch = 0 : i64, scratch_operands = 2 : i64, tpu.core_type = #tpu.core_type<tc>, window_params = [{transform_indices = @transform_0, window_bounds = array<i64: 1, 16, 16, 128>}, {transform_indices = @transform_1, window_bounds = array<i64: 1, 1, 16, 128>}, {transform_indices = @transform_2, window_bounds = array<i64: 1, 1, 16, 128>}, {pipeline_mode = #tpu.pipeline_mode<synchronous>, transform_indices = @transform_3, window_bounds = array<i64: 9, 128, 128>}, {pipeline_mode = #tpu.pipeline_mode<synchronous>, transform_indices = @transform_4, window_bounds = array<i64: 1, 128>}, {pipeline_mode = #tpu.pipeline_mode<synchronous>, transform_indices = @transform_5, window_bounds = array<i64: 1, 128>}, {pipeline_mode = #tpu.pipeline_mode<synchronous>, transform_indices = @transform_6, window_bounds = array<i64: 1, 128>}, {transform_indices = @transform_7, window_bounds = array<i64: 1, 16, 16, 128>}, {transform_indices = @transform_8, window_bounds = array<i64: 1, 1, 2, 128>}]} {
    %c0_i32 = arith.constant 0 : i32
    %0 = arith.cmpi sgt, %arg1, %c0_i32 : i32
    %c0_i32_0 = arith.constant 0 : i32
    %1 = arith.cmpi slt, %arg1, %c0_i32_0 : i32
    %c0 = arith.constant 0 : index
    %c0_1 = arith.constant 0 : index
    %2 = vector.load %arg7[%c0, %c0_1] : memref<1x128xf32, #tpu.memory_space<vmem>>, vector<1x128xf32>
    %3 = vector.shape_cast %2 : vector<1x128xf32> to vector<1x1x128xf32>
    %c0_2 = arith.constant 0 : index
    %c0_3 = arith.constant 0 : index
    %4 = vector.load %arg8[%c0_2, %c0_3] : memref<1x128xf32, #tpu.memory_space<vmem>>, vector<1x128xf32>
    %5 = vector.shape_cast %4 : vector<1x128xf32> to vector<1x1x128xf32>
    %cst = arith.constant 0.000000e+00 : f32
    %6 = vector.broadcast %cst : f32 to vector<18x1x128xf32>
    %c0_4 = arith.constant 0 : index
    %c0_5 = arith.constant 0 : index
    %c0_6 = arith.constant 0 : index
    %7 = vector.load %arg11[%c0_4, %c0_5, %c0_6] : memref<18x18x128xf32, #tpu.memory_space<vmem>>, vector<18x1x128xf32>
    tpu.vector_store %arg11[%c0_4, %c0_5, %c0_6], %6 {strides = array<i32>} : memref<18x18x128xf32, #tpu.memory_space<vmem>>, vector<18x1x128xf32>,
    %c0_7 = arith.constant 0 : index
    %c17 = arith.constant 17 : index
    %c0_8 = arith.constant 0 : index
    %8 = vector.load %arg11[%c0_7, %c17, %c0_8] : memref<18x18x128xf32, #tpu.memory_space<vmem>>, vector<18x1x128xf32>
    tpu.vector_store %arg11[%c0_7, %c17, %c0_8], %6 {strides = array<i32>} : memref<18x18x128xf32, #tpu.memory_space<vmem>>, vector<18x1x128xf32>,
    %c0_9 = arith.constant 0 : index
    %c0_10 = arith.constant 0 : index
    %c0_11 = arith.constant 0 : index
    %c0_12 = arith.constant 0 : index
    %9 = vector.load %arg2[%c0_9, %c0_10, %c0_11, %c0_12] : memref<1x16x16x128xf32, #tpu.memory_space<vmem>>, vector<1x16x16x128xf32>
    %10 = vector.shape_cast %9 : vector<1x16x16x128xf32> to vector<16x16x128xf32>
    %11 = vector.broadcast %3 : vector<1x1x128xf32> to vector<16x16x128xf32>
    %12 = arith.mulf %10, %11 : vector<16x16x128xf32>
    %13 = vector.broadcast %5 : vector<1x1x128xf32> to vector<16x16x128xf32>
    %14 = arith.addf %12, %13 : vector<16x16x128xf32>
    %cst_13 = arith.constant 0.000000e+00 : f32
    %15 = vector.broadcast %cst_13 : f32 to vector<16x16x128xf32>
    %16 = arith.maximumf %14, %15 : vector<16x16x128xf32>
    %c1 = arith.constant 1 : index
    %c1_14 = arith.constant 1 : index
    %c0_15 = arith.constant 0 : index
    %17 = vector.load %arg11[%c1, %c1_14, %c0_15] : memref<18x18x128xf32, #tpu.memory_space<vmem>>, vector<16x16x128xf32>
    tpu.vector_store %arg11[%c1, %c1_14, %c0_15], %16 {strides = array<i32>} : memref<18x18x128xf32, #tpu.memory_space<vmem>>, vector<16x16x128xf32>,
    %c0_16 = arith.constant 0 : index
    %c0_17 = arith.constant 0 : index
    %c0_18 = arith.constant 0 : index
    %c0_19 = arith.constant 0 : index
    %18 = vector.load %arg3[%c0_16, %c0_17, %c0_18, %c0_19] : memref<1x1x16x128xf32, #tpu.memory_space<vmem>>, vector<1x1x16x128xf32>
    %19 = vector.shape_cast %18 : vector<1x1x16x128xf32> to vector<1x16x128xf32>
    %20 = vector.broadcast %3 : vector<1x1x128xf32> to vector<1x16x128xf32>
    %21 = arith.mulf %19, %20 : vector<1x16x128xf32>
    %22 = vector.broadcast %5 : vector<1x1x128xf32> to vector<1x16x128xf32>
    %23 = arith.addf %21, %22 : vector<1x16x128xf32>
    %cst_20 = arith.constant 0.000000e+00 : f32
    %24 = vector.broadcast %cst_20 : f32 to vector<1x16x128xf32>
    %25 = arith.maximumf %23, %24 : vector<1x16x128xf32>
    %26 = arith.extui %0 : i1 to i32
    %27 = arith.sitofp %26 : i32 to f32
    %28 = vector.broadcast %27 : f32 to vector<1x16x128xf32>
    %29 = arith.mulf %25, %28 : vector<1x16x128xf32>
    %c0_21 = arith.constant 0 : index
    %c1_22 = arith.constant 1 : index
    %c0_23 = arith.constant 0 : index
    %30 = vector.load %arg11[%c0_21, %c1_22, %c0_23] : memref<18x18x128xf32, #tpu.memory_space<vmem>>, vector<1x16x128xf32>
    tpu.vector_store %arg11[%c0_21, %c1_22, %c0_23], %29 {strides = array<i32>} : memref<18x18x128xf32, #tpu.memory_space<vmem>>, vector<1x16x128xf32>,
    %c0_24 = arith.constant 0 : index
    %c0_25 = arith.constant 0 : index
    %c0_26 = arith.constant 0 : index
    %c0_27 = arith.constant 0 : index
    %31 = vector.load %arg4[%c0_24, %c0_25, %c0_26, %c0_27] : memref<1x1x16x128xf32, #tpu.memory_space<vmem>>, vector<1x1x16x128xf32>
    %32 = vector.shape_cast %31 : vector<1x1x16x128xf32> to vector<1x16x128xf32>
    %33 = vector.broadcast %3 : vector<1x1x128xf32> to vector<1x16x128xf32>
    %34 = arith.mulf %32, %33 : vector<1x16x128xf32>
    %35 = vector.broadcast %5 : vector<1x1x128xf32> to vector<1x16x128xf32>
    %36 = arith.addf %34, %35 : vector<1x16x128xf32>
    %cst_28 = arith.constant 0.000000e+00 : f32
    %37 = vector.broadcast %cst_28 : f32 to vector<1x16x128xf32>
    %38 = arith.maximumf %36, %37 : vector<1x16x128xf32>
    %39 = arith.extui %1 : i1 to i32
    %40 = arith.sitofp %39 : i32 to f32
    %41 = vector.broadcast %40 : f32 to vector<1x16x128xf32>
    %42 = arith.mulf %38, %41 : vector<1x16x128xf32>
    %c17_29 = arith.constant 17 : index
    %c1_30 = arith.constant 1 : index
    %c0_31 = arith.constant 0 : index
    %43 = vector.load %arg11[%c17_29, %c1_30, %c0_31] : memref<18x18x128xf32, #tpu.memory_space<vmem>>, vector<1x16x128xf32>
    tpu.vector_store %arg11[%c17_29, %c1_30, %c0_31], %42 {strides = array<i32>} : memref<18x18x128xf32, #tpu.memory_space<vmem>>, vector<1x16x128xf32>,
    %c0_32 = arith.constant 0 : index
    %c0_33 = arith.constant 0 : index
    %44 = vector.load %arg6[%c0_32, %c0_33] : memref<1x128xf32, #tpu.memory_space<vmem>>, vector<1x128xf32>
    %45 = vector.shape_cast %44 : vector<1x128xf32> to vector<1x128xf32>
    %46 = vector.broadcast %45 : vector<1x128xf32> to vector<256x128xf32>
    %c0_34 = arith.constant 0 : index
    %c0_35 = arith.constant 0 : index
    %47 = vector.load %arg12[%c0_34, %c0_35] : memref<256x128xf32, #tpu.memory_space<vmem>>, vector<256x128xf32>
    tpu.vector_store %arg12[%c0_34, %c0_35], %46 {strides = array<i32>} : memref<256x128xf32, #tpu.memory_space<vmem>>, vector<256x128xf32>,
    %c0_36 = arith.constant 0 : index
    %c0_37 = arith.constant 0 : index
    %c0_38 = arith.constant 0 : index
    %48 = vector.load %arg11[%c0_36, %c0_37, %c0_38] : memref<18x18x128xf32, #tpu.memory_space<vmem>>, vector<16x16x128xf32>
    %49 = vector.shape_cast %48 : vector<16x16x128xf32> to vector<256x128xf32>
    %c0_39 = arith.constant 0 : index
    %c0_40 = arith.constant 0 : index
    %50 = vector.load %arg12[%c0_39, %c0_40] : memref<256x128xf32, #tpu.memory_space<vmem>>, vector<256x128xf32>
    %c0_41 = arith.constant 0 : index
    %c0_42 = arith.constant 0 : index
    %c0_43 = arith.constant 0 : index
    %51 = vector.load %arg5[%c0_41, %c0_42, %c0_43] : memref<9x128x128xf32, #tpu.memory_space<vmem>>, vector<1x128x128xf32>
    %52 = vector.shape_cast %51 : vector<1x128x128xf32> to vector<128x128xf32>
    %cst_44 = arith.constant dense<0.000000e+00> : vector<256x128xf32>
    %53 = tpu.matmul %49, %52, %cst_44 {dimension_numbers = #tpu.dot_dimension_numbers<[1], [0], [0], [1], [0, 0, 1, 1], [], []>} : vector<256x128xf32>, vector<128x128xf32>, vector<256x128xf32> -> vector<256x128xf32>
    %54 = arith.addf %50, %53 : vector<256x128xf32>
    %c0_45 = arith.constant 0 : index
    %c0_46 = arith.constant 0 : index
    %55 = vector.load %arg12[%c0_45, %c0_46] : memref<256x128xf32, #tpu.memory_space<vmem>>, vector<256x128xf32>
    tpu.vector_store %arg12[%c0_45, %c0_46], %54 {strides = array<i32>} : memref<256x128xf32, #tpu.memory_space<vmem>>, vector<256x128xf32>,
    %c0_47 = arith.constant 0 : index
    %c1_48 = arith.constant 1 : index
    %c0_49 = arith.constant 0 : index
    %56 = vector.load %arg11[%c0_47, %c1_48, %c0_49] : memref<18x18x128xf32, #tpu.memory_space<vmem>>, vector<16x16x128xf32>
    %57 = vector.shape_cast %56 : vector<16x16x128xf32> to vector<256x128xf32>
    %c0_50 = arith.constant 0 : index
    %c0_51 = arith.constant 0 : index
    %58 = vector.load %arg12[%c0_50, %c0_51] : memref<256x128xf32, #tpu.memory_space<vmem>>, vector<256x128xf32>
    %c1_52 = arith.constant 1 : index
    %c0_53 = arith.constant 0 : index
    %c0_54 = arith.constant 0 : index
    %59 = vector.load %arg5[%c1_52, %c0_53, %c0_54] : memref<9x128x128xf32, #tpu.memory_space<vmem>>, vector<1x128x128xf32>
    %60 = vector.shape_cast %59 : vector<1x128x128xf32> to vector<128x128xf32>
    %cst_55 = arith.constant dense<0.000000e+00> : vector<256x128xf32>
    %61 = tpu.matmul %57, %60, %cst_55 {dimension_numbers = #tpu.dot_dimension_numbers<[1], [0], [0], [1], [0, 0, 1, 1], [], []>} : vector<256x128xf32>, vector<128x128xf32>, vector<256x128xf32> -> vector<256x128xf32>
    %62 = arith.addf %58, %61 : vector<256x128xf32>
    %c0_56 = arith.constant 0 : index
    %c0_57 = arith.constant 0 : index
    %63 = vector.load %arg12[%c0_56, %c0_57] : memref<256x128xf32, #tpu.memory_space<vmem>>, vector<256x128xf32>
    tpu.vector_store %arg12[%c0_56, %c0_57], %62 {strides = array<i32>} : memref<256x128xf32, #tpu.memory_space<vmem>>, vector<256x128xf32>,
    %c0_58 = arith.constant 0 : index
    %c2 = arith.constant 2 : index
    %c0_59 = arith.constant 0 : index
    %64 = vector.load %arg11[%c0_58, %c2, %c0_59] : memref<18x18x128xf32, #tpu.memory_space<vmem>>, vector<16x16x128xf32>
    %65 = vector.shape_cast %64 : vector<16x16x128xf32> to vector<256x128xf32>
    %c0_60 = arith.constant 0 : index
    %c0_61 = arith.constant 0 : index
    %66 = vector.load %arg12[%c0_60, %c0_61] : memref<256x128xf32, #tpu.memory_space<vmem>>, vector<256x128xf32>
    %c2_62 = arith.constant 2 : index
    %c0_63 = arith.constant 0 : index
    %c0_64 = arith.constant 0 : index
    %67 = vector.load %arg5[%c2_62, %c0_63, %c0_64] : memref<9x128x128xf32, #tpu.memory_space<vmem>>, vector<1x128x128xf32>
    %68 = vector.shape_cast %67 : vector<1x128x128xf32> to vector<128x128xf32>
    %cst_65 = arith.constant dense<0.000000e+00> : vector<256x128xf32>
    %69 = tpu.matmul %65, %68, %cst_65 {dimension_numbers = #tpu.dot_dimension_numbers<[1], [0], [0], [1], [0, 0, 1, 1], [], []>} : vector<256x128xf32>, vector<128x128xf32>, vector<256x128xf32> -> vector<256x128xf32>
    %70 = arith.addf %66, %69 : vector<256x128xf32>
    %c0_66 = arith.constant 0 : index
    %c0_67 = arith.constant 0 : index
    %71 = vector.load %arg12[%c0_66, %c0_67] : memref<256x128xf32, #tpu.memory_space<vmem>>, vector<256x128xf32>
    tpu.vector_store %arg12[%c0_66, %c0_67], %70 {strides = array<i32>} : memref<256x128xf32, #tpu.memory_space<vmem>>, vector<256x128xf32>,
    %c1_68 = arith.constant 1 : index
    %c0_69 = arith.constant 0 : index
    %c0_70 = arith.constant 0 : index
    %72 = vector.load %arg11[%c1_68, %c0_69, %c0_70] : memref<18x18x128xf32, #tpu.memory_space<vmem>>, vector<16x16x128xf32>
    %73 = vector.shape_cast %72 : vector<16x16x128xf32> to vector<256x128xf32>
    %c0_71 = arith.constant 0 : index
    %c0_72 = arith.constant 0 : index
    %74 = vector.load %arg12[%c0_71, %c0_72] : memref<256x128xf32, #tpu.memory_space<vmem>>, vector<256x128xf32>
    %c3 = arith.constant 3 : index
    %c0_73 = arith.constant 0 : index
    %c0_74 = arith.constant 0 : index
    %75 = vector.load %arg5[%c3, %c0_73, %c0_74] : memref<9x128x128xf32, #tpu.memory_space<vmem>>, vector<1x128x128xf32>
    %76 = vector.shape_cast %75 : vector<1x128x128xf32> to vector<128x128xf32>
    %cst_75 = arith.constant dense<0.000000e+00> : vector<256x128xf32>
    %77 = tpu.matmul %73, %76, %cst_75 {dimension_numbers = #tpu.dot_dimension_numbers<[1], [0], [0], [1], [0, 0, 1, 1], [], []>} : vector<256x128xf32>, vector<128x128xf32>, vector<256x128xf32> -> vector<256x128xf32>
    %78 = arith.addf %74, %77 : vector<256x128xf32>
    %c0_76 = arith.constant 0 : index
    %c0_77 = arith.constant 0 : index
    %79 = vector.load %arg12[%c0_76, %c0_77] : memref<256x128xf32, #tpu.memory_space<vmem>>, vector<256x128xf32>
    tpu.vector_store %arg12[%c0_76, %c0_77], %78 {strides = array<i32>} : memref<256x128xf32, #tpu.memory_space<vmem>>, vector<256x128xf32>,
    %c1_78 = arith.constant 1 : index
    %c1_79 = arith.constant 1 : index
    %c0_80 = arith.constant 0 : index
    %80 = vector.load %arg11[%c1_78, %c1_79, %c0_80] : memref<18x18x128xf32, #tpu.memory_space<vmem>>, vector<16x16x128xf32>
    %81 = vector.shape_cast %80 : vector<16x16x128xf32> to vector<256x128xf32>
    %c0_81 = arith.constant 0 : index
    %c0_82 = arith.constant 0 : index
    %82 = vector.load %arg12[%c0_81, %c0_82] : memref<256x128xf32, #tpu.memory_space<vmem>>, vector<256x128xf32>
    %c4 = arith.constant 4 : index
    %c0_83 = arith.constant 0 : index
    %c0_84 = arith.constant 0 : index
    %83 = vector.load %arg5[%c4, %c0_83, %c0_84] : memref<9x128x128xf32, #tpu.memory_space<vmem>>, vector<1x128x128xf32>
    %84 = vector.shape_cast %83 : vector<1x128x128xf32> to vector<128x128xf32>
    %cst_85 = arith.constant dense<0.000000e+00> : vector<256x128xf32>
    %85 = tpu.matmul %81, %84, %cst_85 {dimension_numbers = #tpu.dot_dimension_numbers<[1], [0], [0], [1], [0, 0, 1, 1], [], []>} : vector<256x128xf32>, vector<128x128xf32>, vector<256x128xf32> -> vector<256x128xf32>
    %86 = arith.addf %82, %85 : vector<256x128xf32>
    %c0_86 = arith.constant 0 : index
    %c0_87 = arith.constant 0 : index
    %87 = vector.load %arg12[%c0_86, %c0_87] : memref<256x128xf32, #tpu.memory_space<vmem>>, vector<256x128xf32>
    tpu.vector_store %arg12[%c0_86, %c0_87], %86 {strides = array<i32>} : memref<256x128xf32, #tpu.memory_space<vmem>>, vector<256x128xf32>,
    %c1_88 = arith.constant 1 : index
    %c2_89 = arith.constant 2 : index
    %c0_90 = arith.constant 0 : index
    %88 = vector.load %arg11[%c1_88, %c2_89, %c0_90] : memref<18x18x128xf32, #tpu.memory_space<vmem>>, vector<16x16x128xf32>
    %89 = vector.shape_cast %88 : vector<16x16x128xf32> to vector<256x128xf32>
    %c0_91 = arith.constant 0 : index
    %c0_92 = arith.constant 0 : index
    %90 = vector.load %arg12[%c0_91, %c0_92] : memref<256x128xf32, #tpu.memory_space<vmem>>, vector<256x128xf32>
    %c5 = arith.constant 5 : index
    %c0_93 = arith.constant 0 : index
    %c0_94 = arith.constant 0 : index
    %91 = vector.load %arg5[%c5, %c0_93, %c0_94] : memref<9x128x128xf32, #tpu.memory_space<vmem>>, vector<1x128x128xf32>
    %92 = vector.shape_cast %91 : vector<1x128x128xf32> to vector<128x128xf32>
    %cst_95 = arith.constant dense<0.000000e+00> : vector<256x128xf32>
    %93 = tpu.matmul %89, %92, %cst_95 {dimension_numbers = #tpu.dot_dimension_numbers<[1], [0], [0], [1], [0, 0, 1, 1], [], []>} : vector<256x128xf32>, vector<128x128xf32>, vector<256x128xf32> -> vector<256x128xf32>
    %94 = arith.addf %90, %93 : vector<256x128xf32>
    %c0_96 = arith.constant 0 : index
    %c0_97 = arith.constant 0 : index
    %95 = vector.load %arg12[%c0_96, %c0_97] : memref<256x128xf32, #tpu.memory_space<vmem>>, vector<256x128xf32>
    tpu.vector_store %arg12[%c0_96, %c0_97], %94 {strides = array<i32>} : memref<256x128xf32, #tpu.memory_space<vmem>>, vector<256x128xf32>,
    %c2_98 = arith.constant 2 : index
    %c0_99 = arith.constant 0 : index
    %c0_100 = arith.constant 0 : index
    %96 = vector.load %arg11[%c2_98, %c0_99, %c0_100] : memref<18x18x128xf32, #tpu.memory_space<vmem>>, vector<16x16x128xf32>
    %97 = vector.shape_cast %96 : vector<16x16x128xf32> to vector<256x128xf32>
    %c0_101 = arith.constant 0 : index
    %c0_102 = arith.constant 0 : index
    %98 = vector.load %arg12[%c0_101, %c0_102] : memref<256x128xf32, #tpu.memory_space<vmem>>, vector<256x128xf32>
    %c6 = arith.constant 6 : index
    %c0_103 = arith.constant 0 : index
    %c0_104 = arith.constant 0 : index
    %99 = vector.load %arg5[%c6, %c0_103, %c0_104] : memref<9x128x128xf32, #tpu.memory_space<vmem>>, vector<1x128x128xf32>
    %100 = vector.shape_cast %99 : vector<1x128x128xf32> to vector<128x128xf32>
    %cst_105 = arith.constant dense<0.000000e+00> : vector<256x128xf32>
    %101 = tpu.matmul %97, %100, %cst_105 {dimension_numbers = #tpu.dot_dimension_numbers<[1], [0], [0], [1], [0, 0, 1, 1], [], []>} : vector<256x128xf32>, vector<128x128xf32>, vector<256x128xf32> -> vector<256x128xf32>
    %102 = arith.addf %98, %101 : vector<256x128xf32>
    %c0_106 = arith.constant 0 : index
    %c0_107 = arith.constant 0 : index
    %103 = vector.load %arg12[%c0_106, %c0_107] : memref<256x128xf32, #tpu.memory_space<vmem>>, vector<256x128xf32>
    tpu.vector_store %arg12[%c0_106, %c0_107], %102 {strides = array<i32>} : memref<256x128xf32, #tpu.memory_space<vmem>>, vector<256x128xf32>,
    %c2_108 = arith.constant 2 : index
    %c1_109 = arith.constant 1 : index
    %c0_110 = arith.constant 0 : index
    %104 = vector.load %arg11[%c2_108, %c1_109, %c0_110] : memref<18x18x128xf32, #tpu.memory_space<vmem>>, vector<16x16x128xf32>
    %105 = vector.shape_cast %104 : vector<16x16x128xf32> to vector<256x128xf32>
    %c0_111 = arith.constant 0 : index
    %c0_112 = arith.constant 0 : index
    %106 = vector.load %arg12[%c0_111, %c0_112] : memref<256x128xf32, #tpu.memory_space<vmem>>, vector<256x128xf32>
    %c7 = arith.constant 7 : index
    %c0_113 = arith.constant 0 : index
    %c0_114 = arith.constant 0 : index
    %107 = vector.load %arg5[%c7, %c0_113, %c0_114] : memref<9x128x128xf32, #tpu.memory_space<vmem>>, vector<1x128x128xf32>
    %108 = vector.shape_cast %107 : vector<1x128x128xf32> to vector<128x128xf32>
    %cst_115 = arith.constant dense<0.000000e+00> : vector<256x128xf32>
    %109 = tpu.matmul %105, %108, %cst_115 {dimension_numbers = #tpu.dot_dimension_numbers<[1], [0], [0], [1], [0, 0, 1, 1], [], []>} : vector<256x128xf32>, vector<128x128xf32>, vector<256x128xf32> -> vector<256x128xf32>
    %110 = arith.addf %106, %109 : vector<256x128xf32>
    %c0_116 = arith.constant 0 : index
    %c0_117 = arith.constant 0 : index
    %111 = vector.load %arg12[%c0_116, %c0_117] : memref<256x128xf32, #tpu.memory_space<vmem>>, vector<256x128xf32>
    tpu.vector_store %arg12[%c0_116, %c0_117], %110 {strides = array<i32>} : memref<256x128xf32, #tpu.memory_space<vmem>>, vector<256x128xf32>,
    %c2_118 = arith.constant 2 : index
    %c2_119 = arith.constant 2 : index
    %c0_120 = arith.constant 0 : index
    %112 = vector.load %arg11[%c2_118, %c2_119, %c0_120] : memref<18x18x128xf32, #tpu.memory_space<vmem>>, vector<16x16x128xf32>
    %113 = vector.shape_cast %112 : vector<16x16x128xf32> to vector<256x128xf32>
    %c0_121 = arith.constant 0 : index
    %c0_122 = arith.constant 0 : index
    %114 = vector.load %arg12[%c0_121, %c0_122] : memref<256x128xf32, #tpu.memory_space<vmem>>, vector<256x128xf32>
    %c8 = arith.constant 8 : index
    %c0_123 = arith.constant 0 : index
    %c0_124 = arith.constant 0 : index
    %115 = vector.load %arg5[%c8, %c0_123, %c0_124] : memref<9x128x128xf32, #tpu.memory_space<vmem>>, vector<1x128x128xf32>
    %116 = vector.shape_cast %115 : vector<1x128x128xf32> to vector<128x128xf32>
    %cst_125 = arith.constant dense<0.000000e+00> : vector<256x128xf32>
    %117 = tpu.matmul %113, %116, %cst_125 {dimension_numbers = #tpu.dot_dimension_numbers<[1], [0], [0], [1], [0, 0, 1, 1], [], []>} : vector<256x128xf32>, vector<128x128xf32>, vector<256x128xf32> -> vector<256x128xf32>
    %118 = arith.addf %114, %117 : vector<256x128xf32>
    %c0_126 = arith.constant 0 : index
    %c0_127 = arith.constant 0 : index
    %119 = vector.load %arg12[%c0_126, %c0_127] : memref<256x128xf32, #tpu.memory_space<vmem>>, vector<256x128xf32>
    tpu.vector_store %arg12[%c0_126, %c0_127], %118 {strides = array<i32>} : memref<256x128xf32, #tpu.memory_space<vmem>>, vector<256x128xf32>,
    %c0_128 = arith.constant 0 : index
    %c0_129 = arith.constant 0 : index
    %120 = vector.load %arg12[%c0_128, %c0_129] : memref<256x128xf32, #tpu.memory_space<vmem>>, vector<256x128xf32>
    %cst_130 = arith.constant dense<0.000000e+00> : vector<128xf32>
    %121 = vector.multi_reduction <add>, %120, %cst_130 [0] : vector<256x128xf32> to vector<128xf32>
    %122 = vector.shape_cast %121 : vector<128xf32> to vector<1x128xf32>
    %c0_131 = arith.constant 0 : index
    %c0_132 = arith.constant 0 : index
    %c0_133 = arith.constant 0 : index
    %c0_134 = arith.constant 0 : index
    %123 = vector.load %arg10[%c0_131, %c0_132, %c0_133, %c0_134] : memref<1x1x2x128xf32, #tpu.memory_space<vmem>>, vector<1x1x1x128xf32>
    %124 = vector.shape_cast %123 : vector<1x1x1x128xf32> to vector<1x128xf32>
    %125 = vector.shape_cast %122 : vector<1x128xf32> to vector<1x1x1x128xf32>
    tpu.vector_store %arg10[%c0_131, %c0_132, %c0_133, %c0_134], %125 {strides = array<i32>} : memref<1x1x2x128xf32, #tpu.memory_space<vmem>>, vector<1x1x1x128xf32>,
    %126 = arith.mulf %120, %120 : vector<256x128xf32>
    %cst_135 = arith.constant dense<0.000000e+00> : vector<128xf32>
    %127 = vector.multi_reduction <add>, %126, %cst_135 [0] : vector<256x128xf32> to vector<128xf32>
    %128 = vector.shape_cast %127 : vector<128xf32> to vector<1x128xf32>
    %c0_136 = arith.constant 0 : index
    %c0_137 = arith.constant 0 : index
    %c1_138 = arith.constant 1 : index
    %c0_139 = arith.constant 0 : index
    %129 = vector.load %arg10[%c0_136, %c0_137, %c1_138, %c0_139] : memref<1x1x2x128xf32, #tpu.memory_space<vmem>>, vector<1x1x1x128xf32>
    %130 = vector.shape_cast %129 : vector<1x1x1x128xf32> to vector<1x128xf32>
    %131 = vector.shape_cast %128 : vector<1x128xf32> to vector<1x1x1x128xf32>
    tpu.vector_store %arg10[%c0_136, %c0_137, %c1_138, %c0_139], %131 {strides = array<i32>} : memref<1x1x2x128xf32, #tpu.memory_space<vmem>>, vector<1x1x1x128xf32>,
    %132 = vector.shape_cast %120 : vector<256x128xf32> to vector<16x16x128xf32>
    %c0_140 = arith.constant 0 : index
    %c0_141 = arith.constant 0 : index
    %c0_142 = arith.constant 0 : index
    %c0_143 = arith.constant 0 : index
    %133 = vector.load %arg9[%c0_140, %c0_141, %c0_142, %c0_143] : memref<1x16x16x128xf32, #tpu.memory_space<vmem>>, vector<1x16x16x128xf32>
    %134 = vector.shape_cast %133 : vector<1x16x16x128xf32> to vector<16x16x128xf32>
    %135 = vector.shape_cast %132 : vector<16x16x128xf32> to vector<1x16x16x128xf32>
    tpu.vector_store %arg9[%c0_140, %c0_141, %c0_142, %c0_143], %135 {strides = array<i32>} : memref<1x16x16x128xf32, #tpu.memory_space<vmem>>, vector<1x16x16x128xf32>,
    return
  }
  func.func @transform_0(%arg0: i32, %arg1: i32) -> (i32, i32, i32, i32) {
    %c0_i32 = arith.constant 0 : i32
    %c0_i32_0 = arith.constant 0 : i32
    %c0_i32_1 = arith.constant 0 : i32
    return %arg0, %arg1, %c0_i32, %c0_i32_0 : i32, i32, i32, i32
  }
  func.func @transform_1(%arg0: i32, %arg1: i32) -> (i32, i32, i32, i32) {
    %c16_i32 = arith.constant 16 : i32
    %0 = arith.muli %arg1, %c16_i32 : i32
    %c1_i32 = arith.constant 1 : i32
    %1 = arith.subi %0, %c1_i32 : i32
    %c0_i32 = arith.constant 0 : i32
    %2 = arith.maxsi %1, %c0_i32 : i32
    %c0_i32_0 = arith.constant 0 : i32
    %c0_i32_1 = arith.constant 0 : i32
    %c0_i32_2 = arith.constant 0 : i32
    return %arg0, %2, %c0_i32_0, %c0_i32_1 : i32, i32, i32, i32
  }
  func.func @transform_2(%arg0: i32, %arg1: i32) -> (i32, i32, i32, i32) {
    %c16_i32 = arith.constant 16 : i32
    %0 = arith.muli %arg1, %c16_i32 : i32
    %c16_i32_0 = arith.constant 16 : i32
    %1 = arith.addi %0, %c16_i32_0 : i32
    %c15_i32 = arith.constant 15 : i32
    %2 = arith.minsi %1, %c15_i32 : i32
    %c0_i32 = arith.constant 0 : i32
    %c0_i32_1 = arith.constant 0 : i32
    %c0_i32_2 = arith.constant 0 : i32
    return %arg0, %2, %c0_i32, %c0_i32_1 : i32, i32, i32, i32
  }
  func.func @transform_3(%arg0: i32, %arg1: i32) -> (i32, i32, i32) {
    %c0_i32 = arith.constant 0 : i32
    %c0_i32_0 = arith.constant 0 : i32
    %c0_i32_1 = arith.constant 0 : i32
    %c0_i32_2 = arith.constant 0 : i32
    return %c0_i32, %c0_i32_0, %c0_i32_1 : i32, i32, i32
  }
  func.func @transform_4(%arg0: i32, %arg1: i32) -> (i32, i32) {
    %c0_i32 = arith.constant 0 : i32
    %c0_i32_0 = arith.constant 0 : i32
    %c0_i32_1 = arith.constant 0 : i32
    return %c0_i32, %c0_i32_0 : i32, i32
  }
  func.func @transform_5(%arg0: i32, %arg1: i32) -> (i32, i32) {
    %c0_i32 = arith.constant 0 : i32
    %c0_i32_0 = arith.constant 0 : i32
    %c0_i32_1 = arith.constant 0 : i32
    return %c0_i32, %c0_i32_0 : i32, i32
  }
  func.func @transform_6(%arg0: i32, %arg1: i32) -> (i32, i32) {
    %c0_i32 = arith.constant 0 : i32
    %c0_i32_0 = arith.constant 0 : i32
    %c0_i32_1 = arith.constant 0 : i32
    return %c0_i32, %c0_i32_0 : i32, i32
  }
  func.func @transform_7(%arg0: i32, %arg1: i32) -> (i32, i32, i32, i32) {
    %c0_i32 = arith.constant 0 : i32
    %c0_i32_0 = arith.constant 0 : i32
    %c0_i32_1 = arith.constant 0 : i32
    return %arg0, %arg1, %c0_i32, %c0_i32_0 : i32, i32, i32, i32
  }
  func.func @transform_8(%arg0: i32, %arg1: i32) -> (i32, i32, i32, i32) {
    %c0_i32 = arith.constant 0 : i32
    %c0_i32_0 = arith.constant 0 : i32
    %c0_i32_1 = arith.constant 0 : i32
    return %arg0, %arg1, %c0_i32, %c0_i32_0 : i32, i32, i32, i32
  }
}

module attributes {stable_mosaic.version = 11 : i64} {
  func.func @_bnrelu_kernel(%arg0: i32, %arg1: i32, %arg2: memref<1x16x16x128xf32, #tpu.memory_space<vmem>>, %arg3: memref<1x128xf32, #tpu.memory_space<vmem>>, %arg4: memref<1x128xf32, #tpu.memory_space<vmem>>, %arg5: memref<1x16x16x128xf32, #tpu.memory_space<vmem>>) attributes {dimension_semantics = [#tpu.dimension_semantics<parallel>, #tpu.dimension_semantics<parallel>], iteration_bounds = array<i64: 2, 1>, scalar_prefetch = 0 : i64, scratch_operands = 0 : i64, tpu.core_type = #tpu.core_type<tc>, window_params = [{transform_indices = @transform_0, window_bounds = array<i64: 1, 16, 16, 128>}, {pipeline_mode = #tpu.pipeline_mode<synchronous>, transform_indices = @transform_1, window_bounds = array<i64: 1, 128>}, {pipeline_mode = #tpu.pipeline_mode<synchronous>, transform_indices = @transform_2, window_bounds = array<i64: 1, 128>}, {transform_indices = @transform_3, window_bounds = array<i64: 1, 16, 16, 128>}]} {
    %c0 = arith.constant 0 : index
    %c0_0 = arith.constant 0 : index
    %0 = vector.load %arg3[%c0, %c0_0] : memref<1x128xf32, #tpu.memory_space<vmem>>, vector<1x128xf32>
    %1 = vector.shape_cast %0 : vector<1x128xf32> to vector<1x1x128xf32>
    %c0_1 = arith.constant 0 : index
    %c0_2 = arith.constant 0 : index
    %2 = vector.load %arg4[%c0_1, %c0_2] : memref<1x128xf32, #tpu.memory_space<vmem>>, vector<1x128xf32>
    %3 = vector.shape_cast %2 : vector<1x128xf32> to vector<1x1x128xf32>
    %c0_3 = arith.constant 0 : index
    %c0_4 = arith.constant 0 : index
    %c0_5 = arith.constant 0 : index
    %c0_6 = arith.constant 0 : index
    %4 = vector.load %arg2[%c0_3, %c0_4, %c0_5, %c0_6] : memref<1x16x16x128xf32, #tpu.memory_space<vmem>>, vector<1x16x16x128xf32>
    %5 = vector.shape_cast %4 : vector<1x16x16x128xf32> to vector<16x16x128xf32>
    %6 = vector.broadcast %1 : vector<1x1x128xf32> to vector<16x16x128xf32>
    %7 = arith.mulf %5, %6 : vector<16x16x128xf32>
    %8 = vector.broadcast %3 : vector<1x1x128xf32> to vector<16x16x128xf32>
    %9 = arith.addf %7, %8 : vector<16x16x128xf32>
    %cst = arith.constant 0.000000e+00 : f32
    %10 = vector.broadcast %cst : f32 to vector<16x16x128xf32>
    %11 = arith.maximumf %9, %10 : vector<16x16x128xf32>
    %c0_7 = arith.constant 0 : index
    %c0_8 = arith.constant 0 : index
    %c0_9 = arith.constant 0 : index
    %c0_10 = arith.constant 0 : index
    %12 = vector.load %arg5[%c0_7, %c0_8, %c0_9, %c0_10] : memref<1x16x16x128xf32, #tpu.memory_space<vmem>>, vector<1x16x16x128xf32>
    %13 = vector.shape_cast %12 : vector<1x16x16x128xf32> to vector<16x16x128xf32>
    %14 = vector.shape_cast %11 : vector<16x16x128xf32> to vector<1x16x16x128xf32>
    tpu.vector_store %arg5[%c0_7, %c0_8, %c0_9, %c0_10], %14 {strides = array<i32>} : memref<1x16x16x128xf32, #tpu.memory_space<vmem>>, vector<1x16x16x128xf32>,
    return
  }
  func.func @transform_0(%arg0: i32, %arg1: i32) -> (i32, i32, i32, i32) {
    %c0_i32 = arith.constant 0 : i32
    %c0_i32_0 = arith.constant 0 : i32
    %c0_i32_1 = arith.constant 0 : i32
    return %arg0, %arg1, %c0_i32, %c0_i32_0 : i32, i32, i32, i32
  }
  func.func @transform_1(%arg0: i32, %arg1: i32) -> (i32, i32) {
    %c0_i32 = arith.constant 0 : i32
    %c0_i32_0 = arith.constant 0 : i32
    %c0_i32_1 = arith.constant 0 : i32
    return %c0_i32, %c0_i32_0 : i32, i32
  }
  func.func @transform_2(%arg0: i32, %arg1: i32) -> (i32, i32) {
    %c0_i32 = arith.constant 0 : i32
    %c0_i32_0 = arith.constant 0 : i32
    %c0_i32_1 = arith.constant 0 : i32
    return %c0_i32, %c0_i32_0 : i32, i32
  }
  func.func @transform_3(%arg0: i32, %arg1: i32) -> (i32, i32, i32, i32) {
    %c0_i32 = arith.constant 0 : i32
    %c0_i32_0 = arith.constant 0 : i32
    %c0_i32_1 = arith.constant 0 : i32
    return %arg0, %arg1, %c0_i32, %c0_i32_0 : i32, i32, i32, i32
  }
}

</mosaic_0001>

<bundles_post_ra>
// kernel: tile.8
= control target key start
LH: loop header
LB: loop body
LE: loop exit
PB: predicated region body
PF: predicated region fallthrough
CT: control target
= control target key end

     0   :  { %s22_s0 = inlined_call_operand.vmem [shape: f32[128], index: 0, kind: input, shape index: {}]   ;;  %s23_s1 = inlined_call_operand.vmem [shape: f32[4,128], index: 1, kind: output, shape index: {}]  }
   0x1   :  { %v4_v0 = vld [vmem:[%s22_s0] ss:$0 sm:$0xff] }
   0x2   :  { %5 = vst [vmem:[%s23_s1] sm:$0xf] %v4_v0 }

// kernel: decoder_block_forward.4
= control target key start
LH: loop header
LB: loop body
LE: loop exit
PB: predicated region body
PF: predicated region fallthrough
CT: control target
= control target key end

     0   :  { %s821_s12 = smov 0   ;;  %s823_s13 = smov 0   ;;  %s1159_s0 = inlined_call_operand.vmem [shape: f32[2,8,8,128], index: 0, kind: input, shape index: {}]   ;;  %s1160_s1 = inlined_call_operand.vmem [shape: f32[128,512], index: 1, kind: input, shape index: {}]   ;;  %s1161_s2 = inlined_call_operand.vmem [shape: f32[1,512], index: 2, kind: input, shape index: {}]   ;;  %s1162_s3 = inlined_call_operand.vmem [shape: f32[2,8,2,8,256], index: 3, kind: output, shape index: {}]  }
   0x1   :  { %s825_s14 = smov 0  }
   0x2 LB: > { %s25_s15 = sadd.s32 1, %s794_s13  ;;  %p662_p0 = scmp.ge.s32.totalorder %s798_s14, 1  ;;  %s798_s14 = sphi %s825_s14, %s13_s14   ;;  %s794_s13 = sphi %s823_s13, %s1164_s13   ;;  %s790_s12 = sphi %s821_s12, %s1163_s12  }
   0x3   : > { %p27_p1 = scmp.ge.s32.totalorder %s25_s15, 2  ;;  %p158_p2 = scmp.lt.s32.totalorder %s798_s14, 3 }
   0x5   : > { %s1166_s15 = smov (%p27_p1, %s25_s15), 0  ;;  %p159_p3 = pnand %p662_p0, %p158_p2 }
   0x6   : > { %v221_v0 = vld [vmem:[%s1160_s1 + $0x8] sm:$0xff] (!%p159_p3)  ;;  %v223_v2 = vld [vmem:[%s1160_s1 + $0x18] sm:$0xff] (!%p159_p3)  ;;  %v220_v5 = vld [vmem:[%s1160_s1] sm:$0xff] (!%p159_p3)  ;;  %v800_v7 = vmov (!%p159_p3), 0.0   ;;  %p192_p4 = scmp.lt.s32.totalorder (!%p159_p3), %s790_s12, 1 }
   0x7   : > { %162 = sbr.rel (%p159_p3) target bundleno = 287 (0x11f), region = 32  ;;  %v225_v1 = vld [vmem:[%s1160_s1 + $0x28] sm:$0xff] (!%p159_p3)  ;;  %v227_v4 = vld [vmem:[%s1160_s1 + $0x38] sm:$0xff] (!%p159_p3)  ;;  %v224_v6 = vld [vmem:[%s1160_s1 + $0x20] sm:$0xff] (!%p159_p3)  ;;  %370 = vmatprep.mubr.f32.mxu0 (!%p159_p3), %v800_v7  ;;  %483 = vmatprep.mubr.f32.mxu1 (!%p159_p3), %v800_v7 }
   0x8   : > { %v687_v3 = vpack.c.bf16 (!%p159_p3), %v225_v1, %v221_v0  ;;  %v719_v8 = vpack.c.bf16 (!%p159_p3), %v227_v4, %v223_v2  ;;  %v689_v9 = vpack.c.bf16 (!%p159_p3), %v224_v6, %v220_v5  ;;  %v222_v10 = vld [vmem:[%s1160_s1 + $0x10] sm:$0xff] (!%p159_p3)  ;;  %v229_v12 = vld [vmem:[%s1160_s1 + $0x48] sm:$0xff] (!%p159_p3)  ;;  %v231_v15 = vld [vmem:[%s1160_s1 + $0x58] sm:$0xff] (!%p159_p3) }
   0x9   : > { %v226_v11 = vld [vmem:[%s1160_s1 + $0x30] sm:$0xff] (!%p159_p3)  ;;  %v233_v14 = vld [vmem:[%s1160_s1 + $0x68] sm:$0xff] (!%p159_p3)  ;;  %v235_v16 = vld [vmem:[%s1160_s1 + $0x78] sm:$0xff] (!%p159_p3) }
   0xa   : > { %688 = vmatprep.subr.bf16.mxu0 (!%p159_p3), %v687_v3  ;;  %v721_v13 = vpack.c.bf16 (!%p159_p3), %v226_v11, %v222_v10  ;;  %720 = vmatprep.subr.bf16.mxu1 (!%p159_p3), %v719_v8  ;;  %v691_v17 = vpack.c.bf16 (!%p159_p3), %v233_v14, %v229_v12  ;;  %v723_v18 = vpack.c.bf16 (!%p159_p3), %v235_v16, %v231_v15  ;;  %v228_v19 = vld [vmem:[%s1160_s1 + $0x40] sm:$0xff] (!%p159_p3)  ;;  %v230_v21 = vld [vmem:[%s1160_s1 + $0x50] sm:$0xff] (!%p159_p3)  ;;  %v237_v24 = vld [vmem:[%s1160_s1 + $0x88] sm:$0xff] (!%p159_p3) }
   0xb   : > { %690 = vmatpush1.bf16.msra.mxu0 (!%p159_p3), %v689_v9  ;;  %v232_v20 = vld [vmem:[%s1160_s1 + $0x60] sm:$0xff] (!%p159_p3)  ;;  %v234_v23 = vld [vmem:[%s1160_s1 + $0x70] sm:$0xff] (!%p159_p3)  ;;  %v241_v25 = vld [vmem:[%s1160_s1 + $0xa8] sm:$0xff] (!%p159_p3) }
   0xc   : > { %722 = vmatpush1.bf16.msra.mxu1 (!%p159_p3), %v721_v13  ;;  %v693_v22 = vpack.c.bf16 (!%p159_p3), %v232_v20, %v228_v19  ;;  %692 = vmatprep.subr.bf16.mxu0 (!%p159_p3), %v691_v17  ;;  %v725_v26 = vpack.c.bf16 (!%p159_p3), %v234_v23, %v230_v21  ;;  %v695_v27 = vpack.c.bf16 (!%p159_p3), %v241_v25, %v237_v24  ;;  %v239_v28 = vld [vmem:[%s1160_s1 + $0x98] sm:$0xff] (!%p159_p3)  ;;  %v236_v30 = vld [vmem:[%s1160_s1 + $0x80] sm:$0xff] (!%p159_p3)  ;;  %v238_v33 = vld [vmem:[%s1160_s1 + $0x90] sm:$0xff] (!%p159_p3) }
   0xd   : > { %724 = vmatprep.subr.bf16.mxu1 (!%p159_p3), %v723_v18  ;;  %v243_v29 = vld [vmem:[%s1160_s1 + $0xb8] sm:$0xff] (!%p159_p3)  ;;  %v240_v32 = vld [vmem:[%s1160_s1 + $0xa0] sm:$0xff] (!%p159_p3)  ;;  %v242_v34 = vld [vmem:[%s1160_s1 + $0xb0] sm:$0xff] (!%p159_p3) }
   0xe   : > { %v727_v31 = vpack.c.bf16 %v243_v29, %v239_v28  ;;  %v697_v35 = vpack.c.bf16 %v240_v32, %v236_v30  ;;  %v245_v36 = vld [vmem:[%s1160_s1 + $0xc8] sm:$0xff]  ;;  %v247_v38 = vld [vmem:[%s1160_s1 + $0xd8] sm:$0xff]  ;;  %v729_v39 = vpack.c.bf16 %v242_v34, %v238_v33  ;;  %v244_v42 = vld [vmem:[%s1160_s1 + $0xc0] sm:$0xff]  ;;  %s1168_s12 = smov (!%p192_p4, %s790_s12), 1 }
   0xf   : > { %694 = vmatpush1.bf16.msra.mxu0 %v693_v22  ;;  %v249_v37 = vld [vmem:[%s1160_s1 + $0xe8] sm:$0xff]  ;;  %v251_v41 = vld [vmem:[%s1160_s1 + $0xf8] sm:$0xff]  ;;  %v248_v43 = vld [vmem:[%s1160_s1 + $0xe0] sm:$0xff]  ;;  %s685_s29 = sshll.u32 %s1168_s12, 6  ;;  %s686_s8 = sshll.u32 %s1168_s12, 8 }
  0x10   : > { %726 = vmatpush1.bf16.msra.mxu1 %v725_v26  ;;  %696 = vmatprep.subr.bf16.mxu0 %v695_v27  ;;  %v699_v40 = vpack.c.bf16 %v249_v37, %v245_v36  ;;  %v731_v44 = vpack.c.bf16 %v251_v41, %v247_v38  ;;  %v246_v45 = vld [vmem:[%s1160_s1 + $0xd0] sm:$0xff]  ;;  %v253_v47 = vld [vmem:[%s1160_s1 + $0x108] sm:$0xff]  ;;  %v255_v49 = vld [vmem:[%s1160_s1 + $0x118] sm:$0xff]  ;;  %v701_v51 = vpack.c.bf16 %v248_v43, %v244_v42  ;;  %s1045_s5 = scalar_lea.vmem %s1159_s0, %s685_s29  ;;  %v286_v42 = vlaneseq  ;;  %s1084_s11 = scalar_lea.vmem %s1162_s3, %s686_s8 }
  0x11   : > { %728 = vmatprep.subr.bf16.mxu1 %v727_v31  ;;  %v250_v46 = vld [vmem:[%s1160_s1 + $0xf0] sm:$0xff]  ;;  %v257_v48 = vld [vmem:[%s1160_s1 + $0x128] sm:$0xff]  ;;  %v259_v50 = vld [vmem:[%s1160_s1 + $0x138] sm:$0xff] }
  0x12   : > { %v733_v52 = vpack.c.bf16 %v250_v46, %v246_v45  ;;  %v703_v53 = vpack.c.bf16 %v257_v48, %v253_v47  ;;  %v252_v54 = vld [vmem:[%s1160_s1 + $0x100] sm:$0xff]  ;;  %v254_v56 = vld [vmem:[%s1160_s1 + $0x110] sm:$0xff]  ;;  %v735_v57 = vpack.c.bf16 %v259_v50, %v255_v49  ;;  %v261_v59 = vld [vmem:[%s1160_s1 + $0x148] sm:$0xff]  ;;  %v287_v43 = vshrl.u32 %v286_v42, 7 }
  0x13   : > { %698 = vmatpush1.bf16.msra.mxu0 %v697_v35  ;;  %v256_v55 = vld [vmem:[%s1160_s1 + $0x120] sm:$0xff]  ;;  %v258_v58 = vld [vmem:[%s1160_s1 + $0x130] sm:$0xff]  ;;  %v265_v60 = vld [vmem:[%s1160_s1 + $0x168] sm:$0xff] }
  0x14   : > { %730 = vmatpush1.bf16.msra.mxu1 %v729_v39  ;;  %700 = vmatprep.subr.bf16.mxu0 %v699_v40  ;;  %v263_v61 = vld [vmem:[%s1160_s1 + $0x158] sm:$0xff]  ;;  %v705_v63 = vpack.c.bf16 %v256_v55, %v252_v54  ;;  %v737_v0 = vpack.c.bf16 %v258_v58, %v254_v56  ;;  %v707_v1 = vpack.c.bf16 %v265_v60, %v261_v59  ;;  %v260_v2 = vld [vmem:[%s1160_s1 + $0x140] sm:$0xff]  ;;  %v262_v4 = vld [vmem:[%s1160_s1 + $0x150] sm:$0xff]  ;;  %v296_v46 = vsub.s32 2, %v287_v43 }
  0x15   : > { %732 = vmatprep.subr.bf16.mxu1 %v731_v44  ;;  %v267_v62 = vld [vmem:[%s1160_s1 + $0x178] sm:$0xff]  ;;  %v264_v3 = vld [vmem:[%s1160_s1 + $0x160] sm:$0xff]  ;;  %v266_v6 = vld [vmem:[%s1160_s1 + $0x170] sm:$0xff]  ;;  %v288_v44 = vsub.s32 0, %v287_v43  ;;  %v292_v47 = vsub.s32 1, %v287_v43  ;;  %v300_v48 = vsub.s32 3, %v287_v43 }
  0x16   : > { %v739_v5 = vpack.c.bf16 %v267_v62, %v263_v61  ;;  %v269_v8 = vld [vmem:[%s1160_s1 + $0x188] sm:$0xff]  ;;  %v271_v10 = vld [vmem:[%s1160_s1 + $0x198] sm:$0xff]  ;;  %v709_v12 = vpack.c.bf16 %v264_v3, %v260_v2  ;;  %v741_v13 = vpack.c.bf16 %v266_v6, %v262_v4  ;;  %v268_v15 = vld [vmem:[%s1160_s1 + $0x180] sm:$0xff] }
  0x17   : > { %702 = vmatpush1.bf16.msra.mxu0 %v701_v51  ;;  %v273_v9 = vld [vmem:[%s1160_s1 + $0x1a8] sm:$0xff]  ;;  %v275_v11 = vld [vmem:[%s1160_s1 + $0x1b8] sm:$0xff]  ;;  %v272_v16 = vld [vmem:[%s1160_s1 + $0x1a0] sm:$0xff] }
  0x18   : > { %734 = vmatpush1.bf16.msra.mxu1 %v733_v52  ;;  %704 = vmatprep.subr.bf16.mxu0 %v703_v53  ;;  %v711_v14 = vpack.c.bf16 %v273_v9, %v269_v8  ;;  %v270_v17 = vld [vmem:[%s1160_s1 + $0x190] sm:$0xff]  ;;  %v743_v18 = vpack.c.bf16 %v275_v11, %v271_v10  ;;  %v277_v20 = vld [vmem:[%s1160_s1 + $0x1c8] sm:$0xff]  ;;  %v279_v22 = vld [vmem:[%s1160_s1 + $0x1d8] sm:$0xff]  ;;  %v713_v24 = vpack.c.bf16 %v272_v16, %v268_v15 }
  0x19   : > { %736 = vmatprep.subr.bf16.mxu1 %v735_v57  ;;  %v274_v19 = vld [vmem:[%s1160_s1 + $0x1b0] sm:$0xff]  ;;  %v281_v21 = vld [vmem:[%s1160_s1 + $0x1e8] sm:$0xff]  ;;  %v283_v23 = vld [vmem:[%s1160_s1 + $0x1f8] sm:$0xff] }
  0x1a   : > { %v745_v25 = vpack.c.bf16 %v274_v19, %v270_v17  ;;  %v715_v26 = vpack.c.bf16 %v281_v21, %v277_v20  ;;  %v276_v27 = vld [vmem:[%s1160_s1 + $0x1c0] sm:$0xff]  ;;  %v747_v29 = vpack.c.bf16 %v283_v23, %v279_v22  ;;  %v278_v30 = vld [vmem:[%s1160_s1 + $0x1d0] sm:$0xff]  ;;  %v213_v35 = vld [vmem:[%s1045_s5 + $0x8] sm:$0xff] }
  0x1b   : > { %706 = vmatpush1.bf16.msra.mxu0 %v705_v63  ;;  %v280_v28 = vld [vmem:[%s1160_s1 + $0x1e0] sm:$0xff]  ;;  %v282_v31 = vld [vmem:[%s1160_s1 + $0x1f0] sm:$0xff]  ;;  %v215_v37 = vld [vmem:[%s1045_s5 + $0x18] sm:$0xff] }
  0x1c   : > { %738 = vmatpush1.bf16.msra.mxu1 %v737_v0  ;;  %708 = vmatprep.subr.bf16.mxu0 %v707_v1  ;;  %v717_v32 = vpack.c.bf16 %v280_v28, %v276_v27  ;;  %v749_v33 = vpack.c.bf16 %v282_v31, %v278_v30  ;;  %v212_v34 = vld [vmem:[%s1045_s5] sm:$0xff]  ;;  %v214_v36 = vld [vmem:[%s1045_s5 + $0x10] sm:$0xff]  ;;  %v217_v39 = vld [vmem:[%s1045_s5 + $0x28] sm:$0xff] }
  0x1d   : > { %740 = vmatprep.subr.bf16.mxu1 %v739_v5  ;;  %v216_v38 = vld [vmem:[%s1045_s5 + $0x20] sm:$0xff]  ;;  %v218_v40 = vld [vmem:[%s1045_s5 + $0x30] sm:$0xff]  ;;  %v219_v41 = vld [vmem:[%s1045_s5 + $0x38] sm:$0xff] }
  0x1e   : > { %v284_v45 = vld [vmem:[%s1161_s2] sm:$0xf] }
  0x1f   : > { %710 = vmatpush1.bf16.msra.mxu0 %v709_v12  ;;  %v1073_v49 = vrot.slane %v284_v45, %v288_v44  ;;  %v1075_v50 = vrot.slane %v284_v45, %v296_v46  ;;  %v1077_v51 = vrot.slane %v284_v45, %v292_v47 }
  0x20   : > { %742 = vmatpush1.bf16.msra.mxu1 %v741_v13  ;;  %712 = vmatprep.subr.bf16.mxu0 %v711_v14 }
  0x21   : > { %744 = vmatprep.subr.bf16.mxu1 %v743_v18 }
  0x23   : > { %714 = vmatpush1.bf16.msra.mxu0 %v713_v24 }
  0x24   : > { %746 = vmatpush1.bf16.msra.mxu1 %v745_v25  ;;  %716 = vmatprep.subr.bf16.mxu0 %v715_v26 }
  0x25   : > { %748 = vmatprep.subr.bf16.mxu1 %v747_v29 }
  0x27   : > { %718 = vmatpush1.bf16.msra.mxu0 %v717_v32 }
  0x28   : > { %750 = vmatpush1.bf16.msra.mxu1 %v749_v33 }
  0x2a   : > { %371 = vmatmul.mubr.f32.vlgmr.msra.gmra.mrb[0].mxu0 %v212_v34 }
  0x2b   : > { %484 = vmatmul.mubr.f32.vlgmr.msra.gmra.mrb[0].mxu1 %v212_v34  ;;  %376 = vmatprep.mubr.f32.mxu0 %v800_v7 }
  0x2c   : > { %489 = vmatprep.mubr.f32.mxu1 %v800_v7 }
  0x2e   : > { %377 = vmatmul.mubr.f32.gmra.mrb[2].mxu0 %v213_v35 }
  0x2f   : > { %490 = vmatmul.mubr.f32.gmra.mrb[2].mxu1 %v213_v35  ;;  %382 = vmatprep.mubr.f32.mxu0 %v800_v7 }
  0x30   : > { %495 = vmatprep.mubr.f32.mxu1 %v800_v7 }
  0x32   : > { %383 = vmatmul.mubr.f32.gmra.mrb[4].mxu0 %v214_v36 }
  0x33   : > { %496 = vmatmul.mubr.f32.gmra.mrb[4].mxu1 %v214_v36  ;;  %388 = vmatprep.mubr.f32.mxu0 %v800_v7 }
  0x34   : > { %501 = vmatprep.mubr.f32.mxu1 %v800_v7 }
  0x36   : > { %389 = vmatmul.mubr.f32.gmra.mrb[6].mxu0 %v215_v37 }
  0x37   : > { %502 = vmatmul.mubr.f32.gmra.mrb[6].mxu1 %v215_v37  ;;  %394 = vmatprep.mubr.f32.mxu0 %v800_v7 }
  0x38   : > { %507 = vmatprep.mubr.f32.mxu1 %v800_v7 }
  0x3a   : > { %395 = vmatmul.mubr.f32.gmra.mrb[8].mxu0 %v216_v38 }
  0x3b   : > { %508 = vmatmul.mubr.f32.gmra.mrb[8].mxu1 %v216_v38  ;;  %400 = vmatprep.mubr.f32.mxu0 %v800_v7 }
  0x3c   : > { %513 = vmatprep.mubr.f32.mxu1 %v800_v7 }
  0x3e   : > { %401 = vmatmul.mubr.f32.gmra.mrb[10].mxu0 %v217_v39 }
  0x3f   : > { %514 = vmatmul.mubr.f32.gmra.mrb[10].mxu1 %v217_v39  ;;  %406 = vmatprep.mubr.f32.mxu0 %v800_v7 }
  0x40   : > { %519 = vmatprep.mubr.f32.mxu1 %v800_v7 }
  0x42   : > { %407 = vmatmul.mubr.f32.gmra.mrb[12].mxu0 %v218_v40 }
  0x43   : > { %520 = vmatmul.mubr.f32.gmra.mrb[12].mxu1 %v218_v40  ;;  %412 = vmatprep.mubr.f32.mxu0 %v800_v7 }
  0x44   : > { %525 = vmatprep.mubr.f32.mxu1 %v800_v7  ;;  %v1079_v7 = vrot.slane %v284_v45, %v300_v48 }
  0x46   : > { %413 = vmatmul.mubr.f32.gmra.mrb[14].mxu0 %v219_v41 }
  0x47   : > { %526 = vmatmul.mubr.f32.gmra.mrb[14].mxu1 %v219_v41 }
  0xfd   : > { %v372_v52 = vpop.f32.mrb[0].mxu0 }
  0xfe   : > { %v373_v53 = vadd.f32 %v372_v52, %v1073_v49  ;;  %v485_v54 = vpop.f32.mrb[0].mxu1  ;;  %v374_v55 = vpop.f32.mrb[1].mxu0 }
  0xff   : > { %v486_v56 = vadd.f32 %v485_v54, %v1075_v50  ;;  %v375_v57 = vadd.f32 %v374_v55, %v1077_v51  ;;  %v487_v58 = vpop.f32.mrb[1].mxu1 }
 0x100   : > { %532 = vst [vmem:[%s1084_s11] sm:$0xff] %v373_v53  ;;  %v488_v59 = vadd.f32 %v487_v58, %v1079_v7 }
 0x101   : > { %667 = vst [vmem:[%s1084_s11 + $0x10] sm:$0xff] %v486_v56  ;;  %533 = vst [vmem:[%s1084_s11 + $0x8] sm:$0xff] %v375_v57  ;;  %v378_v60 = vpop.f32.mrb[2].mxu0 }
 0x102   : > { %668 = vst [vmem:[%s1084_s11 + $0x18] sm:$0xff] %v488_v59  ;;  %v379_v61 = vadd.f32 %v378_v60, %v1073_v49  ;;  %v491_v62 = vpop.f32.mrb[2].mxu1  ;;  %v380_v63 = vpop.f32.mrb[3].mxu0 }
 0x103   : > { %v492_v0 = vadd.f32 %v491_v62, %v1075_v50  ;;  %v381_v1 = vadd.f32 %v380_v63, %v1077_v51  ;;  %v493_v2 = vpop.f32.mrb[3].mxu1 }
 0x104   : > { %534 = vst [vmem:[%s1084_s11 + $0x20] sm:$0xff] %v379_v61  ;;  %v494_v3 = vadd.f32 %v493_v2, %v1079_v7 }
 0x105   : > { %669 = vst [vmem:[%s1084_s11 + $0x30] sm:$0xff] %v492_v0  ;;  %535 = vst [vmem:[%s1084_s11 + $0x28] sm:$0xff] %v381_v1  ;;  %v384_v4 = vpop.f32.mrb[4].mxu0 }
 0x106   : > { %670 = vst [vmem:[%s1084_s11 + $0x38] sm:$0xff] %v494_v3  ;;  %v385_v5 = vadd.f32 %v384_v4, %v1073_v49  ;;  %v497_v6 = vpop.f32.mrb[4].mxu1  ;;  %v386_v8 = vpop.f32.mrb[5].mxu0 }
 0x107   : > { %v498_v9 = vadd.f32 %v497_v6, %v1075_v50  ;;  %v387_v10 = vadd.f32 %v386_v8, %v1077_v51  ;;  %v499_v11 = vpop.f32.mrb[5].mxu1 }
 0x108   : > { %536 = vst [vmem:[%s1084_s11 + $0x40] sm:$0xff] %v385_v5  ;;  %v500_v12 = vadd.f32 %v499_v11, %v1079_v7 }
 0x109   : > { %671 = vst [vmem:[%s1084_s11 + $0x50] sm:$0xff] %v498_v9  ;;  %537 = vst [vmem:[%s1084_s11 + $0x48] sm:$0xff] %v387_v10  ;;  %v390_v13 = vpop.f32.mrb[6].mxu0 }
 0x10a   : > { %672 = vst [vmem:[%s1084_s11 + $0x58] sm:$0xff] %v500_v12  ;;  %v391_v14 = vadd.f32 %v390_v13, %v1073_v49  ;;  %v503_v15 = vpop.f32.mrb[6].mxu1  ;;  %v392_v16 = vpop.f32.mrb[7].mxu0 }
 0x10b   : > { %v504_v17 = vadd.f32 %v503_v15, %v1075_v50  ;;  %v393_v18 = vadd.f32 %v392_v16, %v1077_v51  ;;  %v505_v19 = vpop.f32.mrb[7].mxu1 }
 0x10c   : > { %538 = vst [vmem:[%s1084_s11 + $0x60] sm:$0xff] %v391_v14  ;;  %v506_v20 = vadd.f32 %v505_v19, %v1079_v7 }
 0x10d   : > { %673 = vst [vmem:[%s1084_s11 + $0x70] sm:$0xff] %v504_v17  ;;  %539 = vst [vmem:[%s1084_s11 + $0x68] sm:$0xff] %v393_v18  ;;  %v396_v21 = vpop.f32.mrb[8].mxu0 }
 0x10e   : > { %674 = vst [vmem:[%s1084_s11 + $0x78] sm:$0xff] %v506_v20  ;;  %v397_v22 = vadd.f32 %v396_v21, %v1073_v49  ;;  %v509_v23 = vpop.f32.mrb[8].mxu1  ;;  %v398_v24 = vpop.f32.mrb[9].mxu0 }
 0x10f   : > { %v510_v25 = vadd.f32 %v509_v23, %v1075_v50  ;;  %v399_v26 = vadd.f32 %v398_v24, %v1077_v51  ;;  %v511_v27 = vpop.f32.mrb[9].mxu1 }
 0x110   : > { %540 = vst [vmem:[%s1084_s11 + $0x80] sm:$0xff] %v397_v22  ;;  %v512_v28 = vadd.f32 %v511_v27, %v1079_v7 }
 0x111   : > { %675 = vst [vmem:[%s1084_s11 + $0x90] sm:$0xff] %v510_v25  ;;  %541 = vst [vmem:[%s1084_s11 + $0x88] sm:$0xff] %v399_v26  ;;  %v402_v29 = vpop.f32.mrb[10].mxu0 }
 0x112   : > { %676 = vst [vmem:[%s1084_s11 + $0x98] sm:$0xff] %v512_v28  ;;  %v403_v30 = vadd.f32 %v402_v29, %v1073_v49  ;;  %v515_v31 = vpop.f32.mrb[10].mxu1  ;;  %v404_v32 = vpop.f32.mrb[11].mxu0 }
 0x113   : > { %v516_v33 = vadd.f32 %v515_v31, %v1075_v50  ;;  %v405_v34 = vadd.f32 %v404_v32, %v1077_v51  ;;  %v517_v35 = vpop.f32.mrb[11].mxu1 }
 0x114   : > { %542 = vst [vmem:[%s1084_s11 + $0xa0] sm:$0xff] %v403_v30  ;;  %v518_v36 = vadd.f32 %v517_v35, %v1079_v7 }
 0x115   : > { %677 = vst [vmem:[%s1084_s11 + $0xb0] sm:$0xff] %v516_v33  ;;  %543 = vst [vmem:[%s1084_s11 + $0xa8] sm:$0xff] %v405_v34  ;;  %v408_v37 = vpop.f32.mrb[12].mxu0 }
 0x116   : > { %678 = vst [vmem:[%s1084_s11 + $0xb8] sm:$0xff] %v518_v36  ;;  %v409_v38 = vadd.f32 %v408_v37, %v1073_v49  ;;  %v521_v39 = vpop.f32.mrb[12].mxu1  ;;  %v410_v40 = vpop.f32.mrb[13].mxu0 }
 0x117   : > { %v522_v41 = vadd.f32 %v521_v39, %v1075_v50  ;;  %v411_v42 = vadd.f32 %v410_v40, %v1077_v51  ;;  %v523_v43 = vpop.f32.mrb[13].mxu1 }
 0x118   : > { %544 = vst [vmem:[%s1084_s11 + $0xc0] sm:$0xff] %v409_v38  ;;  %v524_v44 = vadd.f32 %v523_v43, %v1079_v7 }
 0x119   : > { %679 = vst [vmem:[%s1084_s11 + $0xd0] sm:$0xff] %v522_v41  ;;  %545 = vst [vmem:[%s1084_s11 + $0xc8] sm:$0xff] %v411_v42  ;;  %v414_v45 = vpop.f32.mrb[14].mxu0 }
 0x11a   : > { %680 = vst [vmem:[%s1084_s11 + $0xd8] sm:$0xff] %v524_v44  ;;  %v415_v46 = vadd.f32 %v414_v45, %v1073_v49  ;;  %v527_v47 = vpop.f32.mrb[14].mxu1  ;;  %v416_v48 = vpop.f32.mrb[15].mxu0 }
 0x11b   : > { %v528_v52 = vadd.f32 %v527_v47, %v1075_v50  ;;  %v417_v53 = vadd.f32 %v416_v48, %v1077_v51  ;;  %v529_v54 = vpop.f32.mrb[15].mxu1 }
 0x11c   : > { %546 = vst [vmem:[%s1084_s11 + $0xe0] sm:$0xff] %v415_v46  ;;  %v530_v55 = vadd.f32 %v529_v54, %v1079_v7 }
 0x11d   : > { %681 = vst [vmem:[%s1084_s11 + $0xf0] sm:$0xff] %v528_v52  ;;  %547 = vst [vmem:[%s1084_s11 + $0xe8] sm:$0xff] %v417_v53 }
 0x11e   : > { %682 = vst [vmem:[%s1084_s11 + $0xf8] sm:$0xff] %v530_v55 }
 0x11f PF: > { %s13_s14 = sadd.s32 1, %s798_s14   ;;  %s1163_s12 = smov %s794_s13 }
 0x120   : > { %p10_p5 = scmp.ge.s32.totalorder %s13_s14, 4   ;;  %s1164_s13 = smov %s1166_s15 }
 0x122   :  { %12 = sbr.rel (!%p10_p5) target bundleno = 2 (0x2), region = 63 }

// kernel: decoder_block_forward.7
= control target key start
LH: loop header
LB: loop body
LE: loop exit
PB: predicated region body
PF: predicated region fallthrough
CT: control target
= control target key end

     0   :  { %s568_s12 = smov 0   ;;  %s570_s13 = smov 0   ;;  %s743_s0 = inlined_call_operand.vmem [shape: f32[2,16,16,128], index: 0, kind: input, shape index: {}]   ;;  %s744_s1 = inlined_call_operand.vmem [shape: f32[1,128], index: 1, kind: input, shape index: {}]   ;;  %s745_s2 = inlined_call_operand.vmem [shape: f32[1,128], index: 2, kind: input, shape index: {}]   ;;  %s746_s3 = inlined_call_operand.vmem [shape: f32[2,16,16,128], index: 3, kind: output, shape index: {}]  }
   0x1   :  { %s572_s14 = smov 0  }
   0x2 LB: > { %s25_s15 = sadd.s32 1, %s542_s13  ;;  %p489_p0 = scmp.ge.s32.totalorder %s546_s14, 1  ;;  %s546_s14 = sphi %s572_s14, %s13_s14   ;;  %s542_s13 = sphi %s570_s13, %s748_s13   ;;  %s538_s12 = sphi %s568_s12, %s747_s12  }
   0x3   : > { %p27_p1 = scmp.ge.s32.totalorder %s25_s15, 2  ;;  %p159_p2 = scmp.lt.s32.totalorder %s546_s14, 3 }
   0x5   : > { %s750_s15 = smov (%p27_p1, %s25_s15), 0  ;;  %p160_p3 = pnand %p489_p0, %p159_p2 }
   0x6   : > { %p194_p4 = scmp.lt.s32.totalorder (!%p160_p3), %s538_s12, 1  ;;  %v589_v0 = vld [vmem:[%s744_s1] ss:$0 sm:$0xff] (!%p160_p3) }
   0x7   : > { %163 = sbr.rel (%p160_p3) target bundleno = 47 (0x2f), region = 32  ;;  %v599_v1 = vld [vmem:[%s745_s2] ss:$0 sm:$0xff] (!%p160_p3) }
   0xe   : > { %s752_s12 = smov (!%p194_p4, %s538_s12), 1 }
   0xf   : > { %s498_s16 = sshll.u32 %s752_s12, 8 }
  0x10   : > { %s594_s21 = scalar_lea.vmem %s743_s0, %s498_s16  ;;  %s622_s26 = scalar_lea.vmem %s746_s3, %s498_s16 }
  0x11   : > { %v217_v2 = vld [vmem:[%s594_s21] sm:$0xff]  ;;  %v218_v3 = vld [vmem:[%s594_s21 + $0x8] sm:$0xff]  ;;  %v219_v4 = vld [vmem:[%s594_s21 + $0x10] sm:$0xff] }
  0x12   : > { %v255_v5 = vmul.f32 %v589_v0, %v217_v2  ;;  %v256_v6 = vmul.f32 %v589_v0, %v218_v3  ;;  %v257_v7 = vmul.f32 %v589_v0, %v219_v4  ;;  %v220_v8 = vld [vmem:[%s594_s21 + $0x18] sm:$0xff]  ;;  %v221_v9 = vld [vmem:[%s594_s21 + $0x20] sm:$0xff]  ;;  %v222_v10 = vld [vmem:[%s594_s21 + $0x28] sm:$0xff] }
  0x13   : > { %v258_v11 = vmul.f32 %v589_v0, %v220_v8  ;;  %v259_v12 = vmul.f32 %v589_v0, %v221_v9  ;;  %v260_v13 = vmul.f32 %v589_v0, %v222_v10  ;;  %v223_v14 = vld [vmem:[%s594_s21 + $0x30] sm:$0xff]  ;;  %v224_v15 = vld [vmem:[%s594_s21 + $0x38] sm:$0xff]  ;;  %v225_v24 = vld [vmem:[%s594_s21 + $0x40] sm:$0xff] }
  0x14   : > { %v293_v16 = vadd.f32 %v599_v1, %v255_v5  ;;  %v294_v17 = vadd.f32 %v599_v1, %v256_v6  ;;  %v295_v18 = vadd.f32 %v599_v1, %v257_v7  ;;  %v261_v19 = vmul.f32 %v589_v0, %v223_v14  ;;  %v226_v25 = vld [vmem:[%s594_s21 + $0x48] sm:$0xff]  ;;  %v227_v26 = vld [vmem:[%s594_s21 + $0x50] sm:$0xff]  ;;  %v228_v31 = vld [vmem:[%s594_s21 + $0x58] sm:$0xff] }
  0x15   : > { %v296_v20 = vadd.f32 %v599_v1, %v258_v11  ;;  %v297_v21 = vadd.f32 %v599_v1, %v259_v12  ;;  %v298_v22 = vadd.f32 %v599_v1, %v260_v13  ;;  %v262_v23 = vmul.f32 %v589_v0, %v224_v15  ;;  %v229_v32 = vld [vmem:[%s594_s21 + $0x60] sm:$0xff]  ;;  %v230_v33 = vld [vmem:[%s594_s21 + $0x68] sm:$0xff]  ;;  %v231_v38 = vld [vmem:[%s594_s21 + $0x70] sm:$0xff] }
  0x16   : > { %v325_v27 = vmax.f32 %v293_v16, 0.0  ;;  %v326_v28 = vmax.f32 %v294_v17, 0.0  ;;  %v327_v29 = vmax.f32 %v295_v18, 0.0  ;;  %v299_v30 = vadd.f32 %v599_v1, %v261_v19  ;;  %v232_v43 = vld [vmem:[%s594_s21 + $0x78] sm:$0xff]  ;;  %v233_v56 = vld [vmem:[%s594_s21 + $0x80] sm:$0xff]  ;;  %v234_v57 = vld [vmem:[%s594_s21 + $0x88] sm:$0xff] }
  0x17   : > { %v328_v34 = vmax.f32 %v296_v20, 0.0  ;;  %v329_v35 = vmax.f32 %v297_v21, 0.0  ;;  %v330_v36 = vmax.f32 %v298_v22, 0.0  ;;  %v300_v37 = vadd.f32 %v599_v1, %v262_v23  ;;  %v235_v58 = vld [vmem:[%s594_s21 + $0x90] sm:$0xff]  ;;  %v236_v63 = vld [vmem:[%s594_s21 + $0x98] sm:$0xff]  ;;  %v237_v2 = vld [vmem:[%s594_s21 + $0xa0] sm:$0xff] }
  0x18   : > { %357 = vst [vmem:[%s622_s26] sm:$0xff] %v325_v27  ;;  %358 = vst [vmem:[%s622_s26 + $0x8] sm:$0xff] %v326_v28  ;;  %v331_v39 = vmax.f32 %v299_v30, 0.0  ;;  %v263_v40 = vmul.f32 %v589_v0, %v225_v24  ;;  %v264_v41 = vmul.f32 %v589_v0, %v226_v25  ;;  %v265_v42 = vmul.f32 %v589_v0, %v227_v26  ;;  %v238_v3 = vld [vmem:[%s594_s21 + $0xa8] sm:$0xff]  ;;  %v239_v8 = vld [vmem:[%s594_s21 + $0xb0] sm:$0xff] }
  0x19   : > { %359 = vst [vmem:[%s622_s26 + $0x10] sm:$0xff] %v327_v29  ;;  %360 = vst [vmem:[%s622_s26 + $0x18] sm:$0xff] %v328_v34  ;;  %v332_v44 = vmax.f32 %v300_v37, 0.0  ;;  %v266_v45 = vmul.f32 %v589_v0, %v228_v31  ;;  %v267_v46 = vmul.f32 %v589_v0, %v229_v32  ;;  %v268_v47 = vmul.f32 %v589_v0, %v230_v33  ;;  %v240_v13 = vld [vmem:[%s594_s21 + $0xb8] sm:$0xff]  ;;  %v241_v26 = vld [vmem:[%s594_s21 + $0xc0] sm:$0xff] }
  0x1a   : > { %361 = vst [vmem:[%s622_s26 + $0x20] sm:$0xff] %v329_v35  ;;  %362 = vst [vmem:[%s622_s26 + $0x28] sm:$0xff] %v330_v36  ;;  %v301_v48 = vadd.f32 %v599_v1, %v263_v40  ;;  %v302_v49 = vadd.f32 %v599_v1, %v264_v41  ;;  %v303_v50 = vadd.f32 %v599_v1, %v265_v42  ;;  %v242_v27 = vld [vmem:[%s594_s21 + $0xc8] sm:$0xff]  ;;  %v243_v28 = vld [vmem:[%s594_s21 + $0xd0] sm:$0xff] }
  0x1b   : > { %363 = vst [vmem:[%s622_s26 + $0x30] sm:$0xff] %v331_v39  ;;  %v269_v51 = vmul.f32 %v589_v0, %v231_v38  ;;  %364 = vst [vmem:[%s622_s26 + $0x38] sm:$0xff] %v332_v44  ;;  %v304_v52 = vadd.f32 %v599_v1, %v266_v45  ;;  %v305_v53 = vadd.f32 %v599_v1, %v267_v46  ;;  %v244_v33 = vld [vmem:[%s594_s21 + $0xd8] sm:$0xff]  ;;  %v245_v34 = vld [vmem:[%s594_s21 + $0xe0] sm:$0xff] }
  0x1c   : > { %v306_v54 = vadd.f32 %v599_v1, %v268_v47  ;;  %v270_v55 = vmul.f32 %v589_v0, %v232_v43  ;;  %v333_v59 = vmax.f32 %v301_v48, 0.0  ;;  %v334_v60 = vmax.f32 %v302_v49, 0.0  ;;  %v246_v35 = vld [vmem:[%s594_s21 + $0xe8] sm:$0xff]  ;;  %v247_v40 = vld [vmem:[%s594_s21 + $0xf0] sm:$0xff]  ;;  %v248_v45 = vld [vmem:[%s594_s21 + $0xf8] sm:$0xff] }
  0x1d   : > { %v335_v61 = vmax.f32 %v303_v50, 0.0  ;;  %v307_v62 = vadd.f32 %v599_v1, %v269_v51  ;;  %v336_v4 = vmax.f32 %v304_v52, 0.0  ;;  %v337_v5 = vmax.f32 %v305_v53, 0.0 }
  0x1e   : > { %v338_v6 = vmax.f32 %v306_v54, 0.0  ;;  %v308_v7 = vadd.f32 %v599_v1, %v270_v55  ;;  %365 = vst [vmem:[%s622_s26 + $0x40] sm:$0xff] %v333_v59  ;;  %366 = vst [vmem:[%s622_s26 + $0x48] sm:$0xff] %v334_v60  ;;  %v271_v10 = vmul.f32 %v589_v0, %v233_v56  ;;  %v272_v11 = vmul.f32 %v589_v0, %v234_v57 }
  0x1f   : > { %367 = vst [vmem:[%s622_s26 + $0x50] sm:$0xff] %v335_v61  ;;  %v339_v9 = vmax.f32 %v307_v62, 0.0  ;;  %v273_v12 = vmul.f32 %v589_v0, %v235_v58  ;;  %368 = vst [vmem:[%s622_s26 + $0x58] sm:$0xff] %v336_v4  ;;  %v274_v15 = vmul.f32 %v589_v0, %v236_v63  ;;  %v275_v16 = vmul.f32 %v589_v0, %v237_v2 }
  0x20   : > { %369 = vst [vmem:[%s622_s26 + $0x60] sm:$0xff] %v337_v5  ;;  %370 = vst [vmem:[%s622_s26 + $0x68] sm:$0xff] %v338_v6  ;;  %v340_v14 = vmax.f32 %v308_v7, 0.0  ;;  %v276_v17 = vmul.f32 %v589_v0, %v238_v3  ;;  %v309_v18 = vadd.f32 %v599_v1, %v271_v10  ;;  %v310_v19 = vadd.f32 %v599_v1, %v272_v11 }
  0x21   : > { %371 = vst [vmem:[%s622_s26 + $0x70] sm:$0xff] %v339_v9  ;;  %v311_v20 = vadd.f32 %v599_v1, %v273_v12  ;;  %v277_v21 = vmul.f32 %v589_v0, %v239_v8  ;;  %v312_v22 = vadd.f32 %v599_v1, %v274_v15  ;;  %v313_v23 = vadd.f32 %v599_v1, %v275_v16 }
  0x22   : > { %372 = vst [vmem:[%s622_s26 + $0x78] sm:$0xff] %v340_v14  ;;  %v314_v24 = vadd.f32 %v599_v1, %v276_v17  ;;  %v278_v25 = vmul.f32 %v589_v0, %v240_v13  ;;  %v341_v29 = vmax.f32 %v309_v18, 0.0  ;;  %v342_v30 = vmax.f32 %v310_v19, 0.0 }
  0x23   : > { %v343_v31 = vmax.f32 %v311_v20, 0.0  ;;  %v315_v32 = vadd.f32 %v599_v1, %v277_v21  ;;  %v344_v36 = vmax.f32 %v312_v22, 0.0  ;;  %v345_v37 = vmax.f32 %v313_v23, 0.0 }
  0x24   : > { %v346_v38 = vmax.f32 %v314_v24, 0.0  ;;  %v316_v39 = vadd.f32 %v599_v1, %v278_v25  ;;  %373 = vst [vmem:[%s622_s26 + $0x80] sm:$0xff] %v341_v29  ;;  %374 = vst [vmem:[%s622_s26 + $0x88] sm:$0xff] %v342_v30  ;;  %v279_v42 = vmul.f32 %v589_v0, %v241_v26  ;;  %v280_v43 = vmul.f32 %v589_v0, %v242_v27 }
  0x25   : > { %375 = vst [vmem:[%s622_s26 + $0x90] sm:$0xff] %v343_v31  ;;  %v347_v41 = vmax.f32 %v315_v32, 0.0  ;;  %v281_v44 = vmul.f32 %v589_v0, %v243_v28  ;;  %376 = vst [vmem:[%s622_s26 + $0x98] sm:$0xff] %v344_v36  ;;  %v282_v47 = vmul.f32 %v589_v0, %v244_v33  ;;  %v283_v48 = vmul.f32 %v589_v0, %v245_v34 }
  0x26   : > { %377 = vst [vmem:[%s622_s26 + $0xa0] sm:$0xff] %v345_v37  ;;  %378 = vst [vmem:[%s622_s26 + $0xa8] sm:$0xff] %v346_v38  ;;  %v348_v46 = vmax.f32 %v316_v39, 0.0  ;;  %v284_v49 = vmul.f32 %v589_v0, %v246_v35  ;;  %v317_v50 = vadd.f32 %v599_v1, %v279_v42  ;;  %v318_v51 = vadd.f32 %v599_v1, %v280_v43 }
  0x27   : > { %379 = vst [vmem:[%s622_s26 + $0xb0] sm:$0xff] %v347_v41  ;;  %v319_v52 = vadd.f32 %v599_v1, %v281_v44  ;;  %v285_v53 = vmul.f32 %v589_v0, %v247_v40  ;;  %v320_v54 = vadd.f32 %v599_v1, %v282_v47  ;;  %v321_v55 = vadd.f32 %v599_v1, %v283_v48 }
  0x28   : > { %380 = vst [vmem:[%s622_s26 + $0xb8] sm:$0xff] %v348_v46  ;;  %v322_v56 = vadd.f32 %v599_v1, %v284_v49  ;;  %v286_v57 = vmul.f32 %v589_v0, %v248_v45  ;;  %v349_v58 = vmax.f32 %v317_v50, 0.0  ;;  %v350_v59 = vmax.f32 %v318_v51, 0.0 }
  0x29   : > { %v351_v60 = vmax.f32 %v319_v52, 0.0  ;;  %v323_v61 = vadd.f32 %v599_v1, %v285_v53  ;;  %v352_v62 = vmax.f32 %v320_v54, 0.0  ;;  %v353_v63 = vmax.f32 %v321_v55, 0.0 }
  0x2a   : > { %v354_v2 = vmax.f32 %v322_v56, 0.0  ;;  %v324_v3 = vadd.f32 %v599_v1, %v286_v57  ;;  %381 = vst [vmem:[%s622_s26 + $0xc0] sm:$0xff] %v349_v58  ;;  %382 = vst [vmem:[%s622_s26 + $0xc8] sm:$0xff] %v350_v59 }
  0x2b   : > { %383 = vst [vmem:[%s622_s26 + $0xd0] sm:$0xff] %v351_v60  ;;  %v355_v4 = vmax.f32 %v323_v61, 0.0  ;;  %384 = vst [vmem:[%s622_s26 + $0xd8] sm:$0xff] %v352_v62 }
  0x2c   : > { %385 = vst [vmem:[%s622_s26 + $0xe0] sm:$0xff] %v353_v63  ;;  %386 = vst [vmem:[%s622_s26 + $0xe8] sm:$0xff] %v354_v2  ;;  %v356_v0 = vmax.f32 %v324_v3, 0.0 }
  0x2d   : > { %387 = vst [vmem:[%s622_s26 + $0xf0] sm:$0xff] %v355_v4 }
  0x2e   : > { %388 = vst [vmem:[%s622_s26 + $0xf8] sm:$0xff] %v356_v0 }
  0x2f PF: > { %s13_s14 = sadd.s32 1, %s546_s14   ;;  %s747_s12 = smov %s542_s13 }
  0x30   : > { %p10_p5 = scmp.ge.s32.totalorder %s13_s14, 4   ;;  %s748_s13 = smov %s750_s15 }
  0x32   :  { %12 = sbr.rel (!%p10_p5) target bundleno = 2 (0x2), region = 62 }

// kernel: decoder_block_forward.6
= control target key start
LH: loop header
LB: loop body
LE: loop exit
PB: predicated region body
PF: predicated region fallthrough
CT: control target
= control target key end

     0   :  { %s6450_s27 = smov 0   ;;  %s6452_s28 = smov 0   ;;  %s7709_s0 = inlined_call_operand.vmem [shape: f32[2,16,16,128], index: 0, kind: input, shape index: {}, may-alias: {0,1,2}]   ;;  %s7710_s1 = inlined_call_operand.vmem [shape: f32[2,16,16,128], index: 1, kind: input, shape index: {}, may-alias: {0,1,2}]   ;;  %s7711_s2 = inlined_call_operand.vmem [shape: f32[2,16,16,128], index: 2, kind: input, shape index: {}, may-alias: {0,1,2}]   ;;  %s7712_s3 = inlined_call_operand.vmem [shape: f32[9,128,128], index: 3, kind: input, shape index: {}]   ;;  %s7713_s4 = inlined_call_operand.vmem [shape: f32[1,128], index: 4, kind: input, shape index: {}]   ;;  %s7714_s5 = inlined_call_operand.vmem [shape: f32[1,128], index: 5, kind: input, shape index: {}]   ;;  %s7715_s6 = inlined_call_operand.vmem [shape: f32[1,128], index: 6, kind: input, shape index: {}]   ;;  %s7716_s7 = inlined_call_operand.vmem [shape: f32[2,16,16,128], index: 7, kind: output, shape index: {0}]   ;;  %s7717_s8 = inlined_call_operand.vmem [shape: f32[2,1,2,128], index: 8, kind: output, shape index: {1}]  }
   0x1   :  { %s6454_s29 = smov 0  }
   0x2 LB: > { %s31_s30 = sadd.s32 1, %s6398_s28  ;;  %p4461_p0 = scmp.ge.s32.totalorder %s6402_s29, 1  ;;  %s6402_s29 = sphi %s6454_s29, %s19_s29   ;;  %s6398_s28 = sphi %s6452_s28, %s7864_s28   ;;  %s6394_s27 = sphi %s6450_s27, %s7863_s27  }
   0x3   : > { %p33_p1 = scmp.ge.s32.totalorder %s31_s30, 2  ;;  %p353_p2 = scmp.lt.s32.totalorder %s6402_s29, 3 }
   0x5   : > { %s7866_s30 = smov (%p33_p1, %s31_s30), 0  ;;  %p354_p3 = pnand %p4461_p0, %p353_p2 }
   0x7   : > { %357 = sbr.rel (%p354_p3) target bundleno = 570 (0x23a), region = 48 }
   0xe   : > { %v840_v0 = vld [vmem:[%s7712_s3] sm:$0xff]  ;;  %v841_v1 = vld [vmem:[%s7712_s3 + $0x8] sm:$0xff]  ;;  %p431_p4 = scmp.lt.s32.totalorder %s6394_s27, 1  ;;  %v842_v5 = vld [vmem:[%s7712_s3 + $0x10] sm:$0xff]  ;;  %v6404_v7 = vmov 0.0  }
   0xf   : > { %v4522_v2 = vld [vmem:[%s7712_s3 + $0x200] sm:$0xff]  ;;  %v5762_v3 = vpack.c.bf16 %v841_v1, %v840_v0  ;;  %v4523_v4 = vld [vmem:[%s7712_s3 + $0x208] sm:$0xff]  ;;  %v843_v6 = vld [vmem:[%s7712_s3 + $0x18] sm:$0xff]  ;;  %497 = vst [vmem:[#allocation2] sm:$0x1] %v6404_v7 }
  0x10   : > { %498 = vst [vmem:[#allocation2 + $0x18] sm:$0x1] %v6404_v7  ;;  %499 = vst [vmem:[#allocation2 + $0x30] sm:$0x1] %v6404_v7  ;;  %v6489_v8 = vpack.c.bf16 %v4523_v4, %v4522_v2  ;;  %v5766_v9 = vpack.c.bf16 %v843_v6, %v842_v5  ;;  %v4524_v10 = vld [vmem:[%s7712_s3 + $0x210] sm:$0xff]  ;;  %v4525_v11 = vld [vmem:[%s7712_s3 + $0x218] sm:$0xff] }
  0x11   : > { %500 = vst [vmem:[#allocation2 + $0x48] sm:$0x1] %v6404_v7  ;;  %501 = vst [vmem:[#allocation2 + $0x60] sm:$0x1] %v6404_v7  ;;  %v844_v12 = vld [vmem:[%s7712_s3 + $0x20] sm:$0xff]  ;;  %s7868_s27 = smov (!%p431_p4, %s6394_s27), 1  ;;  %5763 = vmatprep.subr.bf16.mxu1 %v5762_v3  ;;  %v6505_v13 = vpack.c.bf16 %v4525_v11, %v4524_v10 }
  0x12   : > { %502 = vst [vmem:[#allocation2 + $0x78] sm:$0x1] %v6404_v7  ;;  %503 = vst [vmem:[#allocation2 + $0x90] sm:$0x1] %v6404_v7  ;;  %v845_v14 = vld [vmem:[%s7712_s3 + $0x28] sm:$0xff]  ;;  %v4526_v15 = vld [vmem:[%s7712_s3 + $0x220] sm:$0xff]  ;;  %5891 = vmatprep.subr.bf16.mxu0 %v6489_v8  ;;  %5765 = vmatpush3.bf16.msra.mxu1 %v5762_v3 }
  0x13   : > { %504 = vst [vmem:[#allocation2 + $0xa8] sm:$0x1] %v6404_v7  ;;  %505 = vst [vmem:[#allocation2 + $0xc0] sm:$0x1] %v6404_v7  ;;  %v4527_v16 = vld [vmem:[%s7712_s3 + $0x228] sm:$0xff]  ;;  %5893 = vmatpush3.bf16.msra.mxu0 %v6489_v8  ;;  %5767 = vmatprep.subr.bf16.mxu1 %v5766_v9  ;;  %v5770_v17 = vpack.c.bf16 %v845_v14, %v844_v12  ;;  %s6519_s15 = sshll.u32 %s7868_s27, 8 }
  0x14   : > { %506 = vst [vmem:[#allocation2 + $0xd8] sm:$0x1] %v6404_v7  ;;  %507 = vst [vmem:[#allocation2 + $0xf0] sm:$0x1] %v6404_v7  ;;  %5895 = vmatprep.subr.bf16.mxu0 %v6505_v13  ;;  %v6522_v18 = vpack.c.bf16 %v4527_v16, %v4526_v15  ;;  %v846_v19 = vld [vmem:[%s7712_s3 + $0x30] sm:$0xff]  ;;  %v847_v20 = vld [vmem:[%s7712_s3 + $0x38] sm:$0xff]  ;;  %s6540_s26 = scalar_lea.vmem %s7709_s0, %s6519_s15  ;;  %s453_s11 = scalar_lea.vmem %s7710_s1, %s6519_s15 }
  0x15   : > { %508 = vst [vmem:[#allocation2 + $0x108] sm:$0x1] %v6404_v7  ;;  %509 = vst [vmem:[#allocation2 + $0x120] sm:$0x1] %v6404_v7  ;;  %v4528_v21 = vld [vmem:[%s7712_s3 + $0x230] sm:$0xff]  ;;  %v4529_v22 = vld [vmem:[%s7712_s3 + $0x238] sm:$0xff]  ;;  %v5774_v23 = vpack.c.bf16 %v847_v20, %v846_v19  ;;  %s7625_s14 = scalar_lea.vmem %s7716_s7, %s6519_s15 }
  0x16   : > { %510 = vst [vmem:[#allocation2 + $0x138] sm:$0x1] %v6404_v7  ;;  %511 = vst [vmem:[#allocation2 + $0x150] sm:$0x1] %v6404_v7  ;;  %5769 = vmatpush3.bf16.msra.mxu1 %v5766_v9  ;;  %v848_v24 = vld [vmem:[%s7712_s3 + $0x40] sm:$0xff]  ;;  %v849_v25 = vld [vmem:[%s7712_s3 + $0x48] sm:$0xff]  ;;  %v6554_v26 = vpack.c.bf16 %v4529_v22, %v4528_v21 }
  0x17   : > { %512 = vst [vmem:[#allocation2 + $0x168] sm:$0x1] %v6404_v7  ;;  %513 = vst [vmem:[#allocation2 + $0x180] sm:$0x1] %v6404_v7  ;;  %5897 = vmatpush3.bf16.msra.mxu0 %v6505_v13  ;;  %5771 = vmatprep.subr.bf16.mxu1 %v5770_v17  ;;  %v4530_v27 = vld [vmem:[%s7712_s3 + $0x240] sm:$0xff]  ;;  %v4531_v28 = vld [vmem:[%s7712_s3 + $0x248] sm:$0xff]  ;;  %v5778_v36 = vpack.c.bf16 %v849_v25, %v848_v24 }
  0x18   : > { %514 = vst [vmem:[#allocation2 + $0x198] sm:$0x1] %v6404_v7  ;;  %515 = vst [vmem:[#allocation2 + $0x11] sm:$0x1] %v6404_v7  ;;  %5899 = vmatprep.subr.bf16.mxu0 %v6522_v18  ;;  %v6565_v29 = vld [vmem:[%s7714_s5] ss:$0 sm:$0xff]  ;;  %v6585_v41 = vpack.c.bf16 %v4531_v28, %v4530_v27 }
  0x19   : > { %516 = vst [vmem:[#allocation2 + $0x29] sm:$0x1] %v6404_v7  ;;  %517 = vst [vmem:[#allocation2 + $0x41] sm:$0x1] %v6404_v7  ;;  %v6570_v30 = vld [vmem:[%s7715_s6] ss:$0 sm:$0xff] }
  0x1a   : > { %518 = vst [vmem:[#allocation2 + $0x59] sm:$0x1] %v6404_v7  ;;  %519 = vst [vmem:[#allocation2 + $0x71] sm:$0x1] %v6404_v7  ;;  %v706_v31 = vld [vmem:[%s453_s11] sm:$0xff]  ;;  %5773 = vmatpush3.bf16.msra.mxu1 %v5770_v17  ;;  %v707_v35 = vld [vmem:[%s453_s11 + $0x8] sm:$0xff] }
  0x1b   : > { %520 = vst [vmem:[#allocation2 + $0x89] sm:$0x1] %v6404_v7  ;;  %521 = vst [vmem:[#allocation2 + $0xa1] sm:$0x1] %v6404_v7  ;;  %v533_v32 = vld [vmem:[%s6540_s26] sm:$0xff]  ;;  %v708_v33 = vmul.f32 %v6565_v29, %v706_v31  ;;  %5901 = vmatpush3.bf16.msra.mxu0 %v6522_v18  ;;  %5775 = vmatprep.subr.bf16.mxu1 %v5774_v23  ;;  %v850_v37 = vld [vmem:[%s7712_s3 + $0x50] sm:$0xff]  ;;  %v709_v39 = vmul.f32 %v6565_v29, %v707_v35 }
  0x1c   : > { %522 = vst [vmem:[#allocation2 + $0xb9] sm:$0x1] %v6404_v7  ;;  %523 = vst [vmem:[#allocation2 + $0xd1] sm:$0x1] %v6404_v7  ;;  %v571_v34 = vmul.f32 %v6565_v29, %v533_v32  ;;  %v851_v38 = vld [vmem:[%s7712_s3 + $0x58] sm:$0xff]  ;;  %v534_v40 = vld [vmem:[%s6540_s26 + $0x8] sm:$0xff]  ;;  %5903 = vmatprep.subr.bf16.mxu0 %v6554_v26 }
  0x1d   : > { %524 = vst [vmem:[#allocation2 + $0xe9] sm:$0x1] %v6404_v7  ;;  %525 = vst [vmem:[#allocation2 + $0x101] sm:$0x1] %v6404_v7  ;;  %v710_v42 = vadd.f32 %v6570_v30, %v708_v33  ;;  %v572_v44 = vmul.f32 %v6565_v29, %v534_v40  ;;  %v535_v45 = vld [vmem:[%s6540_s26 + $0x10] sm:$0xff]  ;;  %v536_v46 = vld [vmem:[%s6540_s26 + $0x18] sm:$0xff]  ;;  %v711_v49 = vadd.f32 %v6570_v30, %v709_v39 }
  0x1e   : > { %526 = vst [vmem:[#allocation2 + $0x119] sm:$0x1] %v6404_v7  ;;  %527 = vst [vmem:[#allocation2 + $0x131] sm:$0x1] %v6404_v7  ;;  %v609_v43 = vadd.f32 %v6570_v30, %v571_v34  ;;  %v4532_v47 = vld [vmem:[%s7712_s3 + $0x250] sm:$0xff]  ;;  %v4533_v48 = vld [vmem:[%s7712_s3 + $0x258] sm:$0xff]  ;;  %v573_v50 = vmul.f32 %v6565_v29, %v535_v45  ;;  %v574_v51 = vmul.f32 %v6565_v29, %v536_v46  ;;  %5777 = vmatpush3.bf16.msra.mxu1 %v5774_v23 }
  0x1f   : > { %528 = vst [vmem:[#allocation2 + $0x149] sm:$0x1] %v6404_v7  ;;  %529 = vst [vmem:[#allocation2 + $0x161] sm:$0x1] %v6404_v7  ;;  %v537_v52 = vld [vmem:[%s6540_s26 + $0x20] sm:$0xff]  ;;  %v5782_v53 = vpack.c.bf16 %v851_v38, %v850_v37  ;;  %v712_v55 = vmax.f32 %v710_v42, 0.0  ;;  %v610_v57 = vadd.f32 %v6570_v30, %v572_v44  ;;  %5905 = vmatpush3.bf16.msra.mxu0 %v6554_v26  ;;  %5779 = vmatprep.subr.bf16.mxu1 %v5778_v36 }
  0x20   : > { %530 = vst [vmem:[#allocation2 + $0x179] sm:$0x1] %v6404_v7  ;;  %531 = vst [vmem:[#allocation2 + $0x191] sm:$0x1] %v6404_v7  ;;  %v852_v54 = vld [vmem:[%s7712_s3 + $0x60] sm:$0xff]  ;;  %v6605_v56 = vmax.f32 %v609_v43, 0.0  ;;  %v611_v61 = vadd.f32 %v6570_v30, %v573_v50  ;;  %v612_v62 = vadd.f32 %v6570_v30, %v574_v51  ;;  %v575_v63 = vmul.f32 %v6565_v29, %v537_v52 }
  0x21   : > { %532 = vst [vmem:[#allocation2 + $0x1a9] sm:$0x1] %v6404_v7  ;;  %7777 = vst [vmem:[#allocation4_spill] sm:$0xff] %v6489_v8  ;;  %v538_v58 = vld [vmem:[%s6540_s26 + $0x28] sm:$0xff]  ;;  %v713_v60 = vmax.f32 %v711_v49, 0.0  ;;  %v539_v0 = vld [vmem:[%s6540_s26 + $0x30] sm:$0xff]  ;;  %5907 = vmatprep.subr.bf16.mxu0 %v6585_v41  ;;  %v6619_v2 = vpack.c.bf16 %v4533_v48, %v4532_v47 }
  0x22   : > { %7778 = vst [vmem:[#allocation5_spill] sm:$0xff] %v6505_v13  ;;  %7779 = vst [vmem:[#allocation6_spill] sm:$0xff] %v6522_v18  ;;  %v853_v59 = vld [vmem:[%s7712_s3 + $0x68] sm:$0xff]  ;;  %v540_v1 = vld [vmem:[%s6540_s26 + $0x38] sm:$0xff]  ;;  %v6627_v5 = vmul.f32 0.0, %v712_v55  ;;  %5394 = vmatprep.mubr.f32.mxu0 %v6605_v56  ;;  %v6631_v6 = vmax.f32 %v610_v57, 0.0  ;;  %v576_v7 = vmul.f32 %v6565_v29, %v538_v58  ;;  %v613_v14 = vadd.f32 %v6570_v30, %v575_v63 }
  0x23   : > { %7780 = vst [vmem:[#allocation7_spill] sm:$0xff] %v6554_v26  ;;  %7781 = vst [vmem:[#allocation8_spill] sm:$0xff] %v6585_v41  ;;  %v4534_v3 = vld [vmem:[%s7712_s3 + $0x260] sm:$0xff]  ;;  %v4535_v4 = vld [vmem:[%s7712_s3 + $0x268] sm:$0xff]  ;;  %v6635_v10 = vmul.f32 0.0, %v713_v60  ;;  %v6637_v11 = vmax.f32 %v611_v61, 0.0  ;;  %5781 = vmatpush3.bf16.msra.mxu1 %v5778_v36  ;;  %v577_v17 = vmul.f32 %v6565_v29, %v539_v0  ;;  %v578_v19 = vmul.f32 %v6565_v29, %v540_v1 }
  0x24   : > { %7782 = vst [vmem:[#allocation9_spill] sm:$0xff] %v6619_v2  ;;  %674 = vst [vmem:[#allocation2 + $0x19] sm:$0xff] %v6605_v56  ;;  %v541_v9 = vld [vmem:[%s6540_s26 + $0x40] sm:$0xff]  ;;  %v6639_v12 = vmax.f32 %v612_v62, 0.0  ;;  %v542_v15 = vld [vmem:[%s6540_s26 + $0x48] sm:$0xff]  ;;  %v614_v16 = vadd.f32 %v6570_v30, %v576_v7  ;;  %5909 = vmatpush3.bf16.msra.mxu0 %v6585_v41  ;;  %5783 = vmatprep.subr.bf16.mxu1 %v5782_v53  ;;  %v5786_v21 = vpack.c.bf16 %v853_v59, %v852_v54  ;;  %s4607_s16 = sadd.s32 240, %s6519_s15 }
  0x25   : > { %719 = vst [vmem:[#allocation2 + $0x1] sm:$0xff] %v6627_v5  ;;  %675 = vst [vmem:[#allocation2 + $0x21] sm:$0xff] %v6631_v6  ;;  %v543_v20 = vld [vmem:[%s6540_s26 + $0x50] sm:$0xff]  ;;  %v6650_v22 = vpack.c.bf16 %v4535_v4, %v4534_v3  ;;  %v855_v24 = vld [vmem:[%s7712_s3 + $0x78] sm:$0xff]  ;;  %v6661_v25 = vmax.f32 %v613_v14, 0.0  ;;  %v579_v27 = vmul.f32 %v6565_v29, %v541_v9  ;;  %5911 = vmatprep.subr.bf16.mxu0 %v6619_v2  ;;  %s470_s19 = scalar_lea.vmem %s7711_s2, %s4607_s16  ;;  %s4470_s15 = sshll.u32 %s7868_s27, 1 }
  0x26   : > { %v854_v23 = vld [vmem:[%s7712_s3 + $0x70] sm:$0xff]  ;;  %720 = vst [vmem:[#allocation2 + $0x9] sm:$0xff] %v6635_v10  ;;  %676 = vst [vmem:[#allocation2 + $0x31] sm:$0xff] %v6637_v11  ;;  %v544_v28 = vld [vmem:[%s6540_s26 + $0x58] sm:$0xff]  ;;  %v6666_v31 = vmax.f32 %v614_v16, 0.0  ;;  %v615_v32 = vadd.f32 %v6570_v30, %v577_v17  ;;  %v616_v33 = vadd.f32 %v6570_v30, %v578_v19  ;;  %v580_v34 = vmul.f32 %v6565_v29, %v542_v15  ;;  %s492_s18 = scalar_lea.vmem %s7717_s8, %s4470_s15 }
  0x27   : > { %7783 = vst [vmem:[#allocation10_spill] sm:$0xff] %v6650_v22  ;;  %677 = vst [vmem:[#allocation2 + $0x39] sm:$0xff] %v6639_v12  ;;  %v545_v35 = vld [vmem:[%s6540_s26 + $0x60] sm:$0xff]  ;;  %v4536_v36 = vld [vmem:[%s7712_s3 + $0x270] sm:$0xff]  ;;  %v617_v38 = vadd.f32 %v6570_v30, %v579_v27  ;;  %v581_v39 = vmul.f32 %v6565_v29, %v543_v20  ;;  %v582_v40 = vmul.f32 %v6565_v29, %v544_v28  ;;  %5785 = vmatpush3.bf16.msra.mxu1 %v5782_v53 }
  0x28   : > { %v4537_v37 = vld [vmem:[%s7712_s3 + $0x278] sm:$0xff]  ;;  %678 = vst [vmem:[#allocation2 + $0x49] sm:$0xff] %v6661_v25  ;;  %v546_v42 = vld [vmem:[%s6540_s26 + $0x68] sm:$0xff]  ;;  %v5790_v43 = vpack.c.bf16 %v855_v24, %v854_v23  ;;  %679 = vst [vmem:[#allocation2 + $0x51] sm:$0xff] %v6666_v31  ;;  %v6684_v44 = vmax.f32 %v615_v32, 0.0  ;;  %v6686_v45 = vmax.f32 %v616_v33, 0.0  ;;  %v618_v46 = vadd.f32 %v6570_v30, %v580_v34  ;;  %5913 = vmatpush3.bf16.msra.mxu0 %v6619_v2 }
  0x29   : > { %v547_v47 = vld [vmem:[%s6540_s26 + $0x70] sm:$0xff]  ;;  %5787 = vmatprep.subr.bf16.mxu1 %v5786_v21  ;;  %v6691_v48 = vmax.f32 %v617_v38, 0.0  ;;  %v619_v49 = vadd.f32 %v6570_v30, %v581_v39  ;;  %v620_v50 = vadd.f32 %v6570_v30, %v582_v40  ;;  %v583_v51 = vmul.f32 %v6565_v29, %v545_v35  ;;  %v548_v52 = vld [vmem:[%s6540_s26 + $0x78] sm:$0xff]  ;;  %5915 = vmatprep.subr.bf16.mxu0 %v6650_v22  ;;  %v4474_v54 = vld [vmem:[%s7712_s3 + $0x80] sm:$0xff] }
  0x2a   : > { %v6698_v53 = vpack.c.bf16 %v4537_v37, %v4536_v36  ;;  %v4475_v55 = vld [vmem:[%s7712_s3 + $0x88] sm:$0xff]  ;;  %680 = vst [vmem:[#allocation2 + $0x61] sm:$0xff] %v6684_v44  ;;  %681 = vst [vmem:[#allocation2 + $0x69] sm:$0xff] %v6686_v45  ;;  %v6708_v57 = vmax.f32 %v618_v46, 0.0  ;;  %v584_v58 = vmul.f32 %v6565_v29, %v546_v42  ;;  %v4538_v60 = vld [vmem:[%s7712_s3 + $0x280] sm:$0xff]  ;;  %v585_v1 = vmul.f32 %v6565_v29, %v547_v47 }
  0x2b   : > { %v4539_v61 = vld [vmem:[%s7712_s3 + $0x288] sm:$0xff]  ;;  %682 = vst [vmem:[#allocation2 + $0x79] sm:$0xff] %v6691_v48  ;;  %v6718_v62 = vmax.f32 %v619_v49, 0.0  ;;  %v6720_v63 = vmax.f32 %v620_v50, 0.0  ;;  %v621_v0 = vadd.f32 %v6570_v30, %v583_v51  ;;  %5789 = vmatpush3.bf16.msra.mxu1 %v5786_v21  ;;  %v586_v4 = vmul.f32 %v6565_v29, %v548_v52  ;;  %v549_v15 = vld [vmem:[%s6540_s26 + $0x80] sm:$0xff]  ;;  %v4540_v17 = vld [vmem:[%s7712_s3 + $0x290] sm:$0xff] }
  0x2c   : > { %7784 = vst [vmem:[#allocation11_spill] sm:$0xff] %v6698_v53  ;;  %v776_v59 = vld [vmem:[#allocation2] sm:$0xff]  ;;  %683 = vst [vmem:[#allocation2 + $0x81] sm:$0xff] %v6708_v57  ;;  %v622_v3 = vadd.f32 %v6570_v30, %v584_v58  ;;  %5917 = vmatpush3.bf16.msra.mxu0 %v6650_v22  ;;  %5791 = vmatprep.subr.bf16.mxu1 %v5790_v43  ;;  %v5794_v7 = vpack.c.bf16 %v4475_v55, %v4474_v54  ;;  %v550_v23 = vld [vmem:[%s6540_s26 + $0x88] sm:$0xff] }
  0x2d   : > { %5074 = vmatprep.mubr.f32.mxu1 %v776_v59  ;;  %684 = vst [vmem:[#allocation2 + $0x91] sm:$0xff] %v6718_v62  ;;  %685 = vst [vmem:[#allocation2 + $0x99] sm:$0xff] %v6720_v63  ;;  %v6730_v9 = vmax.f32 %v621_v0, 0.0  ;;  %v623_v14 = vadd.f32 %v6570_v30, %v585_v1  ;;  %5919 = vmatprep.subr.bf16.mxu0 %v6698_v53  ;;  %v5922_v16 = vpack.c.bf16 %v4539_v61, %v4538_v60  ;;  %v4541_v24 = vld [vmem:[%s7712_s3 + $0x298] sm:$0xff]  ;;  %v4476_v27 = vld [vmem:[%s7712_s3 + $0x90] sm:$0xff] }
  0x2e   : > { %v6738_v19 = vmax.f32 %v622_v3, 0.0  ;;  %v624_v20 = vadd.f32 %v6570_v30, %v586_v4  ;;  %v587_v21 = vmul.f32 %v6565_v29, %v549_v15  ;;  %v588_v32 = vmul.f32 %v6565_v29, %v550_v23  ;;  %v551_v33 = vld [vmem:[%s6540_s26 + $0x90] sm:$0xff]  ;;  %v777_v34 = vld [vmem:[#allocation2 + $0x8] sm:$0xff]  ;;  %v4477_v35 = vld [vmem:[%s7712_s3 + $0x98] sm:$0xff] }
  0x2f   : > { %686 = vst [vmem:[#allocation2 + $0xa9] sm:$0xff] %v6730_v9  ;;  %v6750_v28 = vmax.f32 %v623_v14, 0.0  ;;  %5793 = vmatpush3.bf16.msra.mxu1 %v5790_v43  ;;  %v589_v38 = vmul.f32 %v6565_v29, %v551_v33  ;;  %v552_v39 = vld [vmem:[%s6540_s26 + $0x98] sm:$0xff]  ;;  %v5926_v46 = vpack.c.bf16 %v4541_v24, %v4540_v17  ;;  %v4542_v47 = vld [vmem:[%s7712_s3 + $0x2a0] sm:$0xff]  ;;  %v5798_v51 = vpack.c.bf16 %v4477_v35, %v4476_v27  ;;  %v4543_v52 = vld [vmem:[%s7712_s3 + $0x2a8] sm:$0xff] }
  0x30   : > { %687 = vst [vmem:[#allocation2 + $0xb1] sm:$0xff] %v6738_v19  ;;  %v6758_v36 = vmax.f32 %v624_v20, 0.0  ;;  %v6761_v37 = vadd.f32 %v6570_v30, %v587_v21  ;;  %5921 = vmatpush3.bf16.msra.mxu0 %v6698_v53  ;;  %5795 = vmatprep.subr.bf16.mxu1 %v5794_v7  ;;  %v6768_v40 = vadd.f32 %v6570_v30, %v588_v32  ;;  %v778_v43 = vld [vmem:[#allocation2 + $0x18] sm:$0xff]  ;;  %v4478_v54 = vld [vmem:[%s7712_s3 + $0xa0] sm:$0xff]  ;;  %v4479_v61 = vld [vmem:[%s7712_s3 + $0xa8] sm:$0xff] }
  0x31   : > { %688 = vst [vmem:[#allocation2 + $0xc1] sm:$0xff] %v6750_v28  ;;  %v590_v42 = vmul.f32 %v6565_v29, %v552_v39  ;;  %5923 = vmatprep.subr.bf16.mxu0 %v5922_v16  ;;  %v6777_v50 = vadd.f32 %v6570_v30, %v589_v38  ;;  %v553_v59 = vld [vmem:[%s6540_s26 + $0xa0] sm:$0xff]  ;;  %v554_v3 = vld [vmem:[%s6540_s26 + $0xa8] sm:$0xff]  ;;  %v6799_v4 = vld [vmem:[#allocation2 + $0x30] sm:$0xff]  ;;  %v5930_v17 = vpack.c.bf16 %v4543_v52, %v4542_v47 }
  0x32   : > { %689 = vst [vmem:[#allocation2 + $0xc9] sm:$0xff] %v6758_v36  ;;  %v7729_v49 = vmax.f32 %v6761_v37, 0.0  ;;  %5075 = vmatmul.mubr.f32.vlgmr.msra.gmra.mrb[0].mxu1 %v777_v34  ;;  %v7724_v55 = vmax.f32 %v6768_v40, 0.0  ;;  %v779_v60 = vld [vmem:[#allocation2 + $0x20] sm:$0xff]  ;;  %v591_v1 = vmul.f32 %v6565_v29, %v553_v59  ;;  %v592_v14 = vmul.f32 %v6565_v29, %v554_v3  ;;  %v555_v15 = vld [vmem:[%s6540_s26 + $0xb0] sm:$0xff]  ;;  %v556_v21 = vld [vmem:[%s6540_s26 + $0xb8] sm:$0xff] }
  0x33   : > { %v6787_v58 = vadd.f32 %v6570_v30, %v590_v42  ;;  %5395 = vmatmul.mubr.f32.vlgmr.msra.gmra.mrb[0].mxu0 %v6631_v6  ;;  %5797 = vmatpush3.bf16.msra.mxu1 %v5794_v7  ;;  %v7723_v0 = vmax.f32 %v6777_v50, 0.0  ;;  %v593_v20 = vmul.f32 %v6565_v29, %v555_v15  ;;  %v4544_v23 = vld [vmem:[%s7712_s3 + $0x2b0] sm:$0xff]  ;;  %v4545_v24 = vld [vmem:[%s7712_s3 + $0x2b8] sm:$0xff]  ;;  %v5802_v27 = vpack.c.bf16 %v4479_v61, %v4478_v54  ;;  %v557_v54 = vld [vmem:[%s6540_s26 + $0xc0] sm:$0xff] }
  0x34   : > { %690 = vst [vmem:[#allocation2 + $0xd9] sm:$0xff] %v7729_v49  ;;  %5925 = vmatpush3.bf16.msra.mxu0 %v5922_v16  ;;  %5077 = vmatprep.mubr.f32.mxu1 %v778_v43  ;;  %691 = vst [vmem:[#allocation2 + $0xe1] sm:$0xff] %v7724_v55  ;;  %v6810_v16 = vadd.f32 %v6570_v30, %v591_v1  ;;  %v6823_v32 = vadd.f32 %v6570_v30, %v592_v14  ;;  %v6828_v34 = vld [vmem:[#allocation2 + $0x38] sm:$0xff]  ;;  %v4480_v35 = vld [vmem:[%s7712_s3 + $0xb0] sm:$0xff] }
  0x35   : > { %v7722_v7 = vmax.f32 %v6787_v58, 0.0  ;;  %5397 = vmatprep.mubr.f32.mxu0 %v6637_v11  ;;  %5927 = vmatprep.subr.bf16.mxu0 %v5926_v46  ;;  %692 = vst [vmem:[#allocation2 + $0xf1] sm:$0xff] %v7723_v0  ;;  %v594_v33 = vmul.f32 %v6565_v29, %v556_v21  ;;  %v4481_v38 = vld [vmem:[%s7712_s3 + $0xb8] sm:$0xff]  ;;  %v6838_v42 = vadd.f32 %v6570_v30, %v593_v20  ;;  %v6841_v43 = vld [vmem:[#allocation2 + $0x48] sm:$0xff]  ;;  %v559_v1 = vld [vmem:[%s6540_s26 + $0xd0] sm:$0xff] }
  0x36   : > { %5078 = vmatmul.mubr.f32.gmra.mrb[2].mxu1 %v779_v60  ;;  %5799 = vmatprep.subr.bf16.mxu1 %v5798_v51  ;;  %v7721_v39 = vmax.f32 %v6810_v16, 0.0  ;;  %v7718_v47 = vmax.f32 %v6823_v32, 0.0  ;;  %v5934_v59 = vpack.c.bf16 %v4545_v24, %v4544_v23  ;;  %v558_v61 = vld [vmem:[%s6540_s26 + $0xc8] sm:$0xff]  ;;  %v4546_v3 = vld [vmem:[%s7712_s3 + $0x2c0] sm:$0xff]  ;;  %v5806_v14 = vpack.c.bf16 %v4481_v38, %v4480_v35  ;;  %v560_v23 = vld [vmem:[%s6540_s26 + $0xd8] sm:$0xff] }
  0x37   : > { %693 = vst [vmem:[#allocation2 + $0xf9] sm:$0xff] %v7722_v7  ;;  %5398 = vmatmul.mubr.f32.gmra.mrb[2].mxu0 %v6639_v12  ;;  %5080 = vmatprep.mubr.f32.mxu1 %v6799_v4  ;;  %v6845_v52 = vadd.f32 %v6570_v30, %v594_v33  ;;  %v7719_v60 = vmax.f32 %v6838_v42, 0.0  ;;  %v596_v20 = vmul.f32 %v6565_v29, %v558_v61  ;;  %v6869_v24 = vld [vmem:[#allocation2 + $0x50] sm:$0xff]  ;;  %v4482_v33 = vld [vmem:[%s7712_s3 + $0xc0] sm:$0xff]  ;;  %v4483_v35 = vld [vmem:[%s7712_s3 + $0xc8] sm:$0xff] }
  0x38   : > { %5929 = vmatpush3.bf16.msra.mxu0 %v5926_v46  ;;  %5400 = vmatprep.mubr.f32.mxu0 %v6661_v25  ;;  %694 = vst [vmem:[#allocation2 + $0x109] sm:$0xff] %v7721_v39  ;;  %v595_v46 = vmul.f32 %v6565_v29, %v557_v54  ;;  %695 = vst [vmem:[#allocation2 + $0x111] sm:$0xff] %v7718_v47  ;;  %v597_v21 = vmul.f32 %v6565_v29, %v559_v1  ;;  %v6884_v61 = vld [vmem:[#allocation2 + $0x60] sm:$0xff]  ;;  %v6912_v39 = vld [vmem:[#allocation2 + $0x68] sm:$0xff] }
  0x39   : > { %5931 = vmatprep.subr.bf16.mxu0 %v5930_v17  ;;  %5801 = vmatpush3.bf16.msra.mxu1 %v5798_v51  ;;  %v4547_v51 = vld [vmem:[%s7712_s3 + $0x2c8] sm:$0xff]  ;;  %v7720_v15 = vmax.f32 %v6845_v52, 0.0  ;;  %696 = vst [vmem:[#allocation2 + $0x121] sm:$0xff] %v7719_v60  ;;  %v598_v54 = vmul.f32 %v6565_v29, %v560_v23  ;;  %v6889_v1 = vadd.f32 %v6570_v30, %v596_v20  ;;  %v561_v60 = vld [vmem:[%s6540_s26 + $0xe0] sm:$0xff]  ;;  %v4548_v20 = vld [vmem:[%s7712_s3 + $0x2d0] sm:$0xff] }
  0x3a   : > { %5081 = vmatmul.mubr.f32.gmra.mrb[4].mxu1 %v6828_v34  ;;  %5803 = vmatprep.subr.bf16.mxu1 %v5802_v27  ;;  %v6880_v38 = vadd.f32 %v6570_v30, %v595_v46  ;;  %v6892_v47 = vadd.f32 %v6570_v30, %v597_v21  ;;  %v5938_v46 = vpack.c.bf16 %v4547_v51, %v4546_v3  ;;  %v4549_v21 = vld [vmem:[%s7712_s3 + $0x2d8] sm:$0xff]  ;;  %v4484_v7 = vld [vmem:[%s7712_s3 + $0xd0] sm:$0xff]  ;;  %v4490_v22 = vld [vmem:[%s7712_s3 + $0x100] sm:$0xff] }
  0x3b   : > { %5401 = vmatmul.mubr.f32.gmra.mrb[4].mxu0 %v6666_v31  ;;  %5083 = vmatprep.mubr.f32.mxu1 %v6841_v43  ;;  %697 = vst [vmem:[#allocation2 + $0x129] sm:$0xff] %v7720_v15  ;;  %v5810_v15 = vpack.c.bf16 %v4483_v35, %v4482_v33  ;;  %v599_v51 = vmul.f32 %v6565_v29, %v561_v60  ;;  %v4485_v33 = vld [vmem:[%s7712_s3 + $0xd8] sm:$0xff]  ;;  %v7005_v2 = vld [vmem:[#allocation2 + $0xc0] sm:$0xff]  ;;  %v4556_v18 = vld [vmem:[%s7712_s3 + $0x310] sm:$0xff] }
  0x3c   : > { %5933 = vmatpush3.bf16.msra.mxu0 %v5930_v17  ;;  %5403 = vmatprep.mubr.f32.mxu0 %v6684_v44  ;;  %v7725_v23 = vmax.f32 %v6880_v38, 0.0  ;;  %v6896_v17 = vadd.f32 %v6570_v30, %v598_v54  ;;  %v7726_v3 = vmax.f32 %v6892_v47, 0.0  ;;  %v562_v54 = vld [vmem:[%s6540_s26 + $0xe8] sm:$0xff]  ;;  %v6925_v0 = vld [vmem:[#allocation2 + $0x78] sm:$0xff] }
  0x3d   : > { %5935 = vmatprep.subr.bf16.mxu0 %v5934_v59  ;;  %5805 = vmatpush3.bf16.msra.mxu1 %v5802_v27  ;;  %v7728_v27 = vmax.f32 %v6889_v1, 0.0  ;;  %v600_v35 = vmul.f32 %v6565_v29, %v562_v54  ;;  %v6932_v55 = vadd.f32 %v6570_v30, %v599_v51  ;;  %v4550_v54 = vld [vmem:[%s7712_s3 + $0x2e0] sm:$0xff]  ;;  %v4551_v51 = vld [vmem:[%s7712_s3 + $0x2e8] sm:$0xff] }
  0x3e   : > { %5084 = vmatmul.mubr.f32.gmra.mrb[6].mxu1 %v6869_v24  ;;  %5807 = vmatprep.subr.bf16.mxu1 %v5806_v14  ;;  %698 = vst [vmem:[#allocation2 + $0x139] sm:$0xff] %v7725_v23  ;;  %v7727_v60 = vmax.f32 %v6896_v17, 0.0  ;;  %700 = vst [vmem:[#allocation2 + $0x151] sm:$0xff] %v7726_v3  ;;  %v5942_v23 = vpack.c.bf16 %v4549_v21, %v4548_v20  ;;  %v5814_v3 = vpack.c.bf16 %v4485_v33, %v4484_v7  ;;  %v6949_v20 = vld [vmem:[#allocation2 + $0x80] sm:$0xff]  ;;  %v6959_v7 = vld [vmem:[#allocation2 + $0x90] sm:$0xff] }
  0x3f   : > { %5404 = vmatmul.mubr.f32.gmra.mrb[6].mxu0 %v6686_v45  ;;  %5086 = vmatprep.mubr.f32.mxu1 %v6884_v61  ;;  %699 = vst [vmem:[#allocation2 + $0x141] sm:$0xff] %v7728_v27  ;;  %v4486_v21 = vld [vmem:[%s7712_s3 + $0xe0] sm:$0xff]  ;;  %v5946_v33 = vpack.c.bf16 %v4551_v51, %v4550_v54  ;;  %v4552_v27 = vld [vmem:[%s7712_s3 + $0x2f0] sm:$0xff]  ;;  %v4489_v51 = vld [vmem:[%s7712_s3 + $0xf8] sm:$0xff] }
  0x40   : > { %5937 = vmatpush3.bf16.msra.mxu0 %v5934_v59  ;;  %5406 = vmatprep.mubr.f32.mxu0 %v6691_v48  ;;  %701 = vst [vmem:[#allocation2 + $0x159] sm:$0xff] %v7727_v60  ;;  %v6937_v59 = vadd.f32 %v6570_v30, %v600_v35  ;;  %v4487_v35 = vld [vmem:[%s7712_s3 + $0xe8] sm:$0xff]  ;;  %v4488_v54 = vld [vmem:[%s7712_s3 + $0xf0] sm:$0xff]  ;;  %v7009_v41 = vld [vmem:[#allocation2 + $0x1a] sm:$0xff] }
  0x41   : > { %5939 = vmatprep.subr.bf16.mxu0 %v5938_v46  ;;  %5809 = vmatpush3.bf16.msra.mxu1 %v5806_v14  ;;  %v7731_v14 = vmax.f32 %v6932_v55, 0.0  ;;  %v5818_v49 = vpack.c.bf16 %v4487_v35, %v4486_v21  ;;  %v6983_v21 = vld [vmem:[#allocation2 + $0xa8] sm:$0xff]  ;;  %v5822_v53 = vpack.c.bf16 %v4489_v51, %v4488_v54  ;;  %7786 = vst [vmem:[#allocation13_spill] sm:$0xff] %v7009_v41 }
  0x42   : > { %7785 = vst [vmem:[#allocation12_spill] sm:$0xff] %v6937_v59  ;;  %5087 = vmatmul.mubr.f32.gmra.mrb[8].mxu1 %v6912_v39  ;;  %5811 = vmatprep.subr.bf16.mxu1 %v5810_v15  ;;  %v7730_v60 = vmax.f32 %v6937_v59, 0.0  ;;  %v4559_v8 = vld [vmem:[%s7712_s3 + $0x328] sm:$0xff] }
  0x43   : > { %5407 = vmatmul.mubr.f32.gmra.mrb[8].mxu0 %v6708_v57  ;;  %5089 = vmatprep.mubr.f32.mxu1 %v6925_v0  ;;  %702 = vst [vmem:[#allocation2 + $0x169] sm:$0xff] %v7731_v14  ;;  %v6989_v14 = vld [vmem:[#allocation2 + $0xb0] sm:$0xff] }
  0x44   : > { %5941 = vmatpush3.bf16.msra.mxu0 %v5938_v46  ;;  %5409 = vmatprep.mubr.f32.mxu0 %v6718_v62  ;;  %703 = vst [vmem:[#allocation2 + $0x171] sm:$0xff] %v7730_v60  ;;  %v4553_v46 = vld [vmem:[%s7712_s3 + $0x2f8] sm:$0xff]  ;;  %v4554_v60 = vld [vmem:[%s7712_s3 + $0x300] sm:$0xff] }
  0x45   : > { %5943 = vmatprep.subr.bf16.mxu0 %v5942_v23  ;;  %5813 = vmatpush3.bf16.msra.mxu1 %v5810_v15  ;;  %v6974_v15 = vld [vmem:[#allocation2 + $0x98] sm:$0xff]  ;;  %v5950_v35 = vpack.c.bf16 %v4553_v46, %v4552_v27  ;;  %v4491_v27 = vld [vmem:[%s7712_s3 + $0x108] sm:$0xff] }
  0x46   : > { %5090 = vmatmul.mubr.f32.gmra.mrb[10].mxu1 %v6949_v20  ;;  %5815 = vmatprep.subr.bf16.mxu1 %v5814_v3  ;;  %v564_v46 = vld [vmem:[%s6540_s26 + $0xf8] sm:$0xff]  ;;  %v7018_v13 = vpack.c.bf16 %v4491_v27, %v4490_v22 }
  0x47   : > { %5410 = vmatmul.mubr.f32.gmra.mrb[10].mxu0 %v6720_v63  ;;  %5092 = vmatprep.mubr.f32.mxu1 %v6959_v7  ;;  %v602_v51 = vmul.f32 %v6565_v29, %v564_v46  ;;  %v7033_v22 = vld [vmem:[#allocation2 + $0xd8] sm:$0xff] }
  0x48   : > { %5945 = vmatpush3.bf16.msra.mxu0 %v5942_v23  ;;  %5412 = vmatprep.mubr.f32.mxu0 %v6730_v9  ;;  %v4555_v23 = vld [vmem:[%s7712_s3 + $0x308] sm:$0xff]  ;;  %7790 = vst [vmem:[#allocation17_spill] sm:$0xff] %v7033_v22 }
  0x49   : > { %5947 = vmatprep.subr.bf16.mxu0 %v5946_v33  ;;  %5817 = vmatpush3.bf16.msra.mxu1 %v5814_v3  ;;  %v563_v3 = vld [vmem:[%s6540_s26 + $0xf0] sm:$0xff]  ;;  %v5954_v26 = vpack.c.bf16 %v4555_v23, %v4554_v60  ;;  %v7024_v46 = vadd.f32 %v6570_v30, %v602_v51  ;;  %v7031_v60 = vld [vmem:[#allocation2 + $0x22] sm:$0xff] }
  0x4a   : > { %5093 = vmatmul.mubr.f32.gmra.mrb[12].mxu1 %v6974_v15  ;;  %5819 = vmatprep.subr.bf16.mxu1 %v5818_v49  ;;  %v601_v54 = vmul.f32 %v6565_v29, %v563_v3  ;;  %7789 = vst [vmem:[#allocation16_spill] sm:$0xff] %v7031_v60 }
  0x4b   : > { %5413 = vmatmul.mubr.f32.gmra.mrb[12].mxu0 %v6738_v19  ;;  %5095 = vmatprep.mubr.f32.mxu1 %v6983_v21  ;;  %7788 = vst [vmem:[#allocation15_spill] sm:$0xff] %v7024_v46  ;;  %v7750_v27 = vmax.f32 %v7024_v46, 0.0  ;;  %v7075_v46 = vld [vmem:[#allocation2 + $0xf8] sm:$0xff] }
  0x4c   : > { %5949 = vmatpush3.bf16.msra.mxu0 %v5946_v33  ;;  %5415 = vmatprep.mubr.f32.mxu0 %v6750_v28  ;;  %v4557_v33 = vld [vmem:[%s7712_s3 + $0x318] sm:$0xff]  ;;  %v7021_v3 = vadd.f32 %v6570_v30, %v601_v54  ;;  %7796 = vst [vmem:[#allocation23_spill] sm:$0xff] %v7075_v46 }
  0x4d   : > { %5951 = vmatprep.subr.bf16.mxu0 %v5950_v35  ;;  %5821 = vmatpush3.bf16.msra.mxu1 %v5818_v49  ;;  %v7028_v49 = vld [vmem:[#allocation2 + $0xc8] sm:$0xff]  ;;  %v7037_v54 = vld [vmem:[#allocation2 + $0x32] sm:$0xff]  ;;  %v5958_v51 = vpack.c.bf16 %v4557_v33, %v4556_v18  ;;  %705 = vst [vmem:[#allocation2 + $0x189] sm:$0xff] %v7750_v27  ;;  %v7054_v18 = vld [vmem:[#allocation2 + $0xe0] sm:$0xff] }
  0x4e   : > { %5096 = vmatmul.mubr.f32.gmra.mrb[14].mxu1 %v6989_v14  ;;  %5823 = vmatprep.subr.bf16.mxu1 %v5822_v53  ;;  %7787 = vst [vmem:[#allocation14_spill] sm:$0xff] %v7021_v3  ;;  %v7749_v23 = vmax.f32 %v7021_v3, 0.0  ;;  %7791 = vst [vmem:[#allocation18_spill] sm:$0xff] %v7037_v54  ;;  %v7059_v33 = vld [vmem:[#allocation2 + $0xf0] sm:$0xff]  ;;  %v721_v3 = vld [vmem:[%s470_s19] sm:$0xff] }
  0x4f   : > { %5416 = vmatmul.mubr.f32.gmra.mrb[14].mxu0 %v6758_v36  ;;  %5098 = vmatprep.mubr.f32.mxu1 %v7005_v2  ;;  %7792 = vst [vmem:[#allocation19_spill] sm:$0xff] %v7054_v18  ;;  %7794 = vst [vmem:[#allocation21_spill] sm:$0xff] %v7059_v33  ;;  %v4560_v27 = vld [vmem:[%s7712_s3 + $0x330] sm:$0xff]  ;;  %v723_v59 = vmul.f32 %v6565_v29, %v721_v3 }
  0x50   : > { %5953 = vmatpush3.bf16.msra.mxu0 %v5950_v35  ;;  %5474 = vmatprep.mubr.f32.mxu0 %v7009_v41  ;;  %v4558_v35 = vld [vmem:[%s7712_s3 + $0x320] sm:$0xff]  ;;  %704 = vst [vmem:[#allocation2 + $0x181] sm:$0xff] %v7749_v23  ;;  %v7061_v41 = vld [vmem:[#allocation2 + $0x4a] sm:$0xff] }
  0x51   : > { %5955 = vmatprep.subr.bf16.mxu0 %v5954_v26  ;;  %5825 = vmatpush3.bf16.msra.mxu1 %v5822_v53  ;;  %v7057_v53 = vld [vmem:[#allocation2 + $0x3a] sm:$0xff]  ;;  %7795 = vst [vmem:[#allocation22_spill] sm:$0xff] %v7061_v41  ;;  %v5962_v23 = vpack.c.bf16 %v4559_v8, %v4558_v35  ;;  %v7077_v8 = vld [vmem:[#allocation2 + $0x52] sm:$0xff]  ;;  %v7080_v35 = vld [vmem:[#allocation2 + $0x108] sm:$0xff]  ;;  %v725_v3 = vadd.f32 %v6570_v30, %v723_v59 }
  0x52   : > { %5099 = vmatmul.mubr.f32.gmra.mrb[16].mxu1 %v7028_v49  ;;  %5827 = vmatprep.subr.bf16.mxu1 %v7018_v13  ;;  %7793 = vst [vmem:[#allocation20_spill] sm:$0xff] %v7057_v53  ;;  %7797 = vst [vmem:[#allocation24_spill] sm:$0xff] %v7077_v8  ;;  %v4564_v59 = vld [vmem:[%s7712_s3 + $0x350] sm:$0xff] }
  0x53   : > { %5475 = vmatmul.mubr.f32.vlgmr.msra.gmra.mrb[0].mxu0 %v7031_v60  ;;  %5101 = vmatprep.mubr.f32.mxu1 %v7033_v22  ;;  %v7082_v60 = vld [vmem:[#allocation2 + $0x62] sm:$0xff] }
  0x54   : > { %5477 = vmatprep.mubr.f32.mxu0 %v7037_v54  ;;  %5957 = vmatpush3.bf16.msra.mxu0 %v5954_v26  ;;  %v4561_v26 = vld [vmem:[%s7712_s3 + $0x338] sm:$0xff]  ;;  %v722_v54 = vld [vmem:[%s470_s19 + $0x8] sm:$0xff]  ;;  %7798 = vst [vmem:[#allocation25_spill] sm:$0xff] %v7082_v60 }
  0x55   : > { %5959 = vmatprep.subr.bf16.mxu0 %v5958_v51 }
  0x56   : > { %5102 = vmatmul.mubr.f32.gmra.mrb[18].mxu1 %v7054_v18  ;;  %v5966_v18 = vpack.c.bf16 %v4561_v26, %v4560_v27  ;;  %v7100_v27 = vld [vmem:[#allocation2 + $0x6a] sm:$0xff]  ;;  %v7104_v26 = vld [vmem:[#allocation2 + $0x7a] sm:$0xff] }
  0x57   : > { %5478 = vmatmul.mubr.f32.gmra.mrb[2].mxu0 %v7057_v53  ;;  %5104 = vmatprep.mubr.f32.mxu1 %v7059_v33  ;;  %v724_v53 = vmul.f32 %v6565_v29, %v722_v54  ;;  %v4562_v33 = vld [vmem:[%s7712_s3 + $0x340] sm:$0xff]  ;;  %7799 = vst [vmem:[#allocation26_spill] sm:$0xff] %v7100_v27  ;;  %7800 = vst [vmem:[#allocation27_spill] sm:$0xff] %v7104_v26 }
  0x58   : > { %5480 = vmatprep.mubr.f32.mxu0 %v7061_v41  ;;  %5961 = vmatpush3.bf16.msra.mxu0 %v5958_v51  ;;  %v4563_v51 = vld [vmem:[%s7712_s3 + $0x348] sm:$0xff]  ;;  %v7095_v41 = vld [vmem:[#allocation2 + $0x110] sm:$0xff]  ;;  %v7102_v54 = vld [vmem:[#allocation2 + $0x120] sm:$0xff] }
  0x59   : > { %5963 = vmatprep.subr.bf16.mxu0 %v5962_v23  ;;  %v726_v29 = vadd.f32 %v6570_v30, %v724_v53  ;;  %v4565_v30 = vld [vmem:[%s7712_s3 + $0x358] sm:$0xff] }
  0x5a   : > { %5105 = vmatmul.mubr.f32.gmra.mrb[20].mxu1 %v7075_v46  ;;  %v5970_v46 = vpack.c.bf16 %v4563_v51, %v4562_v33  ;;  %v7122_v51 = vld [vmem:[#allocation2 + $0x82] sm:$0xff] }
  0x5b   : > { %5481 = vmatmul.mubr.f32.gmra.mrb[4].mxu0 %v7077_v8  ;;  %5107 = vmatprep.mubr.f32.mxu1 %v7080_v35  ;;  %v727_v8 = vmax.f32 %v725_v3, 0.0  ;;  %v728_v22 = vmax.f32 %v726_v29, 0.0  ;;  %7803 = vst [vmem:[#allocation30_spill] sm:$0xff] %v7122_v51  ;;  %v7124_v3 = vld [vmem:[#allocation2 + $0x138] sm:$0xff] }
  0x5c   : > { %5483 = vmatprep.mubr.f32.mxu0 %v7082_v60  ;;  %5965 = vmatpush3.bf16.msra.mxu0 %v5962_v23  ;;  %v7115_v23 = vld [vmem:[#allocation2 + $0x128] sm:$0xff]  ;;  %v7126_v29 = vld [vmem:[#allocation2 + $0x92] sm:$0xff]  ;;  %v5974_v60 = vpack.c.bf16 %v4565_v30, %v4564_v59  ;;  %v7142_v59 = vld [vmem:[#allocation2 + $0x9a] sm:$0xff] }
  0x5d   : > { %5967 = vmatprep.subr.bf16.mxu0 %v5966_v18  ;;  %v7117_v53 = vmul.f32 0.0, %v727_v8  ;;  %v7119_v33 = vmul.f32 0.0, %v728_v22  ;;  %7804 = vst [vmem:[#allocation31_spill] sm:$0xff] %v7126_v29  ;;  %v4566_v22 = vld [vmem:[%s7712_s3 + $0x360] sm:$0xff]  ;;  %v4567_v8 = vld [vmem:[%s7712_s3 + $0x368] sm:$0xff]  ;;  %7805 = vst [vmem:[#allocation32_spill] sm:$0xff] %v7142_v59 }
  0x5e   : > { %5108 = vmatmul.mubr.f32.gmra.mrb[22].mxu1 %v7095_v41  ;;  %v7144_v30 = vld [vmem:[#allocation2 + $0x150] sm:$0xff] }
  0x5f   : > { %5484 = vmatmul.mubr.f32.gmra.mrb[6].mxu0 %v7100_v27  ;;  %5110 = vmatprep.mubr.f32.mxu1 %v7102_v54  ;;  %7801 = vst [vmem:[#allocation28_spill] sm:$0xff] %v7117_v53  ;;  %7802 = vst [vmem:[#allocation29_spill] sm:$0xff] %v7119_v33 }
  0x60   : > { %5486 = vmatprep.mubr.f32.mxu0 %v7104_v26  ;;  %5969 = vmatpush3.bf16.msra.mxu0 %v5966_v18  ;;  %735 = vst [vmem:[#allocation2 + $0x199] sm:$0xff] %v7117_v53  ;;  %736 = vst [vmem:[#allocation2 + $0x1a1] sm:$0xff] %v7119_v33  ;;  %v7139_v18 = vld [vmem:[#allocation2 + $0x140] sm:$0xff]  ;;  %v7146_v33 = vld [vmem:[#allocation2 + $0xaa] sm:$0xff]  ;;  %v5978_v53 = vpack.c.bf16 %v4567_v8, %v4566_v22 }
  0x61   : > { %5971 = vmatprep.subr.bf16.mxu0 %v5970_v46  ;;  %7806 = vst [vmem:[#allocation33_spill] sm:$0xff] %v7144_v30  ;;  %7807 = vst [vmem:[#allocation34_spill] sm:$0xff] %v7146_v33  ;;  %v4569_v26 = vld [vmem:[%s7712_s3 + $0x378] sm:$0xff]  ;;  %v7162_v22 = vld [vmem:[#allocation2 + $0x168] sm:$0xff] }
  0x62   : > { %5111 = vmatmul.mubr.f32.gmra.mrb[24].mxu1 %v7115_v23  ;;  %7809 = vst [vmem:[#allocation36_spill] sm:$0xff] %v7162_v22  ;;  %v7164_v8 = vld [vmem:[#allocation2 + $0xc2] sm:$0xff] }
  0x63   : > { %5487 = vmatmul.mubr.f32.gmra.mrb[8].mxu0 %v7122_v51  ;;  %5113 = vmatprep.mubr.f32.mxu1 %v7124_v3  ;;  %v4568_v51 = vld [vmem:[%s7712_s3 + $0x370] sm:$0xff]  ;;  %7810 = vst [vmem:[#allocation37_spill] sm:$0xff] %v7164_v8 }
  0x64   : > { %5489 = vmatprep.mubr.f32.mxu0 %v7126_v29  ;;  %5973 = vmatpush3.bf16.msra.mxu0 %v5970_v46  ;;  %v7157_v29 = vld [vmem:[#allocation2 + $0x158] sm:$0xff]  ;;  %v5982_v27 = vpack.c.bf16 %v4569_v26, %v4568_v51 }
  0x65   : > { %5975 = vmatprep.subr.bf16.mxu0 %v5974_v60  ;;  %v7160_v46 = vld [vmem:[#allocation2 + $0xb2] sm:$0xff]  ;;  %v7180_v26 = vld [vmem:[#allocation2 + $0xda] sm:$0xff] }
  0x66   : > { %5114 = vmatmul.mubr.f32.gmra.mrb[26].mxu1 %v7139_v18  ;;  %7808 = vst [vmem:[#allocation35_spill] sm:$0xff] %v7160_v46 }
  0x67   : > { %5490 = vmatmul.mubr.f32.gmra.mrb[10].mxu0 %v7142_v59  ;;  %5116 = vmatprep.mubr.f32.mxu1 %v7144_v30  ;;  %v4570_v59 = vld [vmem:[%s7712_s3 + $0x380] sm:$0xff]  ;;  %v4571_v30 = vld [vmem:[%s7712_s3 + $0x388] sm:$0xff] }
  0x68   : > { %5492 = vmatprep.mubr.f32.mxu0 %v7146_v33  ;;  %5977 = vmatpush3.bf16.msra.mxu0 %v5974_v60  ;;  %v7175_v33 = vld [vmem:[#allocation2 + $0x170] sm:$0xff]  ;;  %v7182_v51 = vpack.c.bf16 %v4571_v30, %v4570_v59 }
  0x69   : > { %5979 = vmatprep.subr.bf16.mxu0 %v5978_v53  ;;  %v7178_v60 = vld [vmem:[#allocation2 + $0xca] sm:$0xff]  ;;  %v7196_v59 = vld [vmem:[#allocation2 + $0xf2] sm:$0xff] }
  0x6a   : > { %5117 = vmatmul.mubr.f32.gmra.mrb[28].mxu1 %v7157_v29 }
  0x6b   : > { %5493 = vmatmul.mubr.f32.gmra.mrb[12].mxu0 %v7160_v46  ;;  %5119 = vmatprep.mubr.f32.mxu1 %v7162_v22  ;;  %v4492_v46 = vld [vmem:[%s7712_s3 + $0x110] sm:$0xff]  ;;  %v4493_v22 = vld [vmem:[%s7712_s3 + $0x118] sm:$0xff] }
  0x6c   : > { %5495 = vmatprep.mubr.f32.mxu0 %v7164_v8  ;;  %5981 = vmatpush3.bf16.msra.mxu0 %v5978_v53  ;;  %v7194_v53 = vld [vmem:[#allocation2 + $0xe2] sm:$0xff]  ;;  %v5830_v30 = vpack.c.bf16 %v4493_v22, %v4492_v46  ;;  %v7212_v46 = vld [vmem:[#allocation2 + $0x10a] sm:$0xff] }
  0x6d   : > { %5983 = vmatprep.subr.bf16.mxu0 %v5982_v27  ;;  %v4494_v8 = vld [vmem:[%s7712_s3 + $0x120] sm:$0xff]  ;;  %v4496_v22 = vld [vmem:[%s7712_s3 + $0x130] sm:$0xff] }
  0x6e   : > { %5120 = vmatmul.mubr.f32.gmra.mrb[30].mxu1 %v7175_v33 }
  0x6f   : > { %5496 = vmatmul.mubr.f32.gmra.mrb[14].mxu0 %v7178_v60  ;;  %5154 = vmatprep.mubr.f32.mxu1 %v6627_v5  ;;  %v4495_v5 = vld [vmem:[%s7712_s3 + $0x128] sm:$0xff] }
  0x70   : > { %5498 = vmatprep.mubr.f32.mxu0 %v7180_v26  ;;  %5985 = vmatpush3.bf16.msra.mxu0 %v5982_v27  ;;  %v7210_v27 = vld [vmem:[#allocation2 + $0xfa] sm:$0xff] }
  0x71   : > { %5987 = vmatprep.subr.bf16.mxu0 %v7182_v51  ;;  %7811 = vst [vmem:[#allocation38_spill] sm:$0xff] %v7210_v27 }
  0x72   : > { %5155 = vmatmul.mubr.f32.vlgmr.msra.gmra.mrb[0].mxu1 %v6635_v10  ;;  %v5834_v10 = vpack.c.bf16 %v4495_v5, %v4494_v8  ;;  %v7226_v8 = vld [vmem:[#allocation2 + $0x122] sm:$0xff] }
  0x73   : > { %5499 = vmatmul.mubr.f32.gmra.mrb[16].mxu0 %v7194_v53  ;;  %5829 = vmatpush3.bf16.msra.mxu1 %v7018_v13  ;;  %v4497_v13 = vld [vmem:[%s7712_s3 + $0x138] sm:$0xff]  ;;  %v4498_v5 = vld [vmem:[%s7712_s3 + $0x140] sm:$0xff] }
  0x74   : > { %5157 = vmatprep.mubr.f32.mxu1 %v6605_v56  ;;  %5501 = vmatprep.mubr.f32.mxu0 %v7196_v59  ;;  %v7224_v56 = vld [vmem:[#allocation2 + $0x112] sm:$0xff] }
  0x75   : > { %5831 = vmatprep.subr.bf16.mxu1 %v5830_v30 }
  0x76   : > { %5158 = vmatmul.mubr.f32.gmra.mrb[2].mxu1 %v6631_v6  ;;  %v5838_v6 = vpack.c.bf16 %v4497_v13, %v4496_v22  ;;  %v4500_v22 = vld [vmem:[%s7712_s3 + $0x150] sm:$0xff]  ;;  %v4501_v13 = vld [vmem:[%s7712_s3 + $0x158] sm:$0xff] }
  0x77   : > { %5502 = vmatmul.mubr.f32.gmra.mrb[18].mxu0 %v7210_v27  ;;  %5160 = vmatprep.mubr.f32.mxu1 %v6637_v11  ;;  %v4499_v27 = vld [vmem:[%s7712_s3 + $0x148] sm:$0xff] }
  0x78   : > { %5504 = vmatprep.mubr.f32.mxu0 %v7212_v46  ;;  %5833 = vmatpush3.bf16.msra.mxu1 %v5830_v30  ;;  %v7238_v11 = vld [vmem:[#allocation2 + $0x12a] sm:$0xff]  ;;  %v7240_v30 = vld [vmem:[#allocation2 + $0x13a] sm:$0xff] }
  0x79   : > { %5835 = vmatprep.subr.bf16.mxu1 %v5834_v10 }
  0x7a   : > { %5161 = vmatmul.mubr.f32.gmra.mrb[4].mxu1 %v6639_v12  ;;  %v5842_v12 = vpack.c.bf16 %v4499_v27, %v4498_v5  ;;  %v7254_v27 = vld [vmem:[#allocation2 + $0x152] sm:$0xff]  ;;  %v4503_v5 = vld [vmem:[%s7712_s3 + $0x168] sm:$0xff] }
  0x7b   : > { %5505 = vmatmul.mubr.f32.gmra.mrb[20].mxu0 %v7224_v56  ;;  %5163 = vmatprep.mubr.f32.mxu1 %v6661_v25  ;;  %v7252_v25 = vld [vmem:[#allocation2 + $0x142] sm:$0xff] }
  0x7c   : > { %5507 = vmatprep.mubr.f32.mxu0 %v7226_v8  ;;  %5837 = vmatpush3.bf16.msra.mxu1 %v5834_v10  ;;  %v4502_v10 = vld [vmem:[%s7712_s3 + $0x160] sm:$0xff] }
  0x7d   : > { %5839 = vmatprep.subr.bf16.mxu1 %v5838_v6 }
  0x7e   : > { %5164 = vmatmul.mubr.f32.gmra.mrb[6].mxu1 %v6666_v31  ;;  %v5846_v31 = vpack.c.bf16 %v4501_v13, %v4500_v22  ;;  %v4504_v22 = vld [vmem:[%s7712_s3 + $0x170] sm:$0xff]  ;;  %v4505_v13 = vld [vmem:[%s7712_s3 + $0x178] sm:$0xff] }
  0x7f   : > { %5508 = vmatmul.mubr.f32.gmra.mrb[22].mxu0 %v7238_v11  ;;  %5166 = vmatprep.mubr.f32.mxu1 %v6684_v44  ;;  %v7266_v44 = vld [vmem:[#allocation2 + $0x15a] sm:$0xff] }
  0x80   : > { %5510 = vmatprep.mubr.f32.mxu0 %v7240_v30  ;;  %5841 = vmatpush3.bf16.msra.mxu1 %v5838_v6  ;;  %v7268_v6 = vld [vmem:[#allocation2 + $0x16a] sm:$0xff] }
  0x81   : > { %5843 = vmatprep.subr.bf16.mxu1 %v5842_v12 }
  0x82   : > { %5167 = vmatmul.mubr.f32.gmra.mrb[8].mxu1 %v6686_v45  ;;  %v5850_v45 = vpack.c.bf16 %v4503_v5, %v4502_v10  ;;  %v4506_v10 = vld [vmem:[%s7712_s3 + $0x180] sm:$0xff]  ;;  %v4507_v5 = vld [vmem:[%s7712_s3 + $0x188] sm:$0xff] }
  0x83   : > { %5511 = vmatmul.mubr.f32.gmra.mrb[24].mxu0 %v7252_v25  ;;  %5169 = vmatprep.mubr.f32.mxu1 %v6691_v48  ;;  %v7280_v48 = vld [vmem:[#allocation2 + $0x172] sm:$0xff] }
  0x84   : > { %5513 = vmatprep.mubr.f32.mxu0 %v7254_v27  ;;  %5845 = vmatpush3.bf16.msra.mxu1 %v5842_v12  ;;  %v2655_v12 = vld [vmem:[#allocation2 + $0x182] sm:$0xff] }
  0x85   : > { %5847 = vmatprep.subr.bf16.mxu1 %v5846_v31 }
  0x86   : > { %5170 = vmatmul.mubr.f32.gmra.mrb[10].mxu1 %v6708_v57  ;;  %v5854_v57 = vpack.c.bf16 %v4505_v13, %v4504_v22  ;;  %v4573_v22 = vld [vmem:[%s7712_s3 + $0x398] sm:$0xff]  ;;  %v4576_v13 = vld [vmem:[%s7712_s3 + $0x3b0] sm:$0xff] }
  0x87   : > { %5514 = vmatmul.mubr.f32.gmra.mrb[26].mxu0 %v7266_v44  ;;  %5172 = vmatprep.mubr.f32.mxu1 %v6718_v62  ;;  %v2656_v62 = vld [vmem:[#allocation2 + $0x18a] sm:$0xff] }
  0x88   : > { %5516 = vmatprep.mubr.f32.mxu0 %v7268_v6  ;;  %5849 = vmatpush3.bf16.msra.mxu1 %v5846_v31  ;;  %v7291_v31 = vpack.c.bf16 %v4507_v5, %v4506_v10  ;;  %v4583_v10 = vld [vmem:[%s7712_s3 + $0x3e8] sm:$0xff]  ;;  %v4585_v5 = vld [vmem:[%s7712_s3 + $0x3f8] sm:$0xff] }
  0x89   : > { %5851 = vmatprep.subr.bf16.mxu1 %v5850_v45 }
  0x8a   : > { %5173 = vmatmul.mubr.f32.gmra.mrb[12].mxu1 %v6720_v63  ;;  %v4572_v63 = vld [vmem:[%s7712_s3 + $0x390] sm:$0xff] }
  0x8b   : > { %5517 = vmatmul.mubr.f32.gmra.mrb[28].mxu0 %v7280_v48  ;;  %5175 = vmatprep.mubr.f32.mxu1 %v6730_v9  ;;  %v5990_v9 = vpack.c.bf16 %v4573_v22, %v4572_v63  ;;  %v7826_v63 = vld [vmem:[#allocation12_spill] sm:$0xff] }
  0x8c   : > { %5519 = vmatprep.mubr.f32.mxu0 %v2655_v12  ;;  %5853 = vmatpush3.bf16.msra.mxu1 %v5850_v45  ;;  %v4575_v45 = vld [vmem:[%s7712_s3 + $0x3a8] sm:$0xff]  ;;  %v7827_v22 = vmax.f32 %v7826_v63, 0.0  ;;  %v4589_v63 = vld [vmem:[%s7712_s3 + $0x418] sm:$0xff] }
  0x8d   : > { %5855 = vmatprep.subr.bf16.mxu1 %v5854_v57  ;;  %v4579_v12 = vld [vmem:[%s7712_s3 + $0x3c8] sm:$0xff] }
  0x8e   : > { %5176 = vmatmul.mubr.f32.gmra.mrb[14].mxu1 %v6738_v19  ;;  %v4574_v19 = vld [vmem:[%s7712_s3 + $0x3a0] sm:$0xff] }
  0x8f   : > { %5520 = vmatmul.mubr.f32.gmra.mrb[30].mxu0 %v2656_v62  ;;  %5178 = vmatprep.mubr.f32.mxu1 %v6750_v28  ;;  %v7812_v28 = vmax.f32 %v6761_v37, 0.0  ;;  %v7814_v37 = vmax.f32 %v6777_v50, 0.0  ;;  %v7816_v50 = vmax.f32 %v6810_v16, 0.0  ;;  %v7818_v16 = vmax.f32 %v6838_v42, 0.0  ;;  %v4587_v62 = vld [vmem:[%s7712_s3 + $0x408] sm:$0xff] }
  0x90   : > { %5554 = vmatprep.mubr.f32.mxu0 %v6799_v4  ;;  %5857 = vmatpush3.bf16.msra.mxu1 %v5854_v57  ;;  %v5994_v4 = vpack.c.bf16 %v4575_v45, %v4574_v19  ;;  %v4581_v57 = vld [vmem:[%s7712_s3 + $0x3d8] sm:$0xff]  ;;  %v7820_v42 = vmax.f32 %v6880_v38, 0.0  ;;  %v7822_v38 = vmax.f32 %v6892_v47, 0.0  ;;  %v7824_v47 = vmax.f32 %v6932_v55, 0.0  ;;  %v7828_v55 = vld [vmem:[#allocation19_spill] sm:$0xff] }
  0x91   : > { %5859 = vmatprep.subr.bf16.mxu1 %v7291_v31  ;;  %v1516_v19 = vld [vmem:[#allocation2 + $0xa] sm:$0xff]  ;;  %v7829_v45 = vld [vmem:[#allocation21_spill] sm:$0xff] }
  0x92   : > { %5179 = vmatmul.mubr.f32.gmra.mrb[16].mxu1 %v6758_v36  ;;  %v7813_v36 = vmax.f32 %v6768_v40, 0.0  ;;  %v7815_v40 = vmax.f32 %v6787_v58, 0.0  ;;  %v7817_v58 = vmax.f32 %v6823_v32, 0.0  ;;  %v7819_v32 = vmax.f32 %v6845_v52, 0.0 }
  0x93   : > { %5555 = vmatmul.mubr.f32.vlgmr.msra.gmra.mrb[0].mxu0 %v6828_v34  ;;  %5181 = vmatprep.mubr.f32.mxu1 %v7812_v28  ;;  %v4577_v34 = vld [vmem:[%s7712_s3 + $0x3b8] sm:$0xff]  ;;  %v7821_v52 = vmax.f32 %v6889_v1, 0.0  ;;  %v7823_v1 = vmax.f32 %v6896_v17, 0.0 }
  0x94   : > { %5557 = vmatprep.mubr.f32.mxu0 %v6841_v43  ;;  %5989 = vmatpush3.bf16.msra.mxu0 %v7182_v51  ;;  %v5998_v43 = vpack.c.bf16 %v4577_v34, %v4576_v13  ;;  %v4578_v51 = vld [vmem:[%s7712_s3 + $0x3c0] sm:$0xff]  ;;  %v7830_v13 = vld [vmem:[#allocation23_spill] sm:$0xff]  ;;  %v7831_v34 = vld [vmem:[#allocation13_spill] sm:$0xff] }
  0x95   : > { %5991 = vmatprep.subr.bf16.mxu0 %v5990_v9 }
  0x96   : > { %5182 = vmatmul.mubr.f32.gmra.mrb[18].mxu1 %v7813_v36  ;;  %v4511_v36 = vld [vmem:[%s7712_s3 + $0x1a8] sm:$0xff] }
  0x97   : > { %5558 = vmatmul.mubr.f32.gmra.mrb[2].mxu0 %v6869_v24  ;;  %5184 = vmatprep.mubr.f32.mxu1 %v7814_v37  ;;  %v6002_v24 = vpack.c.bf16 %v4579_v12, %v4578_v51  ;;  %v4513_v51 = vld [vmem:[%s7712_s3 + $0x1b8] sm:$0xff]  ;;  %v7833_v12 = vld [vmem:[#allocation18_spill] sm:$0xff] }
  0x98   : > { %5560 = vmatprep.mubr.f32.mxu0 %v6884_v61  ;;  %5993 = vmatpush3.bf16.msra.mxu0 %v5990_v9  ;;  %v4580_v61 = vld [vmem:[%s7712_s3 + $0x3d0] sm:$0xff] }
  0x99   : > { %5995 = vmatprep.subr.bf16.mxu0 %v5994_v4  ;;  %v4508_v9 = vld [vmem:[%s7712_s3 + $0x190] sm:$0xff] }
  0x9a   : > { %5185 = vmatmul.mubr.f32.gmra.mrb[20].mxu1 %v7815_v40  ;;  %v4512_v40 = vld [vmem:[%s7712_s3 + $0x1b0] sm:$0xff] }
  0x9b   : > { %5561 = vmatmul.mubr.f32.gmra.mrb[4].mxu0 %v6912_v39  ;;  %5187 = vmatprep.mubr.f32.mxu1 %v7816_v50  ;;  %v4582_v39 = vld [vmem:[%s7712_s3 + $0x3e0] sm:$0xff] }
  0x9c   : > { %5563 = vmatprep.mubr.f32.mxu0 %v6925_v0  ;;  %5997 = vmatpush3.bf16.msra.mxu0 %v5994_v4  ;;  %v6006_v0 = vpack.c.bf16 %v4581_v57, %v4580_v61  ;;  %v4510_v4 = vld [vmem:[%s7712_s3 + $0x1a0] sm:$0xff]  ;;  %v4516_v61 = vld [vmem:[%s7712_s3 + $0x1d0] sm:$0xff]  ;;  %v4517_v57 = vld [vmem:[%s7712_s3 + $0x1d8] sm:$0xff] }
  0x9d   : > { %5999 = vmatprep.subr.bf16.mxu0 %v5998_v43  ;;  %v5866_v37 = vpack.c.bf16 %v4511_v36, %v4510_v4  ;;  %v4514_v50 = vld [vmem:[%s7712_s3 + $0x1c0] sm:$0xff]  ;;  %v3369_v4 = vld [vmem:[#allocation2 + $0x51] sm:$0xff] }
  0x9e   : > { %5188 = vmatmul.mubr.f32.gmra.mrb[22].mxu1 %v7817_v58  ;;  %v7836_v58 = vld [vmem:[#allocation24_spill] sm:$0xff]  ;;  %v3370_v36 = vld [vmem:[#allocation2 + $0x61] sm:$0xff] }
  0x9f   : > { %5564 = vmatmul.mubr.f32.gmra.mrb[6].mxu0 %v6949_v20  ;;  %5190 = vmatprep.mubr.f32.mxu1 %v7818_v16  ;;  %v6010_v20 = vpack.c.bf16 %v4583_v10, %v4582_v39  ;;  %v7838_v16 = vld [vmem:[#allocation33_spill] sm:$0xff]  ;;  %v4519_v39 = vld [vmem:[%s7712_s3 + $0x1e8] sm:$0xff]  ;;  %v7841_v10 = vld [vmem:[#allocation36_spill] sm:$0xff] }
  0xa0   : > { %5566 = vmatprep.mubr.f32.mxu0 %v6959_v7  ;;  %6001 = vmatpush3.bf16.msra.mxu0 %v5998_v43  ;;  %v4584_v7 = vld [vmem:[%s7712_s3 + $0x3f0] sm:$0xff] }
  0xa1   : > { %6003 = vmatprep.subr.bf16.mxu0 %v6002_v24  ;;  %v7832_v43 = vld [vmem:[#allocation16_spill] sm:$0xff] }
  0xa2   : > { %5191 = vmatmul.mubr.f32.gmra.mrb[24].mxu1 %v7819_v32  ;;  %v4518_v32 = vld [vmem:[%s7712_s3 + $0x1e0] sm:$0xff] }
  0xa3   : > { %5567 = vmatmul.mubr.f32.gmra.mrb[8].mxu0 %v6974_v15  ;;  %5193 = vmatprep.mubr.f32.mxu1 %v7820_v42  ;;  %v6014_v15 = vpack.c.bf16 %v4585_v5, %v4584_v7  ;;  %v7450_v42 = vld [vmem:[#allocation2 + $0x180] sm:$0xff]  ;;  %v4520_v7 = vld [vmem:[%s7712_s3 + $0x1f0] sm:$0xff]  ;;  %v4521_v5 = vld [vmem:[%s7712_s3 + $0x1f8] sm:$0xff] }
  0xa4   : > { %5569 = vmatprep.mubr.f32.mxu0 %v6983_v21  ;;  %6005 = vmatpush3.bf16.msra.mxu0 %v6002_v24  ;;  %v4586_v21 = vld [vmem:[%s7712_s3 + $0x400] sm:$0xff]  ;;  %v4515_v24 = vld [vmem:[%s7712_s3 + $0x1c8] sm:$0xff] }
  0xa5   : > { %6007 = vmatprep.subr.bf16.mxu0 %v6006_v0  ;;  %v7387_v17 = vpack.c.bf16 %v4587_v62, %v4586_v21  ;;  %v7844_v21 = vld [vmem:[#allocation32_spill] sm:$0xff]  ;;  %v7845_v62 = vld [vmem:[#allocation34_spill] sm:$0xff] }
  0xa6   : > { %5194 = vmatmul.mubr.f32.gmra.mrb[26].mxu1 %v7821_v52  ;;  %v7842_v52 = vld [vmem:[#allocation30_spill] sm:$0xff] }
  0xa7   : > { %5570 = vmatmul.mubr.f32.gmra.mrb[10].mxu0 %v6989_v14  ;;  %5196 = vmatprep.mubr.f32.mxu1 %v7822_v38  ;;  %v1515_v14 = vld [vmem:[#allocation2 + $0x2] sm:$0xff] }
  0xa8   : > { %5572 = vmatprep.mubr.f32.mxu0 %v7005_v2  ;;  %6009 = vmatpush3.bf16.msra.mxu0 %v6006_v0  ;;  %v7825_v2 = vld [vmem:[#allocation17_spill] sm:$0xff]  ;;  %v7839_v0 = vld [vmem:[#allocation26_spill] sm:$0xff]  ;;  %v7462_v38 = vld [vmem:[#allocation2 + $0x188] sm:$0xff] }
  0xa9   : > { %6011 = vmatprep.subr.bf16.mxu0 %v6010_v20 }
  0xaa   : > { %5197 = vmatmul.mubr.f32.gmra.mrb[28].mxu1 %v7823_v1  ;;  %v5886_v1 = vpack.c.bf16 %v4521_v5, %v4520_v7  ;;  %v1891_v7 = vld [vmem:[#allocation2 + $0x60] sm:$0xff] }
  0xab   : > { %5573 = vmatmul.mubr.f32.gmra.mrb[12].mxu0 %v7028_v49  ;;  %5199 = vmatprep.mubr.f32.mxu1 %v7824_v47  ;;  %v4509_v49 = vld [vmem:[%s7712_s3 + $0x198] sm:$0xff]  ;;  %v3027_v47 = vld [vmem:[#allocation2 + $0x1a0] sm:$0xff] }
  0xac   : > { %5575 = vmatprep.mubr.f32.mxu0 %v7825_v2  ;;  %6013 = vmatpush3.bf16.msra.mxu0 %v6010_v20  ;;  %v5862_v28 = vpack.c.bf16 %v4509_v49, %v4508_v9  ;;  %v5882_v20 = vpack.c.bf16 %v4519_v39, %v4518_v32  ;;  %v7846_v2 = vld [vmem:[#allocation35_spill] sm:$0xff]  ;;  %v3367_v9 = vld [vmem:[#allocation2 + $0x39] sm:$0xff] }
  0xad   : > { %6015 = vmatprep.subr.bf16.mxu0 %v6014_v15  ;;  %v3368_v49 = vld [vmem:[#allocation2 + $0x49] sm:$0xff]  ;;  %v1888_v32 = vld [vmem:[#allocation2 + $0x38] sm:$0xff] }
  0xae   : > { %5200 = vmatmul.mubr.f32.gmra.mrb[30].mxu1 %v7827_v22  ;;  %v7847_v22 = vld [vmem:[#allocation37_spill] sm:$0xff]  ;;  %v1889_v39 = vld [vmem:[#allocation2 + $0x48] sm:$0xff] }
  0xaf   : > { %5576 = vmatmul.mubr.f32.gmra.mrb[14].mxu0 %v7828_v55  ;;  %5234 = vmatprep.mubr.f32.mxu1 %v1515_v14  ;;  %v4588_v14 = vld [vmem:[%s7712_s3 + $0x410] sm:$0xff]  ;;  %v7554_v5 = vld [vmem:[#allocation2 + $0x139] sm:$0xff] }
  0xb0   : > { %5578 = vmatprep.mubr.f32.mxu0 %v7829_v45  ;;  %6017 = vmatpush3.bf16.msra.mxu0 %v6014_v15  ;;  %v3026_v15 = vld [vmem:[#allocation2 + $0x198] sm:$0xff]  ;;  %v6022_v55 = vpack.c.bf16 %v4589_v63, %v4588_v14  ;;  %v4590_v45 = vld [vmem:[%s7712_s3 + $0x420] sm:$0xff]  ;;  %v1895_v14 = vld [vmem:[#allocation2 + $0x90] sm:$0xff] }
  0xb1   : > { %6019 = vmatprep.subr.bf16.mxu0 %v7387_v17  ;;  %v7570_v63 = vld [vmem:[#allocation2 + $0x169] sm:$0xff] }
  0xb2   : > { %5235 = vmatmul.mubr.f32.vlgmr.msra.gmra.mrb[0].mxu1 %v1516_v19  ;;  %v7848_v19 = vld [vmem:[#allocation4_spill] sm:$0xff] }
  0xb3   : > { %5579 = vmatmul.mubr.f32.gmra.mrb[16].mxu0 %v7830_v13  ;;  %5861 = vmatpush3.bf16.msra.mxu1 %v7291_v31  ;;  %v7834_v31 = vld [vmem:[#allocation20_spill] sm:$0xff] }
  0xb4   : > { %5237 = vmatprep.mubr.f32.mxu1 %v7831_v34  ;;  %5581 = vmatprep.mubr.f32.mxu0 %v7080_v35  ;;  %v5870_v35 = vpack.c.bf16 %v4513_v51, %v4512_v40  ;;  %v4593_v34 = vld [vmem:[%s7712_s3 + $0x438] sm:$0xff]  ;;  %v4595_v40 = vld [vmem:[%s7712_s3 + $0x448] sm:$0xff] }
  0xb5   : > { %5863 = vmatprep.subr.bf16.mxu1 %v5862_v28  ;;  %v3374_v51 = vld [vmem:[#allocation2 + $0x91] sm:$0xff] }
  0xb6   : > { %5238 = vmatmul.mubr.f32.gmra.mrb[2].mxu1 %v7832_v43  ;;  %v7849_v43 = vld [vmem:[#allocation38_spill] sm:$0xff] }
  0xb7   : > { %5582 = vmatmul.mubr.f32.gmra.mrb[18].mxu0 %v7095_v41  ;;  %5240 = vmatprep.mubr.f32.mxu1 %v7833_v12  ;;  %v7835_v41 = vld [vmem:[#allocation22_spill] sm:$0xff] }
  0xb8   : > { %5584 = vmatprep.mubr.f32.mxu0 %v7102_v54  ;;  %5865 = vmatpush3.bf16.msra.mxu1 %v5862_v28  ;;  %v5874_v54 = vpack.c.bf16 %v4515_v24, %v4514_v50  ;;  %v4591_v28 = vld [vmem:[%s7712_s3 + $0x428] sm:$0xff] }
  0xb9   : > { %5867 = vmatprep.subr.bf16.mxu1 %v5866_v37  ;;  %v6026_v13 = vpack.c.bf16 %v4591_v28, %v4590_v45  ;;  %v3376_v50 = vld [vmem:[#allocation2 + $0xa9] sm:$0xff]  ;;  %v7855_v28 = vld [vmem:[#allocation14_spill] sm:$0xff] }
  0xba   : > { %5241 = vmatmul.mubr.f32.gmra.mrb[4].mxu1 %v7834_v31  ;;  %v4597_v31 = vld [vmem:[%s7712_s3 + $0x458] sm:$0xff]  ;;  %v1898_v45 = vld [vmem:[#allocation2 + $0xb0] sm:$0xff] }
  0xbb   : > { %5585 = vmatmul.mubr.f32.gmra.mrb[20].mxu0 %v7115_v23  ;;  %5243 = vmatprep.mubr.f32.mxu1 %v7835_v41  ;;  %v7837_v23 = vld [vmem:[#allocation25_spill] sm:$0xff]  ;;  %v4599_v41 = vld [vmem:[%s7712_s3 + $0x468] sm:$0xff] }
  0xbc   : > { %5587 = vmatprep.mubr.f32.mxu0 %v7124_v3  ;;  %5869 = vmatpush3.bf16.msra.mxu1 %v5866_v37  ;;  %v5878_v3 = vpack.c.bf16 %v4517_v57, %v4516_v61  ;;  %v4601_v61 = vld [vmem:[%s7712_s3 + $0x478] sm:$0xff] }
  0xbd   : > { %5871 = vmatprep.subr.bf16.mxu1 %v5870_v35  ;;  %v7525_v57 = vld [vmem:[#allocation2 + $0xd9] sm:$0xff] }
  0xbe   : > { %5244 = vmatmul.mubr.f32.gmra.mrb[6].mxu1 %v7836_v58 }
  0xbf   : > { %5588 = vmatmul.mubr.f32.gmra.mrb[22].mxu0 %v7139_v18  ;;  %5246 = vmatprep.mubr.f32.mxu1 %v7837_v23  ;;  %v7840_v18 = vld [vmem:[#allocation27_spill] sm:$0xff] }
  0xc0   : > { %5590 = vmatprep.mubr.f32.mxu0 %v7838_v16  ;;  %5873 = vmatpush3.bf16.msra.mxu1 %v5870_v35  ;;  %v4596_v35 = vld [vmem:[%s7712_s3 + $0x450] sm:$0xff]  ;;  %v1885_v16 = vld [vmem:[#allocation2 + $0x18] sm:$0xff] }
  0xc1   : > { %5875 = vmatprep.subr.bf16.mxu1 %v5874_v54  ;;  %v6038_v24 = vpack.c.bf16 %v4597_v31, %v4596_v35  ;;  %v3738_v35 = vld [vmem:[#allocation2 + $0x4a] sm:$0xff]  ;;  %v1904_v31 = vld [vmem:[#allocation2 + $0xf8] sm:$0xff] }
  0xc2   : > { %5247 = vmatmul.mubr.f32.gmra.mrb[8].mxu1 %v7839_v0  ;;  %v7539_v0 = vld [vmem:[#allocation2 + $0x109] sm:$0xff] }
  0xc3   : > { %5591 = vmatmul.mubr.f32.gmra.mrb[24].mxu0 %v7157_v29  ;;  %5249 = vmatprep.mubr.f32.mxu1 %v7840_v18  ;;  %v7843_v29 = vld [vmem:[#allocation31_spill] sm:$0xff] }
  0xc4   : > { %5593 = vmatprep.mubr.f32.mxu0 %v7841_v10  ;;  %5877 = vmatpush3.bf16.msra.mxu1 %v5874_v54  ;;  %v3378_v54 = vld [vmem:[#allocation2 + $0xc1] sm:$0xff]  ;;  %v7850_v10 = vld [vmem:[#allocation5_spill] sm:$0xff] }
  0xc5   : > { %5879 = vmatprep.subr.bf16.mxu1 %v5878_v3  ;;  %v7546_v18 = vld [vmem:[#allocation2 + $0x121] sm:$0xff] }
  0xc6   : > { %5250 = vmatmul.mubr.f32.gmra.mrb[10].mxu1 %v7842_v52  ;;  %v7551_v52 = vld [vmem:[#allocation2 + $0x129] sm:$0xff] }
  0xc7   : > { %5594 = vmatmul.mubr.f32.gmra.mrb[26].mxu0 %v7175_v33  ;;  %5252 = vmatprep.mubr.f32.mxu1 %v7843_v29  ;;  %v3366_v33 = vld [vmem:[#allocation2 + $0x31] sm:$0xff]  ;;  %v7851_v29 = vld [vmem:[#allocation6_spill] sm:$0xff] }
  0xc8   : > { %5596 = vmatprep.mubr.f32.mxu0 %v7450_v42  ;;  %5881 = vmatpush3.bf16.msra.mxu1 %v5878_v3  ;;  %v7532_v3 = vld [vmem:[#allocation2 + $0xf1] sm:$0xff] }
  0xc9   : > { %5883 = vmatprep.subr.bf16.mxu1 %v5882_v20 }
  0xca   : > { %5253 = vmatmul.mubr.f32.gmra.mrb[12].mxu1 %v7844_v21  ;;  %v1893_v21 = vld [vmem:[#allocation2 + $0x78] sm:$0xff] }
  0xcb   : > { %5597 = vmatmul.mubr.f32.gmra.mrb[28].mxu0 %v7462_v38  ;;  %5255 = vmatprep.mubr.f32.mxu1 %v7845_v62  ;;  %v7562_v62 = vld [vmem:[#allocation2 + $0x151] sm:$0xff] }
  0xcc   : > { %5599 = vmatprep.mubr.f32.mxu0 %v3026_v15  ;;  %5885 = vmatpush3.bf16.msra.mxu1 %v5882_v20  ;;  %v1890_v20 = vld [vmem:[#allocation2 + $0x50] sm:$0xff]  ;;  %v1892_v15 = vld [vmem:[#allocation2 + $0x68] sm:$0xff] }
  0xcd   : > { %5887 = vmatprep.subr.bf16.mxu1 %v5886_v1 }
  0xce   : > { %5256 = vmatmul.mubr.f32.gmra.mrb[14].mxu1 %v7846_v2  ;;  %v7567_v2 = vld [vmem:[#allocation2 + $0x159] sm:$0xff] }
  0xcf   : > { %5600 = vmatmul.mubr.f32.gmra.mrb[30].mxu0 %v3027_v47  ;;  %5258 = vmatprep.mubr.f32.mxu1 %v7847_v22  ;;  %v7852_v47 = vld [vmem:[#allocation7_spill] sm:$0xff]  ;;  %v7853_v22 = vld [vmem:[#allocation8_spill] sm:$0xff] }
  0xd0   : > { %5634 = vmatprep.mubr.f32.mxu0 %v3366_v33  ;;  %5889 = vmatpush3.bf16.msra.mxu1 %v5886_v1  ;;  %v7559_v1 = vld [vmem:[#allocation2 + $0x141] sm:$0xff] }
  0xd1   : > { %6050 = vmatprep.subr.bf16.mxu1 %v7848_v19  ;;  %v1894_v33 = vld [vmem:[#allocation2 + $0x80] sm:$0xff] }
  0xd2   : > { %5259 = vmatmul.mubr.f32.gmra.mrb[16].mxu1 %v7178_v60  ;;  %v4592_v60 = vld [vmem:[%s7712_s3 + $0x430] sm:$0xff] }
  0xd3   : > { %5635 = vmatmul.mubr.f32.vlgmr.msra.gmra.mrb[0].mxu0 %v3367_v9  ;;  %5261 = vmatprep.mubr.f32.mxu1 %v7180_v26  ;;  %v3371_v26 = vld [vmem:[#allocation2 + $0x69] sm:$0xff]  ;;  %v6030_v37 = vpack.c.bf16 %v4593_v34, %v4592_v60  ;;  %v1896_v9 = vld [vmem:[#allocation2 + $0x98] sm:$0xff] }
  0xd4   : > { %5637 = vmatprep.mubr.f32.mxu0 %v3368_v49  ;;  %6021 = vmatpush3.bf16.msra.mxu0 %v7387_v17  ;;  %v3372_v17 = vld [vmem:[#allocation2 + $0x79] sm:$0xff]  ;;  %v1897_v49 = vld [vmem:[#allocation2 + $0xa8] sm:$0xff] }
  0xd5   : > { %6023 = vmatprep.subr.bf16.mxu0 %v6022_v55  ;;  %v7858_v60 = vld [vmem:[#allocation15_spill] sm:$0xff] }
  0xd6   : > { %5262 = vmatmul.mubr.f32.gmra.mrb[18].mxu1 %v7194_v53  ;;  %v4594_v53 = vld [vmem:[%s7712_s3 + $0x440] sm:$0xff]  ;;  %v7859_v34 = vmax.f32 %v7858_v60, 0.0 }
  0xd7   : > { %5638 = vmatmul.mubr.f32.gmra.mrb[2].mxu0 %v3369_v4  ;;  %5264 = vmatprep.mubr.f32.mxu1 %v7196_v59  ;;  %v3373_v59 = vld [vmem:[#allocation2 + $0x81] sm:$0xff]  ;;  %v6034_v12 = vpack.c.bf16 %v4595_v40, %v4594_v53  ;;  %v7856_v4 = vmax.f32 %v7855_v28, 0.0  ;;  %v7862_v40 = vld [vmem:[#allocation29_spill] sm:$0xff] }
  0xd8   : > { %5640 = vmatprep.mubr.f32.mxu0 %v3370_v36  ;;  %6025 = vmatpush3.bf16.msra.mxu0 %v6022_v55  ;;  %v7854_v55 = vld [vmem:[#allocation9_spill] sm:$0xff]  ;;  %v1899_v36 = vld [vmem:[#allocation2 + $0xc0] sm:$0xff]  ;;  %v7861_v53 = vld [vmem:[#allocation11_spill] sm:$0xff] }
  0xd9   : > { %6027 = vmatprep.subr.bf16.mxu0 %v6026_v13 }
  0xda   : > { %5265 = vmatmul.mubr.f32.gmra.mrb[20].mxu1 %v7849_v43  ;;  %v3736_v43 = vld [vmem:[#allocation2 + $0x32] sm:$0xff] }
  0xdb   : > { %5641 = vmatmul.mubr.f32.gmra.mrb[4].mxu0 %v3371_v26  ;;  %5267 = vmatprep.mubr.f32.mxu1 %v7212_v46  ;;  %v3375_v46 = vld [vmem:[#allocation2 + $0x99] sm:$0xff]  ;;  %v1900_v26 = vld [vmem:[#allocation2 + $0xc8] sm:$0xff] }
  0xdc   : > { %5643 = vmatprep.mubr.f32.mxu0 %v3372_v17  ;;  %6029 = vmatpush3.bf16.msra.mxu0 %v6026_v13  ;;  %v7857_v13 = vld [vmem:[#allocation10_spill] sm:$0xff]  ;;  %v7860_v17 = vld [vmem:[#allocation28_spill] sm:$0xff] }
  0xdd   : > { %6031 = vmatprep.subr.bf16.mxu0 %v6030_v37 }
  0xde   : > { %5268 = vmatmul.mubr.f32.gmra.mrb[22].mxu1 %v7224_v56  ;;  %v4598_v56 = vld [vmem:[%s7712_s3 + $0x460] sm:$0xff] }
  0xdf   : > { %5644 = vmatmul.mubr.f32.gmra.mrb[6].mxu0 %v3373_v59  ;;  %5270 = vmatprep.mubr.f32.mxu1 %v7226_v8  ;;  %v3377_v8 = vld [vmem:[#allocation2 + $0xb1] sm:$0xff]  ;;  %v6042_v58 = vpack.c.bf16 %v4599_v41, %v4598_v56  ;;  %v1902_v59 = vld [vmem:[#allocation2 + $0xe0] sm:$0xff] }
  0xe0   : > { %5646 = vmatprep.mubr.f32.mxu0 %v3374_v51  ;;  %6033 = vmatpush3.bf16.msra.mxu0 %v6030_v37  ;;  %v1901_v37 = vld [vmem:[#allocation2 + $0xd8] sm:$0xff]  ;;  %v1906_v56 = vld [vmem:[#allocation2 + $0x110] sm:$0xff] }
  0xe1   : > { %6035 = vmatprep.subr.bf16.mxu0 %v6034_v12  ;;  %v3737_v51 = vld [vmem:[#allocation2 + $0x3a] sm:$0xff]  ;;  %v3741_v41 = vld [vmem:[#allocation2 + $0x6a] sm:$0xff] }
  0xe2   : > { %5271 = vmatmul.mubr.f32.gmra.mrb[24].mxu1 %v7238_v11  ;;  %v4600_v11 = vld [vmem:[%s7712_s3 + $0x470] sm:$0xff] }
  0xe3   : > { %5647 = vmatmul.mubr.f32.gmra.mrb[8].mxu0 %v3375_v46  ;;  %5273 = vmatprep.mubr.f32.mxu1 %v7240_v30  ;;  %v3379_v30 = vld [vmem:[#allocation2 + $0xc9] sm:$0xff]  ;;  %v6046_v23 = vpack.c.bf16 %v4601_v61, %v4600_v11  ;;  %v3739_v46 = vld [vmem:[#allocation2 + $0x52] sm:$0xff] }
  0xe4   : > { %5649 = vmatprep.mubr.f32.mxu0 %v3376_v50  ;;  %6037 = vmatpush3.bf16.msra.mxu0 %v6034_v12  ;;  %v1903_v12 = vld [vmem:[#allocation2 + $0xf0] sm:$0xff]  ;;  %v1905_v50 = vld [vmem:[#allocation2 + $0x108] sm:$0xff]  ;;  %v1909_v61 = vld [vmem:[#allocation2 + $0x138] sm:$0xff] }
  0xe5   : > { %6039 = vmatprep.subr.bf16.mxu0 %v6038_v24  ;;  %v3743_v11 = vld [vmem:[#allocation2 + $0x82] sm:$0xff] }
  0xe6   : > { %5274 = vmatmul.mubr.f32.gmra.mrb[26].mxu1 %v7252_v25  ;;  %v7530_v25 = vld [vmem:[#allocation2 + $0xe1] sm:$0xff] }
  0xe7   : > { %5650 = vmatmul.mubr.f32.gmra.mrb[10].mxu0 %v3377_v8  ;;  %5276 = vmatprep.mubr.f32.mxu1 %v7254_v27  ;;  %v1886_v27 = vld [vmem:[#allocation2 + $0x20] sm:$0xff] }
  0xe8   : > { %5652 = vmatprep.mubr.f32.mxu0 %v3378_v54  ;;  %6041 = vmatpush3.bf16.msra.mxu0 %v6038_v24  ;;  %v3740_v24 = vld [vmem:[#allocation2 + $0x62] sm:$0xff]  ;;  %v3742_v54 = vld [vmem:[#allocation2 + $0x7a] sm:$0xff] }
  0xe9   : > { %6043 = vmatprep.subr.bf16.mxu0 %v6042_v58  ;;  %v1907_v8 = vld [vmem:[#allocation2 + $0x120] sm:$0xff] }
  0xea   : > { %5277 = vmatmul.mubr.f32.gmra.mrb[28].mxu1 %v7266_v44  ;;  %v7537_v44 = vld [vmem:[#allocation2 + $0xf9] sm:$0xff] }
  0xeb   : > { %5653 = vmatmul.mubr.f32.gmra.mrb[12].mxu0 %v3379_v30  ;;  %5279 = vmatprep.mubr.f32.mxu1 %v7268_v6  ;;  %v1887_v6 = vld [vmem:[#allocation2 + $0x30] sm:$0xff] }
  0xec   : > { %5655 = vmatprep.mubr.f32.mxu0 %v7525_v57  ;;  %6045 = vmatpush3.bf16.msra.mxu0 %v6042_v58  ;;  %v1908_v58 = vld [vmem:[#allocation2 + $0x128] sm:$0xff]  ;;  %v3744_v30 = vld [vmem:[#allocation2 + $0x92] sm:$0xff] }
  0xed   : > { %6047 = vmatprep.subr.bf16.mxu0 %v6046_v23 }
  0xee   : > { %5280 = vmatmul.mubr.f32.gmra.mrb[30].mxu1 %v7280_v48  ;;  %v7544_v48 = vld [vmem:[#allocation2 + $0x111] sm:$0xff] }
  0xef   : > { %5656 = vmatmul.mubr.f32.gmra.mrb[14].mxu0 %v7530_v25  ;;  %5314 = vmatprep.mubr.f32.mxu1 %v1885_v16  ;;  %v3745_v16 = vld [vmem:[#allocation2 + $0x9a] sm:$0xff] }
  0xf0   : > { %5658 = vmatprep.mubr.f32.mxu0 %v7532_v3  ;;  %6049 = vmatpush3.bf16.msra.mxu0 %v6046_v23  ;;  %v1910_v23 = vld [vmem:[#allocation2 + $0x140] sm:$0xff] }
  0xf2   : > { %5315 = vmatmul.mubr.f32.vlgmr.msra.gmra.mrb[0].mxu1 %v1886_v27  ;;  %v1911_v27 = vld [vmem:[#allocation2 + $0x150] sm:$0xff] }
  0xf3   : > { %5659 = vmatmul.mubr.f32.gmra.mrb[16].mxu0 %v7537_v44  ;;  %6058 = vmatpush3.bf16.msra.mxu1 %v7848_v19  ;;  %v6379_v19 = vld [vmem:[#allocation2 + $0x171] sm:$0xff] }
  0xf4   : > { %5317 = vmatprep.mubr.f32.mxu1 %v1887_v6  ;;  %5661 = vmatprep.mubr.f32.mxu0 %v7539_v0  ;;  %v3746_v6 = vld [vmem:[#allocation2 + $0xaa] sm:$0xff] }
  0xf5   : > { %6051 = vmatprep.subr.bf16.mxu1 %v7850_v10 }
  0xf6   : > { %5318 = vmatmul.mubr.f32.gmra.mrb[2].mxu1 %v1888_v32  ;;  %v1912_v32 = vld [vmem:[#allocation2 + $0x158] sm:$0xff] }
  0xf7   : > { %5662 = vmatmul.mubr.f32.gmra.mrb[18].mxu0 %v7544_v48  ;;  %5320 = vmatprep.mubr.f32.mxu1 %v1889_v39  ;;  %v3747_v39 = vld [vmem:[#allocation2 + $0xb2] sm:$0xff] }
  0xf8   : > { %5664 = vmatprep.mubr.f32.mxu0 %v7546_v18  ;;  %6059 = vmatpush3.bf16.msra.mxu1 %v7850_v10  ;;  %v1913_v10 = vld [vmem:[#allocation2 + $0x168] sm:$0xff] }
  0xf9   : > { %6052 = vmatprep.subr.bf16.mxu1 %v7851_v29 }
  0xfa   : > { %5321 = vmatmul.mubr.f32.gmra.mrb[4].mxu1 %v1890_v20  ;;  %v3748_v20 = vld [vmem:[#allocation2 + $0xc2] sm:$0xff] }
  0xfb   : > { %5665 = vmatmul.mubr.f32.gmra.mrb[20].mxu0 %v7551_v52  ;;  %5323 = vmatprep.mubr.f32.mxu1 %v1891_v7  ;;  %v1914_v7 = vld [vmem:[#allocation2 + $0x170] sm:$0xff] }
  0xfc   : > { %5667 = vmatprep.mubr.f32.mxu0 %v7554_v5  ;;  %6060 = vmatpush3.bf16.msra.mxu1 %v7851_v29  ;;  %v3749_v29 = vld [vmem:[#allocation2 + $0xca] sm:$0xff] }
  0xfd   : > { %6053 = vmatprep.subr.bf16.mxu1 %v7852_v47 }
  0xfe   : > { %5324 = vmatmul.mubr.f32.gmra.mrb[6].mxu1 %v1892_v15  ;;  %v3750_v15 = vld [vmem:[#allocation2 + $0xda] sm:$0xff] }
  0xff   : > { %5668 = vmatmul.mubr.f32.gmra.mrb[22].mxu0 %v7559_v1  ;;  %5326 = vmatprep.mubr.f32.mxu1 %v1893_v21  ;;  %v3751_v21 = vld [vmem:[#allocation2 + $0xe2] sm:$0xff] }
 0x100   : > { %5670 = vmatprep.mubr.f32.mxu0 %v7562_v62  ;;  %6061 = vmatpush3.bf16.msra.mxu1 %v7852_v47  ;;  %v3752_v47 = vld [vmem:[#allocation2 + $0xf2] sm:$0xff] }
 0x101   : > { %6054 = vmatprep.subr.bf16.mxu1 %v7853_v22 }
 0x102   : > { %5327 = vmatmul.mubr.f32.gmra.mrb[8].mxu1 %v1894_v33  ;;  %v3753_v33 = vld [vmem:[#allocation2 + $0xfa] sm:$0xff] }
 0x103   : > { %5671 = vmatmul.mubr.f32.gmra.mrb[24].mxu0 %v7567_v2  ;;  %5329 = vmatprep.mubr.f32.mxu1 %v1895_v14  ;;  %v3754_v14 = vld [vmem:[#allocation2 + $0x10a] sm:$0xff] }
 0x104   : > { %5673 = vmatprep.mubr.f32.mxu0 %v7570_v63  ;;  %6062 = vmatpush3.bf16.msra.mxu1 %v7853_v22  ;;  %v3755_v22 = vld [vmem:[#allocation2 + $0x112] sm:$0xff] }
 0x105   : > { %6055 = vmatprep.subr.bf16.mxu1 %v7854_v55 }
 0x106   : > { %5330 = vmatmul.mubr.f32.gmra.mrb[10].mxu1 %v1896_v9  ;;  %v3756_v9 = vld [vmem:[#allocation2 + $0x122] sm:$0xff] }
 0x107   : > { %5674 = vmatmul.mubr.f32.gmra.mrb[26].mxu0 %v6379_v19  ;;  %5332 = vmatprep.mubr.f32.mxu1 %v1897_v49  ;;  %v3766_v49 = vld [vmem:[#allocation2 + $0x19a] sm:$0xff] }
 0x108   : > { %5676 = vmatprep.mubr.f32.mxu0 %v7856_v4  ;;  %6063 = vmatpush3.bf16.msra.mxu1 %v7854_v55  ;;  %v3767_v55 = vld [vmem:[#allocation2 + $0x1a2] sm:$0xff] }
 0x109   : > { %6056 = vmatprep.subr.bf16.mxu1 %v7857_v13 }
 0x10a   : > { %5333 = vmatmul.mubr.f32.gmra.mrb[12].mxu1 %v1898_v45 }
 0x10b   : > { %5677 = vmatmul.mubr.f32.gmra.mrb[28].mxu0 %v7859_v34  ;;  %5335 = vmatprep.mubr.f32.mxu1 %v1899_v36 }
 0x10c   : > { %5679 = vmatprep.mubr.f32.mxu0 %v7860_v17  ;;  %6064 = vmatpush3.bf16.msra.mxu1 %v7857_v13 }
 0x10d   : > { %6057 = vmatprep.subr.bf16.mxu1 %v7861_v53 }
 0x10e   : > { %5336 = vmatmul.mubr.f32.gmra.mrb[14].mxu1 %v1900_v26 }
 0x10f   : > { %5680 = vmatmul.mubr.f32.gmra.mrb[30].mxu0 %v7862_v40  ;;  %5338 = vmatprep.mubr.f32.mxu1 %v1901_v37 }
 0x110   : > { %5714 = vmatprep.mubr.f32.mxu0 %v3736_v43  ;;  %6065 = vmatpush3.bf16.msra.mxu1 %v7861_v53  ;;  %v7616_v53 = vld [vmem:[%s7713_s4] ss:$0 sm:$0xff] }
 0x112   : > { %5339 = vmatmul.mubr.f32.gmra.mrb[16].mxu1 %v1902_v59 }
 0x113   : > { %5715 = vmatmul.mubr.f32.vlgmr.msra.gmra.mrb[0].mxu0 %v3737_v51  ;;  %5341 = vmatprep.mubr.f32.mxu1 %v1903_v12 }
 0x114   : > { %5717 = vmatprep.mubr.f32.mxu0 %v3738_v35 }
 0x116   : > { %5342 = vmatmul.mubr.f32.gmra.mrb[18].mxu1 %v1904_v31 }
 0x117   : > { %5718 = vmatmul.mubr.f32.gmra.mrb[2].mxu0 %v3739_v46  ;;  %5344 = vmatprep.mubr.f32.mxu1 %v1905_v50 }
 0x118   : > { %5720 = vmatprep.mubr.f32.mxu0 %v3740_v24 }
 0x11a   : > { %5345 = vmatmul.mubr.f32.gmra.mrb[20].mxu1 %v1906_v56 }
 0x11b   : > { %5721 = vmatmul.mubr.f32.gmra.mrb[4].mxu0 %v3741_v41  ;;  %5347 = vmatprep.mubr.f32.mxu1 %v1907_v8 }
 0x11c   : > { %5723 = vmatprep.mubr.f32.mxu0 %v3742_v54 }
 0x11e   : > { %5348 = vmatmul.mubr.f32.gmra.mrb[22].mxu1 %v1908_v58 }
 0x11f   : > { %5724 = vmatmul.mubr.f32.gmra.mrb[6].mxu0 %v3743_v11  ;;  %5350 = vmatprep.mubr.f32.mxu1 %v1909_v61 }
 0x120   : > { %5726 = vmatprep.mubr.f32.mxu0 %v3744_v30 }
 0x122   : > { %5351 = vmatmul.mubr.f32.gmra.mrb[24].mxu1 %v1910_v23 }
 0x123   : > { %5727 = vmatmul.mubr.f32.gmra.mrb[8].mxu0 %v3745_v16  ;;  %5353 = vmatprep.mubr.f32.mxu1 %v1911_v27 }
 0x124   : > { %5729 = vmatprep.mubr.f32.mxu0 %v3746_v6 }
 0x126   : > { %5354 = vmatmul.mubr.f32.gmra.mrb[26].mxu1 %v1912_v32 }
 0x127   : > { %5730 = vmatmul.mubr.f32.gmra.mrb[10].mxu0 %v3747_v39  ;;  %5356 = vmatprep.mubr.f32.mxu1 %v1913_v10 }
 0x128   : > { %5732 = vmatprep.mubr.f32.mxu0 %v3748_v20 }
 0x12a   : > { %5357 = vmatmul.mubr.f32.gmra.mrb[28].mxu1 %v1914_v7 }
 0x12b   : > { %5733 = vmatmul.mubr.f32.gmra.mrb[12].mxu0 %v3749_v29  ;;  %5359 = vmatprep.mubr.f32.mxu1 %v7450_v42  ;;  %v3757_v42 = vld [vmem:[#allocation2 + $0x12a] sm:$0xff] }
 0x12c   : > { %5735 = vmatprep.mubr.f32.mxu0 %v3750_v15 }
 0x12e   : > { %5360 = vmatmul.mubr.f32.gmra.mrb[30].mxu1 %v7462_v38  ;;  %v3758_v38 = vld [vmem:[#allocation2 + $0x13a] sm:$0xff] }
 0x12f   : > { %5736 = vmatmul.mubr.f32.gmra.mrb[14].mxu0 %v3751_v21  ;;  %5418 = vmatprep.mubr.f32.mxu1 %v7525_v57  ;;  %v3759_v57 = vld [vmem:[#allocation2 + $0x142] sm:$0xff] }
 0x130   : > { %5738 = vmatprep.mubr.f32.mxu0 %v3752_v47 }
 0x132   : > { %5419 = vmatmul.mubr.f32.vlgmr.msra.gmra.mrb[16].mxu1 %v7530_v25  ;;  %v3760_v25 = vld [vmem:[#allocation2 + $0x152] sm:$0xff] }
 0x133   : > { %5739 = vmatmul.mubr.f32.gmra.mrb[16].mxu0 %v3753_v33  ;;  %5421 = vmatprep.mubr.f32.mxu1 %v7532_v3  ;;  %v3761_v3 = vld [vmem:[#allocation2 + $0x15a] sm:$0xff] }
 0x134   : > { %5741 = vmatprep.mubr.f32.mxu0 %v3754_v14 }
 0x136   : > { %5422 = vmatmul.mubr.f32.gmra.mrb[18].mxu1 %v7537_v44  ;;  %v3762_v44 = vld [vmem:[#allocation2 + $0x16a] sm:$0xff] }
 0x137   : > { %5742 = vmatmul.mubr.f32.gmra.mrb[18].mxu0 %v3755_v22  ;;  %5424 = vmatprep.mubr.f32.mxu1 %v7539_v0  ;;  %v3763_v0 = vld [vmem:[#allocation2 + $0x172] sm:$0xff] }
 0x138   : > { %5744 = vmatprep.mubr.f32.mxu0 %v3756_v9 }
 0x13a   : > { %5425 = vmatmul.mubr.f32.gmra.mrb[20].mxu1 %v7544_v48  ;;  %v3764_v48 = vld [vmem:[#allocation2 + $0x182] sm:$0xff] }
 0x13b   : > { %5745 = vmatmul.mubr.f32.gmra.mrb[20].mxu0 %v3757_v42  ;;  %5427 = vmatprep.mubr.f32.mxu1 %v7546_v18  ;;  %v2284_v18 = vld [vmem:[#allocation2 + $0x171] sm:$0xff] }
 0x13c   : > { %5747 = vmatprep.mubr.f32.mxu0 %v3758_v38 }
 0x13e   : > { %5428 = vmatmul.mubr.f32.gmra.mrb[22].mxu1 %v7551_v52  ;;  %v3765_v52 = vld [vmem:[#allocation2 + $0x18a] sm:$0xff] }
 0x13f   : > { %5748 = vmatmul.mubr.f32.gmra.mrb[22].mxu0 %v3759_v57  ;;  %5430 = vmatprep.mubr.f32.mxu1 %v7554_v5  ;;  %v2285_v5 = vld [vmem:[#allocation2 + $0x181] sm:$0xff] }
 0x140   : > { %5750 = vmatprep.mubr.f32.mxu0 %v3760_v25 }
 0x142   : > { %5431 = vmatmul.mubr.f32.gmra.mrb[24].mxu1 %v7559_v1  ;;  %v2286_v1 = vld [vmem:[#allocation2 + $0x189] sm:$0xff] }
 0x143   : > { %5751 = vmatmul.mubr.f32.gmra.mrb[24].mxu0 %v3761_v3  ;;  %5433 = vmatprep.mubr.f32.mxu1 %v7562_v62 }
 0x144   : > { %5753 = vmatprep.mubr.f32.mxu0 %v3762_v44 }
 0x146   : > { %5434 = vmatmul.mubr.f32.gmra.mrb[26].mxu1 %v7567_v2 }
 0x147   : > { %5754 = vmatmul.mubr.f32.gmra.mrb[26].mxu0 %v3763_v0  ;;  %5436 = vmatprep.mubr.f32.mxu1 %v7570_v63 }
 0x148   : > { %5756 = vmatprep.mubr.f32.mxu0 %v3764_v48 }
 0x14a   : > { %5437 = vmatmul.mubr.f32.gmra.mrb[28].mxu1 %v2284_v18 }
 0x14b   : > { %5757 = vmatmul.mubr.f32.gmra.mrb[28].mxu0 %v3765_v52  ;;  %5439 = vmatprep.mubr.f32.mxu1 %v2285_v5 }
 0x14c   : > { %5759 = vmatprep.mubr.f32.mxu0 %v3766_v49 }
 0x14e   : > { %5440 = vmatmul.mubr.f32.gmra.mrb[30].mxu1 %v2286_v1 }
 0x14f   : > { %5760 = vmatmul.mubr.f32.gmra.mrb[30].mxu0 %v3767_v55 }
 0x1c5   : > { %v5316_v62 = vpop.f32.mrb[0].mxu1 }
 0x1c6   : > { %v2032_v19 = vpop.f32.mrb[1].mxu1  ;;  %v6066_v59 = vadd.f32 %v5316_v62, %v7616_v53 }
 0x1c7   : > { %v6068_v51 = vadd.f32 %v7616_v53, %v2032_v19 }
 0x1c9   : > { %v5319_v45 = vpop.f32.mrb[2].mxu1 }
 0x1ca   : > { %v2042_v2 = vpop.f32.mrb[3].mxu1  ;;  %v6070_v50 = vadd.f32 %v5319_v45, %v7616_v53 }
 0x1cb   : > { %v6072_v56 = vadd.f32 %v7616_v53, %v2042_v2 }
 0x1cd   : > { %v5322_v28 = vpop.f32.mrb[4].mxu1 }
 0x1ce   : > { %v2052_v63 = vpop.f32.mrb[5].mxu1  ;;  %v6074_v23 = vadd.f32 %v5322_v28, %v7616_v53 }
 0x1cf   : > { %v6076_v16 = vadd.f32 %v7616_v53, %v2052_v63 }
 0x1d1   : > { %v5325_v4 = vpop.f32.mrb[6].mxu1 }
 0x1d2   : > { %v2062_v36 = vpop.f32.mrb[7].mxu1  ;;  %v6078_v21 = vadd.f32 %v5325_v4, %v7616_v53 }
 0x1d3   : > { %v6080_v47 = vadd.f32 %v7616_v53, %v2062_v36 }
 0x1d5   : > { %v5328_v13 = vpop.f32.mrb[8].mxu1 }
 0x1d6   : > { %v2072_v60 = vpop.f32.mrb[9].mxu1  ;;  %v6082_v0 = vadd.f32 %v5328_v13, %v7616_v53 }
 0x1d7   : > { %v6084_v48 = vadd.f32 %v7616_v53, %v2072_v60 }
 0x1d9   : > { %v7603_v34 = vpop.f32.mrb[10].mxu1 }
 0x1da   : > { %v7605_v26 = vpop.f32.mrb[11].mxu1  ;;  %v6086_v28 = vadd.f32 %v7603_v34, %v7616_v53 }
 0x1db   : > { %v6088_v63 = vadd.f32 %v7616_v53, %v7605_v26 }
 0x1dd   : > { %v7607_v17 = vpop.f32.mrb[12].mxu1 }
 0x1de   : > { %v7609_v37 = vpop.f32.mrb[13].mxu1  ;;  %v6090_v34 = vadd.f32 %v7607_v17, %v7616_v53 }
 0x1df   : > { %v6092_v26 = vadd.f32 %v7616_v53, %v7609_v37 }
 0x1e1   : > { %v7611_v43 = vpop.f32.mrb[14].mxu1 }
 0x1e2   : > { %v7618_v40 = vpop.f32.mrb[15].mxu1  ;;  %v6094_v17 = vadd.f32 %v7611_v43, %v7616_v53 }
 0x1e3   : > { %v6096_v37 = vadd.f32 %v7616_v53, %v7618_v40 }
 0x1e6   : > { %v5716_v12 = vpop.f32.mrb[0].mxu0 }
 0x1e7   : > { %v6067_v35 = vadd.f32 %v6066_v59, %v5716_v12  ;;  %v3883_v31 = vpop.f32.mrb[1].mxu0 }
 0x1e8   : > { %v6069_v46 = vadd.f32 %v6068_v51, %v3883_v31 }
 0x1e9   : > { %v4177_v24 = vmul.f32 %v6067_v35, %v6067_v35  ;;  %4247 = vst [vmem:[%s7625_s14 + $0x8] sm:$0xff] %v6067_v35 }
 0x1ea   : > { %v4138_v41 = vadd.f32 %v6069_v46, %v6067_v35  ;;  %v4176_v8 = vmul.f32 %v6069_v46, %v6069_v46  ;;  %4246 = vst [vmem:[%s7625_s14] sm:$0xff] %v6069_v46  ;;  %v5719_v54 = vpop.f32.mrb[2].mxu0 }
 0x1eb   : > { %v6071_v58 = vadd.f32 %v6070_v50, %v5719_v54  ;;  %v3893_v11 = vpop.f32.mrb[3].mxu0 }
 0x1ec   : > { %v4208_v61 = vadd.f32 %v4177_v24, %v4176_v8  ;;  %v6073_v30 = vadd.f32 %v6072_v56, %v3893_v11 }
 0x1ed   : > { %4249 = vst [vmem:[%s7625_s14 + $0x18] sm:$0xff] %v6071_v58  ;;  %v4179_v20 = vmul.f32 %v6071_v58, %v6071_v58 }
 0x1ee   : > { %v4139_v27 = vadd.f32 %v6073_v30, %v4138_v41  ;;  %v4178_v6 = vmul.f32 %v6073_v30, %v6073_v30  ;;  %4248 = vst [vmem:[%s7625_s14 + $0x10] sm:$0xff] %v6073_v30  ;;  %v5722_v32 = vpop.f32.mrb[4].mxu0 }
 0x1ef   : > { %v6075_v39 = vadd.f32 %v6074_v23, %v5722_v32  ;;  %v3903_v10 = vpop.f32.mrb[5].mxu0 }
 0x1f0   : > { %v4209_v7 = vadd.f32 %v4208_v61, %v4178_v6  ;;  %v6077_v29 = vadd.f32 %v6076_v16, %v3903_v10  ;;  %v4140_v15 = vadd.f32 %v6071_v58, %v4139_v27 }
 0x1f1   : > { %4251 = vst [vmem:[%s7625_s14 + $0x28] sm:$0xff] %v6075_v39  ;;  %v4181_v57 = vmul.f32 %v6075_v39, %v6075_v39 }
 0x1f2   : > { %v4141_v33 = vadd.f32 %v6077_v29, %v4140_v15  ;;  %v4180_v14 = vmul.f32 %v6077_v29, %v6077_v29  ;;  %v4210_v22 = vadd.f32 %v4209_v7, %v4179_v20  ;;  %4250 = vst [vmem:[%s7625_s14 + $0x20] sm:$0xff] %v6077_v29  ;;  %v5725_v9 = vpop.f32.mrb[6].mxu0 }
 0x1f3   : > { %v6079_v42 = vadd.f32 %v6078_v21, %v5725_v9  ;;  %v3913_v38 = vpop.f32.mrb[7].mxu0 }
 0x1f4   : > { %v4211_v25 = vadd.f32 %v4210_v22, %v4180_v14  ;;  %v6081_v3 = vadd.f32 %v6080_v47, %v3913_v38  ;;  %v4142_v44 = vadd.f32 %v6075_v39, %v4141_v33 }
 0x1f5   : > { %4253 = vst [vmem:[%s7625_s14 + $0x38] sm:$0xff] %v6079_v42  ;;  %v4183_v62 = vmul.f32 %v6079_v42, %v6079_v42 }
 0x1f6   : > { %v4143_v18 = vadd.f32 %v6081_v3, %v4142_v44  ;;  %v4182_v52 = vmul.f32 %v6081_v3, %v6081_v3  ;;  %v4212_v5 = vadd.f32 %v4211_v25, %v4181_v57  ;;  %4252 = vst [vmem:[%s7625_s14 + $0x30] sm:$0xff] %v6081_v3  ;;  %v5728_v49 = vpop.f32.mrb[8].mxu0 }
 0x1f7   : > { %v6083_v1 = vadd.f32 %v6082_v0, %v5728_v49  ;;  %v3923_v55 = vpop.f32.mrb[9].mxu0 }
 0x1f8   : > { %v4213_v19 = vadd.f32 %v4212_v5, %v4182_v52  ;;  %v6085_v45 = vadd.f32 %v6084_v48, %v3923_v55  ;;  %v4144_v2 = vadd.f32 %v6079_v42, %v4143_v18 }
 0x1f9   : > { %4255 = vst [vmem:[%s7625_s14 + $0x48] sm:$0xff] %v6083_v1  ;;  %v4185_v12 = vmul.f32 %v6083_v1, %v6083_v1 }
 0x1fa   : > { %v4145_v4 = vadd.f32 %v6085_v45, %v4144_v2  ;;  %v4184_v36 = vmul.f32 %v6085_v45, %v6085_v45  ;;  %v4214_v13 = vadd.f32 %v4213_v19, %v4183_v62  ;;  %4254 = vst [vmem:[%s7625_s14 + $0x40] sm:$0xff] %v6085_v45  ;;  %v5731_v60 = vpop.f32.mrb[10].mxu0 }
 0x1fb   : > { %v6087_v59 = vadd.f32 %v6086_v28, %v5731_v60  ;;  %v3933_v51 = vpop.f32.mrb[11].mxu0 }
 0x1fc   : > { %v4215_v35 = vadd.f32 %v4214_v13, %v4184_v36  ;;  %v6089_v31 = vadd.f32 %v6088_v63, %v3933_v51  ;;  %v4146_v46 = vadd.f32 %v6083_v1, %v4145_v4 }
 0x1fd   : > { %4257 = vst [vmem:[%s7625_s14 + $0x58] sm:$0xff] %v6087_v59  ;;  %v4187_v58 = vmul.f32 %v6087_v59, %v6087_v59 }
 0x1fe   : > { %v4147_v50 = vadd.f32 %v6089_v31, %v4146_v46  ;;  %v4186_v24 = vmul.f32 %v6089_v31, %v6089_v31  ;;  %v4216_v56 = vadd.f32 %v4215_v35, %v4185_v12  ;;  %4256 = vst [vmem:[%s7625_s14 + $0x50] sm:$0xff] %v6089_v31  ;;  %v5734_v41 = vpop.f32.mrb[12].mxu0 }
 0x1ff   : > { %v6091_v8 = vadd.f32 %v6090_v34, %v5734_v41  ;;  %v3943_v54 = vpop.f32.mrb[13].mxu0 }
 0x200   : > { %v4217_v11 = vadd.f32 %v4216_v56, %v4186_v24  ;;  %v6093_v61 = vadd.f32 %v6092_v26, %v3943_v54  ;;  %v4148_v30 = vadd.f32 %v6087_v59, %v4147_v50 }
 0x201   : > { %4259 = vst [vmem:[%s7625_s14 + $0x68] sm:$0xff] %v6091_v8  ;;  %v4189_v10 = vmul.f32 %v6091_v8, %v6091_v8 }
 0x202   : > { %v4149_v23 = vadd.f32 %v6093_v61, %v4148_v30  ;;  %v4188_v16 = vmul.f32 %v6093_v61, %v6093_v61  ;;  %v4218_v27 = vadd.f32 %v4217_v11, %v4187_v58  ;;  %4258 = vst [vmem:[%s7625_s14 + $0x60] sm:$0xff] %v6093_v61  ;;  %v5737_v6 = vpop.f32.mrb[14].mxu0 }
 0x203   : > { %v6095_v32 = vadd.f32 %v6094_v17, %v5737_v6  ;;  %v3953_v39 = vpop.f32.mrb[15].mxu0 }
 0x204   : > { %v4219_v20 = vadd.f32 %v4218_v27, %v4188_v16  ;;  %v6097_v7 = vadd.f32 %v6096_v37, %v3953_v39  ;;  %v4150_v29 = vadd.f32 %v6091_v8, %v4149_v23 }
 0x205   : > { %4261 = vst [vmem:[%s7625_s14 + $0x78] sm:$0xff] %v6095_v32  ;;  %v5420_v15 = vpop.f32.mrb[16].mxu1  ;;  %v4191_v42 = vmul.f32 %v6095_v32, %v6095_v32 }
 0x206   : > { %v4151_v43 = vadd.f32 %v6097_v7, %v4150_v29  ;;  %v4190_v21 = vmul.f32 %v6097_v7, %v6097_v7  ;;  %v4220_v47 = vadd.f32 %v4219_v20, %v4189_v10  ;;  %4260 = vst [vmem:[%s7625_s14 + $0x70] sm:$0xff] %v6097_v7  ;;  %v6098_v40 = vadd.f32 %v5420_v15, %v7616_v53  ;;  %v5740_v33 = vpop.f32.mrb[16].mxu0  ;;  %v2482_v14 = vpop.f32.mrb[17].mxu1 }
 0x207   : > { %v6100_v22 = vadd.f32 %v7616_v53, %v2482_v14  ;;  %v3963_v9 = vpop.f32.mrb[17].mxu0 }
 0x208   : > { %v4221_v38 = vadd.f32 %v4220_v47, %v4190_v21  ;;  %v6099_v57 = vadd.f32 %v6098_v40, %v5740_v33  ;;  %v4152_v25 = vadd.f32 %v6095_v32, %v4151_v43 }
 0x209   : > { %v6101_v3 = vadd.f32 %v6100_v22, %v3963_v9  ;;  %v5423_v44 = vpop.f32.mrb[18].mxu1 }
 0x20a   : > { %4263 = vst [vmem:[%s7625_s14 + $0x88] sm:$0xff] %v6099_v57  ;;  %v4222_v0 = vadd.f32 %v4221_v38, %v4191_v42  ;;  %v6102_v48 = vadd.f32 %v5423_v44, %v7616_v53  ;;  %v5743_v18 = vpop.f32.mrb[18].mxu0  ;;  %v2492_v52 = vpop.f32.mrb[19].mxu1  ;;  %v4193_v19 = vmul.f32 %v6099_v57, %v6099_v57 }
 0x20b   : > { %v4153_v5 = vadd.f32 %v6101_v3, %v4152_v25  ;;  %v4192_v49 = vmul.f32 %v6101_v3, %v6101_v3  ;;  %4262 = vst [vmem:[%s7625_s14 + $0x80] sm:$0xff] %v6101_v3  ;;  %v6104_v1 = vadd.f32 %v7616_v53, %v2492_v52  ;;  %v3973_v55 = vpop.f32.mrb[19].mxu0 }
 0x20c   : > { %v6103_v62 = vadd.f32 %v6102_v48, %v5743_v18 }
 0x20d   : > { %v4223_v45 = vadd.f32 %v4222_v0, %v4192_v49  ;;  %v6105_v2 = vadd.f32 %v6104_v1, %v3973_v55  ;;  %v4154_v28 = vadd.f32 %v6099_v57, %v4153_v5  ;;  %v5426_v63 = vpop.f32.mrb[20].mxu1 }
 0x20e   : > { %4265 = vst [vmem:[%s7625_s14 + $0x98] sm:$0xff] %v6103_v62  ;;  %v6106_v4 = vadd.f32 %v5426_v63, %v7616_v53  ;;  %v5746_v36 = vpop.f32.mrb[20].mxu0  ;;  %v2502_v13 = vpop.f32.mrb[21].mxu1  ;;  %v4195_v46 = vmul.f32 %v6103_v62, %v6103_v62 }
 0x20f   : > { %v4155_v60 = vadd.f32 %v6105_v2, %v4154_v28  ;;  %v4194_v59 = vmul.f32 %v6105_v2, %v6105_v2  ;;  %v4224_v51 = vadd.f32 %v4223_v45, %v4193_v19  ;;  %4264 = vst [vmem:[%s7625_s14 + $0x90] sm:$0xff] %v6105_v2  ;;  %v6108_v12 = vadd.f32 %v7616_v53, %v2502_v13  ;;  %v3983_v35 = vpop.f32.mrb[21].mxu0 }
 0x210   : > { %v6107_v31 = vadd.f32 %v6106_v4, %v5746_v36 }
 0x211   : > { %v4225_v34 = vadd.f32 %v4224_v51, %v4194_v59  ;;  %v6109_v26 = vadd.f32 %v6108_v12, %v3983_v35  ;;  %v4156_v50 = vadd.f32 %v6103_v62, %v4155_v60  ;;  %v5429_v24 = vpop.f32.mrb[22].mxu1 }
 0x212   : > { %4267 = vst [vmem:[%s7625_s14 + $0xa8] sm:$0xff] %v6107_v31  ;;  %v6110_v56 = vadd.f32 %v5429_v24, %v7616_v53  ;;  %v5749_v41 = vpop.f32.mrb[22].mxu0  ;;  %v2512_v8 = vpop.f32.mrb[23].mxu1  ;;  %v4197_v37 = vmul.f32 %v6107_v31, %v6107_v31 }
 0x213   : > { %v4157_v54 = vadd.f32 %v6109_v26, %v4156_v50  ;;  %v4196_v58 = vmul.f32 %v6109_v26, %v6109_v26  ;;  %v4226_v11 = vadd.f32 %v4225_v34, %v4195_v46  ;;  %4266 = vst [vmem:[%s7625_s14 + $0xa0] sm:$0xff] %v6109_v26  ;;  %v6112_v61 = vadd.f32 %v7616_v53, %v2512_v8  ;;  %v3993_v30 = vpop.f32.mrb[23].mxu0 }
 0x214   : > { %v6111_v17 = vadd.f32 %v6110_v56, %v5749_v41 }
 0x215   : > { %v4227_v23 = vadd.f32 %v4226_v11, %v4196_v58  ;;  %v6113_v16 = vadd.f32 %v6112_v61, %v3993_v30  ;;  %v4158_v27 = vadd.f32 %v6107_v31, %v4157_v54  ;;  %v5432_v6 = vpop.f32.mrb[24].mxu1 }
 0x216   : > { %4269 = vst [vmem:[%s7625_s14 + $0xb8] sm:$0xff] %v6111_v17  ;;  %v6114_v32 = vadd.f32 %v5432_v6, %v7616_v53  ;;  %v5752_v39 = vpop.f32.mrb[24].mxu0  ;;  %v2522_v10 = vpop.f32.mrb[25].mxu1  ;;  %v4199_v47 = vmul.f32 %v6111_v17, %v6111_v17 }
 0x217   : > { %v4159_v20 = vadd.f32 %v6113_v16, %v4158_v27  ;;  %v4198_v7 = vmul.f32 %v6113_v16, %v6113_v16  ;;  %v4228_v29 = vadd.f32 %v4227_v23, %v4197_v37  ;;  %4268 = vst [vmem:[%s7625_s14 + $0xb0] sm:$0xff] %v6113_v16  ;;  %v6116_v15 = vadd.f32 %v7616_v53, %v2522_v10  ;;  %v4003_v43 = vpop.f32.mrb[25].mxu0 }
 0x218   : > { %v6115_v21 = vadd.f32 %v6114_v32, %v5752_v39 }
 0x219   : > { %v4229_v40 = vadd.f32 %v4228_v29, %v4198_v7  ;;  %v6117_v33 = vadd.f32 %v6116_v15, %v4003_v43  ;;  %v4160_v14 = vadd.f32 %v6111_v17, %v4159_v20  ;;  %v5435_v22 = vpop.f32.mrb[26].mxu1 }
 0x21a   : > { %4271 = vst [vmem:[%s7625_s14 + $0xc8] sm:$0xff] %v6115_v21  ;;  %v6118_v9 = vadd.f32 %v5435_v22, %v7616_v53  ;;  %v5755_v42 = vpop.f32.mrb[26].mxu0  ;;  %v2532_v38 = vpop.f32.mrb[27].mxu1  ;;  %v4201_v18 = vmul.f32 %v6115_v21, %v6115_v21 }
 0x21b   : > { %v4161_v57 = vadd.f32 %v6117_v33, %v4160_v14  ;;  %v4200_v25 = vmul.f32 %v6117_v33, %v6117_v33  ;;  %v4230_v3 = vadd.f32 %v4229_v40, %v4199_v47  ;;  %4270 = vst [vmem:[%s7625_s14 + $0xc0] sm:$0xff] %v6117_v33  ;;  %v6120_v44 = vadd.f32 %v7616_v53, %v2532_v38  ;;  %v4013_v0 = vpop.f32.mrb[27].mxu0 }
 0x21c   : > { %v6119_v48 = vadd.f32 %v6118_v9, %v5755_v42 }
 0x21d   : > { %v4231_v52 = vadd.f32 %v4230_v3, %v4200_v25  ;;  %v6121_v5 = vadd.f32 %v6120_v44, %v4013_v0  ;;  %v4162_v49 = vadd.f32 %v6115_v21, %v4161_v57  ;;  %v5438_v1 = vpop.f32.mrb[28].mxu1 }
 0x21e   : > { %4273 = vst [vmem:[%s7625_s14 + $0xd8] sm:$0xff] %v6119_v48  ;;  %v6122_v55 = vadd.f32 %v5438_v1, %v7616_v53  ;;  %v5758_v62 = vpop.f32.mrb[28].mxu0  ;;  %v2542_v19 = vpop.f32.mrb[29].mxu1  ;;  %v4203_v13 = vmul.f32 %v6119_v48, %v6119_v48 }
 0x21f   : > { %v4163_v45 = vadd.f32 %v6121_v5, %v4162_v49  ;;  %v4202_v2 = vmul.f32 %v6121_v5, %v6121_v5  ;;  %v4232_v28 = vadd.f32 %v4231_v52, %v4201_v18  ;;  %4272 = vst [vmem:[%s7625_s14 + $0xd0] sm:$0xff] %v6121_v5  ;;  %v6124_v63 = vadd.f32 %v7616_v53, %v2542_v19  ;;  %v4023_v4 = vpop.f32.mrb[29].mxu0 }
 0x220   : > { %v6123_v36 = vadd.f32 %v6122_v55, %v5758_v62 }
 0x221   : > { %v4233_v60 = vadd.f32 %v4232_v28, %v4202_v2  ;;  %v6125_v59 = vadd.f32 %v6124_v63, %v4023_v4  ;;  %v4164_v51 = vadd.f32 %v6119_v48, %v4163_v45  ;;  %v5441_v12 = vpop.f32.mrb[30].mxu1 }
 0x222   : > { %4275 = vst [vmem:[%s7625_s14 + $0xe8] sm:$0xff] %v6123_v36  ;;  %v6126_v35 = vadd.f32 %v5441_v12, %v7616_v53  ;;  %v5761_v31 = vpop.f32.mrb[30].mxu0  ;;  %v2552_v46 = vpop.f32.mrb[31].mxu1  ;;  %v4205_v8 = vmul.f32 %v6123_v36, %v6123_v36 }
 0x223   : > { %v4165_v34 = vadd.f32 %v6125_v59, %v4164_v51  ;;  %v4204_v26 = vmul.f32 %v6125_v59, %v6125_v59  ;;  %v4234_v50 = vadd.f32 %v4233_v60, %v4203_v13  ;;  %4274 = vst [vmem:[%s7625_s14 + $0xe0] sm:$0xff] %v6125_v59  ;;  %v6128_v24 = vadd.f32 %v7616_v53, %v2552_v46  ;;  %v4033_v56 = vpop.f32.mrb[31].mxu0 }
 0x224   : > { %v6127_v41 = vadd.f32 %v6126_v35, %v5761_v31 }
 0x225   : > { %v4235_v54 = vadd.f32 %v4234_v50, %v4204_v26  ;;  %v6129_v58 = vadd.f32 %v6128_v24, %v4033_v56  ;;  %v4166_v11 = vadd.f32 %v6123_v36, %v4165_v34 }
 0x226   : > { %4277 = vst [vmem:[%s7625_s14 + $0xf8] sm:$0xff] %v6127_v41  ;;  %v4207_v37 = vmul.f32 %v6127_v41, %v6127_v41 }
 0x227   : > { %v4167_v61 = vadd.f32 %v6129_v58, %v4166_v11  ;;  %v4206_v30 = vmul.f32 %v6129_v58, %v6129_v58  ;;  %v4236_v17 = vadd.f32 %v4235_v54, %v4205_v8  ;;  %4276 = vst [vmem:[%s7625_s14 + $0xf0] sm:$0xff] %v6129_v58 }
 0x229   : > { %v4168_v23 = vadd.f32 %v6127_v41, %v4167_v61  ;;  %v4237_v16 = vadd.f32 %v4236_v17, %v4206_v30 }
 0x22b   : > { %v4169_v27 = vrot.slane %v4168_v23, 4  ;;  %v4238_v6 = vadd.f32 %v4237_v16, %v4207_v37 }
 0x22d   : > { %v4170_v32 = vadd.f32 %v4169_v27, %v4168_v23  ;;  %v4239_v39 = vrot.slane %v4238_v6, 4 }
 0x22f   : > { %v4171_v53 = vrot.slane %v4170_v32, 2  ;;  %v4240_v10 = vadd.f32 %v4239_v39, %v4238_v6 }
 0x231   : > { %v4172_v20 = vadd.f32 %v4171_v53, %v4170_v32  ;;  %v4241_v7 = vrot.slane %v4240_v10, 2 }
 0x233   : > { %v4173_v29 = vrot.slane %v4172_v20, 1  ;;  %v4242_v15 = vadd.f32 %v4241_v7, %v4240_v10 }
 0x235   : > { %v4174_v43 = vadd.f32 %v4173_v29, %v4172_v20  ;;  %v4243_v21 = vrot.slane %v4242_v15, 1 }
 0x237   : > { %4175 = vst [vmem:[%s492_s18] sm:$0x1] %v4174_v43  ;;  %v4244_v47 = vadd.f32 %v4243_v21, %v4242_v15 }
 0x239   : > { %4245 = vst [vmem:[%s492_s18 + $0x1] sm:$0x1] %v4244_v47 }
 0x23a PF: > { %s19_s29 = sadd.s32 1, %s6402_s29   ;;  %s7863_s27 = smov %s6398_s28 }
 0x23b   : > { %p16_p5 = scmp.ge.s32.totalorder %s19_s29, 4   ;;  %s7864_s28 = smov %s7866_s30 }
 0x23d   :  { %18 = sbr.rel (!%p16_p5) target bundleno = 2 (0x2), region = 107 }

// kernel: decoder_block_forward.5
= control target key start
LH: loop header
LB: loop body
LE: loop exit
PB: predicated region body
PF: predicated region fallthrough
CT: control target
= control target key end

     0   :  { %s9011_s30 = smov 0   ;;  %s9013_s10 = smov 0   ;;  %s11520_s0 = inlined_call_operand.vmem [shape: f32[2,16,16,128], index: 0, kind: input, shape index: {}, may-alias: {0,1,2}]   ;;  %s11521_s1 = inlined_call_operand.vmem [shape: f32[2,16,16,128], index: 1, kind: input, shape index: {}, may-alias: {0,1,2}]   ;;  %s11522_s2 = inlined_call_operand.vmem [shape: f32[2,16,16,128], index: 2, kind: input, shape index: {}, may-alias: {0,1,2}]   ;;  %s11523_s3 = inlined_call_operand.vmem [shape: f32[2,16,16,128], index: 3, kind: input, shape index: {}, may-alias: {3,4,5}]   ;;  %s11524_s4 = inlined_call_operand.vmem [shape: f32[2,16,16,128], index: 4, kind: input, shape index: {}, may-alias: {3,4,5}]   ;;  %s11525_s5 = inlined_call_operand.vmem [shape: f32[2,16,16,128], index: 5, kind: input, shape index: {}, may-alias: {3,4,5}]   ;;  %s11526_s6 = inlined_call_operand.vmem [shape: f32[9,256,128], index: 6, kind: input, shape index: {}]   ;;  %s11527_s7 = inlined_call_operand.vmem [shape: f32[1,128], index: 7, kind: input, shape index: {}]   ;;  %s11528_s8 = inlined_call_operand.vmem [shape: f32[2,16,16,128], index: 8, kind: output, shape index: {0}]   ;;  %s11529_s9 = inlined_call_operand.vmem [shape: f32[2,1,2,128], index: 9, kind: output, shape index: {1}]  }
   0x1   :  { %s9015_s11 = smov 0  }
   0x2 LB: > { %s32_s12 = sadd.s32 1, %s8953_s10  ;;  %p7614_p0 = scmp.ge.s32.totalorder %s8957_s11, 1  ;;  %s8957_s11 = sphi %s9015_s11, %s20_s11   ;;  %s8953_s10 = sphi %s9013_s10, %s11533_s10   ;;  %s8949_s30 = sphi %s9011_s30, %s11532_s30  }
   0x3   : > { %p34_p1 = scmp.ge.s32.totalorder %s32_s12, 2  ;;  %p460_p2 = scmp.lt.s32.totalorder %s8957_s11, 3 }
   0x5   : > { %s11535_s12 = smov (%p34_p1, %s32_s12), 0  ;;  %p461_p3 = pnand %p7614_p0, %p460_p2 }
   0x6   : > { %v1416_v0 = vld [vmem:[%s11526_s6] sm:$0xff] (!%p461_p3)  ;;  %v1417_v1 = vld [vmem:[%s11526_s6 + $0x8] sm:$0xff] (!%p461_p3)  ;;  %v685_v3 = vlaneseq (!%p461_p3)  ;;  %v8959_v4 = vmov (!%p461_p3), 0.0|0.0   ;;  %v1418_v7 = vld [vmem:[%s11526_s6 + $0x10] sm:$0xff] (!%p461_p3)  ;;  %v8960_v14 = vmov (!%p461_p3), 0.0   ;;  %p576_p4 = scmp.lt.s32.totalorder (!%p461_p3), %s8949_s30, 1 }
   0x7   : > { %464 = sbr.rel (%p461_p3) target bundleno = 890 (0x37a), region = 52  ;;  %v7727_v2 = vld [vmem:[%s11526_s6 + $0x400] sm:$0xff] (!%p461_p3)  ;;  %7900 = vmatprep.subr.bf16.mxu1 (!%p461_p3), %v8959_v4  ;;  %8092 = vmatprep.subr.bf16.mxu0 (!%p461_p3), %v8959_v4  ;;  %v7901_v5 = vpack.c.bf16 (!%p461_p3), %v1417_v1, %v1416_v0  ;;  %v7728_v6 = vld [vmem:[%s11526_s6 + $0x408] sm:$0xff] (!%p461_p3)  ;;  %v1419_v8 = vld [vmem:[%s11526_s6 + $0x18] sm:$0xff] (!%p461_p3)  ;;  %vm860_vm1 = vcmask (!%p461_p3), 1040384   ;;  %vm1929_vm2 = vcmask (!%p461_p3), 1046528  }
   0x8   : > { %v9051_v9 = vpack.c.bf16 (!%p461_p3), %v7728_v6, %v7727_v2  ;;  %v7729_v10 = vld [vmem:[%s11526_s6 + $0x410] sm:$0xff] (!%p461_p3)  ;;  %v7730_v11 = vld [vmem:[%s11526_s6 + $0x418] sm:$0xff] (!%p461_p3)  ;;  %vm9059_vm0 = vcmp.lt.s32.totalorder (!%p461_p3), %v685_v3, 256  ;;  %v7904_v13 = vpack.c.bf16 (!%p461_p3), %v1419_v8, %v1418_v7  ;;  %v1420_v16 = vld [vmem:[%s11526_s6 + $0x20] sm:$0xff] (!%p461_p3)  ;;  %vm2700_vm3 = vcmask (!%p461_p3), 1045504  }
   0x9   : > { %7902 = vmatpush1.bf16.msra.mxu1 (!%p461_p3), %v7901_v5  ;;  %689 = vst.msk [vmem:[#allocation2] ss:$8 sm:$0x3] (!%p461_p3), %vm9059_vm0, %v8960_v14  ;;  %692 = vst.msk [vmem:[#allocation2 + $0x30] ss:$8 sm:$0x3] (!%p461_p3), %vm9059_vm0, %v8960_v14  ;;  %v9137_v15 = vpack.c.bf16 (!%p461_p3), %v7730_v11, %v7729_v10 }
   0xa   : > { %695 = vst.msk [vmem:[#allocation2 + $0x60] ss:$8 sm:$0x3] (!%p461_p3), %vm9059_vm0, %v8960_v14  ;;  %698 = vst.msk [vmem:[#allocation2 + $0x90] ss:$8 sm:$0x3] (!%p461_p3), %vm9059_vm0, %v8960_v14  ;;  %8094 = vmatpush1.bf16.msra.mxu0 (!%p461_p3), %v9051_v9  ;;  %7903 = vmatprep.subr.bf16.mxu1 (!%p461_p3), %v8959_v4 }
   0xb   : > { %701 = vst.msk [vmem:[#allocation2 + $0xc0] ss:$8 sm:$0x3] (!%p461_p3), %vm9059_vm0, %v8960_v14  ;;  %704 = vst.msk [vmem:[#allocation2 + $0xf0] ss:$8 sm:$0x3] (!%p461_p3), %vm9059_vm0, %v8960_v14  ;;  %8095 = vmatprep.subr.bf16.mxu0 (!%p461_p3), %v8959_v4 }
   0xc   : > { %707 = vst.msk [vmem:[#allocation2 + $0x120] ss:$8 sm:$0x3] (!%p461_p3), %vm9059_vm0, %v8960_v14  ;;  %710 = vst.msk [vmem:[#allocation2 + $0x150] ss:$8 sm:$0x3] (!%p461_p3), %vm9059_vm0, %v8960_v14 }
   0xd   : > { %713 = vst.msk [vmem:[#allocation2 + $0x180] ss:$8 sm:$0x3] (!%p461_p3), %vm9059_vm0, %v8960_v14  ;;  %716 = vst.msk [vmem:[#allocation2 + $0x1b0] ss:$8 sm:$0x3] (!%p461_p3), %vm9059_vm0, %v8960_v14  ;;  %7905 = vmatpush1.bf16.msra.mxu1 (!%p461_p3), %v7904_v13 }
   0xe   : > { %719 = vst.msk [vmem:[#allocation2 + $0x1e0] ss:$8 sm:$0x3] %vm9059_vm0, %v8960_v14  ;;  %722 = vst.msk [vmem:[#allocation2 + $0x210] ss:$8 sm:$0x3] %vm9059_vm0, %v8960_v14  ;;  %8097 = vmatpush1.bf16.msra.mxu0 %v9137_v15  ;;  %7906 = vmatprep.subr.bf16.mxu1 %v8959_v4 }
   0xf   : > { %725 = vst.msk [vmem:[#allocation2 + $0x240] ss:$8 sm:$0x3] %vm9059_vm0, %v8960_v14  ;;  %728 = vst.msk [vmem:[#allocation2 + $0x270] ss:$8 sm:$0x3] %vm9059_vm0, %v8960_v14  ;;  %8098 = vmatprep.subr.bf16.mxu0 %v8959_v4 }
  0x10   : > { %731 = vst.msk [vmem:[#allocation2 + $0x2a0] ss:$8 sm:$0x3] %vm9059_vm0, %v8960_v14  ;;  %734 = vst.msk [vmem:[#allocation2 + $0x2d0] ss:$8 sm:$0x3] %vm9059_vm0, %v8960_v14 }
  0x11   : > { %737 = vst.msk [vmem:[#allocation2 + $0x300] ss:$8 sm:$0x3] %vm9059_vm0, %v8960_v14  ;;  %740 = vst.msk [vmem:[#allocation2 + $0x330] ss:$8 sm:$0x3] %vm9059_vm0, %v8960_v14 }
  0x12   : > { %743 = vst.msk [vmem:[#allocation2 + $0x21] ss:$8 sm:$0x3] %vm9059_vm0, %v8960_v14  ;;  %746 = vst.msk [vmem:[#allocation2 + $0x51] ss:$8 sm:$0x3] %vm9059_vm0, %v8960_v14 }
  0x13   : > { %749 = vst.msk [vmem:[#allocation2 + $0x81] ss:$8 sm:$0x3] %vm9059_vm0, %v8960_v14  ;;  %752 = vst.msk [vmem:[#allocation2 + $0xb1] ss:$8 sm:$0x3] %vm9059_vm0, %v8960_v14 }
  0x14   : > { %755 = vst.msk [vmem:[#allocation2 + $0xe1] ss:$8 sm:$0x3] %vm9059_vm0, %v8960_v14  ;;  %758 = vst.msk [vmem:[#allocation2 + $0x111] ss:$8 sm:$0x3] %vm9059_vm0, %v8960_v14 }
  0x15   : > { %761 = vst.msk [vmem:[#allocation2 + $0x141] ss:$8 sm:$0x3] %vm9059_vm0, %v8960_v14  ;;  %764 = vst.msk [vmem:[#allocation2 + $0x171] ss:$8 sm:$0x3] %vm9059_vm0, %v8960_v14 }
  0x16   : > { %767 = vst.msk [vmem:[#allocation2 + $0x1a1] ss:$8 sm:$0x3] %vm9059_vm0, %v8960_v14  ;;  %770 = vst.msk [vmem:[#allocation2 + $0x1d1] ss:$8 sm:$0x3] %vm9059_vm0, %v8960_v14 }
  0x17   : > { %773 = vst.msk [vmem:[#allocation2 + $0x201] ss:$8 sm:$0x3] %vm9059_vm0, %v8960_v14  ;;  %776 = vst.msk [vmem:[#allocation2 + $0x231] ss:$8 sm:$0x3] %vm9059_vm0, %v8960_v14 }
  0x18   : > { %779 = vst.msk [vmem:[#allocation2 + $0x261] ss:$8 sm:$0x3] %vm9059_vm0, %v8960_v14  ;;  %782 = vst.msk [vmem:[#allocation2 + $0x291] ss:$8 sm:$0x3] %vm9059_vm0, %v8960_v14 }
  0x19   : > { %785 = vst.msk [vmem:[#allocation2 + $0x2c1] ss:$8 sm:$0x3] %vm9059_vm0, %v8960_v14  ;;  %788 = vst.msk [vmem:[#allocation2 + $0x2f1] ss:$8 sm:$0x3] %vm9059_vm0, %v8960_v14 }
  0x1a   : > { %791 = vst.msk [vmem:[#allocation2 + $0x321] ss:$8 sm:$0x3] %vm9059_vm0, %v8960_v14  ;;  %794 = vst.msk [vmem:[#allocation2 + $0x351] ss:$8 sm:$0x3] %vm9059_vm0, %v8960_v14 }
  0x1b   : > { %v1421_v17 = vld [vmem:[%s11526_s6 + $0x28] sm:$0xff]  ;;  %v7731_v18 = vld [vmem:[%s11526_s6 + $0x420] sm:$0xff]  ;;  %v1422_v22 = vld [vmem:[%s11526_s6 + $0x30] sm:$0xff]  ;;  %s11537_s30 = smov (!%p576_p4, %s8949_s30), 1 }
  0x1c   : > { %v7732_v19 = vld [vmem:[%s11526_s6 + $0x428] sm:$0xff]  ;;  %v7907_v20 = vpack.c.bf16 %v1421_v17, %v1420_v16  ;;  %v1423_v23 = vld [vmem:[%s11526_s6 + $0x38] sm:$0xff]  ;;  %v7733_v24 = vld [vmem:[%s11526_s6 + $0x430] sm:$0xff]  ;;  %s9191_s19 = sshll.u32 %s11537_s30, 8 }
  0x1d   : > { %v9155_v21 = vpack.c.bf16 %v7732_v19, %v7731_v18  ;;  %v7734_v25 = vld [vmem:[%s11526_s6 + $0x438] sm:$0xff]  ;;  %v7910_v26 = vpack.c.bf16 %v1423_v23, %v1422_v22  ;;  %v1424_v28 = vld [vmem:[%s11526_s6 + $0x40] sm:$0xff]  ;;  %v1425_v29 = vld [vmem:[%s11526_s6 + $0x48] sm:$0xff]  ;;  %s643_s13 = scalar_lea.vmem %s11524_s4, %s9191_s19  ;;  %s9224_s21 = scalar_lea.vmem %s11523_s3, %s9191_s19 }
  0x1e   : > { %7908 = vmatpush1.bf16.msra.mxu1 %v7907_v20  ;;  %v9175_v27 = vpack.c.bf16 %v7734_v25, %v7733_v24  ;;  %v7735_v30 = vld [vmem:[%s11526_s6 + $0x440] sm:$0xff]  ;;  %v7736_v31 = vld [vmem:[%s11526_s6 + $0x448] sm:$0xff]  ;;  %v7913_v32 = vpack.c.bf16 %v1425_v29, %v1424_v28  ;;  %v1426_v34 = vld [vmem:[%s11526_s6 + $0x50] sm:$0xff]  ;;  %s598_s24 = scalar_lea.vmem %s11521_s1, %s9191_s19  ;;  %s9244_s15 = scalar_lea.vmem %s11520_s0, %s9191_s19 }
  0x1f   : > { %8100 = vmatpush1.bf16.msra.mxu0 %v9155_v21  ;;  %7909 = vmatprep.subr.bf16.mxu1 %v8959_v4  ;;  %v9195_v33 = vpack.c.bf16 %v7736_v31, %v7735_v30  ;;  %v1427_v35 = vld [vmem:[%s11526_s6 + $0x58] sm:$0xff]  ;;  %v7737_v36 = vld [vmem:[%s11526_s6 + $0x450] sm:$0xff]  ;;  %v1428_v39 = vld [vmem:[%s11526_s6 + $0x60] sm:$0xff]  ;;  %s7892_s23 = sadd.s32 240, %s9191_s19  ;;  %s11432_s16 = scalar_lea.vmem %s11528_s8, %s9191_s19 }
  0x20   : > { %8101 = vmatprep.subr.bf16.mxu0 %v8959_v4  ;;  %v7738_v37 = vld [vmem:[%s11526_s6 + $0x458] sm:$0xff]  ;;  %v7916_v38 = vpack.c.bf16 %v1427_v35, %v1426_v34  ;;  %v1429_v40 = vld [vmem:[%s11526_s6 + $0x68] sm:$0xff]  ;;  %v7739_v42 = vld [vmem:[%s11526_s6 + $0x460] sm:$0xff]  ;;  %s10369_s26 = scalar_lea.vmem %s11525_s5, %s7892_s23  ;;  %s7629_s19 = sshll.u32 %s11537_s30, 1 }
  0x21   : > { %v9232_v41 = vpack.c.bf16 %v7738_v37, %v7737_v36  ;;  %v7740_v43 = vld [vmem:[%s11526_s6 + $0x468] sm:$0xff]  ;;  %v1251_v44 = vld [vmem:[%s643_s13] sm:$0xff]  ;;  %v7919_v46 = vpack.c.bf16 %v1429_v40, %v1428_v39  ;;  %v1430_v59 = vld [vmem:[%s11526_s6 + $0x70] sm:$0xff]  ;;  %s682_s20 = scalar_lea.vmem %s11529_s9, %s7629_s19 }
  0x22   : > { %7911 = vmatpush1.bf16.msra.mxu1 %v7910_v26  ;;  %v1252_v45 = vld [vmem:[%s643_s13 + $0x8] sm:$0xff]  ;;  %v1253_v47 = vmul.f32 0.0, %v1251_v44  ;;  %v1043_v49 = vld [vmem:[%s9224_s21] sm:$0xff]  ;;  %v9249_v52 = vpack.c.bf16 %v7740_v43, %v7739_v42  ;;  %v1431_v60 = vld [vmem:[%s11526_s6 + $0x78] sm:$0xff] }
  0x23   : > { %8103 = vmatpush1.bf16.msra.mxu0 %v9175_v27  ;;  %7912 = vmatprep.subr.bf16.mxu1 %v8959_v4  ;;  %v1254_v48 = vmul.f32 0.0, %v1252_v45  ;;  %v1044_v50 = vld [vmem:[%s9224_s21 + $0x8] sm:$0xff]  ;;  %v1006_v51 = vld [vmem:[%s598_s24] sm:$0xff]  ;;  %v1107_v53 = vrot.slane %v1043_v49, 7  ;;  %v7741_v1 = vld [vmem:[%s11526_s6 + $0x470] sm:$0xff]  ;;  %v7922_v13 = vpack.c.bf16 %v1431_v60, %v1430_v59 }
  0x24   : > { %8104 = vmatprep.subr.bf16.mxu0 %v8959_v4  ;;  %v1108_v54 = vrot.slane %v1044_v50, 7  ;;  %v1007_v55 = vld [vmem:[%s598_s24 + $0x8] sm:$0xff]  ;;  %v1011_v56 = vmul.f32 0.0, %v1006_v51  ;;  %v796_v57 = vld [vmem:[%s9244_s15] sm:$0xff]  ;;  %v1257_v61 = vrot.slane %v1253_v47, 7  ;;  %v7742_v2 = vld [vmem:[%s11526_s6 + $0x478] sm:$0xff] }
  0x25   : > { %v797_v58 = vld [vmem:[%s9244_s15 + $0x8] sm:$0xff]  ;;  %v1258_v62 = vrot.slane %v1254_v48, 7  ;;  %v1012_v63 = vmul.f32 0.0, %v1007_v55  ;;  %v861_v0 = vrot.slane %v796_v57, 7  ;;  %1203 = vst [vmem:[#allocation2 + $0x38] sm:$0xfe] %v1107_v53  ;;  %v9293_v22 = vpack.c.bf16 %v7742_v2, %v7741_v1 }
  0x26   : > { %7914 = vmatpush1.bf16.msra.mxu1 %v7913_v32  ;;  %v9269_v3 = vsel %vm860_vm1, %v1107_v53, %v1108_v54  ;;  %1205 = vst [vmem:[#allocation2 + $0x58] sm:$0x1] %v1108_v54  ;;  %v1015_v5 = vrot.slane %v1011_v56, 7  ;;  %v862_v6 = vrot.slane %v797_v58, 7  ;;  %v9274_v7 = vld [vmem:[%s11526_s6 + $0x80] sm:$0xff]  ;;  %v1045_v11 = vld [vmem:[%s9224_s21 + $0x10] sm:$0xff] }
  0x27   : > { %8106 = vmatpush1.bf16.msra.mxu0 %v9195_v33  ;;  %7915 = vmatprep.subr.bf16.mxu1 %v8959_v4  ;;  %1263 = vst [vmem:[#allocation2 + $0x8] sm:$0xfe] %v1257_v61  ;;  %1265 = vst [vmem:[#allocation2 + $0x28] sm:$0x1] %v1258_v62  ;;  %v9278_v8 = vsel %vm860_vm1, %v1257_v61, %v1258_v62  ;;  %v1016_v10 = vrot.slane %v1012_v63, 7  ;;  %v1046_v12 = vld [vmem:[%s9224_s21 + $0x18] sm:$0xff] }
  0x28   : > { %8107 = vmatprep.subr.bf16.mxu0 %v8959_v4  ;;  %1204 = vst [vmem:[#allocation2 + $0x48] sm:$0xff] %v9269_v3  ;;  %958 = vst [vmem:[#allocation2 + $0x30] sm:$0xfe] %v861_v0  ;;  %v1433_v14 = vld [vmem:[%s11526_s6 + $0x88] sm:$0xff]  ;;  %v9286_v16 = vsel %vm860_vm1, %v861_v0, %v862_v6  ;;  %v1110_v17 = vrot.slane %v1045_v11, 7  ;;  %v1111_v18 = vrot.slane %v1046_v12, 7 }
  0x29   : > { %1021 = vst [vmem:[#allocation2] sm:$0xfe] %v1015_v5  ;;  %960 = vst [vmem:[#allocation2 + $0x50] sm:$0x1] %v862_v6  ;;  %v798_v19 = vld [vmem:[%s9244_s15 + $0x10] sm:$0xff]  ;;  %v799_v20 = vld [vmem:[%s9244_s15 + $0x18] sm:$0xff]  ;;  %v9297_v23 = vsel %vm860_vm1, %v1015_v5, %v1016_v10  ;;  %v7925_v31 = vpack.c.bf16 %v1433_v14, %v9274_v7 }
  0x2a   : > { %7917 = vmatpush1.bf16.msra.mxu1 %v7916_v38  ;;  %1264 = vst [vmem:[#allocation2 + $0x18] sm:$0xff] %v9278_v8  ;;  %959 = vst [vmem:[#allocation2 + $0x40] sm:$0xff] %v9286_v16  ;;  %v864_v24 = vrot.slane %v798_v19, 7  ;;  %v865_v25 = vrot.slane %v799_v20, 7  ;;  %v7743_v26 = vld [vmem:[%s11526_s6 + $0x480] sm:$0xff]  ;;  %v7744_v28 = vld [vmem:[%s11526_s6 + $0x488] sm:$0xff]  ;;  %v9308_v29 = vsel %vm860_vm1, %v1110_v17, %v1111_v18 }
  0x2b   : > { %8109 = vmatpush1.bf16.msra.mxu0 %v9232_v41  ;;  %7918 = vmatprep.subr.bf16.mxu1 %v8959_v4  ;;  %1023 = vst [vmem:[#allocation2 + $0x20] sm:$0x1] %v1016_v10  ;;  %1022 = vst [vmem:[#allocation2 + $0x10] sm:$0xff] %v9297_v23  ;;  %v1047_v30 = vld [vmem:[%s9224_s21 + $0x20] sm:$0xff]  ;;  %v1048_v34 = vld [vmem:[%s9224_s21 + $0x28] sm:$0xff]  ;;  %v3893_v38 = vrot.slane %v9269_v3, 1  ;;  %v9323_v43 = vpack.c.bf16 %v7744_v28, %v7743_v26 }
  0x2c   : > { %8110 = vmatprep.subr.bf16.mxu0 %v8959_v4  ;;  %1206 = vst [vmem:[#allocation2 + $0x68] sm:$0xfe] %v1110_v17  ;;  %1208 = vst [vmem:[#allocation2 + $0x88] sm:$0x1] %v1111_v18  ;;  %v9314_v32 = vsel %vm860_vm1, %v864_v24, %v865_v25  ;;  %v1113_v35 = vrot.slane %v1047_v30, 7  ;;  %v800_v36 = vld [vmem:[%s9244_s15 + $0x20] sm:$0xff] }
  0x2d   : > { %1207 = vst [vmem:[#allocation2 + $0x78] sm:$0xff] %v9308_v29  ;;  %961 = vst [vmem:[#allocation2 + $0x60] sm:$0xfe] %v864_v24  ;;  %v801_v37 = vld [vmem:[%s9244_s15 + $0x28] sm:$0xff]  ;;  %v1114_v39 = vrot.slane %v1048_v34, 7  ;;  %v867_v40 = vrot.slane %v800_v36, 7 }
  0x2e   : > { %7920 = vmatpush1.bf16.msra.mxu1 %v7919_v46  ;;  %963 = vst [vmem:[#allocation2 + $0x80] sm:$0x1] %v865_v25  ;;  %962 = vst [vmem:[#allocation2 + $0x70] sm:$0xff] %v9314_v32  ;;  %v868_v42 = vrot.slane %v801_v37, 7  ;;  %v1434_v44 = vld [vmem:[%s11526_s6 + $0x90] sm:$0xff]  ;;  %v1435_v45 = vld [vmem:[%s11526_s6 + $0x98] sm:$0xff] }
  0x2f   : > { %8112 = vmatpush1.bf16.msra.mxu0 %v9249_v52  ;;  %7921 = vmatprep.subr.bf16.mxu1 %v8959_v4  ;;  %v3698_v46 = vld [vmem:[#allocation2 + $0x38] sm:$0xfe]  ;;  %1209 = vst [vmem:[#allocation2 + $0x98] sm:$0xfe] %v1113_v35  ;;  %v7745_v47 = vld [vmem:[%s11526_s6 + $0x490] sm:$0xff]  ;;  %v1321_v49 = vld [vmem:[#allocation2 + $0x8] sm:$0xff]  ;;  %v9339_v51 = vsel %vm860_vm1, %v1113_v35, %v1114_v39  ;;  %v7928_v54 = vpack.c.bf16 %v1435_v45, %v1434_v44 }
  0x30   : > { %8113 = vmatprep.subr.bf16.mxu0 %v8959_v4  ;;  %v7746_v48 = vld [vmem:[%s11526_s6 + $0x498] sm:$0xff]  ;;  %v3892_v50 = vrot.slane %v3698_v46, 1  ;;  %1211 = vst [vmem:[#allocation2 + $0xb8] sm:$0x1] %v1114_v39  ;;  %v9342_v53 = vsel %vm860_vm1, %v867_v40, %v868_v42  ;;  %964 = vst [vmem:[#allocation2 + $0x90] sm:$0xfe] %v867_v40  ;;  %1512 = vmatprep.mubr.f32.mxu1 %v1321_v49 }
  0x31   : > { %966 = vst [vmem:[#allocation2 + $0xb0] sm:$0x1] %v868_v42  ;;  %1210 = vst [vmem:[#allocation2 + $0xa8] sm:$0xff] %v9339_v51  ;;  %v9351_v56 = vpack.c.bf16 %v7746_v48, %v7745_v47  ;;  %v1436_v57 = vld [vmem:[%s11526_s6 + $0xa0] sm:$0xff]  ;;  %v1437_v58 = vld [vmem:[%s11526_s6 + $0xa8] sm:$0xff] }
  0x32   : > { %7923 = vmatpush1.bf16.msra.mxu1 %v7922_v13  ;;  %965 = vst [vmem:[#allocation2 + $0xa0] sm:$0xff] %v9342_v53  ;;  %v3894_v55 = vsel %vm1929_vm2, %v3892_v50, %v3893_v38  ;;  %v7747_v59 = vld [vmem:[%s11526_s6 + $0x4a0] sm:$0xff]  ;;  %v7748_v60 = vld [vmem:[%s11526_s6 + $0x4a8] sm:$0xff]  ;;  %v1049_v61 = vld [vmem:[%s9224_s21 + $0x30] sm:$0xff]  ;;  %v7931_v62 = vpack.c.bf16 %v1437_v58, %v1436_v57 }
  0x33   : > { %8115 = vmatpush1.bf16.msra.mxu0 %v9293_v22  ;;  %7924 = vmatprep.subr.bf16.mxu1 %v8959_v4  ;;  %v1050_v63 = vld [vmem:[%s9224_s21 + $0x38] sm:$0xff]  ;;  %v1116_v0 = vrot.slane %v1049_v61, 7  ;;  %v9370_v1 = vpack.c.bf16 %v7748_v60, %v7747_v59  ;;  %v1438_v2 = vld [vmem:[%s11526_s6 + $0xb0] sm:$0xff]  ;;  %v1440_v18 = vld [vmem:[%s11526_s6 + $0xc0] sm:$0xff] }
  0x34   : > { %8116 = vmatprep.subr.bf16.mxu0 %v8959_v4  ;;  %4242 = vmatprep.mubr.f32.mxu0 %v3894_v55  ;;  %v1439_v5 = vld [vmem:[%s11526_s6 + $0xb8] sm:$0xff]  ;;  %v1117_v6 = vrot.slane %v1050_v63, 7  ;;  %v7749_v7 = vld [vmem:[%s11526_s6 + $0x4b0] sm:$0xff]  ;;  %v1441_v19 = vld [vmem:[%s11526_s6 + $0xc8] sm:$0xff] }
  0x35   : > { %v7750_v10 = vld [vmem:[%s11526_s6 + $0x4b8] sm:$0xff]  ;;  %1212 = vst [vmem:[#allocation2 + $0xc8] sm:$0xfe] %v1116_v0  ;;  %v802_v11 = vld [vmem:[%s9244_s15 + $0x30] sm:$0xff]  ;;  %v7934_v17 = vpack.c.bf16 %v1439_v5, %v1438_v2  ;;  %v7751_v25 = vld [vmem:[%s11526_s6 + $0x4c0] sm:$0xff]  ;;  %v7937_v42 = vpack.c.bf16 %v1441_v19, %v1440_v18 }
  0x36   : > { %7926 = vmatpush1.bf16.msra.mxu1 %v7925_v31  ;;  %v9387_v12 = vsel %vm860_vm1, %v1116_v0, %v1117_v6  ;;  %1214 = vst [vmem:[#allocation2 + $0xe8] sm:$0x1] %v1117_v6  ;;  %v803_v13 = vld [vmem:[%s9244_s15 + $0x38] sm:$0xff]  ;;  %v870_v14 = vrot.slane %v802_v11, 7  ;;  %v9399_v24 = vpack.c.bf16 %v7750_v10, %v7749_v7  ;;  %v1051_v26 = vld [vmem:[%s9224_s21 + $0x40] sm:$0xff]  ;;  %v1052_v28 = vld [vmem:[%s9224_s21 + $0x48] sm:$0xff] }
  0x37   : > { %8118 = vmatpush1.bf16.msra.mxu0 %v9323_v43  ;;  %7927 = vmatprep.subr.bf16.mxu1 %v8959_v4  ;;  %1213 = vst [vmem:[#allocation2 + $0xd8] sm:$0xff] %v9387_v12  ;;  %v871_v20 = vrot.slane %v803_v13, 7  ;;  %v7752_v30 = vld [vmem:[%s11526_s6 + $0x4c8] sm:$0xff]  ;;  %v1119_v34 = vrot.slane %v1051_v26, 7  ;;  %v1120_v35 = vrot.slane %v1052_v28, 7  ;;  %v804_v36 = vld [vmem:[%s9244_s15 + $0x40] sm:$0xff] }
  0x38   : > { %8119 = vmatprep.subr.bf16.mxu0 %v8959_v4  ;;  %967 = vst [vmem:[#allocation2 + $0xc0] sm:$0xfe] %v870_v14  ;;  %v805_v37 = vld [vmem:[%s9244_s15 + $0x48] sm:$0xff]  ;;  %v873_v39 = vrot.slane %v804_v36, 7  ;;  %v1053_v45 = vld [vmem:[%s9224_s21 + $0x50] sm:$0xff]  ;;  %v9422_v46 = vpack.c.bf16 %v7752_v30, %v7751_v25  ;;  %v1443_v48 = vld [vmem:[%s11526_s6 + $0xd8] sm:$0xff] }
  0x39   : > { %v9411_v31 = vsel %vm860_vm1, %v870_v14, %v871_v20  ;;  %969 = vst [vmem:[#allocation2 + $0xe0] sm:$0x1] %v871_v20  ;;  %v874_v40 = vrot.slane %v805_v37, 7  ;;  %v9417_v44 = vsel %vm860_vm1, %v1119_v34, %v1120_v35  ;;  %1215 = vst [vmem:[#allocation2 + $0xf8] sm:$0xfe] %v1119_v34  ;;  %v1442_v47 = vld [vmem:[%s11526_s6 + $0xd0] sm:$0xff] }
  0x3a   : > { %7929 = vmatpush1.bf16.msra.mxu1 %v7928_v54  ;;  %968 = vst [vmem:[#allocation2 + $0xd0] sm:$0xff] %v9411_v31  ;;  %1217 = vst [vmem:[#allocation2 + $0x118] sm:$0x1] %v1120_v35  ;;  %v1054_v50 = vld [vmem:[%s9224_s21 + $0x58] sm:$0xff]  ;;  %v1122_v54 = vrot.slane %v1053_v45, 7  ;;  %v7753_v55 = vld [vmem:[%s11526_s6 + $0x4d0] sm:$0xff] }
  0x3b   : > { %8121 = vmatpush1.bf16.msra.mxu0 %v9351_v56  ;;  %7930 = vmatprep.subr.bf16.mxu1 %v8959_v4  ;;  %1216 = vst [vmem:[#allocation2 + $0x108] sm:$0xff] %v9417_v44  ;;  %v9432_v49 = vsel %vm860_vm1, %v873_v39, %v874_v40  ;;  %970 = vst [vmem:[#allocation2 + $0xf0] sm:$0xfe] %v873_v39  ;;  %v7754_v57 = vld [vmem:[%s11526_s6 + $0x4d8] sm:$0xff]  ;;  %v1123_v58 = vrot.slane %v1054_v50, 7  ;;  %v806_v59 = vld [vmem:[%s9244_s15 + $0x50] sm:$0xff] }
  0x3c   : > { %8122 = vmatprep.subr.bf16.mxu0 %v8959_v4  ;;  %972 = vst [vmem:[#allocation2 + $0x110] sm:$0x1] %v874_v40  ;;  %971 = vst [vmem:[#allocation2 + $0x100] sm:$0xff] %v9432_v49  ;;  %v807_v60 = vld [vmem:[%s9244_s15 + $0x58] sm:$0xff]  ;;  %v876_v61 = vrot.slane %v806_v59, 7  ;;  %v9450_v2 = vpack.c.bf16 %v7754_v57, %v7753_v55  ;;  %v1444_v5 = vld [vmem:[%s11526_s6 + $0xe0] sm:$0xff] }
  0x3d   : > { %1218 = vst [vmem:[#allocation2 + $0x128] sm:$0xfe] %v1122_v54  ;;  %v9446_v63 = vsel %vm860_vm1, %v1122_v54, %v1123_v58  ;;  %1220 = vst [vmem:[#allocation2 + $0x148] sm:$0x1] %v1123_v58  ;;  %v877_v0 = vrot.slane %v807_v60, 7  ;;  %v1445_v6 = vld [vmem:[%s11526_s6 + $0xe8] sm:$0xff] }
  0x3e   : > { %7932 = vmatpush1.bf16.msra.mxu1 %v7931_v62  ;;  %v7940_v62 = vpack.c.bf16 %v1443_v48, %v1442_v47  ;;  %v7755_v7 = vld [vmem:[%s11526_s6 + $0x4e0] sm:$0xff]  ;;  %1219 = vst [vmem:[#allocation2 + $0x138] sm:$0xff] %v9446_v63  ;;  %973 = vst [vmem:[#allocation2 + $0x120] sm:$0xfe] %v876_v61  ;;  %v7756_v10 = vld [vmem:[%s11526_s6 + $0x4e8] sm:$0xff]  ;;  %v3890_v54 = vrot.slane %v9286_v16, 1 }
  0x3f   : > { %8124 = vmatpush1.bf16.msra.mxu0 %v9370_v1  ;;  %7933 = vmatprep.subr.bf16.mxu1 %v8959_v4  ;;  %v9467_v11 = vsel %vm860_vm1, %v876_v61, %v877_v0  ;;  %975 = vst [vmem:[#allocation2 + $0x140] sm:$0x1] %v877_v0  ;;  %v1055_v13 = vld [vmem:[%s9224_s21 + $0x60] sm:$0xff]  ;;  %v1056_v14 = vld [vmem:[%s9224_s21 + $0x68] sm:$0xff]  ;;  %v1446_v18 = vld [vmem:[%s11526_s6 + $0xf0] sm:$0xff]  ;;  %v9477_v19 = vpack.c.bf16 %v7756_v10, %v7755_v7 }
  0x40   : > { %8125 = vmatprep.subr.bf16.mxu0 %v8959_v4  ;;  %974 = vst [vmem:[#allocation2 + $0x130] sm:$0xff] %v9467_v11  ;;  %v1447_v20 = vld [vmem:[%s11526_s6 + $0xf8] sm:$0xff]  ;;  %v7757_v25 = vld [vmem:[%s11526_s6 + $0x4f0] sm:$0xff]  ;;  %v1125_v26 = vrot.slane %v1055_v13, 7  ;;  %v1126_v28 = vrot.slane %v1056_v14, 7  ;;  %v808_v30 = vld [vmem:[%s9244_s15 + $0x60] sm:$0xff] }
  0x41   : > { %v7758_v34 = vld [vmem:[%s11526_s6 + $0x4f8] sm:$0xff]  ;;  %v3697_v35 = vld [vmem:[#allocation2 + $0x30] sm:$0xfe]  ;;  %v809_v36 = vld [vmem:[%s9244_s15 + $0x68] sm:$0xff]  ;;  %v879_v37 = vrot.slane %v808_v30, 7  ;;  %v7946_v40 = vpack.c.bf16 %v1447_v20, %v1446_v18 }
  0x42   : > { %7935 = vmatpush1.bf16.msra.mxu1 %v7934_v17  ;;  %v7943_v17 = vpack.c.bf16 %v1445_v6, %v1444_v5  ;;  %v9492_v39 = vsel %vm860_vm1, %v1125_v26, %v1126_v28  ;;  %1221 = vst [vmem:[#allocation2 + $0x158] sm:$0xfe] %v1125_v26  ;;  %1223 = vst [vmem:[#allocation2 + $0x178] sm:$0x1] %v1126_v28  ;;  %v3702_v45 = vld [vmem:[#allocation2 + $0x58] sm:$0x1]  ;;  %v9500_v48 = vpack.c.bf16 %v7758_v34, %v7757_v25 }
  0x43   : > { %8127 = vmatpush1.bf16.msra.mxu0 %v9399_v24  ;;  %7936 = vmatprep.subr.bf16.mxu1 %v8959_v4  ;;  %1222 = vst [vmem:[#allocation2 + $0x168] sm:$0xff] %v9492_v39  ;;  %v880_v47 = vrot.slane %v809_v36, 7  ;;  %976 = vst [vmem:[#allocation2 + $0x150] sm:$0xfe] %v879_v37  ;;  %v3889_v50 = vrot.slane %v3697_v35, 1  ;;  %v7632_v55 = vld [vmem:[%s11526_s6 + $0x108] sm:$0xff] }
  0x44   : > { %8128 = vmatprep.subr.bf16.mxu0 %v8959_v4  ;;  %v7759_v57 = vld [vmem:[%s11526_s6 + $0x500] sm:$0xff]  ;;  %v7760_v58 = vld [vmem:[%s11526_s6 + $0x508] sm:$0xff]  ;;  %v3701_v59 = vld [vmem:[#allocation2 + $0x50] sm:$0x1]  ;;  %v3897_v0 = vrot.slane %v3702_v45, 1  ;;  %v3903_v36 = vrot.slane %v9308_v29, 1 }
  0x45   : > { %v3704_v60 = vld [vmem:[#allocation2 + $0x68] sm:$0xfe]  ;;  %v9514_v61 = vsel %vm860_vm1, %v879_v37, %v880_v47  ;;  %978 = vst [vmem:[#allocation2 + $0x170] sm:$0x1] %v880_v47  ;;  %v1058_v5 = vld [vmem:[%s9224_s21 + $0x78] sm:$0xff]  ;;  %v810_v7 = vld [vmem:[%s9244_s15 + $0x70] sm:$0xff]  ;;  %v3891_v25 = vsel %vm1929_vm2, %v3889_v50, %v3890_v54  ;;  %v8141_v26 = vpack.c.bf16 %v7760_v58, %v7759_v57 }
  0x46   : > { %7938 = vmatpush1.bf16.msra.mxu1 %v7937_v42  ;;  %v7631_v42 = vld [vmem:[%s11526_s6 + $0x100] sm:$0xff]  ;;  %977 = vst [vmem:[#allocation2 + $0x160] sm:$0xff] %v9514_v61  ;;  %v811_v10 = vld [vmem:[%s9244_s15 + $0x78] sm:$0xff]  ;;  %v882_v18 = vrot.slane %v810_v7, 7  ;;  %v3895_v28 = vrot.slane %v3701_v59, 1  ;;  %v7761_v30 = vld [vmem:[%s11526_s6 + $0x510] sm:$0xff]  ;;  %v3898_v45 = vsel %vm1929_vm2, %v3893_v38, %v3897_v0 }
  0x47   : > { %8130 = vmatpush1.bf16.msra.mxu0 %v9422_v46  ;;  %7939 = vmatprep.subr.bf16.mxu1 %v8959_v4  ;;  %v1320_v13 = vld [vmem:[#allocation2] sm:$0xff]  ;;  %v7949_v14 = vpack.c.bf16 %v7632_v55, %v7631_v42  ;;  %v883_v20 = vrot.slane %v811_v10, 7  ;;  %v7762_v34 = vld [vmem:[%s11526_s6 + $0x518] sm:$0xff]  ;;  %v3902_v35 = vrot.slane %v3704_v60, 1  ;;  %v7633_v47 = vld [vmem:[%s11526_s6 + $0x110] sm:$0xff]  ;;  %v3900_v60 = vrot.slane %v9314_v32, 1 }
  0x48   : > { %8131 = vmatprep.subr.bf16.mxu0 %v8959_v4  ;;  %v3703_v37 = vld [vmem:[#allocation2 + $0x60] sm:$0xfe]  ;;  %979 = vst [vmem:[#allocation2 + $0x180] sm:$0xfe] %v882_v18  ;;  %v7634_v50 = vld [vmem:[%s11526_s6 + $0x118] sm:$0xff]  ;;  %v3896_v38 = vsel %vm1929_vm2, %v3890_v54, %v3895_v28  ;;  %v8144_v57 = vpack.c.bf16 %v7762_v34, %v7761_v30 }
  0x49   : > { %v9536_v42 = vsel %vm860_vm1, %v882_v18, %v883_v20  ;;  %981 = vst [vmem:[#allocation2 + $0x1a0] sm:$0x1] %v883_v20  ;;  %v3708_v55 = vld [vmem:[#allocation2 + $0x88] sm:$0x1]  ;;  %v1325_v58 = vld [vmem:[#allocation2 + $0x38] sm:$0xff]  ;;  %v3899_v59 = vrot.slane %v3703_v37, 1  ;;  %v3904_v0 = vsel %vm1929_vm2, %v3902_v35, %v3903_v36 }
  0x4a   : > { %7941 = vmatpush1.bf16.msra.mxu1 %v7940_v62  ;;  %v1057_v62 = vld [vmem:[%s9224_s21 + $0x70] sm:$0xff]  ;;  %980 = vst [vmem:[#allocation2 + $0x190] sm:$0xff] %v9536_v42  ;;  %v3907_v54 = vrot.slane %v3708_v55, 1  ;;  %v7635_v7 = vld [vmem:[%s11526_s6 + $0x120] sm:$0xff]  ;;  %v3710_v10 = vld [vmem:[#allocation2 + $0x98] sm:$0xfe] }
  0x4b   : > { %8133 = vmatpush1.bf16.msra.mxu0 %v9450_v2  ;;  %7942 = vmatprep.subr.bf16.mxu1 %v8959_v4  ;;  %v1128_v6 = vrot.slane %v1057_v62, 7  ;;  %v7763_v62 = vld [vmem:[%s11526_s6 + $0x520] sm:$0xff]  ;;  %v3901_v20 = vsel %vm1929_vm2, %v3899_v59, %v3900_v60  ;;  %v9573_v28 = vld [vmem:[#allocation2 + $0x90] sm:$0xfe]  ;;  %v7766_v34 = vld [vmem:[%s11526_s6 + $0x538] sm:$0xff]  ;;  %v3912_v35 = vrot.slane %v3710_v10, 1 }
  0x4c   : > { %8134 = vmatprep.subr.bf16.mxu0 %v8959_v4  ;;  %v3908_v30 = vsel %vm1929_vm2, %v3903_v36, %v3907_v54  ;;  %v3913_v37 = vrot.slane %v9339_v51, 1  ;;  %v7637_v55 = vld [vmem:[%s11526_s6 + $0x130] sm:$0xff]  ;;  %v7638_v36 = vld [vmem:[%s11526_s6 + $0x138] sm:$0xff]  ;;  %v3909_v59 = vrot.slane %v9573_v28, 1  ;;  %v813_v10 = vld [vmem:[%s9244_s15 + $0x88] sm:$0xff] }
  0x4d   : > { %1224 = vst [vmem:[#allocation2 + $0x188] sm:$0xfe] %v1128_v6  ;;  %v9628_v28 = vld [vmem:[%s11526_s6 + $0x148] sm:$0xff] }
  0x4e   : > { %7944 = vmatpush1.bf16.msra.mxu1 %v7943_v17  ;;  %v1129_v17 = vrot.slane %v1058_v5, 7  ;;  %v7952_v5 = vpack.c.bf16 %v7634_v50, %v7633_v47  ;;  %v9581_v47 = vld [vmem:[#allocation2 + $0xb8] sm:$0x1]  ;;  %v812_v50 = vld [vmem:[%s9244_s15 + $0x80] sm:$0xff] }
  0x4f   : > { %8136 = vmatpush1.bf16.msra.mxu0 %v9477_v19  ;;  %7945 = vmatprep.subr.bf16.mxu1 %v8959_v4  ;;  %v3917_v54 = vrot.slane %v9581_v47, 1 }
  0x50   : > { %8137 = vmatprep.subr.bf16.mxu0 %v8959_v4  ;;  %1226 = vst [vmem:[#allocation2 + $0x1a8] sm:$0x1] %v1129_v17 }
  0x52   : > { %7947 = vmatpush1.bf16.msra.mxu1 %v7946_v40  ;;  %v9533_v40 = vsel %vm860_vm1, %v1128_v6, %v1129_v17  ;;  %v3707_v6 = vld [vmem:[#allocation2 + $0x80] sm:$0x1]  ;;  %v1324_v17 = vld [vmem:[#allocation2 + $0x30] sm:$0xff] }
  0x53   : > { %8139 = vmatpush1.bf16.msra.mxu0 %v9500_v48  ;;  %7948 = vmatprep.subr.bf16.mxu1 %v8959_v4  ;;  %1225 = vst [vmem:[#allocation2 + $0x198] sm:$0xff] %v9533_v40 }
  0x54   : > { %8140 = vmatprep.subr.bf16.mxu0 %v8959_v4 }
  0x55   : > { %1513 = vmatmul.mubr.f32.vlgmr.msra.gmra.mrb[0].mxu1 %v1320_v13  ;;  %v7636_v13 = vld [vmem:[%s11526_s6 + $0x128] sm:$0xff] }
  0x56   : > { %4243 = vmatmul.mubr.f32.vlgmr.msra.gmra.mrb[0].mxu0 %v3891_v25  ;;  %7950 = vmatpush1.bf16.msra.mxu1 %v7949_v14  ;;  %v1059_v14 = vld [vmem:[%s9224_s21 + $0x80] sm:$0xff] }
  0x57   : > { %8142 = vmatpush1.bf16.msra.mxu0 %v8141_v26  ;;  %1517 = vmatprep.mubr.f32.mxu1 %v9278_v8  ;;  %v7764_v8 = vld [vmem:[%s11526_s6 + $0x528] sm:$0xff]  ;;  %v1131_v18 = vrot.slane %v1059_v14, 7  ;;  %v3905_v26 = vrot.slane %v3707_v6, 1  ;;  %v9607_v6 = vld [vmem:[#allocation2 + $0xb0] sm:$0x1]  ;;  %v3914_v14 = vsel %vm1929_vm2, %v3912_v35, %v3913_v37 }
  0x58   : > { %4247 = vmatprep.mubr.f32.mxu0 %v3898_v45  ;;  %8143 = vmatprep.subr.bf16.mxu0 %v8959_v4  ;;  %v8147_v25 = vpack.c.bf16 %v7764_v8, %v7763_v62  ;;  %v7955_v45 = vpack.c.bf16 %v7636_v13, %v7635_v7  ;;  %v3910_v62 = vrot.slane %v9342_v53, 1  ;;  %v1061_v13 = vld [vmem:[%s9224_s21 + $0x90] sm:$0xff] }
  0x59   : > { %1518 = vmatmul.mubr.f32.gmra.mrb[2].mxu1 %v9297_v23  ;;  %7951 = vmatprep.subr.bf16.mxu1 %v8959_v4  ;;  %v7765_v23 = vld [vmem:[%s11526_s6 + $0x530] sm:$0xff]  ;;  %1227 = vst [vmem:[#allocation2 + $0x1b8] sm:$0xfe] %v1131_v18 }
  0x5a   : > { %4248 = vmatmul.mubr.f32.gmra.mrb[2].mxu0 %v3896_v38  ;;  %1522 = vmatprep.mubr.f32.mxu1 %v1325_v58  ;;  %v885_v38 = vrot.slane %v812_v50, 7  ;;  %v1329_v58 = vld [vmem:[#allocation2 + $0x68] sm:$0xff]  ;;  %v8150_v8 = vpack.c.bf16 %v7766_v34, %v7765_v23  ;;  %v9623_v23 = vld [vmem:[%s11526_s6 + $0x140] sm:$0xff]  ;;  %v3911_v50 = vsel %vm1929_vm2, %v3909_v59, %v3910_v62  ;;  %v815_v59 = vld [vmem:[%s9244_s15 + $0x98] sm:$0xff] }
  0x5b   : > { %8145 = vmatpush1.bf16.msra.mxu0 %v8144_v57  ;;  %4252 = vmatprep.mubr.f32.mxu0 %v3904_v0  ;;  %v1060_v57 = vld [vmem:[%s9224_s21 + $0x88] sm:$0xff]  ;;  %v9598_v0 = vld [vmem:[%s11526_s6 + $0x540] sm:$0xff] }
  0x5c   : > { %8146 = vmatprep.subr.bf16.mxu0 %v8959_v4  ;;  %7953 = vmatpush1.bf16.msra.mxu1 %v7952_v5  ;;  %v9603_v5 = vld [vmem:[%s11526_s6 + $0x548] sm:$0xff]  ;;  %982 = vst [vmem:[#allocation2 + $0x1b0] sm:$0xfe] %v885_v38  ;;  %v1132_v7 = vrot.slane %v1060_v57, 7  ;;  %v3923_v57 = vrot.slane %v9387_v12, 1 }
  0x5d   : > { %1523 = vmatmul.mubr.f32.gmra.mrb[4].mxu1 %v1324_v17  ;;  %7954 = vmatprep.subr.bf16.mxu1 %v8959_v4  ;;  %v9615_v17 = vld [vmem:[#allocation2 + $0xc8] sm:$0xfe]  ;;  %v8153_v35 = vpack.c.bf16 %v9603_v5, %v9598_v0  ;;  %v3918_v0 = vsel %vm1929_vm2, %v3913_v37, %v3917_v54  ;;  %v9662_v5 = vld [vmem:[#allocation2 + $0xc0] sm:$0xfe]  ;;  %v9678_v37 = vld [vmem:[%s11526_s6 + $0x158] sm:$0xff] }
  0x5e   : > { %4253 = vmatmul.mubr.f32.gmra.mrb[4].mxu0 %v3901_v20  ;;  %1527 = vmatprep.mubr.f32.mxu1 %v9269_v3  ;;  %v3906_v3 = vsel %vm1929_vm2, %v3900_v60, %v3905_v26  ;;  %v7958_v20 = vpack.c.bf16 %v7638_v36, %v7637_v55  ;;  %v886_v60 = vrot.slane %v813_v10, 7  ;;  %v814_v26 = vld [vmem:[%s9244_s15 + $0x90] sm:$0xff]  ;;  %1229 = vst [vmem:[#allocation2 + $0x1d8] sm:$0x1] %v1132_v7  ;;  %v9652_v36 = vld [vmem:[%s11526_s6 + $0x558] sm:$0xff] }
  0x5f   : > { %8148 = vmatpush1.bf16.msra.mxu0 %v8147_v25  ;;  %4257 = vmatprep.mubr.f32.mxu0 %v3908_v30  ;;  %v1134_v25 = vrot.slane %v1061_v13, 7  ;;  %v9631_v30 = vsel %vm860_vm1, %v1131_v18, %v1132_v7  ;;  %v888_v34 = vrot.slane %v814_v26, 7  ;;  %v1062_v18 = vld [vmem:[%s9224_s21 + $0x98] sm:$0xff]  ;;  %v9647_v55 = vld [vmem:[%s11526_s6 + $0x550] sm:$0xff]  ;;  %v1063_v7 = vld [vmem:[%s9224_s21 + $0xa0] sm:$0xff] }
  0x60   : > { %8149 = vmatprep.subr.bf16.mxu0 %v8959_v4  ;;  %7956 = vmatpush1.bf16.msra.mxu1 %v7955_v45  ;;  %v3915_v45 = vrot.slane %v9607_v6, 1  ;;  %1228 = vst [vmem:[#allocation2 + $0x1c8] sm:$0xff] %v9631_v30  ;;  %v9638_v47 = vsel %vm860_vm1, %v885_v38, %v886_v60  ;;  %984 = vst [vmem:[#allocation2 + $0x1d0] sm:$0x1] %v886_v60  ;;  %v3922_v38 = vrot.slane %v9615_v17, 1  ;;  %v889_v6 = vrot.slane %v815_v59, 7 }
  0x61   : > { %1528 = vmatmul.mubr.f32.gmra.mrb[6].mxu1 %v9286_v16  ;;  %7957 = vmatprep.subr.bf16.mxu1 %v8959_v4  ;;  %v1328_v16 = vld [vmem:[#allocation2 + $0x60] sm:$0xff]  ;;  %1230 = vst [vmem:[#allocation2 + $0x1e8] sm:$0xfe] %v1134_v25  ;;  %983 = vst [vmem:[#allocation2 + $0x1c0] sm:$0xff] %v9638_v47  ;;  %v9673_v10 = vld [vmem:[%s11526_s6 + $0x150] sm:$0xff]  ;;  %v1137_v13 = vrot.slane %v1063_v7, 7  ;;  %v8156_v17 = vpack.c.bf16 %v9652_v36, %v9647_v55 }
  0x62   : > { %4258 = vmatmul.mubr.f32.gmra.mrb[6].mxu0 %v3906_v3  ;;  %1532 = vmatprep.mubr.f32.mxu1 %v1329_v58  ;;  %985 = vst [vmem:[#allocation2 + $0x1e0] sm:$0xfe] %v888_v34  ;;  %v1135_v58 = vrot.slane %v1062_v18, 7  ;;  %v9664_v3 = vld [vmem:[#allocation2 + $0xe8] sm:$0x1]  ;;  %v1065_v36 = vld [vmem:[%s9224_s21 + $0xb0] sm:$0xff] }
  0x63   : > { %8151 = vmatpush1.bf16.msra.mxu0 %v8150_v8  ;;  %4262 = vmatprep.mubr.f32.mxu0 %v3914_v14  ;;  %v7961_v8 = vpack.c.bf16 %v9628_v28, %v9623_v23  ;;  %v816_v14 = vld [vmem:[%s9244_s15 + $0xa0] sm:$0xff]  ;;  %987 = vst [vmem:[#allocation2 + $0x200] sm:$0x1] %v889_v6  ;;  %v1064_v26 = vld [vmem:[%s9224_s21 + $0xa8] sm:$0xff]  ;;  %v1333_v23 = vld [vmem:[#allocation2 + $0x98] sm:$0xff]  ;;  %v3920_v28 = vrot.slane %v9411_v31, 1 }
  0x64   : > { %8152 = vmatprep.subr.bf16.mxu0 %v8959_v4  ;;  %7959 = vmatpush1.bf16.msra.mxu1 %v7958_v20  ;;  %v9681_v54 = vsel %vm860_vm1, %v1134_v25, %v1135_v58  ;;  %1232 = vst [vmem:[#allocation2 + $0x208] sm:$0x1] %v1135_v58  ;;  %v9689_v20 = vsel %vm860_vm1, %v888_v34, %v889_v6  ;;  %v891_v60 = vrot.slane %v816_v14, 7  ;;  %v9700_v34 = vld [vmem:[%s11526_s6 + $0x560] sm:$0xff]  ;;  %1233 = vst [vmem:[#allocation2 + $0x218] sm:$0xfe] %v1137_v13 }
  0x65   : > { %1533 = vmatmul.mubr.f32.gmra.mrb[8].mxu1 %v1328_v16  ;;  %7960 = vmatprep.subr.bf16.mxu1 %v8959_v4  ;;  %1231 = vst [vmem:[#allocation2 + $0x1f8] sm:$0xff] %v9681_v54  ;;  %v3916_v25 = vsel %vm1929_vm2, %v3910_v62, %v3915_v45  ;;  %v9705_v16 = vld [vmem:[%s11526_s6 + $0x568] sm:$0xff]  ;;  %986 = vst [vmem:[#allocation2 + $0x1f0] sm:$0xff] %v9689_v20  ;;  %v1138_v62 = vrot.slane %v1064_v26, 7  ;;  %v3927_v45 = vrot.slane %v9664_v3, 1  ;;  %v1140_v3 = vrot.slane %v1065_v36, 7 }
  0x66   : > { %4263 = vmatmul.mubr.f32.gmra.mrb[8].mxu0 %v3911_v50  ;;  %1537 = vmatprep.mubr.f32.mxu1 %v9308_v29  ;;  %v3919_v29 = vrot.slane %v9662_v5, 1  ;;  %v9713_v18 = vld [vmem:[#allocation2 + $0xe0] sm:$0x1]  ;;  %v7964_v50 = vpack.c.bf16 %v9678_v37, %v9673_v10  ;;  %988 = vst [vmem:[#allocation2 + $0x210] sm:$0xfe] %v891_v60  ;;  %v817_v55 = vld [vmem:[%s9244_s15 + $0xa8] sm:$0xff] }
  0x67   : > { %8154 = vmatpush1.bf16.msra.mxu0 %v8153_v35  ;;  %4267 = vmatprep.mubr.f32.mxu0 %v3918_v0  ;;  %v3924_v35 = vsel %vm1929_vm2, %v3922_v38, %v3923_v57  ;;  %v9720_v58 = vld [vmem:[#allocation2 + $0xf8] sm:$0xfe]  ;;  %v7643_v38 = vld [vmem:[%s11526_s6 + $0x160] sm:$0xff]  ;;  %v7644_v59 = vld [vmem:[%s11526_s6 + $0x168] sm:$0xff]  ;;  %v9730_v0 = vsel %vm860_vm1, %v1137_v13, %v1138_v62  ;;  %1235 = vst [vmem:[#allocation2 + $0x238] sm:$0x1] %v1138_v62 }
  0x68   : > { %8155 = vmatprep.subr.bf16.mxu0 %v8959_v4  ;;  %7962 = vmatpush1.bf16.msra.mxu1 %v7961_v8  ;;  %v892_v5 = vrot.slane %v817_v55, 7  ;;  %v8159_v8 = vpack.c.bf16 %v9705_v16, %v9700_v34  ;;  %v9737_v6 = vld [vmem:[%s11526_s6 + $0x570] sm:$0xff]  ;;  %v3933_v7 = vrot.slane %v9417_v44, 1  ;;  %1234 = vst [vmem:[#allocation2 + $0x228] sm:$0xff] %v9730_v0  ;;  %v3921_v37 = vsel %vm1929_vm2, %v3919_v29, %v3920_v28  ;;  %v9749_v14 = vld [vmem:[%s11526_s6 + $0x578] sm:$0xff]  ;;  %v1337_v55 = vld [vmem:[#allocation2 + $0xc8] sm:$0xff] }
  0x69   : > { %1538 = vmatmul.mubr.f32.gmra.mrb[10].mxu1 %v9314_v32  ;;  %7963 = vmatprep.subr.bf16.mxu1 %v8959_v4  ;;  %v1332_v32 = vld [vmem:[#allocation2 + $0x90] sm:$0xff]  ;;  %v3925_v13 = vrot.slane %v9713_v18, 1  ;;  %v9751_v26 = vld [vmem:[#allocation2 + $0x118] sm:$0x1]  ;;  %1236 = vst [vmem:[#allocation2 + $0x248] sm:$0xfe] %v1140_v3  ;;  %v3928_v29 = vsel %vm1929_vm2, %v3923_v57, %v3927_v45  ;;  %v7967_v62 = vpack.c.bf16 %v7644_v59, %v7643_v38 }
  0x6a   : > { %4268 = vmatmul.mubr.f32.gmra.mrb[10].mxu0 %v3916_v25  ;;  %1542 = vmatprep.mubr.f32.mxu1 %v1333_v23  ;;  %v818_v10 = vld [vmem:[%s9244_s15 + $0xb0] sm:$0xff]  ;;  %v9754_v25 = vsel %vm860_vm1, %v891_v60, %v892_v5  ;;  %990 = vst [vmem:[#allocation2 + $0x230] sm:$0x1] %v892_v5  ;;  %v1066_v23 = vld [vmem:[%s9224_s21 + $0xb8] sm:$0xff]  ;;  %v3932_v34 = vrot.slane %v9720_v58, 1  ;;  %v1067_v18 = vld [vmem:[%s9224_s21 + $0xc0] sm:$0xff] }
  0x6b   : > { %8157 = vmatpush1.bf16.msra.mxu0 %v8156_v17  ;;  %4272 = vmatprep.mubr.f32.mxu0 %v3924_v35  ;;  %v894_v17 = vrot.slane %v818_v10, 7  ;;  %v3721_v16 = vld [vmem:[#allocation2 + $0xf0] sm:$0xfe]  ;;  %989 = vst [vmem:[#allocation2 + $0x220] sm:$0xff] %v9754_v25  ;;  %v1141_v35 = vrot.slane %v1066_v23, 7  ;;  %v7646_v57 = vld [vmem:[%s11526_s6 + $0x178] sm:$0xff]  ;;  %v3926_v5 = vsel %vm1929_vm2, %v3920_v28, %v3925_v13 }
  0x6c   : > { %8158 = vmatprep.subr.bf16.mxu0 %v8959_v4  ;;  %7965 = vmatpush1.bf16.msra.mxu1 %v7964_v50  ;;  %v9765_v60 = vld [vmem:[%s11526_s6 + $0x170] sm:$0xff]  ;;  %v819_v45 = vld [vmem:[%s9244_s15 + $0xb8] sm:$0xff]  ;;  %v8162_v50 = vpack.c.bf16 %v9749_v14, %v9737_v6  ;;  %v9780_v36 = vld [vmem:[%s11526_s6 + $0x580] sm:$0xff]  ;;  %v1143_v59 = vrot.slane %v1067_v18, 7  ;;  %v3930_v6 = vrot.slane %v9432_v49, 1  ;;  %v3937_v10 = vrot.slane %v9751_v26, 1 }
  0x6d   : > { %1543 = vmatmul.mubr.f32.gmra.mrb[12].mxu1 %v1332_v32  ;;  %7966 = vmatprep.subr.bf16.mxu1 %v8959_v4  ;;  %991 = vst [vmem:[#allocation2 + $0x240] sm:$0xfe] %v894_v17  ;;  %v9785_v58 = vld [vmem:[%s11526_s6 + $0x588] sm:$0xff]  ;;  %v9788_v38 = vsel %vm860_vm1, %v1140_v3, %v1141_v35  ;;  %1238 = vst [vmem:[#allocation2 + $0x268] sm:$0x1] %v1141_v35  ;;  %v3929_v32 = vrot.slane %v3721_v16, 1  ;;  %v7970_v28 = vpack.c.bf16 %v7646_v57, %v9765_v60 }
  0x6e   : > { %4273 = vmatmul.mubr.f32.gmra.mrb[12].mxu0 %v3921_v37  ;;  %1547 = vmatprep.mubr.f32.mxu1 %v9339_v51  ;;  %v895_v51 = vrot.slane %v819_v45, 7  ;;  %v9795_v37 = vld [vmem:[#allocation2 + $0x110] sm:$0x1]  ;;  %1237 = vst [vmem:[#allocation2 + $0x258] sm:$0xff] %v9788_v38  ;;  %v820_v3 = vld [vmem:[%s9244_s15 + $0xc0] sm:$0xff]  ;;  %v1068_v23 = vld [vmem:[%s9224_s21 + $0xc8] sm:$0xff] }
  0x6f   : > { %8160 = vmatpush1.bf16.msra.mxu0 %v8159_v8  ;;  %4277 = vmatprep.mubr.f32.mxu0 %v3928_v29  ;;  %v3934_v8 = vsel %vm1929_vm2, %v3932_v34, %v3933_v7  ;;  %v9803_v14 = vld [vmem:[#allocation2 + $0x128] sm:$0xfe]  ;;  %1239 = vst [vmem:[#allocation2 + $0x278] sm:$0xfe] %v1143_v59  ;;  %v897_v26 = vrot.slane %v820_v3, 7  ;;  %v7647_v29 = vld [vmem:[%s11526_s6 + $0x180] sm:$0xff]  ;;  %v3931_v45 = vsel %vm1929_vm2, %v3929_v32, %v3930_v6 }
  0x70   : > { %8161 = vmatprep.subr.bf16.mxu0 %v8959_v4  ;;  %7968 = vmatpush1.bf16.msra.mxu1 %v7967_v62  ;;  %v9807_v13 = vsel %vm860_vm1, %v894_v17, %v895_v51  ;;  %993 = vst [vmem:[#allocation2 + $0x260] sm:$0x1] %v895_v51  ;;  %v7648_v34 = vld [vmem:[%s11526_s6 + $0x188] sm:$0xff]  ;;  %v1144_v17 = vrot.slane %v1068_v23, 7  ;;  %v1336_v16 = vld [vmem:[#allocation2 + $0xc0] sm:$0xff]  ;;  %v3935_v62 = vrot.slane %v9795_v37, 1 }
  0x71   : > { %1548 = vmatmul.mubr.f32.gmra.mrb[14].mxu1 %v9342_v53  ;;  %7969 = vmatprep.subr.bf16.mxu1 %v8959_v4  ;;  %992 = vst [vmem:[#allocation2 + $0x250] sm:$0xff] %v9807_v13  ;;  %v8165_v53 = vpack.c.bf16 %v9785_v58, %v9780_v36  ;;  %v9825_v60 = vld [vmem:[%s11526_s6 + $0x590] sm:$0xff]  ;;  %v3943_v35 = vrot.slane %v9446_v63, 1  ;;  %994 = vst [vmem:[#allocation2 + $0x270] sm:$0xfe] %v897_v26  ;;  %v821_v57 = vld [vmem:[%s9244_s15 + $0xc8] sm:$0xff]  ;;  %v7973_v3 = vpack.c.bf16 %v7648_v34, %v7647_v29 }
  0x72   : > { %4278 = vmatmul.mubr.f32.gmra.mrb[14].mxu0 %v3926_v5  ;;  %1552 = vmatprep.mubr.f32.mxu1 %v1337_v55  ;;  %v9835_v18 = vld [vmem:[%s11526_s6 + $0x598] sm:$0xff]  ;;  %v3942_v55 = vrot.slane %v9803_v14, 1  ;;  %v9839_v36 = vsel %vm860_vm1, %v1143_v59, %v1144_v17  ;;  %1241 = vst [vmem:[#allocation2 + $0x298] sm:$0x1] %v1144_v17  ;;  %v898_v58 = vrot.slane %v821_v57, 7  ;;  %v1069_v51 = vld [vmem:[%s9224_s21 + $0xd0] sm:$0xff] }
  0x73   : > { %8163 = vmatpush1.bf16.msra.mxu0 %v8162_v50  ;;  %4282 = vmatprep.mubr.f32.mxu0 %v3934_v8  ;;  %v822_v5 = vld [vmem:[%s9244_s15 + $0xd0] sm:$0xff]  ;;  %v3938_v50 = vsel %vm1929_vm2, %v3933_v7, %v3937_v10  ;;  %v3727_v32 = vld [vmem:[#allocation2 + $0x120] sm:$0xfe]  ;;  %v9847_v37 = vld [vmem:[#allocation2 + $0x148] sm:$0x1]  ;;  %1240 = vst [vmem:[#allocation2 + $0x288] sm:$0xff] %v9839_v36  ;;  %v8168_v23 = vpack.c.bf16 %v9835_v18, %v9825_v60 }
  0x74   : > { %8164 = vmatprep.subr.bf16.mxu0 %v8959_v4  ;;  %7971 = vmatpush1.bf16.msra.mxu1 %v7970_v28  ;;  %v1146_v59 = vrot.slane %v1069_v51, 7  ;;  %v900_v8 = vrot.slane %v822_v5, 7  ;;  %v7649_v14 = vld [vmem:[%s11526_s6 + $0x190] sm:$0xff]  ;;  %v7650_v7 = vld [vmem:[%s11526_s6 + $0x198] sm:$0xff]  ;;  %v9858_v10 = vsel %vm860_vm1, %v897_v26, %v898_v58  ;;  %996 = vst [vmem:[#allocation2 + $0x290] sm:$0x1] %v898_v58 }
  0x75   : > { %1553 = vmatmul.mubr.f32.gmra.mrb[16].mxu1 %v1336_v16  ;;  %7972 = vmatprep.subr.bf16.mxu1 %v8959_v4  ;;  %v1070_v28 = vld [vmem:[%s9224_s21 + $0xd8] sm:$0xff]  ;;  %v9867_v29 = vld [vmem:[%s11526_s6 + $0x5a0] sm:$0xff]  ;;  %995 = vst [vmem:[#allocation2 + $0x280] sm:$0xff] %v9858_v10  ;;  %v3939_v17 = vrot.slane %v3727_v32, 1  ;;  %v3940_v16 = vrot.slane %v9467_v11, 1  ;;  %v7780_v60 = vld [vmem:[%s11526_s6 + $0x5a8] sm:$0xff] }
  0x76   : > { %4283 = vmatmul.mubr.f32.gmra.mrb[16].mxu0 %v3931_v45  ;;  %1557 = vmatprep.mubr.f32.mxu1 %v9387_v12  ;;  %1242 = vst [vmem:[#allocation2 + $0x2a8] sm:$0xfe] %v1146_v59  ;;  %997 = vst [vmem:[#allocation2 + $0x2a0] sm:$0xfe] %v900_v8  ;;  %v1147_v26 = vrot.slane %v1070_v28, 7  ;;  %v3936_v12 = vsel %vm1929_vm2, %v3930_v6, %v3935_v62  ;;  %v1341_v34 = vld [vmem:[#allocation2 + $0xf8] sm:$0xff]  ;;  %v7976_v6 = vpack.c.bf16 %v7650_v7, %v7649_v14 }
  0x77   : > { %8166 = vmatpush1.bf16.msra.mxu0 %v8165_v53  ;;  %4287 = vmatprep.mubr.f32.mxu0 %v3938_v50  ;;  %v3947_v57 = vrot.slane %v9847_v37, 1  ;;  %v823_v45 = vld [vmem:[%s9244_s15 + $0xd8] sm:$0xff]  ;;  %v3944_v53 = vsel %vm1929_vm2, %v3942_v55, %v3943_v35  ;;  %v3731_v18 = vld [vmem:[#allocation2 + $0x140] sm:$0x1]  ;;  %v7652_v32 = vld [vmem:[%s11526_s6 + $0x1a8] sm:$0xff]  ;;  %v3941_v7 = vsel %vm1929_vm2, %v3939_v17, %v3940_v16  ;;  %v8171_v28 = vpack.c.bf16 %v7780_v60, %v9867_v29 }
  0x78   : > { %8167 = vmatprep.subr.bf16.mxu0 %v8959_v4  ;;  %7974 = vmatpush1.bf16.msra.mxu1 %v7973_v3  ;;  %v9884_v62 = vsel %vm860_vm1, %v1146_v59, %v1147_v26  ;;  %1244 = vst [vmem:[#allocation2 + $0x2c8] sm:$0x1] %v1147_v26  ;;  %v901_v58 = vrot.slane %v823_v45, 7  ;;  %v1071_v51 = vld [vmem:[%s9224_s21 + $0xe0] sm:$0xff]  ;;  %v3734_v50 = vld [vmem:[#allocation2 + $0x158] sm:$0xfe] }
  0x79   : > { %v824_v5 = vld [vmem:[%s9244_s15 + $0xe0] sm:$0xff]  ;;  %1558 = vmatmul.mubr.f32.gmra.mrb[18].mxu1 %v9411_v31  ;;  %7975 = vmatprep.subr.bf16.mxu1 %v8959_v4  ;;  %1243 = vst [vmem:[#allocation2 + $0x2b8] sm:$0xff] %v9884_v62  ;;  %v1149_v37 = vrot.slane %v1071_v51, 7  ;;  %v1340_v59 = vld [vmem:[#allocation2 + $0xf0] sm:$0xff]  ;;  %v1072_v14 = vld [vmem:[%s9224_s21 + $0xe8] sm:$0xff]  ;;  %v3945_v26 = vrot.slane %v3731_v18, 1 }
  0x7a   : > { %v7651_v55 = vld [vmem:[%s11526_s6 + $0x1a0] sm:$0xff]  ;;  %v903_v3 = vrot.slane %v824_v5, 7  ;;  %4288 = vmatmul.mubr.f32.gmra.mrb[18].mxu0 %v3936_v12  ;;  %1562 = vmatprep.mubr.f32.mxu1 %v1341_v34  ;;  %v9898_v31 = vsel %vm860_vm1, %v900_v8, %v901_v58  ;;  %999 = vst [vmem:[#allocation2 + $0x2c0] sm:$0x1] %v901_v58  ;;  %v7781_v45 = vld [vmem:[%s11526_s6 + $0x5b0] sm:$0xff]  ;;  %v7782_v12 = vld [vmem:[%s11526_s6 + $0x5b8] sm:$0xff] }
  0x7b   : > { %8169 = vmatpush1.bf16.msra.mxu0 %v8168_v23  ;;  %4292 = vmatprep.mubr.f32.mxu0 %v3944_v53  ;;  %998 = vst [vmem:[#allocation2 + $0x2b0] sm:$0xff] %v9898_v31  ;;  %1245 = vst [vmem:[#allocation2 + $0x2d8] sm:$0xfe] %v1149_v37  ;;  %v1150_v8 = vrot.slane %v1072_v14, 7  ;;  %v3948_v23 = vsel %vm1929_vm2, %v3943_v35, %v3947_v57  ;;  %v3952_v29 = vrot.slane %v3734_v50, 1  ;;  %v3953_v34 = vrot.slane %v9492_v39, 1 }
  0x7c   : > { %1000 = vst [vmem:[#allocation2 + $0x2d0] sm:$0xfe] %v903_v3  ;;  %8170 = vmatprep.subr.bf16.mxu0 %v8959_v4  ;;  %v3733_v17 = vld [vmem:[#allocation2 + $0x150] sm:$0xfe]  ;;  %7977 = vmatpush1.bf16.msra.mxu1 %v7976_v6  ;;  %v7979_v60 = vpack.c.bf16 %v7652_v32, %v7651_v55  ;;  %v825_v53 = vld [vmem:[%s9244_s15 + $0xe8] sm:$0xff]  ;;  %v7654_v51 = vld [vmem:[%s11526_s6 + $0x1b8] sm:$0xff]  ;;  %v8174_v6 = vpack.c.bf16 %v7782_v12, %v7781_v45 }
  0x7d   : > { %1563 = vmatmul.mubr.f32.gmra.mrb[20].mxu1 %v1340_v59  ;;  %v3738_v18 = vld [vmem:[#allocation2 + $0x178] sm:$0x1]  ;;  %7978 = vmatprep.subr.bf16.mxu1 %v8959_v4  ;;  %v7653_v58 = vld [vmem:[%s11526_s6 + $0x1b0] sm:$0xff]  ;;  %v9924_v35 = vsel %vm860_vm1, %v1149_v37, %v1150_v8  ;;  %1247 = vst [vmem:[#allocation2 + $0x2f8] sm:$0x1] %v1150_v8  ;;  %v904_v57 = vrot.slane %v825_v53, 7  ;;  %v3946_v5 = vsel %vm1929_vm2, %v3940_v16, %v3945_v26 }
  0x7e   : > { %4293 = vmatmul.mubr.f32.gmra.mrb[20].mxu0 %v3941_v7  ;;  %1567 = vmatprep.mubr.f32.mxu1 %v9417_v44  ;;  %1246 = vst [vmem:[#allocation2 + $0x2e8] sm:$0xff] %v9924_v35  ;;  %v1345_v50 = vld [vmem:[#allocation2 + $0x128] sm:$0xff]  ;;  %v3949_v55 = vrot.slane %v3733_v17, 1  ;;  %v3950_v32 = vrot.slane %v9514_v61, 1  ;;  %v3954_v37 = vsel %vm1929_vm2, %v3952_v29, %v3953_v34  ;;  %v7783_v44 = vld [vmem:[%s11526_s6 + $0x5c0] sm:$0xff]  ;;  %v3957_v14 = vrot.slane %v3738_v18, 1 }
  0x7f   : > { %8172 = vmatpush1.bf16.msra.mxu0 %v8171_v28  ;;  %4297 = vmatprep.mubr.f32.mxu0 %v3948_v23  ;;  %v9931_v59 = vsel %vm860_vm1, %v903_v3, %v904_v57  ;;  %1002 = vst [vmem:[#allocation2 + $0x2f0] sm:$0x1] %v904_v57  ;;  %v7784_v16 = vld [vmem:[%s11526_s6 + $0x5c8] sm:$0xff]  ;;  %v3737_v7 = vld [vmem:[#allocation2 + $0x170] sm:$0x1]  ;;  %v7982_v28 = vpack.c.bf16 %v7654_v51, %v7653_v58  ;;  %v7655_v26 = vld [vmem:[%s11526_s6 + $0x1c0] sm:$0xff] }
  0x80   : > { %8173 = vmatprep.subr.bf16.mxu0 %v8959_v4  ;;  %7980 = vmatpush1.bf16.msra.mxu1 %v7979_v60  ;;  %1001 = vst [vmem:[#allocation2 + $0x2e0] sm:$0xff] %v9931_v59  ;;  %v3740_v3 = vld [vmem:[#allocation2 + $0x188] sm:$0xfe]  ;;  %v1344_v12 = vld [vmem:[#allocation2 + $0x120] sm:$0xff]  ;;  %v3951_v8 = vsel %vm1929_vm2, %v3949_v55, %v3950_v32  ;;  %v8177_v23 = vpack.c.bf16 %v7784_v16, %v7783_v44  ;;  %v7785_v17 = vld [vmem:[%s11526_s6 + $0x5d0] sm:$0xff]  ;;  %v3963_v18 = vrot.slane %v9533_v40, 1 }
  0x81   : > { %1568 = vmatmul.mubr.f32.gmra.mrb[22].mxu1 %v9432_v49  ;;  %7981 = vmatprep.subr.bf16.mxu1 %v8959_v4  ;;  %v7656_v45 = vld [vmem:[%s11526_s6 + $0x1c8] sm:$0xff]  ;;  %v3955_v49 = vrot.slane %v3737_v7, 1  ;;  %v3958_v29 = vsel %vm1929_vm2, %v3953_v34, %v3957_v14  ;;  %v7786_v60 = vld [vmem:[%s11526_s6 + $0x5d8] sm:$0xff]  ;;  %v3962_v53 = vrot.slane %v3740_v3, 1  ;;  %v3739_v58 = vld [vmem:[#allocation2 + $0x180] sm:$0xfe] }
  0x82   : > { %4298 = vmatmul.mubr.f32.gmra.mrb[22].mxu0 %v3946_v5  ;;  %1572 = vmatprep.mubr.f32.mxu1 %v1345_v50  ;;  %v7985_v51 = vpack.c.bf16 %v7656_v45, %v7655_v26  ;;  %v3744_v57 = vld [vmem:[#allocation2 + $0x1a8] sm:$0x1]  ;;  %v7657_v34 = vld [vmem:[%s11526_s6 + $0x1d0] sm:$0xff]  ;;  %v8180_v50 = vpack.c.bf16 %v7786_v60, %v7785_v17  ;;  %v1349_v55 = vld [vmem:[#allocation2 + $0x158] sm:$0xff]  ;;  %v3960_v44 = vrot.slane %v9536_v42, 1 }
  0x83   : > { %8175 = vmatpush1.bf16.msra.mxu0 %v8174_v6  ;;  %4302 = vmatprep.mubr.f32.mxu0 %v3954_v37  ;;  %v7658_v6 = vld [vmem:[%s11526_s6 + $0x1d8] sm:$0xff]  ;;  %v3956_v5 = vsel %vm1929_vm2, %v3950_v32, %v3955_v49  ;;  %v3959_v37 = vrot.slane %v3739_v58, 1  ;;  %v3964_v16 = vsel %vm1929_vm2, %v3962_v53, %v3963_v18  ;;  %v7787_v14 = vld [vmem:[%s11526_s6 + $0x5e0] sm:$0xff]  ;;  %v3967_v7 = vrot.slane %v3744_v57, 1  ;;  %v7660_v45 = vld [vmem:[%s11526_s6 + $0x1e8] sm:$0xff] }
  0x84   : > { %8176 = vmatprep.subr.bf16.mxu0 %v8959_v4  ;;  %7983 = vmatpush1.bf16.msra.mxu1 %v7982_v28  ;;  %v3743_v28 = vld [vmem:[#allocation2 + $0x1a0] sm:$0x1]  ;;  %v7988_v32 = vpack.c.bf16 %v7658_v6, %v7657_v34  ;;  %v4468_v3 = vld [vmem:[#allocation2 + $0x38] sm:$0xfc]  ;;  %v8902_v53 = vld [vmem:[#allocation2 + $0x48] sm:$0xff] }
  0x85   : > { %1573 = vmatmul.mubr.f32.gmra.mrb[24].mxu1 %v1344_v12  ;;  %7984 = vmatprep.subr.bf16.mxu1 %v8959_v4  ;;  %v7659_v26 = vld [vmem:[%s11526_s6 + $0x1e0] sm:$0xff]  ;;  %v1348_v12 = vld [vmem:[#allocation2 + $0x150] sm:$0xff]  ;;  %v3968_v49 = vsel %vm1929_vm2, %v3963_v18, %v3967_v7  ;;  %v7790_v17 = vld [vmem:[%s11526_s6 + $0x5f8] sm:$0xff]  ;;  %v4662_v60 = vrot.slane %v4468_v3, 2  ;;  %v4663_v58 = vrot.slane %v8902_v53, 2 }
  0x86   : > { %4303 = vmatmul.mubr.f32.gmra.mrb[24].mxu0 %v3951_v8  ;;  %1577 = vmatprep.mubr.f32.mxu1 %v9446_v63  ;;  %v7788_v63 = vld [vmem:[%s11526_s6 + $0x5e8] sm:$0xff]  ;;  %v3961_v8 = vsel %vm1929_vm2, %v3959_v37, %v3960_v44  ;;  %v7991_v57 = vpack.c.bf16 %v7660_v45, %v7659_v26  ;;  %v4472_v34 = vld [vmem:[#allocation2 + $0x58] sm:$0x3]  ;;  %v7661_v18 = vld [vmem:[%s11526_s6 + $0x1f0] sm:$0xff] }
  0x87   : > { %8178 = vmatpush1.bf16.msra.mxu0 %v8177_v23  ;;  %4307 = vmatprep.mubr.f32.mxu0 %v3958_v29  ;;  %v8183_v23 = vpack.c.bf16 %v7788_v63, %v7787_v14  ;;  %v7789_v29 = vld [vmem:[%s11526_s6 + $0x5f0] sm:$0xff]  ;;  %v7662_v6 = vld [vmem:[%s11526_s6 + $0x1f8] sm:$0xff]  ;;  %v4664_v63 = vsel %vm2700_vm3, %v4662_v60, %v4663_v58  ;;  %v4667_v7 = vrot.slane %v4472_v34, 2  ;;  %v4474_v3 = vld [vmem:[#allocation2 + $0x68] sm:$0xfc] }
  0x88   : > { %8179 = vmatprep.subr.bf16.mxu0 %v8959_v4  ;;  %7986 = vmatpush1.bf16.msra.mxu1 %v7985_v51  ;;  %v4467_v51 = vld [vmem:[#allocation2 + $0x30] sm:$0xfc]  ;;  %v1352_v26 = vld [vmem:[#allocation2 + $0x180] sm:$0xff]  ;;  %v7794_v60 = vld [vmem:[%s11526_s6 + $0x618] sm:$0xff] }
  0x89   : > { %1578 = vmatmul.mubr.f32.gmra.mrb[26].mxu1 %v9467_v11  ;;  %7987 = vmatprep.subr.bf16.mxu1 %v8959_v4  ;;  %v3965_v11 = vrot.slane %v3743_v28, 1  ;;  %v4659_v37 = vrot.slane %v4467_v51, 2  ;;  %v7791_v28 = vld [vmem:[%s11526_s6 + $0x600] sm:$0xff]  ;;  %v4478_v53 = vld [vmem:[#allocation2 + $0x88] sm:$0x3]  ;;  %v1357_v51 = vld [vmem:[#allocation2 + $0x1b8] sm:$0xff] }
  0x8a   : > { %4308 = vmatmul.mubr.f32.gmra.mrb[26].mxu0 %v3956_v5  ;;  %1582 = vmatprep.mubr.f32.mxu1 %v1349_v55  ;;  %v1353_v55 = vld [vmem:[#allocation2 + $0x188] sm:$0xff]  ;;  %v8905_v34 = vld [vmem:[#allocation2 + $0x70] sm:$0xff] }
  0x8b   : > { %8181 = vmatpush1.bf16.msra.mxu0 %v8180_v50  ;;  %4312 = vmatprep.mubr.f32.mxu0 %v3964_v16  ;;  %v3966_v5 = vsel %vm1929_vm2, %v3960_v44, %v3965_v11  ;;  %v8186_v50 = vpack.c.bf16 %v7790_v17, %v7789_v29  ;;  %v8903_v16 = vld [vmem:[#allocation2 + $0x40] sm:$0xff]  ;;  %v7994_v44 = vpack.c.bf16 %v7662_v6, %v7661_v18  ;;  %v4672_v11 = vrot.slane %v4474_v3, 2  ;;  %v7793_v17 = vld [vmem:[%s11526_s6 + $0x610] sm:$0xff] }
  0x8c   : > { %8182 = vmatprep.subr.bf16.mxu0 %v8959_v4  ;;  %7989 = vmatpush1.bf16.msra.mxu1 %v7988_v32  ;;  %v4660_v14 = vrot.slane %v8903_v16, 2  ;;  %v4471_v32 = vld [vmem:[#allocation2 + $0x50] sm:$0x3]  ;;  %v4670_v18 = vrot.slane %v8905_v34, 2  ;;  %v8192_v6 = vpack.c.bf16 %v7794_v60, %v7793_v17  ;;  %v4480_v16 = vld [vmem:[#allocation2 + $0x98] sm:$0xfc] }
  0x8d   : > { %1583 = vmatmul.mubr.f32.gmra.mrb[28].mxu1 %v1348_v12  ;;  %7990 = vmatprep.subr.bf16.mxu1 %v8959_v4 }
  0x8e   : > { %4313 = vmatmul.mubr.f32.gmra.mrb[28].mxu0 %v3961_v8  ;;  %1587 = vmatprep.mubr.f32.mxu1 %v9492_v39  ;;  %v7792_v39 = vld [vmem:[%s11526_s6 + $0x608] sm:$0xff]  ;;  %v4661_v45 = vsel %vm2700_vm3, %v4659_v37, %v4660_v14  ;;  %v4665_v8 = vrot.slane %v4471_v32, 2  ;;  %v7795_v37 = vld [vmem:[%s11526_s6 + $0x620] sm:$0xff]  ;;  %v4682_v32 = vrot.slane %v4480_v16, 2  ;;  %v7802_v16 = vld [vmem:[%s11526_s6 + $0x658] sm:$0xff] }
  0x8f   : > { %8184 = vmatpush1.bf16.msra.mxu0 %v8183_v23  ;;  %4317 = vmatprep.mubr.f32.mxu0 %v3968_v49  ;;  %v8189_v12 = vpack.c.bf16 %v7792_v39, %v7791_v28  ;;  %v4668_v23 = vsel %vm2700_vm3, %v4663_v58, %v4667_v7  ;;  %v8904_v49 = vld [vmem:[#allocation2 + $0x78] sm:$0xff] }
  0x90   : > { %8185 = vmatprep.subr.bf16.mxu0 %v8959_v4  ;;  %7992 = vmatpush1.bf16.msra.mxu1 %v7991_v57  ;;  %v4673_v29 = vrot.slane %v8904_v49, 2  ;;  %v4666_v58 = vsel %vm2700_vm3, %v4660_v14, %v4665_v8  ;;  %v1356_v14 = vld [vmem:[#allocation2 + $0x1b0] sm:$0xff]  ;;  %v8907_v49 = vld [vmem:[#allocation2 + $0xa0] sm:$0xff] }
  0x91   : > { %1588 = vmatmul.mubr.f32.gmra.mrb[30].mxu1 %v9514_v61  ;;  %7993 = vmatprep.subr.bf16.mxu1 %v8959_v4  ;;  %v4473_v61 = vld [vmem:[#allocation2 + $0x60] sm:$0xfc] }
  0x92   : > { %4318 = vmatmul.mubr.f32.gmra.mrb[30].mxu0 %v3966_v5  ;;  %1592 = vmatprep.mubr.f32.mxu1 %v1353_v55  ;;  %v4669_v57 = vrot.slane %v4473_v61, 2  ;;  %v4674_v5 = vsel %vm2700_vm3, %v4672_v11, %v4673_v29  ;;  %v4477_v55 = vld [vmem:[#allocation2 + $0x80] sm:$0x3]  ;;  %v4483_v61 = vld [vmem:[#allocation2 + $0xb0] sm:$0x3] }
  0x93   : > { %8187 = vmatpush1.bf16.msra.mxu0 %v8186_v50  ;;  %5012 = vmatprep.mubr.f32.mxu0 %v4664_v63  ;;  %v4677_v50 = vrot.slane %v4478_v53, 2  ;;  %v4675_v7 = vrot.slane %v4477_v55, 2  ;;  %v4685_v34 = vrot.slane %v4483_v61, 2 }
  0x94   : > { %8188 = vmatprep.subr.bf16.mxu0 %v8959_v4  ;;  %7995 = vmatpush1.bf16.msra.mxu1 %v7994_v44  ;;  %v4671_v63 = vsel %vm2700_vm3, %v4669_v57, %v4670_v18  ;;  %v8906_v44 = vld [vmem:[#allocation2 + $0xa8] sm:$0xff]  ;;  %v1360_v57 = vld [vmem:[#allocation2 + $0x1e0] sm:$0xff] }
  0x95   : > { %1593 = vmatmul.mubr.f32.gmra.mrb[32].mxu1 %v1352_v26  ;;  %7996 = vmatprep.subr.bf16.mxu1 %v8959_v4  ;;  %v4678_v39 = vsel %vm2700_vm3, %v4673_v29, %v4677_v50  ;;  %v4683_v3 = vrot.slane %v8906_v44, 2  ;;  %v4479_v26 = vld [vmem:[#allocation2 + $0x90] sm:$0xfc]  ;;  %v4676_v8 = vsel %vm2700_vm3, %v4670_v18, %v4675_v7  ;;  %v4680_v29 = vrot.slane %v8907_v49, 2  ;;  %v4490_v7 = vld [vmem:[#allocation2 + $0xe8] sm:$0x3] }
  0x96   : > { %5013 = vmatmul.mubr.f32.vlgmr.msra.gmra.mrb[0].mxu0 %v4661_v45  ;;  %1597 = vmatprep.mubr.f32.mxu1 %v9533_v40  ;;  %v7796_v40 = vld [vmem:[%s11526_s6 + $0x628] sm:$0xff]  ;;  %v7798_v45 = vld [vmem:[%s11526_s6 + $0x638] sm:$0xff]  ;;  %v4679_v11 = vrot.slane %v4479_v26, 2  ;;  %v7801_v50 = vld [vmem:[%s11526_s6 + $0x650] sm:$0xff] }
  0x97   : > { %5017 = vmatprep.mubr.f32.mxu0 %v4668_v23  ;;  %8190 = vmatpush1.bf16.msra.mxu0 %v8189_v12  ;;  %v8195_v28 = vpack.c.bf16 %v7796_v40, %v7795_v37  ;;  %v4484_v12 = vld [vmem:[#allocation2 + $0xb8] sm:$0x3]  ;;  %v1361_v23 = vld [vmem:[#allocation2 + $0x1e8] sm:$0xff]  ;;  %v4684_v60 = vsel %vm2700_vm3, %v4682_v32, %v4683_v3  ;;  %v826_v32 = vld [vmem:[%s9244_s15 + $0xf0] sm:$0xff]  ;;  %v4686_v44 = vsel %vm2700_vm3, %v4680_v29, %v4685_v34 }
  0x98   : > { %8191 = vmatprep.subr.bf16.mxu0 %v8959_v4  ;;  %v4687_v53 = vrot.slane %v4484_v12, 2  ;;  %v4681_v18 = vsel %vm2700_vm3, %v4679_v11, %v4680_v29  ;;  %v8908_v37 = vld [vmem:[#allocation2 + $0xd8] sm:$0xff]  ;;  %v8909_v26 = vld [vmem:[#allocation2 + $0xd0] sm:$0xff]  ;;  %v906_v11 = vrot.slane %v826_v32, 7  ;;  %v7803_v29 = vld [vmem:[%s11526_s6 + $0x660] sm:$0xff] }
  0x99   : > { %1598 = vmatmul.mubr.f32.gmra.mrb[34].mxu1 %v9536_v42  ;;  %v7797_v42 = vld [vmem:[%s11526_s6 + $0x630] sm:$0xff]  ;;  %v4693_v40 = vrot.slane %v8908_v37, 2  ;;  %v1365_v12 = vld [vmem:[#allocation2 + $0x218] sm:$0xff] }
  0x9a   : > { %5018 = vmatmul.mubr.f32.gmra.mrb[2].mxu0 %v4666_v58  ;;  %1602 = vmatprep.mubr.f32.mxu1 %v1357_v51  ;;  %v8198_v17 = vpack.c.bf16 %v7798_v45, %v7797_v42  ;;  %v7799_v58 = vld [vmem:[%s11526_s6 + $0x640] sm:$0xff]  ;;  %v4486_v51 = vld [vmem:[#allocation2 + $0xc8] sm:$0xfc]  ;;  %v4690_v42 = vrot.slane %v8909_v26, 2  ;;  %v827_v45 = vld [vmem:[%s9244_s15 + $0xf8] sm:$0xff]  ;;  %s10383_s15 = scalar_lea.vmem %s11522_s2, %s7892_s23 }
  0x9b   : > { %5022 = vmatprep.mubr.f32.mxu0 %v4674_v5  ;;  %8193 = vmatpush1.bf16.msra.mxu0 %v8192_v6  ;;  %v4485_v6 = vld [vmem:[#allocation2 + $0xc0] sm:$0xfc]  ;;  %v4692_v55 = vrot.slane %v4486_v51, 2  ;;  %v907_v49 = vrot.slane %v827_v45, 7  ;;  %1003 = vst [vmem:[#allocation2 + $0x300] sm:$0xfe] %v906_v11 }
  0x9c   : > { %8194 = vmatprep.subr.bf16.mxu0 %v8959_v4  ;;  %v4496_v37 = vld [vmem:[#allocation2 + $0x118] sm:$0x3]  ;;  %v4498_v26 = vld [vmem:[#allocation2 + $0x128] sm:$0xfc] }
  0x9d   : > { %1603 = vmatmul.mubr.f32.gmra.mrb[36].mxu1 %v1356_v14  ;;  %v1073_v14 = vld [vmem:[%s9224_s21 + $0xf0] sm:$0xff]  ;;  %v4694_v61 = vsel %vm2700_vm3, %v4692_v55, %v4693_v40  ;;  %1005 = vst [vmem:[#allocation2 + $0x320] sm:$0x1] %v907_v49  ;;  %v7806_v55 = vld [vmem:[%s11526_s6 + $0x678] sm:$0xff]  ;;  %v4707_v32 = vrot.slane %v4496_v37, 2 }
  0x9e   : > { %5023 = vmatmul.mubr.f32.gmra.mrb[4].mxu0 %v4671_v63  ;;  %1607 = vmatprep.mubr.f32.mxu1 %v9631_v30  ;;  %v7800_v30 = vld [vmem:[%s11526_s6 + $0x648] sm:$0xff]  ;;  %v1074_v63 = vld [vmem:[%s9224_s21 + $0xf8] sm:$0xff] }
  0x9f   : > { %5027 = vmatprep.mubr.f32.mxu0 %v4678_v39  ;;  %8196 = vmatpush1.bf16.msra.mxu0 %v8195_v28  ;;  %v8201_v5 = vpack.c.bf16 %v7800_v30, %v7799_v58  ;;  %v1152_v28 = vrot.slane %v1073_v14, 7  ;;  %v1153_v39 = vrot.slane %v1074_v63, 7  ;;  %v908_v58 = vsel %vm860_vm1, %v906_v11, %v907_v49  ;;  %v1364_v30 = vld [vmem:[#allocation2 + $0x210] sm:$0xff]  ;;  %v8911_v63 = vld [vmem:[#allocation2 + $0x100] sm:$0xff] }
  0xa0   : > { %8197 = vmatprep.subr.bf16.mxu0 %v8959_v4  ;;  %1004 = vst [vmem:[#allocation2 + $0x310] sm:$0xff] %v908_v58  ;;  %v4712_v49 = vrot.slane %v4498_v26, 2  ;;  %v1373_v58 = vld [vmem:[#allocation2 + $0x278] sm:$0xff]  ;;  %v8915_v26 = vld [vmem:[#allocation2 + $0x160] sm:$0xff] }
  0xa1   : > { %1608 = vmatmul.mubr.f32.gmra.mrb[38].mxu1 %v9638_v47  ;;  %v4688_v47 = vsel %vm2700_vm3, %v4683_v3, %v4687_v53  ;;  %v4689_v3 = vrot.slane %v4485_v6, 2  ;;  %1248 = vst [vmem:[#allocation2 + $0x308] sm:$0xfe] %v1152_v28  ;;  %1250 = vst [vmem:[#allocation2 + $0x328] sm:$0x1] %v1153_v39 }
  0xa2   : > { %5028 = vmatmul.mubr.f32.gmra.mrb[6].mxu0 %v4676_v8  ;;  %1612 = vmatprep.mubr.f32.mxu1 %v1361_v23  ;;  %v8204_v8 = vpack.c.bf16 %v7802_v16, %v7801_v50  ;;  %v10071_v23 = vsel %vm860_vm1, %v1152_v28, %v1153_v39  ;;  %v4492_v53 = vld [vmem:[#allocation2 + $0xf8] sm:$0xfc]  ;;  %v4491_v50 = vld [vmem:[#allocation2 + $0xf0] sm:$0xfc]  ;;  %v1369_v16 = vld [vmem:[#allocation2 + $0x248] sm:$0xff] }
  0xa3   : > { %5032 = vmatprep.mubr.f32.mxu0 %v4684_v60  ;;  %8199 = vmatpush1.bf16.msra.mxu0 %v8198_v17  ;;  %v4489_v17 = vld [vmem:[#allocation2 + $0xe0] sm:$0x3]  ;;  %v7804_v60 = vld [vmem:[%s11526_s6 + $0x668] sm:$0xff]  ;;  %1249 = vst [vmem:[#allocation2 + $0x318] sm:$0xff] %v10071_v23  ;;  %v4691_v51 = vsel %vm2700_vm3, %v4689_v3, %v4690_v42  ;;  %v4702_v6 = vrot.slane %v4492_v53, 2  ;;  %v4699_v14 = vrot.slane %v4491_v50, 2 }
  0xa4   : > { %8200 = vmatprep.subr.bf16.mxu0 %v8959_v4  ;;  %v8207_v34 = vpack.c.bf16 %v7804_v60, %v7803_v29  ;;  %v7807_v3 = vld [vmem:[%s11526_s6 + $0x680] sm:$0xff]  ;;  %v7810_v29 = vld [vmem:[%s11526_s6 + $0x698] sm:$0xff]  ;;  %v4502_v60 = vld [vmem:[#allocation2 + $0x148] sm:$0x3] }
  0xa5   : > { %1613 = vmatmul.mubr.f32.gmra.mrb[40].mxu1 %v1360_v57  ;;  %v4695_v57 = vrot.slane %v4489_v17, 2  ;;  %v4497_v17 = vld [vmem:[#allocation2 + $0x120] sm:$0xfc]  ;;  %v4504_v50 = vld [vmem:[#allocation2 + $0x158] sm:$0xfc] }
  0xa6   : > { %5033 = vmatmul.mubr.f32.gmra.mrb[8].mxu0 %v4681_v18  ;;  %1617 = vmatprep.mubr.f32.mxu1 %v9681_v54  ;;  %v4697_v54 = vrot.slane %v4490_v7, 2  ;;  %v4700_v7 = vrot.slane %v8911_v63, 2  ;;  %v8914_v63 = vld [vmem:[#allocation2 + $0x168] sm:$0xff] }
  0xa7   : > { %5037 = vmatprep.mubr.f32.mxu0 %v4688_v47  ;;  %8202 = vmatpush1.bf16.msra.mxu0 %v8201_v5  ;;  %v8910_v5 = vld [vmem:[#allocation2 + $0x108] sm:$0xff]  ;;  %v7805_v47 = vld [vmem:[%s11526_s6 + $0x670] sm:$0xff] }
  0xa8   : > { %8203 = vmatprep.subr.bf16.mxu0 %v8959_v4  ;;  %v4698_v18 = vsel %vm2700_vm3, %v4693_v40, %v4697_v54  ;;  %v4696_v40 = vsel %vm2700_vm3, %v4690_v42, %v4695_v57  ;;  %v8210_v28 = vpack.c.bf16 %v7806_v55, %v7805_v47  ;;  %v1368_v42 = vld [vmem:[#allocation2 + $0x240] sm:$0xff]  ;;  %v4701_v45 = vsel %vm2700_vm3, %v4699_v14, %v4700_v7  ;;  %v1372_v47 = vld [vmem:[#allocation2 + $0x270] sm:$0xff] }
  0xa9   : > { %1618 = vmatmul.mubr.f32.gmra.mrb[42].mxu1 %v9689_v20  ;;  %v4703_v20 = vrot.slane %v8910_v5, 2  ;;  %v4501_v5 = vld [vmem:[#allocation2 + $0x140] sm:$0x3]  ;;  %v4722_v14 = vrot.slane %v4504_v50, 2 }
  0xaa   : > { %5038 = vmatmul.mubr.f32.gmra.mrb[10].mxu0 %v4686_v44  ;;  %1622 = vmatprep.mubr.f32.mxu1 %v1365_v12  ;;  %v4495_v44 = vld [vmem:[#allocation2 + $0x110] sm:$0x3]  ;;  %v4715_v37 = vrot.slane %v4501_v5, 2  ;;  %v4513_v50 = vld [vmem:[#allocation2 + $0x1a0] sm:$0x3] }
  0xab   : > { %5042 = vmatprep.mubr.f32.mxu0 %v4694_v61  ;;  %8205 = vmatpush1.bf16.msra.mxu0 %v8204_v8  ;;  %v4704_v39 = vsel %vm2700_vm3, %v4702_v6, %v4703_v20  ;;  %v4705_v12 = vrot.slane %v4495_v44, 2  ;;  %v4708_v11 = vsel %vm2700_vm3, %v4703_v20, %v4707_v32  ;;  %v8912_v61 = vld [vmem:[#allocation2 + $0x138] sm:$0xff]  ;;  %v4717_v6 = vrot.slane %v4502_v60, 2  ;;  %v7811_v20 = vld [vmem:[%s11526_s6 + $0x6a0] sm:$0xff] }
  0xac   : > { %8206 = vmatprep.subr.bf16.mxu0 %v8959_v4  ;;  %v4713_v54 = vrot.slane %v8912_v61, 2  ;;  %v4508_v32 = vld [vmem:[#allocation2 + $0x178] sm:$0x3]  ;;  %v4510_v61 = vld [vmem:[#allocation2 + $0x188] sm:$0xfc] }
  0xad   : > { %1623 = vmatmul.mubr.f32.gmra.mrb[44].mxu1 %v1364_v30  ;;  %v4706_v53 = vsel %vm2700_vm3, %v4700_v7, %v4705_v12  ;;  %v4709_v30 = vrot.slane %v4497_v17, 2  ;;  %v4723_v7 = vrot.slane %v8914_v63, 2  ;;  %v4516_v63 = vld [vmem:[#allocation2 + $0x1b8] sm:$0xfc] }
  0xae   : > { %5043 = vmatmul.mubr.f32.gmra.mrb[12].mxu0 %v4691_v51  ;;  %1627 = vmatprep.mubr.f32.mxu1 %v9730_v0  ;;  %v7808_v0 = vld [vmem:[%s11526_s6 + $0x688] sm:$0xff]  ;;  %v8913_v51 = vld [vmem:[#allocation2 + $0x130] sm:$0xff] }
  0xaf   : > { %5047 = vmatprep.mubr.f32.mxu0 %v4698_v18  ;;  %8208 = vmatpush1.bf16.msra.mxu0 %v8207_v34  ;;  %v8213_v8 = vpack.c.bf16 %v7808_v0, %v7807_v3  ;;  %v4710_v57 = vrot.slane %v8913_v51, 2  ;;  %v4714_v18 = vsel %vm2700_vm3, %v4712_v49, %v4713_v54  ;;  %v1377_v3 = vld [vmem:[#allocation2 + $0x2a8] sm:$0xff]  ;;  %v4724_v12 = vsel %vm2700_vm3, %v4722_v14, %v4723_v7  ;;  %v7815_v49 = vld [vmem:[%s11526_s6 + $0x6c0] sm:$0xff] }
  0xb0   : > { %8209 = vmatprep.subr.bf16.mxu0 %v8959_v4  ;;  %v4509_v51 = vld [vmem:[#allocation2 + $0x180] sm:$0xfc]  ;;  %v7820_v14 = vld [vmem:[%s11526_s6 + $0x6e8] sm:$0xff] }
  0xb1   : > { %1628 = vmatmul.mubr.f32.gmra.mrb[46].mxu1 %v9754_v25  ;;  %v7809_v25 = vld [vmem:[%s11526_s6 + $0x690] sm:$0xff]  ;;  %v4711_v55 = vsel %vm2700_vm3, %v4709_v30, %v4710_v57  ;;  %v4716_v44 = vsel %vm2700_vm3, %v4710_v57, %v4715_v37  ;;  %v7818_v57 = vld [vmem:[%s11526_s6 + $0x6d8] sm:$0xff] }
  0xb2   : > { %5048 = vmatmul.mubr.f32.gmra.mrb[14].mxu0 %v4696_v40  ;;  %1632 = vmatprep.mubr.f32.mxu1 %v1369_v16  ;;  %v8216_v34 = vpack.c.bf16 %v7810_v29, %v7809_v25  ;;  %v4718_v16 = vsel %vm2700_vm3, %v4713_v54, %v4717_v6  ;;  %v1376_v54 = vld [vmem:[#allocation2 + $0x2a0] sm:$0xff] }
  0xb3   : > { %5052 = vmatprep.mubr.f32.mxu0 %v4704_v39  ;;  %8211 = vmatpush1.bf16.msra.mxu0 %v8210_v28  ;;  %v4503_v28 = vld [vmem:[#allocation2 + $0x150] sm:$0xfc]  ;;  %v7814_v39 = vld [vmem:[%s11526_s6 + $0x6b8] sm:$0xff] }
  0xb4   : > { %8212 = vmatprep.subr.bf16.mxu0 %v8959_v4  ;;  %v4719_v0 = vrot.slane %v4503_v28, 2  ;;  %v4735_v28 = vrot.slane %v4513_v50, 2  ;;  %v4522_v50 = vld [vmem:[#allocation2 + $0x1e8] sm:$0xfc] }
  0xb5   : > { %1633 = vmatmul.mubr.f32.gmra.mrb[48].mxu1 %v1368_v42  ;;  %v4720_v42 = vrot.slane %v8915_v26, 2 }
  0xb6   : > { %5053 = vmatmul.mubr.f32.gmra.mrb[16].mxu0 %v4701_v45  ;;  %1637 = vmatprep.mubr.f32.mxu1 %v9788_v38  ;;  %v7812_v38 = vld [vmem:[%s11526_s6 + $0x6a8] sm:$0xff] }
  0xb7   : > { %5057 = vmatprep.mubr.f32.mxu0 %v4708_v11  ;;  %8214 = vmatpush1.bf16.msra.mxu0 %v8213_v8  ;;  %v8219_v40 = vpack.c.bf16 %v7812_v38, %v7811_v20  ;;  %v4727_v8 = vrot.slane %v4508_v32, 2  ;;  %v4507_v11 = vld [vmem:[#allocation2 + $0x170] sm:$0x3]  ;;  %v4721_v17 = vsel %vm2700_vm3, %v4719_v0, %v4720_v42  ;;  %v1381_v20 = vld [vmem:[#allocation2 + $0x2d8] sm:$0xff]  ;;  %v4729_v38 = vrot.slane %v4509_v51, 2 }
  0xb8   : > { %8215 = vmatprep.subr.bf16.mxu0 %v8959_v4  ;;  %v4725_v25 = vrot.slane %v4507_v11, 2  ;;  %v4515_v0 = vld [vmem:[#allocation2 + $0x1b0] sm:$0xfc]  ;;  %v7822_v11 = vld [vmem:[%s11526_s6 + $0x6f8] sm:$0xff]  ;;  %v4519_v51 = vld [vmem:[#allocation2 + $0x1d0] sm:$0x3] }
  0xb9   : > { %1638 = vmatmul.mubr.f32.gmra.mrb[50].mxu1 %v9807_v13  ;;  %v7813_v13 = vld [vmem:[%s11526_s6 + $0x6b0] sm:$0xff]  ;;  %v4728_v60 = vsel %vm2700_vm3, %v4723_v7, %v4727_v8 }
  0xba   : > { %5058 = vmatmul.mubr.f32.gmra.mrb[18].mxu0 %v4706_v53  ;;  %1642 = vmatprep.mubr.f32.mxu1 %v1373_v58  ;;  %v8222_v45 = vpack.c.bf16 %v7814_v39, %v7813_v13  ;;  %v4732_v53 = vrot.slane %v4510_v61, 2  ;;  %v8916_v58 = vld [vmem:[#allocation2 + $0x198] sm:$0xff]  ;;  %v4726_v5 = vsel %vm2700_vm3, %v4720_v42, %v4725_v25  ;;  %v1380_v7 = vld [vmem:[#allocation2 + $0x2d0] sm:$0xff]  ;;  %v8919_v25 = vld [vmem:[#allocation2 + $0x1c0] sm:$0xff] }
  0xbb   : > { %5062 = vmatprep.mubr.f32.mxu0 %v4714_v18  ;;  %8217 = vmatpush1.bf16.msra.mxu0 %v8216_v34  ;;  %v4733_v30 = vrot.slane %v8916_v58, 2  ;;  %v4514_v34 = vld [vmem:[#allocation2 + $0x1a8] sm:$0x3]  ;;  %v8917_v18 = vld [vmem:[#allocation2 + $0x190] sm:$0xff] }
  0xbc   : > { %8218 = vmatprep.subr.bf16.mxu0 %v8959_v4  ;;  %v4730_v6 = vrot.slane %v8917_v18, 2  ;;  %v7821_v8 = vld [vmem:[%s11526_s6 + $0x6f0] sm:$0xff] }
  0xbd   : > { %1643 = vmatmul.mubr.f32.gmra.mrb[52].mxu1 %v1372_v47  ;;  %v1738_v47 = vld [vmem:[#allocation2 + $0x8] sm:$0xfe]  ;;  %v4734_v37 = vsel %vm2700_vm3, %v4732_v53, %v4733_v30 }
  0xbe   : > { %5063 = vmatmul.mubr.f32.gmra.mrb[20].mxu0 %v4711_v55  ;;  %1647 = vmatprep.mubr.f32.mxu1 %v9839_v36  ;;  %v7816_v36 = vld [vmem:[%s11526_s6 + $0x6c8] sm:$0xff]  ;;  %v1933_v13 = vrot.slane %v1738_v47, 1  ;;  %v4731_v39 = vsel %vm2700_vm3, %v4729_v38, %v4730_v6  ;;  %v4736_v58 = vsel %vm2700_vm3, %v4730_v6, %v4735_v28  ;;  %v4752_v28 = vrot.slane %v4522_v50, 2 }
  0xbf   : > { %5067 = vmatprep.mubr.f32.mxu0 %v4718_v16  ;;  %8220 = vmatpush1.bf16.msra.mxu0 %v8219_v40  ;;  %v8225_v29 = vpack.c.bf16 %v7816_v36, %v7815_v49  ;;  %v4737_v40 = vrot.slane %v4514_v34, 2  ;;  %v10156_v16 = vld [vmem:[#allocation2 + $0x18] sm:$0xff]  ;;  %v1742_v49 = vld [vmem:[#allocation2 + $0x28] sm:$0x1] }
  0xc0   : > { %8221 = vmatprep.subr.bf16.mxu0 %v8959_v4  ;;  %v1934_v32 = vrot.slane %v10156_v16, 1  ;;  %v4520_v36 = vld [vmem:[#allocation2 + $0x1d8] sm:$0x3]  ;;  %v7664_v53 = vld [vmem:[%s11526_s6 + $0x208] sm:$0xff]  ;;  %v1938_v18 = vrot.slane %v1742_v49, 1 }
  0xc1   : > { %1648 = vmatmul.mubr.f32.gmra.mrb[54].mxu1 %v9858_v10  ;;  %v7817_v10 = vld [vmem:[%s11526_s6 + $0x6d0] sm:$0xff]  ;;  %v4738_v42 = vsel %vm2700_vm3, %v4733_v30, %v4737_v40 }
  0xc2   : > { %5068 = vmatmul.mubr.f32.gmra.mrb[22].mxu0 %v4716_v44  ;;  %1652 = vmatprep.mubr.f32.mxu1 %v1377_v3  ;;  %v8228_v55 = vpack.c.bf16 %v7818_v57, %v7817_v10  ;;  %v1737_v44 = vld [vmem:[#allocation2] sm:$0xfe]  ;;  %v10168_v3 = vld [vmem:[#allocation2 + $0x10] sm:$0xff]  ;;  %v1935_v30 = vsel %vm1929_vm2, %v1933_v13, %v1934_v32  ;;  %v1744_v10 = vld [vmem:[#allocation2 + $0x38] sm:$0xfe]  ;;  %v8234_v57 = vpack.c.bf16 %v7822_v11, %v7821_v8 }
  0xc3   : > { %5072 = vmatprep.mubr.f32.mxu0 %v4724_v12  ;;  %8223 = vmatpush1.bf16.msra.mxu0 %v8222_v45  ;;  %v8918_v45 = vld [vmem:[#allocation2 + $0x1c8] sm:$0xff]  ;;  %v1930_v61 = vrot.slane %v1737_v44, 1  ;;  %v8920_v13 = vld [vmem:[#allocation2 + $0x1f8] sm:$0xff]  ;;  %v7665_v44 = vld [vmem:[%s11526_s6 + $0x210] sm:$0xff] }
  0xc4   : > { %8224 = vmatprep.subr.bf16.mxu0 %v8959_v4  ;;  %v4743_v12 = vrot.slane %v8918_v45, 2 }
  0xc5   : > { %1653 = vmatmul.mubr.f32.gmra.mrb[56].mxu1 %v1376_v54  ;;  %v1931_v54 = vrot.slane %v10168_v3, 1  ;;  %v7666_v3 = vld [vmem:[%s11526_s6 + $0x218] sm:$0xff] }
  0xc6   : > { %5073 = vmatmul.mubr.f32.gmra.mrb[24].mxu0 %v4721_v17  ;;  %1657 = vmatprep.mubr.f32.mxu1 %v9884_v62  ;;  %v7819_v62 = vld [vmem:[%s11526_s6 + $0x6e0] sm:$0xff]  ;;  %v4739_v17 = vrot.slane %v4515_v0, 2  ;;  %v1748_v0 = vld [vmem:[#allocation2 + $0x58] sm:$0x1] }
  0xc7   : > { %5077 = vmatprep.mubr.f32.mxu0 %v4728_v60  ;;  %8226 = vmatpush1.bf16.msra.mxu0 %v8225_v29  ;;  %v8231_v26 = vpack.c.bf16 %v7820_v14, %v7819_v62  ;;  %v4740_v29 = vrot.slane %v8919_v25, 2  ;;  %v7663_v60 = vld [vmem:[%s11526_s6 + $0x200] sm:$0xff]  ;;  %v1932_v6 = vsel %vm1929_vm2, %v1930_v61, %v1931_v54  ;;  %v1743_v62 = vld [vmem:[#allocation2 + $0x30] sm:$0xfe]  ;;  %v1948_v61 = vrot.slane %v1748_v0, 1 }
  0xc8   : > { %8227 = vmatprep.subr.bf16.mxu0 %v8959_v4  ;;  %v7997_v38 = vpack.c.bf16 %v7664_v53, %v7663_v60  ;;  %v10196_v14 = vld [vmem:[#allocation2 + $0x40] sm:$0xff]  ;;  %v1940_v45 = vrot.slane %v1743_v62, 1  ;;  %v10214_v60 = vld [vmem:[#allocation2 + $0x78] sm:$0xff] }
  0xc9   : > { %1658 = vmatmul.mubr.f32.gmra.mrb[58].mxu1 %v9898_v31  ;;  %v4742_v31 = vrot.slane %v4516_v63, 2  ;;  %v4741_v40 = vsel %vm2700_vm3, %v4739_v17, %v4740_v29  ;;  %v4521_v63 = vld [vmem:[#allocation2 + $0x1e0] sm:$0xfc]  ;;  %v1747_v17 = vld [vmem:[#allocation2 + $0x50] sm:$0x1] }
  0xca   : > { %5078 = vmatmul.mubr.f32.gmra.mrb[26].mxu0 %v4726_v5  ;;  %1662 = vmatprep.mubr.f32.mxu1 %v1381_v20  ;;  %v4747_v5 = vrot.slane %v4520_v36, 2  ;;  %v10189_v20 = vld [vmem:[#allocation2 + $0x48] sm:$0xff]  ;;  %v4749_v8 = vrot.slane %v4521_v63, 2  ;;  %v8000_v36 = vpack.c.bf16 %v7666_v3, %v7665_v44  ;;  %v4525_v25 = vld [vmem:[#allocation2 + $0x200] sm:$0x3]  ;;  %v7669_v63 = vld [vmem:[%s11526_s6 + $0x230] sm:$0xff] }
  0xcb   : > { %5082 = vmatprep.mubr.f32.mxu0 %v4734_v37  ;;  %8229 = vmatpush1.bf16.msra.mxu0 %v8228_v55  ;;  %v4744_v34 = vsel %vm2700_vm3, %v4742_v31, %v4743_v12  ;;  %v4745_v55 = vrot.slane %v4519_v51, 2  ;;  %v1943_v37 = vrot.slane %v1744_v10, 1  ;;  %v1944_v16 = vrot.slane %v10189_v20, 1  ;;  %v8923_v44 = vld [vmem:[#allocation2 + $0x220] sm:$0xff] }
  0xcc   : > { %8230 = vmatprep.subr.bf16.mxu0 %v8959_v4  ;;  %v4760_v3 = vrot.slane %v8923_v44, 2  ;;  %v1753_v0 = vld [vmem:[#allocation2 + $0x80] sm:$0x1]  ;;  %v1759_v44 = vld [vmem:[#allocation2 + $0xb0] sm:$0x1] }
  0xcd   : > { %1663 = vmatmul.mubr.f32.gmra.mrb[60].mxu1 %v1380_v7  ;;  %v4748_v7 = vsel %vm2700_vm3, %v4743_v12, %v4747_v5  ;;  %v1941_v12 = vrot.slane %v10196_v14, 1  ;;  %v4746_v11 = vsel %vm2700_vm3, %v4740_v29, %v4745_v55  ;;  %v1945_v49 = vsel %vm1929_vm2, %v1943_v37, %v1944_v16  ;;  %v7668_v29 = vld [vmem:[%s11526_s6 + $0x228] sm:$0xff]  ;;  %v10227_v5 = vld [vmem:[#allocation2 + $0x70] sm:$0xff] }
  0xce   : > { %5083 = vmatmul.mubr.f32.gmra.mrb[28].mxu0 %v4731_v39  ;;  %1667 = vmatprep.mubr.f32.mxu1 %v9924_v35  ;;  %v1741_v35 = vld [vmem:[#allocation2 + $0x20] sm:$0x1]  ;;  %v4753_v39 = vrot.slane %v8920_v13, 2  ;;  %v1949_v20 = vsel %vm1929_vm2, %v1944_v16, %v1948_v61  ;;  %v1754_v14 = vld [vmem:[#allocation2 + $0x88] sm:$0x1]  ;;  %v7670_v16 = vld [vmem:[%s11526_s6 + $0x238] sm:$0xff] }
  0xcf   : > { %5087 = vmatprep.mubr.f32.mxu0 %v4738_v42  ;;  %8232 = vmatpush1.bf16.msra.mxu0 %v8231_v26  ;;  %v1936_v47 = vrot.slane %v1741_v35, 1  ;;  %v10207_v26 = vld [vmem:[#allocation2 + $0x1f0] sm:$0xff]  ;;  %v4526_v42 = vld [vmem:[#allocation2 + $0x208] sm:$0x3]  ;;  %v4528_v35 = vld [vmem:[#allocation2 + $0x218] sm:$0xfc]  ;;  %v1942_v51 = vsel %vm1929_vm2, %v1940_v45, %v1941_v12 }
  0xd0   : > { %8233 = vmatprep.subr.bf16.mxu0 %v8959_v4  ;;  %v4754_v53 = vsel %vm2700_vm3, %v4752_v28, %v4753_v39  ;;  %v4762_v37 = vrot.slane %v4528_v35, 2  ;;  %v4532_v28 = vld [vmem:[#allocation2 + $0x238] sm:$0x3]  ;;  %v4531_v45 = vld [vmem:[#allocation2 + $0x230] sm:$0x3] }
  0xd1   : > { %1668 = vmatmul.mubr.f32.gmra.mrb[62].mxu1 %v9931_v59  ;;  %v1939_v59 = vsel %vm1929_vm2, %v1934_v32, %v1938_v18  ;;  %v4750_v32 = vrot.slane %v10207_v26, 2  ;;  %v1937_v31 = vsel %vm1929_vm2, %v1931_v54, %v1936_v47  ;;  %v4757_v54 = vrot.slane %v4526_v42, 2  ;;  %v1749_v18 = vld [vmem:[#allocation2 + $0x60] sm:$0xfe] }
  0xd2   : > { %5088 = vmatmul.mubr.f32.gmra.mrb[30].mxu0 %v4736_v58  ;;  %2283 = vmatprep.mubr.f32.mxu1 %v1935_v30  ;;  %v1750_v58 = vld [vmem:[#allocation2 + $0x68] sm:$0xfe]  ;;  %v7667_v30 = vld [vmem:[%s11526_s6 + $0x220] sm:$0xff]  ;;  %v4767_v61 = vrot.slane %v4532_v28, 2 }
  0xd3   : > { %5092 = vmatprep.mubr.f32.mxu0 %v4744_v34  ;;  %8235 = vmatpush1.bf16.msra.mxu0 %v8234_v57  ;;  %v4751_v10 = vsel %vm2700_vm3, %v4749_v8, %v4750_v32  ;;  %v1946_v57 = vrot.slane %v1747_v17, 1  ;;  %v1954_v34 = vrot.slane %v10214_v60, 1  ;;  %v1953_v50 = vrot.slane %v1750_v58, 1  ;;  %v1756_v8 = vld [vmem:[#allocation2 + $0x98] sm:$0xfe] }
  0xd4   : > { %8236 = vmatprep.subr.bf16.mxu0 %v8959_v4  ;;  %v8003_v47 = vpack.c.bf16 %v7668_v29, %v7667_v30  ;;  %v4758_v55 = vsel %vm2700_vm3, %v4753_v39, %v4757_v54  ;;  %v4765_v54 = vrot.slane %v4531_v45, 2  ;;  %v1963_v58 = vrot.slane %v1756_v8, 1  ;;  %v10254_v29 = vld [vmem:[#allocation2 + $0xa0] sm:$0xff]  ;;  %v10271_v8 = vld [vmem:[#allocation2 + $0xd8] sm:$0xff] }
  0xd5   : > { %2284 = vmatmul.mubr.f32.vlgmr.msra.gmra.mrb[0].mxu1 %v1932_v6  ;;  %v4527_v6 = vld [vmem:[#allocation2 + $0x210] sm:$0xfc]  ;;  %v1947_v13 = vsel %vm1929_vm2, %v1941_v12, %v1946_v57  ;;  %v1955_v42 = vsel %vm1929_vm2, %v1953_v50, %v1954_v34  ;;  %v7671_v12 = vld [vmem:[%s11526_s6 + $0x240] sm:$0xff] }
  0xd6   : > { %5093 = vmatmul.mubr.f32.gmra.mrb[32].mxu0 %v4741_v40  ;;  %7998 = vmatpush1.bf16.msra.mxu1 %v7997_v38  ;;  %v4755_v38 = vrot.slane %v4525_v25, 2  ;;  %v8922_v40 = vld [vmem:[#allocation2 + $0x228] sm:$0xff]  ;;  %v4759_v39 = vrot.slane %v4527_v6, 2  ;;  %v4533_v57 = vld [vmem:[#allocation2 + $0x240] sm:$0xfc]  ;;  %v8924_v6 = vld [vmem:[#allocation2 + $0x258] sm:$0xff] }
  0xd7   : > { %2288 = vmatprep.mubr.f32.mxu1 %v1939_v59  ;;  %5097 = vmatprep.mubr.f32.mxu0 %v4748_v7  ;;  %v4763_v62 = vrot.slane %v8922_v40, 2  ;;  %v1950_v59 = vrot.slane %v1749_v18, 1  ;;  %v1951_v7 = vrot.slane %v10227_v5, 1  ;;  %v4534_v25 = vld [vmem:[#allocation2 + $0x248] sm:$0xfc]  ;;  %v8925_v40 = vld [vmem:[#allocation2 + $0x250] sm:$0xff] }
  0xd8   : > { %7999 = vmatprep.subr.bf16.mxu1 %v8959_v4  ;;  %v4756_v26 = vsel %vm2700_vm3, %v4750_v32, %v4755_v38  ;;  %v7672_v32 = vld [vmem:[%s11526_s6 + $0x248] sm:$0xff]  ;;  %v4761_v35 = vsel %vm2700_vm3, %v4759_v39, %v4760_v3  ;;  %v1760_v18 = vld [vmem:[#allocation2 + $0xb8] sm:$0x1]  ;;  %v4772_v50 = vrot.slane %v4534_v25, 2 }
  0xd9   : > { %2289 = vmatmul.mubr.f32.gmra.mrb[2].mxu1 %v1937_v31  ;;  %v1958_v31 = vrot.slane %v1754_v14, 1  ;;  %v1952_v17 = vsel %vm1929_vm2, %v1950_v59, %v1951_v7  ;;  %v4768_v38 = vsel %vm2700_vm3, %v4763_v62, %v4767_v61  ;;  %v4770_v14 = vrot.slane %v8925_v40, 2 }
  0xda   : > { %5098 = vmatmul.mubr.f32.gmra.mrb[34].mxu0 %v4746_v11  ;;  %2293 = vmatprep.mubr.f32.mxu1 %v1945_v49  ;;  %v10242_v11 = vld [vmem:[#allocation2 + $0xa8] sm:$0xff]  ;;  %v8006_v49 = vpack.c.bf16 %v7670_v16, %v7669_v63  ;;  %v4769_v59 = vrot.slane %v4533_v57, 2  ;;  %v1968_v28 = vrot.slane %v1760_v18, 1 }
  0xdb   : > { %5102 = vmatprep.mubr.f32.mxu0 %v4754_v53  ;;  %8001 = vmatpush1.bf16.msra.mxu1 %v8000_v36  ;;  %v4764_v36 = vsel %vm2700_vm3, %v4762_v37, %v4763_v62  ;;  %v1956_v53 = vrot.slane %v1753_v0, 1  ;;  %v1964_v30 = vrot.slane %v10242_v11, 1  ;;  %v1961_v37 = vrot.slane %v10254_v29, 1  ;;  %v4538_v63 = vld [vmem:[#allocation2 + $0x268] sm:$0x3] }
  0xdc   : > { %8002 = vmatprep.subr.bf16.mxu1 %v8959_v4  ;;  %v4537_v0 = vld [vmem:[#allocation2 + $0x260] sm:$0x3]  ;;  %v4777_v45 = vrot.slane %v4538_v63, 2  ;;  %v4771_v61 = vsel %vm2700_vm3, %v4769_v59, %v4770_v14  ;;  %v8926_v18 = vld [vmem:[#allocation2 + $0x288] sm:$0xff] }
  0xdd   : > { %2294 = vmatmul.mubr.f32.gmra.mrb[4].mxu1 %v1942_v51  ;;  %v1959_v51 = vsel %vm1929_vm2, %v1954_v34, %v1958_v31  ;;  %v7674_v34 = vld [vmem:[%s11526_s6 + $0x258] sm:$0xff]  ;;  %v1957_v62 = vsel %vm1929_vm2, %v1951_v7, %v1956_v53  ;;  %v1965_v39 = vsel %vm1929_vm2, %v1963_v58, %v1964_v30  ;;  %v7675_v7 = vld [vmem:[%s11526_s6 + $0x260] sm:$0xff]  ;;  %v1969_v25 = vsel %vm1929_vm2, %v1964_v30, %v1968_v28 }
  0xde   : > { %5103 = vmatmul.mubr.f32.gmra.mrb[36].mxu0 %v4751_v10  ;;  %2298 = vmatprep.mubr.f32.mxu1 %v1949_v20  ;;  %v1755_v10 = vld [vmem:[#allocation2 + $0x90] sm:$0xfe]  ;;  %v8009_v20 = vpack.c.bf16 %v7672_v32, %v7671_v12  ;;  %v1966_v12 = vrot.slane %v1759_v44, 1  ;;  %v4775_v32 = vrot.slane %v4537_v0, 2  ;;  %v1761_v58 = vld [vmem:[#allocation2 + $0xc0] sm:$0xfe] }
  0xdf   : > { %5107 = vmatprep.mubr.f32.mxu0 %v4758_v55  ;;  %8004 = vmatpush1.bf16.msra.mxu1 %v8003_v47  ;;  %v4773_v47 = vrot.slane %v8924_v6, 2  ;;  %v7673_v55 = vld [vmem:[%s11526_s6 + $0x250] sm:$0xff]  ;;  %v1960_v16 = vrot.slane %v1755_v10, 1  ;;  %v7678_v30 = vld [vmem:[%s11526_s6 + $0x278] sm:$0xff]  ;;  %v10294_v6 = vld [vmem:[#allocation2 + $0x280] sm:$0xff]  ;;  %v1970_v63 = vrot.slane %v1761_v58, 1 }
  0xe0   : > { %8005 = vmatprep.subr.bf16.mxu1 %v8959_v4  ;;  %v4776_v40 = vsel %vm2700_vm3, %v4770_v14, %v4775_v32  ;;  %v1768_v44 = vld [vmem:[#allocation2 + $0xf8] sm:$0xfe]  ;;  %v7680_v14 = vld [vmem:[%s11526_s6 + $0x288] sm:$0xff]  ;;  %v4545_v58 = vld [vmem:[#allocation2 + $0x2a0] sm:$0xfc] }
  0xe1   : > { %2299 = vmatmul.mubr.f32.gmra.mrb[6].mxu1 %v1947_v13  ;;  %v4766_v13 = vsel %vm2700_vm3, %v4760_v3, %v4765_v54  ;;  %v4774_v31 = vsel %vm2700_vm3, %v4772_v50, %v4773_v47  ;;  %v7676_v3 = vld [vmem:[%s11526_s6 + $0x268] sm:$0xff]  ;;  %v1974_v54 = vrot.slane %v10271_v8, 1  ;;  %v4778_v10 = vsel %vm2700_vm3, %v4773_v47, %v4777_v45  ;;  %v7677_v50 = vld [vmem:[%s11526_s6 + $0x270] sm:$0xff]  ;;  %v4544_v47 = vld [vmem:[#allocation2 + $0x298] sm:$0x3] }
  0xe2   : > { %5108 = vmatmul.mubr.f32.gmra.mrb[38].mxu0 %v4756_v26  ;;  %2303 = vmatprep.mubr.f32.mxu1 %v1955_v42  ;;  %v1762_v26 = vld [vmem:[#allocation2 + $0xc8] sm:$0xfe]  ;;  %v8012_v42 = vpack.c.bf16 %v7674_v34, %v7673_v55  ;;  %v4780_v55 = vrot.slane %v10294_v6, 2  ;;  %v1967_v34 = vsel %vm1929_vm2, %v1961_v37, %v1966_v12  ;;  %v8018_v0 = vpack.c.bf16 %v7678_v30, %v7677_v50  ;;  %v7681_v50 = vld [vmem:[%s11526_s6 + $0x290] sm:$0xff] }
  0xe3   : > { %5112 = vmatprep.mubr.f32.mxu0 %v4764_v36  ;;  %8007 = vmatpush1.bf16.msra.mxu1 %v8006_v49  ;;  %v4540_v49 = vld [vmem:[#allocation2 + $0x278] sm:$0xfc]  ;;  %v1962_v36 = vsel %vm1929_vm2, %v1960_v16, %v1961_v37  ;;  %v1973_v53 = vrot.slane %v1762_v26, 1  ;;  %v1765_v16 = vld [vmem:[#allocation2 + $0xe0] sm:$0x1]  ;;  %v10326_v6 = vld [vmem:[#allocation2 + $0x2b0] sm:$0xff] }
  0xe4   : > { %8008 = vmatprep.subr.bf16.mxu1 %v8959_v4  ;;  %v4782_v57 = vrot.slane %v4540_v49, 2  ;;  %v7679_v37 = vld [vmem:[%s11526_s6 + $0x280] sm:$0xff]  ;;  %v1976_v45 = vrot.slane %v1765_v16, 1 }
  0xe5   : > { %2304 = vmatmul.mubr.f32.gmra.mrb[8].mxu1 %v1952_v17  ;;  %v10282_v17 = vld [vmem:[#allocation2 + $0xd0] sm:$0xff]  ;;  %v1975_v59 = vsel %vm1929_vm2, %v1973_v53, %v1974_v54  ;;  %v10315_v53 = vld [vmem:[#allocation2 + $0x100] sm:$0xff] }
  0xe6   : > { %5113 = vmatmul.mubr.f32.gmra.mrb[40].mxu0 %v4761_v35  ;;  %2308 = vmatprep.mubr.f32.mxu1 %v1959_v51  ;;  %v4539_v35 = vld [vmem:[#allocation2 + $0x270] sm:$0xfc]  ;;  %v8015_v51 = vpack.c.bf16 %v7676_v3, %v7675_v7  ;;  %v4546_v7 = vld [vmem:[#allocation2 + $0x2a8] sm:$0xfc] }
  0xe7   : > { %5117 = vmatprep.mubr.f32.mxu0 %v4768_v38  ;;  %8010 = vmatpush1.bf16.msra.mxu1 %v8009_v20  ;;  %v4783_v20 = vrot.slane %v8926_v18, 2  ;;  %v1766_v38 = vld [vmem:[#allocation2 + $0xe8] sm:$0x1]  ;;  %v4779_v28 = vrot.slane %v4539_v35, 2  ;;  %v1772_v35 = vld [vmem:[#allocation2 + $0x118] sm:$0x1] }
  0xe8   : > { %8011 = vmatprep.subr.bf16.mxu1 %v8959_v4  ;;  %v8928_v18 = vld [vmem:[#allocation2 + $0x2b8] sm:$0xff]  ;;  %v1988_v16 = vrot.slane %v1772_v35, 1 }
  0xe9   : > { %2309 = vmatmul.mubr.f32.gmra.mrb[10].mxu1 %v1957_v62  ;;  %v1971_v62 = vrot.slane %v10282_v17, 1  ;;  %v4784_v26 = vsel %vm2700_vm3, %v4782_v57, %v4783_v20  ;;  %v4781_v12 = vsel %vm2700_vm3, %v4779_v28, %v4780_v55  ;;  %v4792_v57 = vrot.slane %v4546_v7, 2 }
  0xea   : > { %5118 = vmatmul.mubr.f32.gmra.mrb[42].mxu0 %v4766_v13  ;;  %2313 = vmatprep.mubr.f32.mxu1 %v1965_v39  ;;  %v1978_v13 = vrot.slane %v1766_v38, 1  ;;  %v4543_v39 = vld [vmem:[#allocation2 + $0x290] sm:$0x3]  ;;  %v4793_v38 = vrot.slane %v8928_v18, 2 }
  0xeb   : > { %5122 = vmatprep.mubr.f32.mxu0 %v4774_v31  ;;  %8013 = vmatpush1.bf16.msra.mxu1 %v8012_v42  ;;  %v4787_v42 = vrot.slane %v4544_v47, 2  ;;  %v10302_v31 = vld [vmem:[#allocation2 + $0x108] sm:$0xff]  ;;  %v1972_v3 = vsel %vm1929_vm2, %v1970_v63, %v1971_v62  ;;  %v4785_v49 = vrot.slane %v4543_v39, 2  ;;  %v1977_v30 = vsel %vm1929_vm2, %v1971_v62, %v1976_v45  ;;  %v4549_v39 = vld [vmem:[#allocation2 + $0x2c0] sm:$0x3]  ;;  %v10332_v62 = vld [vmem:[#allocation2 + $0x138] sm:$0xff] }
  0xec   : > { %8014 = vmatprep.subr.bf16.mxu1 %v8959_v4  ;;  %v1979_v32 = vsel %vm1929_vm2, %v1974_v54, %v1978_v13  ;;  %v7682_v54 = vld [vmem:[%s11526_s6 + $0x298] sm:$0xff]  ;;  %v4550_v47 = vld [vmem:[#allocation2 + $0x2c8] sm:$0x3]  ;;  %v4789_v63 = vrot.slane %v4545_v58, 2  ;;  %v1771_v13 = vld [vmem:[#allocation2 + $0x110] sm:$0x1] }
  0xed   : > { %2314 = vmatmul.mubr.f32.gmra.mrb[12].mxu1 %v1962_v36  ;;  %v1983_v36 = vrot.slane %v1768_v44, 1  ;;  %v8024_v44 = vpack.c.bf16 %v7682_v54, %v7681_v50  ;;  %v1994_v35 = vrot.slane %v10332_v62, 1  ;;  %v8930_v50 = vld [vmem:[#allocation2 + $0x2e8] sm:$0xff] }
  0xee   : > { %5123 = vmatmul.mubr.f32.gmra.mrb[44].mxu0 %v4771_v61  ;;  %2318 = vmatprep.mubr.f32.mxu1 %v1969_v25  ;;  %v1767_v61 = vld [vmem:[#allocation2 + $0xf0] sm:$0xfe]  ;;  %v1984_v25 = vrot.slane %v10302_v31, 1  ;;  %v4803_v54 = vrot.slane %v8930_v50, 2 }
  0xef   : > { %5127 = vmatprep.mubr.f32.mxu0 %v4778_v10  ;;  %8016 = vmatpush1.bf16.msra.mxu1 %v8015_v51  ;;  %v8021_v51 = vpack.c.bf16 %v7680_v14, %v7679_v37  ;;  %v4788_v10 = vsel %vm2700_vm3, %v4783_v20, %v4787_v42  ;;  %v4790_v20 = vrot.slane %v10326_v6, 2  ;;  %v1774_v42 = vld [vmem:[#allocation2 + $0x128] sm:$0xfe]  ;;  %v7683_v37 = vld [vmem:[%s11526_s6 + $0x2a0] sm:$0xff]  ;;  %v4552_v14 = vld [vmem:[#allocation2 + $0x2d8] sm:$0xfc] }
  0xf0   : > { %8017 = vmatprep.subr.bf16.mxu1 %v8959_v4  ;;  %v1985_v28 = vsel %vm1929_vm2, %v1983_v36, %v1984_v25  ;;  %v1773_v36 = vld [vmem:[#allocation2 + $0x120] sm:$0xfe]  ;;  %v1993_v58 = vrot.slane %v1774_v42, 1  ;;  %v4802_v18 = vrot.slane %v4552_v14, 2  ;;  %v10364_v42 = vld [vmem:[#allocation2 + $0x168] sm:$0xff] }
  0xf1   : > { %2319 = vmatmul.mubr.f32.gmra.mrb[14].mxu1 %v1967_v34  ;;  %v1980_v34 = vrot.slane %v1767_v61, 1  ;;  %v4791_v7 = vsel %vm2700_vm3, %v4789_v63, %v4790_v20  ;;  %v10345_v61 = vld [vmem:[#allocation2 + $0x130] sm:$0xff]  ;;  %v1990_v6 = vrot.slane %v1773_v36, 1  ;;  %v7688_v14 = vld [vmem:[%s11526_s6 + $0x2c8] sm:$0xff]  ;;  %v2004_v50 = vrot.slane %v10364_v42, 1 }
  0xf2   : > { %5128 = vmatmul.mubr.f32.gmra.mrb[46].mxu0 %v4776_v40  ;;  %2323 = vmatprep.mubr.f32.mxu1 %v1975_v59  ;;  %v1981_v40 = vrot.slane %v10315_v53, 1  ;;  %v4786_v59 = vsel %vm2700_vm3, %v4780_v55, %v4785_v49  ;;  %v7684_v55 = vld [vmem:[%s11526_s6 + $0x2a8] sm:$0xff]  ;;  %v1986_v49 = vrot.slane %v1771_v13, 1  ;;  %v1777_v13 = vld [vmem:[#allocation2 + $0x140] sm:$0x1] }
  0xf3   : > { %5132 = vmatprep.mubr.f32.mxu0 %v4784_v26  ;;  %8019 = vmatpush1.bf16.msra.mxu1 %v8018_v0  ;;  %v4794_v0 = vsel %vm2700_vm3, %v4792_v57, %v4793_v38  ;;  %v4797_v26 = vrot.slane %v4550_v47, 2  ;;  %v1991_v47 = vrot.slane %v10345_v61, 1 }
  0xf4   : > { %8020 = vmatprep.subr.bf16.mxu1 %v8959_v4  ;;  %v1982_v45 = vsel %vm1929_vm2, %v1980_v34, %v1981_v40 }
  0xf5   : > { %2324 = vmatmul.mubr.f32.gmra.mrb[16].mxu1 %v1972_v3  ;;  %v1989_v3 = vsel %vm1929_vm2, %v1984_v25, %v1988_v16  ;;  %v4798_v57 = vsel %vm2700_vm3, %v4793_v38, %v4797_v26  ;;  %v7685_v25 = vld [vmem:[%s11526_s6 + $0x2b0] sm:$0xff]  ;;  %v10357_v38 = vld [vmem:[#allocation2 + $0x2e0] sm:$0xff]  ;;  %v4556_v16 = vld [vmem:[#allocation2 + $0x2f8] sm:$0x3] }
  0xf6   : > { %5133 = vmatmul.mubr.f32.gmra.mrb[48].mxu0 %v4781_v12  ;;  %2328 = vmatprep.mubr.f32.mxu1 %v1979_v32  ;;  %v4551_v12 = vld [vmem:[#allocation2 + $0x2d0] sm:$0xfc]  ;;  %v4795_v32 = vrot.slane %v4549_v39, 2  ;;  %v4800_v63 = vrot.slane %v10357_v38, 2  ;;  %v1780_v26 = vld [vmem:[#allocation2 + $0x158] sm:$0xfe] }
  0xf7   : > { %5137 = vmatprep.mubr.f32.mxu0 %v4788_v10  ;;  %8022 = vmatpush1.bf16.msra.mxu1 %v8021_v51  ;;  %v1778_v51 = vld [vmem:[#allocation2 + $0x148] sm:$0x1]  ;;  %v8027_v10 = vpack.c.bf16 %v7684_v55, %v7683_v37  ;;  %v4799_v34 = vrot.slane %v4551_v12, 2  ;;  %v4807_v55 = vrot.slane %v4556_v16, 2  ;;  %v1024_v12 = vld [vmem:[%s10383_s15] sm:$0xff] }
  0xf8   : > { %8023 = vmatprep.subr.bf16.mxu1 %v8959_v4  ;;  %v4796_v39 = vsel %vm2700_vm3, %v4790_v20, %v4795_v32  ;;  %v7687_v20 = vld [vmem:[%s11526_s6 + $0x2c0] sm:$0xff] }
  0xf9   : > { %2329 = vmatmul.mubr.f32.gmra.mrb[18].mxu1 %v1977_v30  ;;  %v7686_v30 = vld [vmem:[%s11526_s6 + $0x2b8] sm:$0xff]  ;;  %v4808_v38 = vsel %vm2700_vm3, %v4803_v54, %v4807_v55 }
  0xfa   : > { %5138 = vmatmul.mubr.f32.gmra.mrb[50].mxu0 %v4786_v59  ;;  %2333 = vmatprep.mubr.f32.mxu1 %v1985_v28  ;;  %v1987_v59 = vsel %vm1929_vm2, %v1981_v40, %v1986_v49  ;;  %v1998_v28 = vrot.slane %v1778_v51, 1  ;;  %v8030_v37 = vpack.c.bf16 %v7686_v30, %v7685_v25  ;;  %v4804_v40 = vsel %vm2700_vm3, %v4802_v18, %v4803_v54  ;;  %v4558_v49 = vld [vmem:[#allocation2 + $0x308] sm:$0xfc]  ;;  %v10393_v18 = vld [vmem:[#allocation2 + $0x160] sm:$0xff]  ;;  %v1784_v25 = vld [vmem:[#allocation2 + $0x178] sm:$0x1] }
  0xfb   : > { %5142 = vmatprep.mubr.f32.mxu0 %v4794_v0  ;;  %8025 = vmatpush1.bf16.msra.mxu1 %v8024_v44  ;;  %v1995_v44 = vsel %vm1929_vm2, %v1993_v58, %v1994_v35  ;;  %v4555_v0 = vld [vmem:[#allocation2 + $0x2f0] sm:$0x3]  ;;  %v1996_v58 = vrot.slane %v1777_v13, 1  ;;  %v8033_v30 = vpack.c.bf16 %v7688_v14, %v7687_v20  ;;  %v4812_v16 = vrot.slane %v4558_v49, 2  ;;  %v7690_v13 = vld [vmem:[%s11526_s6 + $0x2d8] sm:$0xff] }
  0xfc   : > { %8026 = vmatprep.subr.bf16.mxu1 %v8959_v4  ;;  %v1999_v32 = vsel %vm1929_vm2, %v1994_v35, %v1998_v28  ;;  %v4805_v51 = vrot.slane %v4555_v0, 2  ;;  %v4813_v35 = vrot.slane %v10071_v23, 2  ;;  %v7689_v28 = vld [vmem:[%s11526_s6 + $0x2d0] sm:$0xff]  ;;  %v4562_v0 = vld [vmem:[#allocation2 + $0x328] sm:$0x3]  ;;  %v10417_v49 = vld [vmem:[#allocation2 + $0x198] sm:$0xff] }
  0xfd   : > { %2334 = vmatmul.mubr.f32.gmra.mrb[20].mxu1 %v1982_v45  ;;  %v1266_v45 = vld [vmem:[%s10369_s26] sm:$0xff]  ;;  %v1997_v54 = vsel %vm1929_vm2, %v1991_v47, %v1996_v58  ;;  %v8932_v14 = vld [vmem:[#allocation2 + $0x310] sm:$0xff]  ;;  %v7692_v58 = vld [vmem:[%s11526_s6 + $0x2e8] sm:$0xff] }
  0xfe   : > { %5143 = vmatmul.mubr.f32.gmra.mrb[52].mxu0 %v4791_v7  ;;  %2338 = vmatprep.mubr.f32.mxu1 %v1989_v3  ;;  %v1992_v7 = vsel %vm1929_vm2, %v1990_v6, %v1991_v47  ;;  %v4801_v3 = vsel %vm2700_vm3, %v4799_v34, %v4800_v63  ;;  %v10389_v36 = vmul.f32 0.0, %v1266_v45  ;;  %v10397_v34 = vmul.f32 0.0, %v1024_v12  ;;  %v4561_v12 = vld [vmem:[#allocation2 + $0x320] sm:$0x3] }
  0xff   : > { %5147 = vmatprep.mubr.f32.mxu0 %v4798_v57  ;;  %8028 = vmatpush1.bf16.msra.mxu1 %v8027_v10  ;;  %v2003_v10 = vrot.slane %v1780_v26, 1  ;;  %v1779_v57 = vld [vmem:[#allocation2 + $0x150] sm:$0xfe]  ;;  %v4806_v26 = vsel %vm2700_vm3, %v4800_v63, %v4805_v51  ;;  %v4810_v45 = vrot.slane %v8932_v14, 2  ;;  %v4814_v47 = vsel %vm2700_vm3, %v4812_v16, %v4813_v35  ;;  %v1267_v16 = vld [vmem:[%s10369_s26 + $0x8] sm:$0xff] }
 0x100   : > { %8029 = vmatprep.subr.bf16.mxu1 %v8959_v4  ;;  %v1272_v6 = vrot.slane %v10389_v36, 7  ;;  %v1033_v23 = vrot.slane %v10397_v34, 7  ;;  %v4817_v63 = vrot.slane %v4562_v0, 2  ;;  %v1790_v0 = vld [vmem:[#allocation2 + $0x1a8] sm:$0x1] }
 0x101   : > { %2339 = vmatmul.mubr.f32.gmra.mrb[22].mxu1 %v1987_v59  ;;  %v4557_v59 = vld [vmem:[#allocation2 + $0x300] sm:$0xfc]  ;;  %v2005_v55 = vsel %vm1929_vm2, %v2003_v10, %v2004_v50  ;;  %v1796_v34 = vld [vmem:[#allocation2 + $0x1d8] sm:$0x1] }
 0x102   : > { %5148 = vmatmul.mubr.f32.gmra.mrb[54].mxu0 %v4796_v39  ;;  %2343 = vmatprep.mubr.f32.mxu1 %v1995_v44  ;;  %v2000_v39 = vrot.slane %v1779_v57, 1  ;;  %v2001_v44 = vrot.slane %v10393_v18, 1  ;;  %1278 = vst [vmem:[#allocation2 + $0x338] sm:$0xfe] %v1272_v6  ;;  %v4809_v20 = vrot.slane %v4557_v59, 2 }
 0x103   : > { %5152 = vmatprep.mubr.f32.mxu0 %v4804_v40  ;;  %8031 = vmatpush1.bf16.msra.mxu1 %v8030_v37  ;;  %v2008_v37 = vrot.slane %v1784_v25, 1  ;;  %v1783_v40 = vld [vmem:[#allocation2 + $0x170] sm:$0x1]  ;;  %1040 = vst [vmem:[#allocation2 + $0x330] sm:$0xfe] %v1033_v23 }
 0x104   : > { %8032 = vmatprep.subr.bf16.mxu1 %v8959_v4  ;;  %v2002_v51 = vsel %vm1929_vm2, %v2000_v39, %v2001_v44  ;;  %v2006_v57 = vrot.slane %v1783_v40, 1  ;;  %v4811_v59 = vsel %vm2700_vm3, %v4809_v20, %v4810_v45  ;;  %v1025_v40 = vld [vmem:[%s10383_s15 + $0x8] sm:$0xff] }
 0x105   : > { %2344 = vmatmul.mubr.f32.gmra.mrb[24].mxu1 %v1992_v7  ;;  %v1786_v7 = vld [vmem:[#allocation2 + $0x188] sm:$0xfe]  ;;  %v2009_v10 = vsel %vm1929_vm2, %v2004_v50, %v2008_v37  ;;  %v7693_v50 = vld [vmem:[%s11526_s6 + $0x2f0] sm:$0xff]  ;;  %v7694_v37 = vld [vmem:[%s11526_s6 + $0x2f8] sm:$0xff]  ;;  %v1030_v20 = vmul.f32 0.0, %v1025_v40 }
 0x106   : > { %5153 = vmatmul.mubr.f32.gmra.mrb[56].mxu0 %v4801_v3  ;;  %2348 = vmatprep.mubr.f32.mxu1 %v1999_v32  ;;  %v8036_v3 = vpack.c.bf16 %v7690_v13, %v7689_v28  ;;  %v7691_v32 = vld [vmem:[%s11526_s6 + $0x2e0] sm:$0xff]  ;;  %v2013_v25 = vrot.slane %v1786_v7, 1  ;;  %v4815_v28 = vrot.slane %v4561_v12, 2  ;;  %v10434_v13 = vld [vmem:[#allocation2 + $0x190] sm:$0xff]  ;;  %v2007_v14 = vsel %vm1929_vm2, %v2001_v44, %v2006_v57  ;;  %v7824_v44 = vld [vmem:[%s11526_s6 + $0x708] sm:$0xff] }
 0x107   : > { %5157 = vmatprep.mubr.f32.mxu0 %v4808_v38  ;;  %8034 = vmatpush1.bf16.msra.mxu1 %v8033_v30  ;;  %v2014_v30 = vrot.slane %v10417_v49, 1  ;;  %v1785_v38 = vld [vmem:[#allocation2 + $0x180] sm:$0xfe]  ;;  %v8039_v39 = vpack.c.bf16 %v7692_v58, %v7691_v32  ;;  %v2011_v7 = vrot.slane %v10434_v13, 1  ;;  %v2018_v12 = vrot.slane %v1790_v0, 1 }
 0x108   : > { %8035 = vmatprep.subr.bf16.mxu1 %v8959_v4  ;;  %v7823_v32 = vld [vmem:[%s11526_s6 + $0x700] sm:$0xff]  ;;  %v1792_v57 = vld [vmem:[#allocation2 + $0x1b8] sm:$0xfe] }
 0x109   : > { %2349 = vmatmul.mubr.f32.gmra.mrb[26].mxu1 %v1997_v54  ;;  %v1269_v54 = vmul.f32 0.0, %v1267_v16  ;;  %v1789_v58 = vld [vmem:[#allocation2 + $0x1a0] sm:$0x1]  ;;  %v2019_v36 = vsel %vm1929_vm2, %v2014_v30, %v2018_v12  ;;  %v8237_v0 = vpack.c.bf16 %v7824_v44, %v7823_v32 }
 0x10a   : > { %5158 = vmatmul.mubr.f32.gmra.mrb[58].mxu0 %v4806_v26  ;;  %2353 = vmatprep.mubr.f32.mxu1 %v2005_v55  ;;  %v4818_v26 = vsel %vm2700_vm3, %v4813_v35, %v4817_v63  ;;  %v2010_v55 = vrot.slane %v1785_v38, 1  ;;  %v2015_v35 = vsel %vm1929_vm2, %v2013_v25, %v2014_v30  ;;  %v5239_v63 = vld [vmem:[#allocation2 + $0x68] sm:$0xff] }
 0x10b   : > { %5162 = vmatprep.mubr.f32.mxu0 %v4814_v47  ;;  %8037 = vmatpush1.bf16.msra.mxu1 %v8036_v3  ;;  %v1273_v3 = vrot.slane %v1269_v54, 7  ;;  %v4816_v47 = vsel %vm2700_vm3, %v4810_v45, %v4815_v28  ;;  %v10455_v25 = vld [vmem:[#allocation2 + $0x1c8] sm:$0xff]  ;;  %v5238_v28 = vld [vmem:[#allocation2 + $0x60] sm:$0xff]  ;;  %v1791_v54 = vld [vmem:[#allocation2 + $0x1b0] sm:$0xfe] }
 0x10c   : > { %8038 = vmatprep.subr.bf16.mxu1 %v8959_v4  ;;  %v2012_v16 = vsel %vm1929_vm2, %v2010_v55, %v2011_v7 }
 0x10d   : > { %2354 = vmatmul.mubr.f32.gmra.mrb[28].mxu1 %v2002_v51  ;;  %v8042_v51 = vpack.c.bf16 %v7694_v37, %v7693_v50  ;;  %v1274_v45 = vsel %vm860_vm1, %v1272_v6, %v1273_v3  ;;  %1280 = vst [vmem:[#allocation2 + $0x358] sm:$0x1] %v1273_v3  ;;  %v2023_v6 = vrot.slane %v1792_v57, 1  ;;  %v7826_v50 = vld [vmem:[%s11526_s6 + $0x718] sm:$0xff]  ;;  %v2020_v37 = vrot.slane %v1791_v54, 1 }
 0x10e   : > { %5163 = vmatmul.mubr.f32.gmra.mrb[60].mxu0 %v4811_v59  ;;  %2358 = vmatprep.mubr.f32.mxu1 %v2009_v10  ;;  %v1034_v10 = vrot.slane %v1030_v20, 7  ;;  %1279 = vst [vmem:[#allocation2 + $0x348] sm:$0xff] %v1274_v45  ;;  %v2016_v59 = vrot.slane %v1789_v58, 1  ;;  %v5243_v20 = vld [vmem:[#allocation2 + $0x98] sm:$0xff]  ;;  %v1795_v3 = vld [vmem:[#allocation2 + $0x1d0] sm:$0x1] }
 0x10f   : > { %5167 = vmatprep.mubr.f32.mxu0 %v4818_v26  ;;  %8040 = vmatpush1.bf16.msra.mxu1 %v8039_v39  ;;  %v2024_v39 = vrot.slane %v10455_v25, 1  ;;  %v10467_v26 = vld [vmem:[#allocation2 + $0x1c0] sm:$0xff]  ;;  %v2026_v32 = vrot.slane %v1795_v3, 1  ;;  %v5242_v58 = vld [vmem:[#allocation2 + $0x90] sm:$0xff] }
 0x110   : > { %8041 = vmatprep.subr.bf16.mxu1 %v8959_v4  ;;  %v1035_v38 = vsel %vm860_vm1, %v1033_v23, %v1034_v10  ;;  %1042 = vst [vmem:[#allocation2 + $0x350] sm:$0x1] %v1034_v10  ;;  %v7825_v23 = vld [vmem:[%s11526_s6 + $0x710] sm:$0xff]  ;;  %v2017_v30 = vsel %vm1929_vm2, %v2011_v7, %v2016_v59  ;;  %v2021_v40 = vrot.slane %v10467_v26, 1  ;;  %v7827_v7 = vld [vmem:[%s11526_s6 + $0x720] sm:$0xff]  ;;  %v7830_v59 = vld [vmem:[%s11526_s6 + $0x738] sm:$0xff] }
 0x111   : > { %2359 = vmatmul.mubr.f32.gmra.mrb[30].mxu1 %v2007_v14  ;;  %1041 = vst [vmem:[#allocation2 + $0x340] sm:$0xff] %v1035_v38  ;;  %v2025_v55 = vsel %vm1929_vm2, %v2023_v6, %v2024_v39  ;;  %v2028_v14 = vrot.slane %v1796_v34, 1  ;;  %v1797_v57 = vld [vmem:[#allocation2 + $0x1e0] sm:$0xfe]  ;;  %v10493_v45 = vld [vmem:[#allocation2 + $0x1f0] sm:$0xff] }
 0x112   : > { %5168 = vmatmul.mubr.f32.gmra.mrb[62].mxu0 %v4816_v47  ;;  %2363 = vmatprep.mubr.f32.mxu1 %v2015_v35  ;;  %v8240_v35 = vpack.c.bf16 %v7826_v50, %v7825_v23  ;;  %v10480_v47 = vld [vmem:[#allocation2 + $0x1f8] sm:$0xff]  ;;  %v2022_v12 = vsel %vm1929_vm2, %v2020_v37, %v2021_v40  ;;  %v1801_v34 = vld [vmem:[#allocation2 + $0x200] sm:$0x1] }
 0x113   : > { %5431 = vmatprep.mubr.f32.mxu0 %v5239_v63  ;;  %8043 = vmatpush1.bf16.msra.mxu1 %v8042_v51  ;;  %v1798_v63 = vld [vmem:[#allocation2 + $0x1e8] sm:$0xfe]  ;;  %v2029_v51 = vsel %vm1929_vm2, %v2024_v39, %v2028_v14  ;;  %v2034_v44 = vrot.slane %v10480_v47, 1  ;;  %v1804_v23 = vld [vmem:[#allocation2 + $0x218] sm:$0xfe]  ;;  %v7831_v37 = vld [vmem:[%s11526_s6 + $0x740] sm:$0xff] }
 0x114   : > { %8044 = vmatprep.subr.bf16.mxu1 %v8959_v4  ;;  %v2033_v10 = vrot.slane %v1798_v63, 1  ;;  %v5247_v39 = vld [vmem:[#allocation2 + $0xc8] sm:$0xff]  ;;  %v1803_v63 = vld [vmem:[#allocation2 + $0x210] sm:$0xfe] }
 0x115   : > { %2364 = vmatmul.mubr.f32.gmra.mrb[32].mxu1 %v2012_v16  ;;  %v1802_v16 = vld [vmem:[#allocation2 + $0x208] sm:$0x1] }
 0x116   : > { %5432 = vmatmul.mubr.f32.vlgmr.msra.gmra.mrb[0].mxu0 %v5238_v28  ;;  %2368 = vmatprep.mubr.f32.mxu1 %v2019_v36  ;;  %v2027_v28 = vsel %vm1929_vm2, %v2021_v40, %v2026_v32  ;;  %v2030_v36 = vrot.slane %v1797_v57, 1  ;;  %v2035_v6 = vsel %vm1929_vm2, %v2033_v10, %v2034_v44  ;;  %v2038_v54 = vrot.slane %v1802_v16, 1  ;;  %v7834_v32 = vld [vmem:[%s11526_s6 + $0x758] sm:$0xff]  ;;  %v1807_v16 = vld [vmem:[#allocation2 + $0x230] sm:$0x1] }
 0x117   : > { %5436 = vmatprep.mubr.f32.mxu0 %v10214_v60  ;;  %8238 = vmatpush1.bf16.msra.mxu0 %v8237_v0  ;;  %v7828_v60 = vld [vmem:[%s11526_s6 + $0x728] sm:$0xff]  ;;  %v2031_v0 = vrot.slane %v10493_v45, 1  ;;  %v5251_v57 = vld [vmem:[#allocation2 + $0xf8] sm:$0xff] }
 0x118   : > { %8239 = vmatprep.subr.bf16.mxu0 %v8959_v4  ;;  %v8243_v38 = vpack.c.bf16 %v7828_v60, %v7827_v7  ;;  %v2039_v14 = vsel %vm1929_vm2, %v2034_v44, %v2038_v54  ;;  %v10519_v7 = vld [vmem:[#allocation2 + $0x220] sm:$0xff] }
 0x119   : > { %2369 = vmatmul.mubr.f32.gmra.mrb[34].mxu1 %v2017_v30  ;;  %v10506_v30 = vld [vmem:[#allocation2 + $0x228] sm:$0xff]  ;;  %v2032_v40 = vsel %vm1929_vm2, %v2030_v36, %v2031_v0  ;;  %v2041_v10 = vrot.slane %v10519_v7, 1  ;;  %v7835_v36 = vld [vmem:[%s11526_s6 + $0x760] sm:$0xff] }
 0x11a   : > { %5437 = vmatmul.mubr.f32.gmra.mrb[2].mxu0 %v10227_v5  ;;  %2373 = vmatprep.mubr.f32.mxu1 %v2025_v55  ;;  %v7829_v5 = vld [vmem:[%s11526_s6 + $0x730] sm:$0xff]  ;;  %v2036_v55 = vrot.slane %v1801_v34, 1  ;;  %v2044_v3 = vrot.slane %v10506_v30, 1 }
 0x11b   : > { %5441 = vmatprep.mubr.f32.mxu0 %v5243_v20  ;;  %8241 = vmatpush1.bf16.msra.mxu0 %v8240_v35  ;;  %v8246_v50 = vpack.c.bf16 %v7830_v59, %v7829_v5  ;;  %v5246_v20 = vld [vmem:[#allocation2 + $0xc0] sm:$0xff]  ;;  %v2043_v35 = vrot.slane %v1804_v23, 1  ;;  %v1810_v5 = vld [vmem:[#allocation2 + $0x248] sm:$0xfe] }
 0x11c   : > { %8242 = vmatprep.subr.bf16.mxu0 %v8959_v4  ;;  %v2053_v34 = vrot.slane %v1810_v5, 1 }
 0x11d   : > { %2374 = vmatmul.mubr.f32.gmra.mrb[36].mxu1 %v2022_v12  ;;  %v1808_v12 = vld [vmem:[#allocation2 + $0x238] sm:$0x1]  ;;  %v2045_v44 = vsel %vm1929_vm2, %v2043_v35, %v2044_v3 }
 0x11e   : > { %5442 = vmatmul.mubr.f32.gmra.mrb[4].mxu0 %v5242_v58  ;;  %2378 = vmatprep.mubr.f32.mxu1 %v2029_v51  ;;  %v2037_v58 = vsel %vm1929_vm2, %v2031_v0, %v2036_v55  ;;  %v2040_v51 = vrot.slane %v1803_v63, 1  ;;  %v7838_v55 = vld [vmem:[%s11526_s6 + $0x778] sm:$0xff]  ;;  %v5255_v63 = vld [vmem:[#allocation2 + $0x128] sm:$0xff] }
 0x11f   : > { %5446 = vmatprep.mubr.f32.mxu0 %v10242_v11  ;;  %8244 = vmatpush1.bf16.msra.mxu0 %v8243_v38  ;;  %v7832_v11 = vld [vmem:[%s11526_s6 + $0x748] sm:$0xff]  ;;  %v2048_v38 = vrot.slane %v1808_v12, 1  ;;  %v1813_v12 = vld [vmem:[#allocation2 + $0x260] sm:$0x1] }
 0x120   : > { %8245 = vmatprep.subr.bf16.mxu0 %v8959_v4  ;;  %v8249_v60 = vpack.c.bf16 %v7832_v11, %v7831_v37  ;;  %v2042_v0 = vsel %vm1929_vm2, %v2040_v51, %v2041_v10  ;;  %v10545_v37 = vld [vmem:[#allocation2 + $0x250] sm:$0xff]  ;;  %v7839_v51 = vld [vmem:[%s11526_s6 + $0x780] sm:$0xff] }
 0x121   : > { %2379 = vmatmul.mubr.f32.gmra.mrb[38].mxu1 %v2027_v28  ;;  %v10532_v28 = vld [vmem:[#allocation2 + $0x258] sm:$0xff]  ;;  %v2049_v54 = vsel %vm1929_vm2, %v2044_v3, %v2048_v38  ;;  %v2051_v35 = vrot.slane %v10545_v37, 1 }
 0x122   : > { %5447 = vmatmul.mubr.f32.gmra.mrb[6].mxu0 %v10254_v29  ;;  %2383 = vmatprep.mubr.f32.mxu1 %v2035_v6  ;;  %v7833_v29 = vld [vmem:[%s11526_s6 + $0x750] sm:$0xff]  ;;  %v2046_v6 = vrot.slane %v1807_v16, 1  ;;  %v2054_v23 = vrot.slane %v10532_v28, 1 }
 0x123   : > { %5451 = vmatprep.mubr.f32.mxu0 %v5247_v39  ;;  %8247 = vmatpush1.bf16.msra.mxu0 %v8246_v50  ;;  %v8252_v59 = vpack.c.bf16 %v7834_v32, %v7833_v29  ;;  %v5250_v39 = vld [vmem:[#allocation2 + $0xf0] sm:$0xff]  ;;  %v1809_v50 = vld [vmem:[#allocation2 + $0x240] sm:$0xfe]  ;;  %v1816_v29 = vld [vmem:[#allocation2 + $0x278] sm:$0xfe] }
 0x124   : > { %8248 = vmatprep.subr.bf16.mxu0 %v8959_v4  ;;  %v2055_v3 = vsel %vm1929_vm2, %v2053_v34, %v2054_v23  ;;  %v2063_v16 = vrot.slane %v1816_v29, 1 }
 0x125   : > { %2384 = vmatmul.mubr.f32.gmra.mrb[40].mxu1 %v2032_v40  ;;  %v1814_v40 = vld [vmem:[#allocation2 + $0x268] sm:$0x1] }
 0x126   : > { %5452 = vmatmul.mubr.f32.gmra.mrb[8].mxu0 %v5246_v20  ;;  %2388 = vmatprep.mubr.f32.mxu1 %v2039_v14  ;;  %v2047_v20 = vsel %vm1929_vm2, %v2041_v10, %v2046_v6  ;;  %v2050_v14 = vrot.slane %v1809_v50, 1  ;;  %v7842_v6 = vld [vmem:[%s11526_s6 + $0x798] sm:$0xff] }
 0x127   : > { %5456 = vmatprep.mubr.f32.mxu0 %v10271_v8  ;;  %8250 = vmatpush1.bf16.msra.mxu0 %v8249_v60  ;;  %v7836_v8 = vld [vmem:[%s11526_s6 + $0x768] sm:$0xff]  ;;  %v2058_v60 = vrot.slane %v1814_v40, 1  ;;  %v5259_v50 = vld [vmem:[#allocation2 + $0x158] sm:$0xff]  ;;  %v1819_v40 = vld [vmem:[#allocation2 + $0x290] sm:$0x1] }
 0x128   : > { %8251 = vmatprep.subr.bf16.mxu0 %v8959_v4  ;;  %v8255_v11 = vpack.c.bf16 %v7836_v8, %v7835_v36  ;;  %v2052_v10 = vsel %vm1929_vm2, %v2050_v14, %v2051_v35  ;;  %v10571_v36 = vld [vmem:[#allocation2 + $0x280] sm:$0xff] }
 0x129   : > { %2389 = vmatmul.mubr.f32.gmra.mrb[42].mxu1 %v2037_v58  ;;  %v10558_v58 = vld [vmem:[#allocation2 + $0x288] sm:$0xff]  ;;  %v2059_v38 = vsel %vm1929_vm2, %v2054_v23, %v2058_v60  ;;  %v2061_v34 = vrot.slane %v10571_v36, 1  ;;  %v7843_v14 = vld [vmem:[%s11526_s6 + $0x7a0] sm:$0xff] }
 0x12a   : > { %5457 = vmatmul.mubr.f32.gmra.mrb[10].mxu0 %v10282_v17  ;;  %2393 = vmatprep.mubr.f32.mxu1 %v2045_v44  ;;  %v7837_v17 = vld [vmem:[%s11526_s6 + $0x770] sm:$0xff]  ;;  %v2056_v44 = vrot.slane %v1813_v12, 1  ;;  %v2064_v5 = vrot.slane %v10558_v58, 1 }
 0x12b   : > { %5461 = vmatprep.mubr.f32.mxu0 %v5251_v57  ;;  %8253 = vmatpush1.bf16.msra.mxu0 %v8252_v59  ;;  %v8258_v32 = vpack.c.bf16 %v7838_v55, %v7837_v17  ;;  %v5254_v57 = vld [vmem:[#allocation2 + $0x120] sm:$0xff]  ;;  %v1815_v59 = vld [vmem:[#allocation2 + $0x270] sm:$0xfe]  ;;  %v1822_v17 = vld [vmem:[#allocation2 + $0x2a8] sm:$0xfe] }
 0x12c   : > { %8254 = vmatprep.subr.bf16.mxu0 %v8959_v4  ;;  %v2065_v23 = vsel %vm1929_vm2, %v2063_v16, %v2064_v5  ;;  %v2073_v12 = vrot.slane %v1822_v17, 1 }
 0x12d   : > { %2394 = vmatmul.mubr.f32.gmra.mrb[44].mxu1 %v2042_v0  ;;  %v1820_v0 = vld [vmem:[#allocation2 + $0x298] sm:$0x1] }
 0x12e   : > { %5462 = vmatmul.mubr.f32.gmra.mrb[12].mxu0 %v5250_v39  ;;  %2398 = vmatprep.mubr.f32.mxu1 %v2049_v54  ;;  %v2057_v39 = vsel %vm1929_vm2, %v2051_v35, %v2056_v44  ;;  %v2060_v54 = vrot.slane %v1815_v59, 1  ;;  %v7846_v44 = vld [vmem:[%s11526_s6 + $0x7b8] sm:$0xff]  ;;  %v5263_v59 = vld [vmem:[#allocation2 + $0x188] sm:$0xff] }
 0x12f   : > { %5466 = vmatprep.mubr.f32.mxu0 %v10302_v31  ;;  %8256 = vmatpush1.bf16.msra.mxu0 %v8255_v11  ;;  %v7840_v31 = vld [vmem:[%s11526_s6 + $0x788] sm:$0xff]  ;;  %v2068_v11 = vrot.slane %v1820_v0, 1  ;;  %v1825_v0 = vld [vmem:[#allocation2 + $0x2c0] sm:$0x1] }
 0x130   : > { %8257 = vmatprep.subr.bf16.mxu0 %v8959_v4  ;;  %v8261_v8 = vpack.c.bf16 %v7840_v31, %v7839_v51  ;;  %v2062_v35 = vsel %vm1929_vm2, %v2060_v54, %v2061_v34  ;;  %v10597_v51 = vld [vmem:[#allocation2 + $0x2b0] sm:$0xff]  ;;  %v7847_v54 = vld [vmem:[%s11526_s6 + $0x7c0] sm:$0xff] }
 0x131   : > { %2399 = vmatmul.mubr.f32.gmra.mrb[46].mxu1 %v2047_v20  ;;  %v10584_v20 = vld [vmem:[#allocation2 + $0x2b8] sm:$0xff]  ;;  %v2069_v60 = vsel %vm1929_vm2, %v2064_v5, %v2068_v11  ;;  %v2071_v16 = vrot.slane %v10597_v51, 1 }
 0x132   : > { %5467 = vmatmul.mubr.f32.gmra.mrb[14].mxu0 %v10315_v53  ;;  %2403 = vmatprep.mubr.f32.mxu1 %v2055_v3  ;;  %v7841_v53 = vld [vmem:[%s11526_s6 + $0x790] sm:$0xff]  ;;  %v2066_v3 = vrot.slane %v1819_v40, 1  ;;  %v2074_v29 = vrot.slane %v10584_v20, 1 }
 0x133   : > { %5471 = vmatprep.mubr.f32.mxu0 %v5255_v63  ;;  %8259 = vmatpush1.bf16.msra.mxu0 %v8258_v32  ;;  %v8264_v55 = vpack.c.bf16 %v7842_v6, %v7841_v53  ;;  %v5258_v63 = vld [vmem:[#allocation2 + $0x150] sm:$0xff]  ;;  %v1821_v32 = vld [vmem:[#allocation2 + $0x2a0] sm:$0xfe]  ;;  %v1828_v53 = vld [vmem:[#allocation2 + $0x2d8] sm:$0xfe] }
 0x134   : > { %8260 = vmatprep.subr.bf16.mxu0 %v8959_v4  ;;  %v2075_v5 = vsel %vm1929_vm2, %v2073_v12, %v2074_v29  ;;  %v2083_v40 = vrot.slane %v1828_v53, 1 }
 0x135   : > { %2404 = vmatmul.mubr.f32.gmra.mrb[48].mxu1 %v2052_v10  ;;  %v1826_v10 = vld [vmem:[#allocation2 + $0x2c8] sm:$0x1] }
 0x136   : > { %5472 = vmatmul.mubr.f32.gmra.mrb[16].mxu0 %v5254_v57  ;;  %2408 = vmatprep.mubr.f32.mxu1 %v2059_v38  ;;  %v2067_v57 = vsel %vm1929_vm2, %v2061_v34, %v2066_v3  ;;  %v2070_v38 = vrot.slane %v1821_v32, 1  ;;  %v7850_v3 = vld [vmem:[%s11526_s6 + $0x7d8] sm:$0xff] }
 0x137   : > { %5476 = vmatprep.mubr.f32.mxu0 %v10332_v62  ;;  %8262 = vmatpush1.bf16.msra.mxu0 %v8261_v8  ;;  %v7844_v62 = vld [vmem:[%s11526_s6 + $0x7a8] sm:$0xff]  ;;  %v2078_v8 = vrot.slane %v1826_v10, 1  ;;  %v5267_v32 = vld [vmem:[#allocation2 + $0x1b8] sm:$0xff]  ;;  %v1831_v10 = vld [vmem:[#allocation2 + $0x2f0] sm:$0x1] }
 0x138   : > { %8263 = vmatprep.subr.bf16.mxu0 %v8959_v4  ;;  %v8267_v31 = vpack.c.bf16 %v7844_v62, %v7843_v14  ;;  %v2072_v34 = vsel %vm1929_vm2, %v2070_v38, %v2071_v16  ;;  %v10623_v14 = vld [vmem:[#allocation2 + $0x2e0] sm:$0xff] }
 0x139   : > { %2409 = vmatmul.mubr.f32.gmra.mrb[50].mxu1 %v2057_v39  ;;  %v10610_v39 = vld [vmem:[#allocation2 + $0x2e8] sm:$0xff]  ;;  %v2079_v11 = vsel %vm1929_vm2, %v2074_v29, %v2078_v8  ;;  %v2081_v12 = vrot.slane %v10623_v14, 1  ;;  %v7851_v38 = vld [vmem:[%s11526_s6 + $0x7e0] sm:$0xff] }
 0x13a   : > { %5477 = vmatmul.mubr.f32.gmra.mrb[18].mxu0 %v10345_v61  ;;  %2413 = vmatprep.mubr.f32.mxu1 %v2065_v23  ;;  %v7845_v61 = vld [vmem:[%s11526_s6 + $0x7b0] sm:$0xff]  ;;  %v2076_v23 = vrot.slane %v1825_v0, 1  ;;  %v2084_v17 = vrot.slane %v10610_v39, 1 }
 0x13b   : > { %5481 = vmatprep.mubr.f32.mxu0 %v5259_v50  ;;  %8265 = vmatpush1.bf16.msra.mxu0 %v8264_v55  ;;  %v8270_v6 = vpack.c.bf16 %v7846_v44, %v7845_v61  ;;  %v5262_v50 = vld [vmem:[#allocation2 + $0x180] sm:$0xff]  ;;  %v1827_v55 = vld [vmem:[#allocation2 + $0x2d0] sm:$0xfe]  ;;  %v2509_v61 = vld [vmem:[#allocation2 + $0x8] sm:$0xfc] }
 0x13c   : > { %8266 = vmatprep.subr.bf16.mxu0 %v8959_v4  ;;  %v2085_v29 = vsel %vm1929_vm2, %v2083_v40, %v2084_v17  ;;  %v2704_v0 = vrot.slane %v2509_v61, 2 }
 0x13d   : > { %2414 = vmatmul.mubr.f32.gmra.mrb[52].mxu1 %v2062_v35  ;;  %v1832_v35 = vld [vmem:[#allocation2 + $0x2f8] sm:$0x1] }
 0x13e   : > { %5482 = vmatmul.mubr.f32.gmra.mrb[20].mxu0 %v5258_v63  ;;  %2418 = vmatprep.mubr.f32.mxu1 %v2069_v60  ;;  %v2077_v63 = vsel %vm1929_vm2, %v2071_v16, %v2076_v23  ;;  %v2080_v60 = vrot.slane %v1827_v55, 1  ;;  %v7852_v16 = vld [vmem:[%s11526_s6 + $0x7e8] sm:$0xff]  ;;  %v7695_v55 = vld [vmem:[%s11526_s6 + $0x300] sm:$0xff] }
 0x13f   : > { %5486 = vmatprep.mubr.f32.mxu0 %v10364_v42  ;;  %8268 = vmatpush1.bf16.msra.mxu0 %v8267_v31  ;;  %v7848_v42 = vld [vmem:[%s11526_s6 + $0x7c8] sm:$0xff]  ;;  %v2088_v31 = vrot.slane %v1832_v35, 1  ;;  %v2512_v35 = vld [vmem:[#allocation2 + $0x20] sm:$0x3] }
 0x140   : > { %8269 = vmatprep.subr.bf16.mxu0 %v8959_v4  ;;  %v8273_v62 = vpack.c.bf16 %v7848_v42, %v7847_v54  ;;  %v2510_v54 = vld [vmem:[#allocation2 + $0x10] sm:$0xff]  ;;  %v8279_v42 = vpack.c.bf16 %v7852_v16, %v7851_v38  ;;  %v2513_v23 = vld [vmem:[#allocation2 + $0x28] sm:$0x3] }
 0x141   : > { %2419 = vmatmul.mubr.f32.gmra.mrb[54].mxu1 %v2067_v57  ;;  %v2511_v57 = vld [vmem:[#allocation2 + $0x18] sm:$0xff]  ;;  %v2089_v8 = vsel %vm1929_vm2, %v2084_v17, %v2088_v31  ;;  %v2702_v40 = vrot.slane %v2510_v54, 2  ;;  %v5270_v31 = vld [vmem:[#allocation2 + $0x1e0] sm:$0xff]  ;;  %v7697_v16 = vld [vmem:[%s11526_s6 + $0x310] sm:$0xff] }
 0x142   : > { %5487 = vmatmul.mubr.f32.gmra.mrb[22].mxu0 %v10393_v18  ;;  %2423 = vmatprep.mubr.f32.mxu1 %v2075_v5  ;;  %v7849_v18 = vld [vmem:[%s11526_s6 + $0x7d0] sm:$0xff]  ;;  %v2086_v5 = vrot.slane %v1831_v10, 1  ;;  %v2705_v53 = vrot.slane %v2511_v57, 2  ;;  %v2516_v57 = vld [vmem:[#allocation2 + $0x40] sm:$0xff] }
 0x143   : > { %5491 = vmatprep.mubr.f32.mxu0 %v5263_v59  ;;  %8271 = vmatpush1.bf16.msra.mxu0 %v8270_v6  ;;  %v8276_v44 = vpack.c.bf16 %v7850_v3, %v7849_v18  ;;  %v5266_v59 = vld [vmem:[#allocation2 + $0x1b0] sm:$0xff]  ;;  %v2508_v6 = vld [vmem:[#allocation2] sm:$0xfc]  ;;  %v5271_v3 = vld [vmem:[#allocation2 + $0x1e8] sm:$0xff] }
 0x144   : > { %8272 = vmatprep.subr.bf16.mxu0 %v8959_v4  ;;  %v2706_v17 = vsel %vm2700_vm3, %v2704_v0, %v2705_v53 }
 0x145   : > { %2424 = vmatmul.mubr.f32.gmra.mrb[56].mxu1 %v2072_v34  ;;  %v7854_v34 = vld [vmem:[%s11526_s6 + $0x7f8] sm:$0xff] }
 0x146   : > { %5492 = vmatmul.mubr.f32.gmra.mrb[24].mxu0 %v5262_v50  ;;  %2428 = vmatprep.mubr.f32.mxu1 %v2079_v11  ;;  %v2087_v50 = vsel %vm1929_vm2, %v2081_v12, %v2086_v5  ;;  %v2701_v11 = vrot.slane %v2508_v6, 2 }
 0x147   : > { %5496 = vmatprep.mubr.f32.mxu0 %v10417_v49  ;;  %8274 = vmatpush1.bf16.msra.mxu0 %v8273_v62  ;;  %v2082_v49 = vsel %vm1929_vm2, %v2080_v60, %v2081_v12  ;;  %v7696_v62 = vld [vmem:[%s11526_s6 + $0x308] sm:$0xff]  ;;  %v2515_v60 = vld [vmem:[#allocation2 + $0x38] sm:$0xfc] }
 0x148   : > { %8275 = vmatprep.subr.bf16.mxu0 %v8959_v4  ;;  %v2517_v12 = vld [vmem:[#allocation2 + $0x48] sm:$0xff]  ;;  %v2714_v10 = vrot.slane %v2515_v60, 2  ;;  %v7702_v60 = vld [vmem:[%s11526_s6 + $0x338] sm:$0xff] }
 0x149   : > { %2429 = vmatmul.mubr.f32.gmra.mrb[58].mxu1 %v2077_v63  ;;  %v2709_v63 = vrot.slane %v2513_v23, 2  ;;  %v2715_v61 = vrot.slane %v2517_v12, 2  ;;  %v7699_v23 = vld [vmem:[%s11526_s6 + $0x320] sm:$0xff] }
 0x14a   : > { %5497 = vmatmul.mubr.f32.gmra.mrb[26].mxu0 %v10434_v13  ;;  %2433 = vmatprep.mubr.f32.mxu1 %v2085_v29  ;;  %v7853_v13 = vld [vmem:[%s11526_s6 + $0x7f0] sm:$0xff]  ;;  %v8045_v29 = vpack.c.bf16 %v7696_v62, %v7695_v55 }
 0x14b   : > { %5501 = vmatprep.mubr.f32.mxu0 %v5267_v32  ;;  %8277 = vmatpush1.bf16.msra.mxu0 %v8276_v44  ;;  %v8282_v18 = vpack.c.bf16 %v7854_v34, %v7853_v13  ;;  %v2707_v32 = vrot.slane %v2512_v35, 2  ;;  %v2514_v44 = vld [vmem:[#allocation2 + $0x30] sm:$0xfc]  ;;  %v2710_v38 = vsel %vm2700_vm3, %v2705_v53, %v2709_v63  ;;  %v2716_v0 = vsel %vm2700_vm3, %v2714_v10, %v2715_v61  ;;  %v5275_v53 = vld [vmem:[#allocation2 + $0x218] sm:$0xff]  ;;  %v2521_v13 = vld [vmem:[#allocation2 + $0x68] sm:$0xfc] }
 0x14c   : > { %8278 = vmatprep.subr.bf16.mxu0 %v8959_v4  ;;  %v10677_v34 = vld [vmem:[#allocation2 + $0x78] sm:$0xff]  ;;  %v2724_v55 = vrot.slane %v2521_v13, 2  ;;  %v2520_v35 = vld [vmem:[#allocation2 + $0x60] sm:$0xfc]  ;;  %v2525_v63 = vld [vmem:[#allocation2 + $0x88] sm:$0x3] }
 0x14d   : > { %2434 = vmatmul.mubr.f32.gmra.mrb[60].mxu1 %v2082_v49  ;;  %v2519_v49 = vld [vmem:[#allocation2 + $0x58] sm:$0x3]  ;;  %v2708_v5 = vsel %vm2700_vm3, %v2702_v40, %v2707_v32  ;;  %v2725_v62 = vrot.slane %v10677_v34, 2  ;;  %v2729_v10 = vrot.slane %v2525_v63, 2  ;;  %v7707_v63 = vld [vmem:[%s11526_s6 + $0x360] sm:$0xff] }
 0x14e   : > { %5502 = vmatmul.mubr.f32.gmra.mrb[28].mxu0 %v5266_v59  ;;  %2438 = vmatprep.mubr.f32.mxu1 %v2089_v8  ;;  %v2711_v59 = vrot.slane %v2514_v44, 2  ;;  %v2712_v8 = vrot.slane %v2516_v57, 2  ;;  %v2719_v54 = vrot.slane %v2519_v49, 2  ;;  %v2527_v44 = vld [vmem:[#allocation2 + $0x98] sm:$0xfc] }
 0x14f   : > { %5506 = vmatprep.mubr.f32.mxu0 %v10455_v25  ;;  %8280 = vmatpush1.bf16.msra.mxu0 %v8279_v42  ;;  %v2703_v25 = vsel %vm2700_vm3, %v2701_v11, %v2702_v40  ;;  %v2518_v42 = vld [vmem:[#allocation2 + $0x50] sm:$0x3]  ;;  %v2726_v32 = vsel %vm2700_vm3, %v2724_v55, %v2725_v62  ;;  %v7706_v13 = vld [vmem:[%s11526_s6 + $0x358] sm:$0xff] }
 0x150   : > { %8281 = vmatprep.subr.bf16.mxu0 %v8959_v4  ;;  %v2717_v11 = vrot.slane %v2518_v42, 2  ;;  %v5274_v40 = vld [vmem:[#allocation2 + $0x210] sm:$0xff]  ;;  %v2531_v42 = vld [vmem:[#allocation2 + $0xb8] sm:$0x3] }
 0x151   : > { %2439 = vmatmul.mubr.f32.gmra.mrb[62].mxu1 %v2087_v50  ;;  %v7700_v50 = vld [vmem:[%s11526_s6 + $0x328] sm:$0xff]  ;;  %v2530_v55 = vld [vmem:[#allocation2 + $0xb0] sm:$0x3] }
 0x152   : > { %5507 = vmatmul.mubr.f32.gmra.mrb[30].mxu0 %v10467_v26  ;;  %3054 = vmatprep.mubr.f32.mxu1 %v2706_v17  ;;  %v7698_v26 = vld [vmem:[%s11526_s6 + $0x318] sm:$0xff]  ;;  %v2720_v17 = vsel %vm2700_vm3, %v2715_v61, %v2719_v54  ;;  %v2718_v12 = vsel %vm2700_vm3, %v2712_v8, %v2717_v11  ;;  %v2524_v61 = vld [vmem:[#allocation2 + $0x80] sm:$0x3] }
 0x153   : > { %5511 = vmatprep.mubr.f32.mxu0 %v5271_v3  ;;  %8283 = vmatpush1.bf16.msra.mxu0 %v8282_v18  ;;  %v8048_v6 = vpack.c.bf16 %v7698_v26, %v7697_v16  ;;  %v10689_v18 = vld [vmem:[#allocation2 + $0x70] sm:$0xff]  ;;  %v8051_v3 = vpack.c.bf16 %v7700_v50, %v7699_v23  ;;  %v7703_v16 = vld [vmem:[%s11526_s6 + $0x340] sm:$0xff]  ;;  %v2727_v49 = vrot.slane %v2524_v61, 2 }
 0x154   : > { %8284 = vmatprep.subr.bf16.mxu0 %v8959_v4 }
 0x155   : > { %3055 = vmatmul.mubr.f32.vlgmr.msra.gmra.mrb[0].mxu1 %v2703_v25  ;;  %v2721_v25 = vrot.slane %v2520_v35, 2 }
 0x156   : > { %5512 = vmatmul.mubr.f32.gmra.mrb[32].mxu0 %v5270_v31  ;;  %8046 = vmatpush1.bf16.msra.mxu1 %v8045_v29  ;;  %v2722_v29 = vrot.slane %v10689_v18, 2  ;;  %v5279_v31 = vld [vmem:[#allocation2 + $0x248] sm:$0xff] }
 0x157   : > { %3059 = vmatprep.mubr.f32.mxu1 %v2710_v38  ;;  %5516 = vmatprep.mubr.f32.mxu0 %v10480_v47  ;;  %v2713_v47 = vsel %vm2700_vm3, %v2711_v59, %v2712_v8  ;;  %v10702_v38 = vld [vmem:[#allocation2 + $0xa8] sm:$0xff]  ;;  %v2730_v59 = vsel %vm2700_vm3, %v2725_v62, %v2729_v10  ;;  %v2734_v8 = vrot.slane %v2527_v44, 2  ;;  %v10741_v10 = vld [vmem:[#allocation2 + $0xd0] sm:$0xff] }
 0x158   : > { %8047 = vmatprep.subr.bf16.mxu1 %v8959_v4  ;;  %v2723_v26 = vsel %vm2700_vm3, %v2721_v25, %v2722_v29  ;;  %v2728_v23 = vsel %vm2700_vm3, %v2722_v29, %v2727_v49  ;;  %v2533_v62 = vld [vmem:[#allocation2 + $0xc8] sm:$0xfc]  ;;  %v2537_v44 = vld [vmem:[#allocation2 + $0xe8] sm:$0x3] }
 0x159   : > { %3060 = vmatmul.mubr.f32.gmra.mrb[2].mxu1 %v2708_v5  ;;  %v5278_v5 = vld [vmem:[#allocation2 + $0x240] sm:$0xff]  ;;  %v2744_v29 = vrot.slane %v2533_v62, 2  ;;  %v2543_v62 = vld [vmem:[#allocation2 + $0x118] sm:$0x3] }
 0x15a   : > { %5517 = vmatmul.mubr.f32.gmra.mrb[34].mxu0 %v10493_v45  ;;  %3064 = vmatprep.mubr.f32.mxu1 %v2716_v0  ;;  %v7701_v45 = vld [vmem:[%s11526_s6 + $0x330] sm:$0xff]  ;;  %v2735_v0 = vrot.slane %v10702_v38, 2 }
 0x15b   : > { %5521 = vmatprep.mubr.f32.mxu0 %v5275_v53  ;;  %8049 = vmatpush1.bf16.msra.mxu1 %v8048_v6  ;;  %v8054_v57 = vpack.c.bf16 %v7702_v60, %v7701_v45  ;;  %v2526_v53 = vld [vmem:[#allocation2 + $0x90] sm:$0xfc]  ;;  %v10715_v6 = vld [vmem:[#allocation2 + $0xa0] sm:$0xff]  ;;  %v2737_v60 = vrot.slane %v2530_v55, 2 }
 0x15c   : > { %8050 = vmatprep.subr.bf16.mxu1 %v8959_v4  ;;  %v2731_v50 = vrot.slane %v2526_v53, 2  ;;  %v2736_v11 = vsel %vm2700_vm3, %v2734_v8, %v2735_v0  ;;  %v2536_v8 = vld [vmem:[#allocation2 + $0xe0] sm:$0x3] }
 0x15d   : > { %3065 = vmatmul.mubr.f32.gmra.mrb[4].mxu1 %v2713_v47  ;;  %v2732_v47 = vrot.slane %v10715_v6, 2 }
 0x15e   : > { %5522 = vmatmul.mubr.f32.gmra.mrb[36].mxu0 %v5274_v40  ;;  %3069 = vmatprep.mubr.f32.mxu1 %v2720_v17  ;;  %v5283_v40 = vld [vmem:[#allocation2 + $0x278] sm:$0xff]  ;;  %v2739_v17 = vrot.slane %v2531_v42, 2  ;;  %v7711_v42 = vld [vmem:[%s11526_s6 + $0x380] sm:$0xff] }
 0x15f   : > { %5526 = vmatprep.mubr.f32.mxu0 %v10506_v30  ;;  %8052 = vmatpush1.bf16.msra.mxu1 %v8051_v3  ;;  %v7704_v30 = vld [vmem:[%s11526_s6 + $0x348] sm:$0xff]  ;;  %v10728_v3 = vld [vmem:[#allocation2 + $0xd8] sm:$0xff]  ;;  %v2733_v45 = vsel %vm2700_vm3, %v2731_v50, %v2732_v47 }
 0x160   : > { %8053 = vmatprep.subr.bf16.mxu1 %v8959_v4  ;;  %v8057_v54 = vpack.c.bf16 %v7704_v30, %v7703_v16  ;;  %v2740_v25 = vsel %vm2700_vm3, %v2735_v0, %v2739_v17  ;;  %v2738_v16 = vsel %vm2700_vm3, %v2732_v47, %v2737_v60  ;;  %v2539_v0 = vld [vmem:[#allocation2 + $0xf8] sm:$0xfc]  ;;  %v10767_v17 = vld [vmem:[#allocation2 + $0x100] sm:$0xff] }
 0x161   : > { %3070 = vmatmul.mubr.f32.gmra.mrb[6].mxu1 %v2718_v12  ;;  %v5282_v12 = vld [vmem:[#allocation2 + $0x270] sm:$0xff]  ;;  %v2754_v47 = vrot.slane %v2539_v0, 2  ;;  %v2549_v0 = vld [vmem:[#allocation2 + $0x148] sm:$0x3] }
 0x162   : > { %5527 = vmatmul.mubr.f32.gmra.mrb[38].mxu0 %v10519_v7  ;;  %3074 = vmatprep.mubr.f32.mxu1 %v2726_v32  ;;  %v7705_v7 = vld [vmem:[%s11526_s6 + $0x350] sm:$0xff]  ;;  %v2745_v32 = vrot.slane %v10728_v3, 2 }
 0x163   : > { %5531 = vmatprep.mubr.f32.mxu0 %v5279_v31  ;;  %8055 = vmatpush1.bf16.msra.mxu1 %v8054_v57  ;;  %v8060_v35 = vpack.c.bf16 %v7706_v13, %v7705_v7  ;;  %v2532_v31 = vld [vmem:[#allocation2 + $0xc0] sm:$0xfc]  ;;  %v7710_v57 = vld [vmem:[%s11526_s6 + $0x378] sm:$0xff]  ;;  %v2747_v13 = vrot.slane %v2536_v8, 2 }
 0x164   : > { %8056 = vmatprep.subr.bf16.mxu1 %v8959_v4  ;;  %v2741_v30 = vrot.slane %v2532_v31, 2  ;;  %v2746_v49 = vsel %vm2700_vm3, %v2744_v29, %v2745_v32  ;;  %v2542_v29 = vld [vmem:[#allocation2 + $0x110] sm:$0x3] }
 0x165   : > { %3075 = vmatmul.mubr.f32.gmra.mrb[8].mxu1 %v2723_v26  ;;  %v2742_v26 = vrot.slane %v10741_v10, 2 }
 0x166   : > { %5532 = vmatmul.mubr.f32.gmra.mrb[40].mxu0 %v5278_v5  ;;  %3079 = vmatprep.mubr.f32.mxu1 %v2730_v59  ;;  %v5287_v5 = vld [vmem:[#allocation2 + $0x2a8] sm:$0xff]  ;;  %v2749_v59 = vrot.slane %v2537_v44, 2  ;;  %v7715_v44 = vld [vmem:[%s11526_s6 + $0x3a0] sm:$0xff] }
 0x167   : > { %5536 = vmatprep.mubr.f32.mxu0 %v10532_v28  ;;  %8058 = vmatpush1.bf16.msra.mxu1 %v8057_v54  ;;  %v7708_v28 = vld [vmem:[%s11526_s6 + $0x368] sm:$0xff]  ;;  %v2743_v7 = vsel %vm2700_vm3, %v2741_v30, %v2742_v26 }
 0x168   : > { %8059 = vmatprep.subr.bf16.mxu1 %v8959_v4  ;;  %v8063_v61 = vpack.c.bf16 %v7708_v28, %v7707_v63  ;;  %v10754_v54 = vld [vmem:[#allocation2 + $0x108] sm:$0xff]  ;;  %v2750_v50 = vsel %vm2700_vm3, %v2745_v32, %v2749_v59  ;;  %v2748_v63 = vsel %vm2700_vm3, %v2742_v26, %v2747_v13  ;;  %v10793_v59 = vld [vmem:[#allocation2 + $0x130] sm:$0xff] }
 0x169   : > { %3080 = vmatmul.mubr.f32.gmra.mrb[10].mxu1 %v2728_v23  ;;  %v5286_v23 = vld [vmem:[#allocation2 + $0x2a0] sm:$0xff]  ;;  %v2545_v32 = vld [vmem:[#allocation2 + $0x128] sm:$0xfc] }
 0x16a   : > { %5537 = vmatmul.mubr.f32.gmra.mrb[42].mxu0 %v10545_v37  ;;  %3084 = vmatprep.mubr.f32.mxu1 %v2736_v11  ;;  %v7709_v37 = vld [vmem:[%s11526_s6 + $0x370] sm:$0xff]  ;;  %v2755_v11 = vrot.slane %v10754_v54, 2  ;;  %v2764_v26 = vrot.slane %v2545_v32, 2 }
 0x16b   : > { %5541 = vmatprep.mubr.f32.mxu0 %v5283_v40  ;;  %8061 = vmatpush1.bf16.msra.mxu1 %v8060_v35  ;;  %v8066_v53 = vpack.c.bf16 %v7710_v57, %v7709_v37  ;;  %v2538_v40 = vld [vmem:[#allocation2 + $0xf0] sm:$0xfc]  ;;  %v7714_v35 = vld [vmem:[%s11526_s6 + $0x398] sm:$0xff]  ;;  %v2757_v57 = vrot.slane %v2542_v29, 2  ;;  %v10819_v29 = vld [vmem:[#allocation2 + $0x160] sm:$0xff] }
 0x16c   : > { %8062 = vmatprep.subr.bf16.mxu1 %v8959_v4  ;;  %v2751_v28 = vrot.slane %v2538_v40, 2  ;;  %v2756_v60 = vsel %vm2700_vm3, %v2754_v47, %v2755_v11  ;;  %v2548_v47 = vld [vmem:[#allocation2 + $0x140] sm:$0x3] }
 0x16d   : > { %3085 = vmatmul.mubr.f32.gmra.mrb[12].mxu1 %v2733_v45  ;;  %v2752_v45 = vrot.slane %v10767_v17, 2 }
 0x16e   : > { %5542 = vmatmul.mubr.f32.gmra.mrb[44].mxu0 %v5282_v12  ;;  %3089 = vmatprep.mubr.f32.mxu1 %v2740_v25  ;;  %v5291_v12 = vld [vmem:[#allocation2 + $0x2d8] sm:$0xff]  ;;  %v2759_v25 = vrot.slane %v2543_v62, 2  ;;  %v7719_v62 = vld [vmem:[%s11526_s6 + $0x3c0] sm:$0xff] }
 0x16f   : > { %5546 = vmatprep.mubr.f32.mxu0 %v10558_v58  ;;  %8064 = vmatpush1.bf16.msra.mxu1 %v8063_v61  ;;  %v7712_v58 = vld [vmem:[%s11526_s6 + $0x388] sm:$0xff]  ;;  %v10780_v61 = vld [vmem:[#allocation2 + $0x138] sm:$0xff]  ;;  %v2753_v37 = vsel %vm2700_vm3, %v2751_v28, %v2752_v45 }
 0x170   : > { %8065 = vmatprep.subr.bf16.mxu1 %v8959_v4  ;;  %v8069_v55 = vpack.c.bf16 %v7712_v58, %v7711_v42  ;;  %v2760_v30 = vsel %vm2700_vm3, %v2755_v11, %v2759_v25  ;;  %v2758_v42 = vsel %vm2700_vm3, %v2752_v45, %v2757_v57  ;;  %v2551_v11 = vld [vmem:[#allocation2 + $0x158] sm:$0xfc]  ;;  %v2550_v25 = vld [vmem:[#allocation2 + $0x150] sm:$0xfc] }
 0x171   : > { %3090 = vmatmul.mubr.f32.gmra.mrb[14].mxu1 %v2738_v16  ;;  %v5290_v16 = vld [vmem:[#allocation2 + $0x2d0] sm:$0xff]  ;;  %v5297_v45 = vld [vmem:[#allocation2 + $0x318] sm:$0xff]  ;;  %v2771_v57 = vrot.slane %v2550_v25, 2 }
 0x172   : > { %5547 = vmatmul.mubr.f32.gmra.mrb[46].mxu0 %v10571_v36  ;;  %3094 = vmatprep.mubr.f32.mxu1 %v2746_v49  ;;  %v7713_v36 = vld [vmem:[%s11526_s6 + $0x390] sm:$0xff]  ;;  %v2765_v49 = vrot.slane %v10780_v61, 2 }
 0x173   : > { %5551 = vmatprep.mubr.f32.mxu0 %v5287_v5  ;;  %8067 = vmatpush1.bf16.msra.mxu1 %v8066_v53  ;;  %v8072_v31 = vpack.c.bf16 %v7714_v35, %v7713_v36  ;;  %v2544_v5 = vld [vmem:[#allocation2 + $0x120] sm:$0xfc]  ;;  %v7718_v53 = vld [vmem:[%s11526_s6 + $0x3b8] sm:$0xff] }
 0x174   : > { %8068 = vmatprep.subr.bf16.mxu1 %v8959_v4  ;;  %v2761_v58 = vrot.slane %v2544_v5, 2  ;;  %v2766_v13 = vsel %vm2700_vm3, %v2764_v26, %v2765_v49  ;;  %v5294_v35 = vld [vmem:[#allocation2 + $0x300] sm:$0xff]  ;;  %v5299_v26 = vld [vmem:[#allocation2 + $0x338] sm:$0xff]  ;;  %v2554_v5 = vld [vmem:[#allocation2 + $0x170] sm:$0x3] }
 0x175   : > { %3095 = vmatmul.mubr.f32.gmra.mrb[16].mxu1 %v2743_v7  ;;  %v2762_v7 = vrot.slane %v10793_v59, 2 }
 0x176   : > { %5552 = vmatmul.mubr.f32.gmra.mrb[48].mxu0 %v5286_v23  ;;  %3099 = vmatprep.mubr.f32.mxu1 %v2750_v50  ;;  %v5295_v23 = vld [vmem:[#allocation2 + $0x308] sm:$0xff]  ;;  %v2769_v50 = vrot.slane %v2549_v0, 2 }
 0x177   : > { %5556 = vmatprep.mubr.f32.mxu0 %v10584_v20  ;;  %8070 = vmatpush1.bf16.msra.mxu1 %v8069_v55  ;;  %v7716_v20 = vld [vmem:[%s11526_s6 + $0x3a8] sm:$0xff]  ;;  %v2763_v36 = vsel %vm2700_vm3, %v2761_v58, %v2762_v7 }
 0x178   : > { %8071 = vmatprep.subr.bf16.mxu1 %v8959_v4  ;;  %v8075_v8 = vpack.c.bf16 %v7716_v20, %v7715_v44  ;;  %v10806_v55 = vld [vmem:[#allocation2 + $0x168] sm:$0xff]  ;;  %v2770_v28 = vsel %vm2700_vm3, %v2765_v49, %v2769_v50  ;;  %v7722_v44 = vld [vmem:[%s11526_s6 + $0x3d8] sm:$0xff] }
 0x179   : > { %3100 = vmatmul.mubr.f32.gmra.mrb[18].mxu1 %v2748_v63  ;;  %v2767_v63 = vrot.slane %v2548_v47, 2  ;;  %v5657_v58 = vld [vmem:[#allocation2 + $0x68] sm:$0xfe] }
 0x17a   : > { %5557 = vmatmul.mubr.f32.gmra.mrb[50].mxu0 %v10597_v51  ;;  %3104 = vmatprep.mubr.f32.mxu1 %v2756_v60  ;;  %v7717_v51 = vld [vmem:[%s11526_s6 + $0x3b0] sm:$0xff]  ;;  %v2774_v60 = vrot.slane %v2551_v11, 2 }
 0x17b   : > { %5561 = vmatprep.mubr.f32.mxu0 %v5291_v12  ;;  %8073 = vmatpush1.bf16.msra.mxu1 %v8072_v31  ;;  %v8078_v40 = vpack.c.bf16 %v7718_v53, %v7717_v51  ;;  %v2775_v12 = vrot.slane %v10806_v55, 2  ;;  %v2555_v31 = vld [vmem:[#allocation2 + $0x178] sm:$0x3]  ;;  %v2768_v20 = vsel %vm2700_vm3, %v2762_v7, %v2767_v63  ;;  %v7723_v53 = vld [vmem:[%s11526_s6 + $0x3e0] sm:$0xff]  ;;  %v5852_v63 = vrot.slane %v10677_v34, 1 }
 0x17c   : > { %8074 = vmatprep.subr.bf16.mxu1 %v8959_v4  ;;  %v2779_v49 = vrot.slane %v2555_v31, 2  ;;  %v10831_v51 = vld [vmem:[#allocation2 + $0x198] sm:$0xff]  ;;  %v5849_v31 = vrot.slane %v10689_v18, 1  ;;  %v7856_v18 = vld [vmem:[%s11526_s6 + $0x808] sm:$0xff] }
 0x17d   : > { %3105 = vmatmul.mubr.f32.gmra.mrb[20].mxu1 %v2753_v37  ;;  %v5296_v37 = vld [vmem:[#allocation2 + $0x310] sm:$0xff]  ;;  %v2785_v11 = vrot.slane %v10831_v51, 2 }
 0x17e   : > { %5562 = vmatmul.mubr.f32.gmra.mrb[52].mxu0 %v5290_v16  ;;  %3109 = vmatprep.mubr.f32.mxu1 %v2760_v30  ;;  %v2772_v16 = vrot.slane %v10819_v29, 2  ;;  %v2776_v30 = vsel %vm2700_vm3, %v2774_v60, %v2775_v12  ;;  %v2780_v47 = vsel %vm2700_vm3, %v2775_v12, %v2779_v49  ;;  %v7726_v60 = vld [vmem:[%s11526_s6 + $0x3f8] sm:$0xff]  ;;  %v5661_v12 = vld [vmem:[#allocation2 + $0x88] sm:$0x1] }
 0x17f   : > { %5566 = vmatprep.mubr.f32.mxu0 %v10610_v39  ;;  %8076 = vmatpush1.bf16.msra.mxu1 %v8075_v8  ;;  %v7720_v39 = vld [vmem:[%s11526_s6 + $0x3c8] sm:$0xff] }
 0x180   : > { %8077 = vmatprep.subr.bf16.mxu1 %v8959_v4  ;;  %v8081_v32 = vpack.c.bf16 %v7720_v39, %v7719_v62  ;;  %v2557_v8 = vld [vmem:[#allocation2 + $0x188] sm:$0xfc]  ;;  %v2773_v7 = vsel %vm2700_vm3, %v2771_v57, %v2772_v16  ;;  %v10843_v62 = vld [vmem:[#allocation2 + $0x190] sm:$0xff]  ;;  %v5656_v39 = vld [vmem:[#allocation2 + $0x60] sm:$0xfe] }
 0x181   : > { %3110 = vmatmul.mubr.f32.gmra.mrb[22].mxu1 %v2758_v42  ;;  %v7724_v42 = vld [vmem:[%s11526_s6 + $0x3e8] sm:$0xff]  ;;  %v2784_v50 = vrot.slane %v2557_v8, 2  ;;  %v2782_v34 = vrot.slane %v10843_v62, 2  ;;  %v5856_v8 = vrot.slane %v5661_v12, 1  ;;  %v5862_v12 = vrot.slane %v10702_v38, 1 }
 0x182   : > { %5567 = vmatmul.mubr.f32.gmra.mrb[54].mxu0 %v10623_v14  ;;  %3114 = vmatprep.mubr.f32.mxu1 %v2766_v13  ;;  %v7721_v14 = vld [vmem:[%s11526_s6 + $0x3d0] sm:$0xff] }
 0x183   : > { %5571 = vmatprep.mubr.f32.mxu0 %v5295_v23  ;;  %8079 = vmatpush1.bf16.msra.mxu1 %v8078_v40  ;;  %v8084_v0 = vpack.c.bf16 %v7722_v44, %v7721_v14  ;;  %v5298_v13 = vld [vmem:[#allocation2 + $0x330] sm:$0xff]  ;;  %v2777_v23 = vrot.slane %v2554_v5, 2  ;;  %v2556_v40 = vld [vmem:[#allocation2 + $0x180] sm:$0xfc]  ;;  %v2560_v14 = vld [vmem:[#allocation2 + $0x1a0] sm:$0x3] }
 0x184   : > { %8080 = vmatprep.subr.bf16.mxu1 %v8959_v4  ;;  %v8933_v44 = vld [vmem:[#allocation2 + $0x348] sm:$0xff] }
 0x185   : > { %3115 = vmatmul.mubr.f32.gmra.mrb[24].mxu1 %v2763_v36  ;;  %v8087_v36 = vpack.c.bf16 %v7724_v42, %v7723_v53  ;;  %v2778_v25 = vsel %vm2700_vm3, %v2772_v16, %v2777_v23  ;;  %v7855_v16 = vld [vmem:[%s11526_s6 + $0x800] sm:$0xff]  ;;  %v2787_v53 = vrot.slane %v2560_v14, 2  ;;  %v5663_v42 = vld [vmem:[#allocation2 + $0x98] sm:$0xfe] }
 0x186   : > { %5572 = vmatmul.mubr.f32.gmra.mrb[56].mxu0 %v5294_v35  ;;  %3119 = vmatprep.mubr.f32.mxu1 %v2770_v28  ;;  %v5851_v35 = vrot.slane %v5657_v58, 1  ;;  %v2561_v28 = vld [vmem:[#allocation2 + $0x1a8] sm:$0x3]  ;;  %v8934_v58 = vld [vmem:[#allocation2 + $0x340] sm:$0xff] }
 0x187   : > { %5576 = vmatprep.mubr.f32.mxu0 %v5297_v45  ;;  %8082 = vmatpush1.bf16.msra.mxu1 %v8081_v32  ;;  %v7725_v45 = vld [vmem:[%s11526_s6 + $0x3f0] sm:$0xff]  ;;  %v2781_v32 = vrot.slane %v2556_v40, 2  ;;  %v2789_v57 = vrot.slane %v2561_v28, 2  ;;  %v8285_v40 = vpack.c.bf16 %v7856_v18, %v7855_v16  ;;  %v2788_v14 = vsel %vm2700_vm3, %v2782_v34, %v2787_v53  ;;  %v10889_v18 = vld [vmem:[#allocation2 + $0x1f8] sm:$0xff]  ;;  %v7860_v53 = vld [vmem:[%s11526_s6 + $0x828] sm:$0xff] }
 0x188   : > { %8083 = vmatprep.subr.bf16.mxu1 %v8959_v4  ;;  %v8090_v49 = vpack.c.bf16 %v7726_v60, %v7725_v45  ;;  %v5853_v5 = vsel %vm1929_vm2, %v5851_v35, %v5852_v63  ;;  %v10871_v35 = vld [vmem:[#allocation2 + $0x1c0] sm:$0xff]  ;;  %v5662_v28 = vld [vmem:[#allocation2 + $0x90] sm:$0xfe]  ;;  %v5857_v45 = vsel %vm1929_vm2, %v5852_v63, %v5856_v8  ;;  %v5861_v60 = vrot.slane %v5663_v42, 1  ;;  %v5666_v8 = vld [vmem:[#allocation2 + $0xb0] sm:$0x1] }
 0x189   : > { %3120 = vmatmul.mubr.f32.gmra.mrb[26].mxu1 %v2768_v20  ;;  %v2786_v20 = vsel %vm2700_vm3, %v2784_v50, %v2785_v11 }
 0x18a   : > { %5577 = vmatmul.mubr.f32.gmra.mrb[58].mxu0 %v5296_v37  ;;  %3124 = vmatprep.mubr.f32.mxu1 %v2776_v30  ;;  %v5848_v37 = vrot.slane %v5656_v39, 1  ;;  %v5660_v30 = vld [vmem:[#allocation2 + $0x80] sm:$0x1]  ;;  %v5863_v16 = vsel %vm1929_vm2, %v5861_v60, %v5862_v12 }
 0x18b   : > { %5581 = vmatprep.mubr.f32.mxu0 %v5299_v26  ;;  %8085 = vmatpush1.bf16.msra.mxu1 %v8084_v0  ;;  %v2563_v26 = vld [vmem:[#allocation2 + $0x1b8] sm:$0xfc]  ;;  %v10864_v0 = vld [vmem:[#allocation2 + $0x1c8] sm:$0xff] }
 0x18c   : > { %8086 = vmatprep.subr.bf16.mxu1 %v8959_v4  ;;  %v2794_v23 = vrot.slane %v2563_v26, 2  ;;  %v5850_v50 = vsel %vm1929_vm2, %v5848_v37, %v5849_v31  ;;  %v2795_v39 = vrot.slane %v10864_v0, 2  ;;  %v5859_v37 = vrot.slane %v10715_v6, 1  ;;  %v7859_v6 = vld [vmem:[%s11526_s6 + $0x820] sm:$0xff] }
 0x18d   : > { %3125 = vmatmul.mubr.f32.gmra.mrb[28].mxu1 %v2773_v7  ;;  %v2783_v7 = vsel %vm2700_vm3, %v2781_v32, %v2782_v34  ;;  %v7857_v32 = vld [vmem:[%s11526_s6 + $0x810] sm:$0xff]  ;;  %v5858_v26 = vrot.slane %v5662_v28, 1  ;;  %v2569_v34 = vld [vmem:[#allocation2 + $0x1e8] sm:$0xfc]  ;;  %v8291_v60 = vpack.c.bf16 %v7860_v53, %v7859_v6 }
 0x18e   : > { %5582 = vmatmul.mubr.f32.gmra.mrb[60].mxu0 %v5298_v13  ;;  %3129 = vmatprep.mubr.f32.mxu1 %v2780_v47  ;;  %v5854_v13 = vrot.slane %v5660_v30, 1  ;;  %v2790_v47 = vsel %vm2700_vm3, %v2785_v11, %v2789_v57  ;;  %v7858_v11 = vld [vmem:[%s11526_s6 + $0x818] sm:$0xff]  ;;  %v2566_v57 = vld [vmem:[#allocation2 + $0x1d0] sm:$0x3]  ;;  %v2796_v30 = vsel %vm2700_vm3, %v2794_v23, %v2795_v39  ;;  %v2804_v23 = vrot.slane %v2569_v34, 2  ;;  %v10918_v53 = vld [vmem:[#allocation2 + $0x228] sm:$0xff] }
 0x18f   : > { %5586 = vmatprep.mubr.f32.mxu0 %v8933_v44  ;;  %8088 = vmatpush1.bf16.msra.mxu1 %v8087_v36  ;;  %v2562_v36 = vld [vmem:[#allocation2 + $0x1b0] sm:$0xfc]  ;;  %v5667_v44 = vld [vmem:[#allocation2 + $0xb8] sm:$0x1]  ;;  %v2797_v42 = vrot.slane %v2566_v57, 2 }
 0x190   : > { %8089 = vmatprep.subr.bf16.mxu1 %v8959_v4  ;;  %v5855_v63 = vsel %vm1929_vm2, %v5849_v31, %v5854_v13  ;;  %v2791_v38 = vrot.slane %v2562_v36, 2  ;;  %v5866_v31 = vrot.slane %v5667_v44, 1  ;;  %v5864_v13 = vrot.slane %v5666_v8, 1  ;;  %v2568_v36 = vld [vmem:[#allocation2 + $0x1e0] sm:$0xfc]  ;;  %v10901_v28 = vld [vmem:[#allocation2 + $0x1f0] sm:$0xff] }
 0x191   : > { %3130 = vmatmul.mubr.f32.gmra.mrb[30].mxu1 %v2778_v25  ;;  %v2567_v25 = vld [vmem:[#allocation2 + $0x1d8] sm:$0x3]  ;;  %v2802_v57 = vrot.slane %v10901_v28, 2  ;;  %v5672_v34 = vld [vmem:[#allocation2 + $0xe0] sm:$0x1] }
 0x192   : > { %5587 = vmatmul.mubr.f32.gmra.mrb[62].mxu0 %v8934_v58  ;;  %3134 = vmatprep.mubr.f32.mxu1 %v2786_v20  ;;  %v2792_v20 = vrot.slane %v10871_v35, 2  ;;  %v5669_v58 = vld [vmem:[#allocation2 + $0xc8] sm:$0xfe]  ;;  %v7862_v44 = vld [vmem:[%s11526_s6 + $0x838] sm:$0xff] }
 0x193   : > { %6201 = vmatprep.mubr.f32.mxu0 %v5853_v5  ;;  %8091 = vmatpush1.bf16.msra.mxu1 %v8090_v49  ;;  %v2799_v49 = vrot.slane %v2567_v25, 2  ;;  %v8288_v5 = vpack.c.bf16 %v7858_v11, %v7857_v32  ;;  %v5867_v25 = vsel %vm1929_vm2, %v5862_v12, %v5866_v31  ;;  %v5871_v32 = vrot.slane %v5669_v58, 1  ;;  %v5675_v58 = vld [vmem:[#allocation2 + $0xf8] sm:$0xfe] }
 0x194   : > { %8332 = vmatprep.subr.bf16.mxu1 %v8959_v4  ;;  %v5872_v11 = vrot.slane %v10728_v3, 1  ;;  %v5865_v12 = vsel %vm1929_vm2, %v5859_v37, %v5864_v13  ;;  %v2801_v3 = vrot.slane %v2568_v36, 2  ;;  %v5874_v13 = vrot.slane %v5672_v34, 1 }
 0x195   : > { %3135 = vmatmul.mubr.f32.gmra.mrb[32].mxu1 %v2783_v7  ;;  %v2793_v7 = vsel %vm2700_vm3, %v2791_v38, %v2792_v20  ;;  %v5673_v38 = vld [vmem:[#allocation2 + $0xe8] sm:$0x1]  ;;  %v2815_v36 = vrot.slane %v10918_v53, 2 }
 0x196   : > { %6202 = vmatmul.mubr.f32.vlgmr.msra.gmra.mrb[0].mxu0 %v5850_v50  ;;  %3139 = vmatprep.mubr.f32.mxu1 %v2790_v47  ;;  %v5860_v50 = vsel %vm1929_vm2, %v5858_v26, %v5859_v37  ;;  %v2800_v47 = vsel %vm2700_vm3, %v2795_v39, %v2799_v49  ;;  %v7861_v39 = vld [vmem:[%s11526_s6 + $0x830] sm:$0xff]  ;;  %v2572_v26 = vld [vmem:[#allocation2 + $0x200] sm:$0x3]  ;;  %v5873_v31 = vsel %vm1929_vm2, %v5871_v32, %v5872_v11  ;;  %v5876_v6 = vrot.slane %v5673_v38, 1  ;;  %v7864_v37 = vld [vmem:[%s11526_s6 + $0x848] sm:$0xff] }
 0x197   : > { %6206 = vmatprep.mubr.f32.mxu0 %v5857_v45  ;;  %8286 = vmatpush1.bf16.msra.mxu0 %v8285_v40  ;;  %v2805_v40 = vrot.slane %v10889_v18, 2  ;;  %v5668_v45 = vld [vmem:[#allocation2 + $0xc0] sm:$0xfe]  ;;  %v7866_v38 = vld [vmem:[%s11526_s6 + $0x858] sm:$0xff] }
 0x198   : > { %8287 = vmatprep.subr.bf16.mxu0 %v8959_v4 }
 0x199   : > { %3140 = vmatmul.mubr.f32.gmra.mrb[34].mxu1 %v2788_v14  ;;  %v2573_v14 = vld [vmem:[#allocation2 + $0x208] sm:$0x3]  ;;  %v2806_v49 = vsel %vm2700_vm3, %v2804_v23, %v2805_v40 }
 0x19a   : > { %6207 = vmatmul.mubr.f32.gmra.mrb[2].mxu0 %v5855_v63  ;;  %3144 = vmatprep.mubr.f32.mxu1 %v2796_v30  ;;  %v2798_v63 = vsel %vm2700_vm3, %v2792_v20, %v2797_v42  ;;  %v5869_v30 = vrot.slane %v10741_v10, 1  ;;  %v2809_v8 = vrot.slane %v2573_v14, 2  ;;  %v8294_v20 = vpack.c.bf16 %v7862_v44, %v7861_v39  ;;  %v7863_v10 = vld [vmem:[%s11526_s6 + $0x840] sm:$0xff] }
 0x19b   : > { %6211 = vmatprep.mubr.f32.mxu0 %v5863_v16  ;;  %8289 = vmatpush1.bf16.msra.mxu0 %v8288_v5  ;;  %v5868_v5 = vrot.slane %v5668_v45, 1  ;;  %v2575_v16 = vld [vmem:[#allocation2 + $0x218] sm:$0xfc]  ;;  %v2807_v42 = vrot.slane %v2572_v26, 2  ;;  %v2574_v45 = vld [vmem:[#allocation2 + $0x210] sm:$0xfc]  ;;  %v8297_v32 = vpack.c.bf16 %v7864_v37, %v7863_v10  ;;  %v5877_v14 = vsel %vm1929_vm2, %v5872_v11, %v5876_v6 }
 0x19c   : > { %8290 = vmatprep.subr.bf16.mxu0 %v8959_v4  ;;  %v2814_v23 = vrot.slane %v2575_v16, 2  ;;  %v5881_v39 = vrot.slane %v5675_v58, 1  ;;  %v5882_v44 = vrot.slane %v10754_v54, 1  ;;  %v5875_v11 = vsel %vm1929_vm2, %v5869_v30, %v5874_v13  ;;  %v10948_v37 = vld [vmem:[#allocation2 + $0x258] sm:$0xff]  ;;  %v5681_v58 = vld [vmem:[#allocation2 + $0x128] sm:$0xfe] }
 0x19d   : > { %3145 = vmatmul.mubr.f32.gmra.mrb[36].mxu1 %v2793_v7  ;;  %v2803_v7 = vsel %vm2700_vm3, %v2801_v3, %v2802_v57  ;;  %v5679_v3 = vld [vmem:[#allocation2 + $0x118] sm:$0x1]  ;;  %v2811_v54 = vrot.slane %v2574_v45, 2  ;;  %v2825_v45 = vrot.slane %v10948_v37, 2 }
 0x19e   : > { %6212 = vmatmul.mubr.f32.gmra.mrb[4].mxu0 %v5860_v50  ;;  %3149 = vmatprep.mubr.f32.mxu1 %v2800_v47  ;;  %v5870_v50 = vsel %vm1929_vm2, %v5868_v5, %v5869_v30  ;;  %v2810_v47 = vsel %vm2700_vm3, %v2805_v40, %v2809_v8  ;;  %v7865_v40 = vld [vmem:[%s11526_s6 + $0x850] sm:$0xff]  ;;  %v2816_v8 = vsel %vm2700_vm3, %v2814_v23, %v2815_v36  ;;  %v5886_v10 = vrot.slane %v5679_v3, 1  ;;  %v7868_v30 = vld [vmem:[%s11526_s6 + $0x868] sm:$0xff]  ;;  %v7870_v3 = vld [vmem:[%s11526_s6 + $0x878] sm:$0xff] }
 0x19f   : > { %6216 = vmatprep.mubr.f32.mxu0 %v5867_v25  ;;  %8292 = vmatpush1.bf16.msra.mxu0 %v8291_v60  ;;  %v10931_v60 = vld [vmem:[#allocation2 + $0x220] sm:$0xff]  ;;  %v5674_v25 = vld [vmem:[#allocation2 + $0xf0] sm:$0xfe]  ;;  %v5883_v6 = vsel %vm1929_vm2, %v5881_v39, %v5882_v44 }
 0x1a0   : > { %8293 = vmatprep.subr.bf16.mxu0 %v8959_v4  ;;  %v2812_v26 = vrot.slane %v10931_v60, 2  ;;  %v2578_v5 = vld [vmem:[#allocation2 + $0x230] sm:$0x3]  ;;  %v5878_v34 = vrot.slane %v5674_v25, 1  ;;  %v2580_v25 = vld [vmem:[#allocation2 + $0x240] sm:$0xfc] }
 0x1a1   : > { %3150 = vmatmul.mubr.f32.gmra.mrb[38].mxu1 %v2798_v63  ;;  %v2579_v63 = vld [vmem:[#allocation2 + $0x238] sm:$0x3] }
 0x1a2   : > { %6217 = vmatmul.mubr.f32.gmra.mrb[6].mxu0 %v5865_v12  ;;  %3154 = vmatprep.mubr.f32.mxu1 %v2806_v49  ;;  %v2808_v12 = vsel %vm2700_vm3, %v2802_v57, %v2807_v42  ;;  %v5879_v49 = vrot.slane %v10767_v17, 1  ;;  %v2819_v16 = vrot.slane %v2579_v63, 2  ;;  %v8300_v57 = vpack.c.bf16 %v7866_v38, %v7865_v40  ;;  %v7867_v17 = vld [vmem:[%s11526_s6 + $0x860] sm:$0xff] }
 0x1a3   : > { %6221 = vmatprep.mubr.f32.mxu0 %v5873_v31  ;;  %8295 = vmatpush1.bf16.msra.mxu0 %v8294_v20  ;;  %v5678_v20 = vld [vmem:[#allocation2 + $0x110] sm:$0x1]  ;;  %v2581_v31 = vld [vmem:[#allocation2 + $0x248] sm:$0xfc]  ;;  %v2817_v42 = vrot.slane %v2578_v5, 2  ;;  %v8303_v39 = vpack.c.bf16 %v7868_v30, %v7867_v17  ;;  %v5887_v63 = vsel %vm1929_vm2, %v5882_v44, %v5886_v10  ;;  %v5891_v40 = vrot.slane %v5681_v58, 1 }
 0x1a4   : > { %8296 = vmatprep.subr.bf16.mxu0 %v8959_v4  ;;  %v5884_v13 = vrot.slane %v5678_v20, 1  ;;  %v2824_v23 = vrot.slane %v2581_v31, 2  ;;  %v5892_v38 = vrot.slane %v10780_v61, 1  ;;  %v2821_v61 = vrot.slane %v2580_v25, 2  ;;  %v10978_v30 = vld [vmem:[#allocation2 + $0x288] sm:$0xff] }
 0x1a5   : > { %3155 = vmatmul.mubr.f32.gmra.mrb[40].mxu1 %v2803_v7  ;;  %v2813_v7 = vsel %vm2700_vm3, %v2811_v54, %v2812_v26  ;;  %v5685_v54 = vld [vmem:[#allocation2 + $0x148] sm:$0x1]  ;;  %v5687_v58 = vld [vmem:[#allocation2 + $0x158] sm:$0xfe]  ;;  %v2835_v25 = vrot.slane %v10978_v30, 2 }
 0x1a6   : > { %6222 = vmatmul.mubr.f32.gmra.mrb[8].mxu0 %v5870_v50  ;;  %3159 = vmatprep.mubr.f32.mxu1 %v2810_v47  ;;  %v5880_v50 = vsel %vm1929_vm2, %v5878_v34, %v5879_v49  ;;  %v2820_v47 = vsel %vm2700_vm3, %v2815_v36, %v2819_v16  ;;  %v7869_v36 = vld [vmem:[%s11526_s6 + $0x870] sm:$0xff]  ;;  %v5885_v44 = vsel %vm1929_vm2, %v5879_v49, %v5884_v13  ;;  %v2584_v34 = vld [vmem:[#allocation2 + $0x260] sm:$0x3]  ;;  %v5896_v17 = vrot.slane %v5685_v54, 1  ;;  %v7872_v49 = vld [vmem:[%s11526_s6 + $0x888] sm:$0xff] }
 0x1a7   : > { %6226 = vmatprep.mubr.f32.mxu0 %v5877_v14  ;;  %8298 = vmatpush1.bf16.msra.mxu0 %v8297_v32  ;;  %v10961_v32 = vld [vmem:[#allocation2 + $0x250] sm:$0xff]  ;;  %v5680_v14 = vld [vmem:[#allocation2 + $0x120] sm:$0xfe]  ;;  %v2826_v16 = vsel %vm2700_vm3, %v2824_v23, %v2825_v45  ;;  %v5893_v10 = vsel %vm1929_vm2, %v5891_v40, %v5892_v38  ;;  %v7874_v54 = vld [vmem:[%s11526_s6 + $0x898] sm:$0xff] }
 0x1a8   : > { %8299 = vmatprep.subr.bf16.mxu0 %v8959_v4  ;;  %v2822_v5 = vrot.slane %v10961_v32, 2  ;;  %v5888_v20 = vrot.slane %v5680_v14, 1  ;;  %v2586_v14 = vld [vmem:[#allocation2 + $0x270] sm:$0xfc] }
 0x1a9   : > { %3160 = vmatmul.mubr.f32.gmra.mrb[42].mxu1 %v2808_v12  ;;  %v2585_v12 = vld [vmem:[#allocation2 + $0x268] sm:$0x3] }
 0x1aa   : > { %6227 = vmatmul.mubr.f32.gmra.mrb[10].mxu0 %v5875_v11  ;;  %3164 = vmatprep.mubr.f32.mxu1 %v2816_v8  ;;  %v2818_v11 = vsel %vm2700_vm3, %v2812_v26, %v2817_v42  ;;  %v5889_v8 = vrot.slane %v10793_v59, 1  ;;  %v2829_v31 = vrot.slane %v2585_v12, 2  ;;  %v8306_v26 = vpack.c.bf16 %v7870_v3, %v7869_v36  ;;  %v7871_v59 = vld [vmem:[%s11526_s6 + $0x880] sm:$0xff] }
 0x1ab   : > { %6231 = vmatprep.mubr.f32.mxu0 %v5883_v6  ;;  %8301 = vmatpush1.bf16.msra.mxu0 %v8300_v57  ;;  %v5684_v57 = vld [vmem:[#allocation2 + $0x140] sm:$0x1]  ;;  %v2587_v6 = vld [vmem:[#allocation2 + $0x278] sm:$0xfc]  ;;  %v2827_v42 = vrot.slane %v2584_v34, 2  ;;  %v8309_v40 = vpack.c.bf16 %v7872_v49, %v7871_v59  ;;  %v5897_v12 = vsel %vm1929_vm2, %v5892_v38, %v5896_v17  ;;  %v5901_v36 = vrot.slane %v5687_v58, 1 }
 0x1ac   : > { %8302 = vmatprep.subr.bf16.mxu0 %v8959_v4  ;;  %v5894_v13 = vrot.slane %v5684_v57, 1  ;;  %v2834_v23 = vrot.slane %v2587_v6, 2  ;;  %v5902_v3 = vrot.slane %v10806_v55, 1  ;;  %v2831_v55 = vrot.slane %v2586_v14, 2  ;;  %v11008_v49 = vld [vmem:[#allocation2 + $0x2b8] sm:$0xff] }
 0x1ad   : > { %3165 = vmatmul.mubr.f32.gmra.mrb[44].mxu1 %v2813_v7  ;;  %v2823_v7 = vsel %vm2700_vm3, %v2821_v61, %v2822_v5  ;;  %v5691_v61 = vld [vmem:[#allocation2 + $0x178] sm:$0x1]  ;;  %v5693_v58 = vld [vmem:[#allocation2 + $0x188] sm:$0xfe]  ;;  %v2845_v14 = vrot.slane %v11008_v49, 2 }
 0x1ae   : > { %6232 = vmatmul.mubr.f32.gmra.mrb[12].mxu0 %v5880_v50  ;;  %3169 = vmatprep.mubr.f32.mxu1 %v2820_v47  ;;  %v5890_v50 = vsel %vm1929_vm2, %v5888_v20, %v5889_v8  ;;  %v2830_v47 = vsel %vm2700_vm3, %v2825_v45, %v2829_v31  ;;  %v7873_v45 = vld [vmem:[%s11526_s6 + $0x890] sm:$0xff]  ;;  %v5895_v38 = vsel %vm1929_vm2, %v5889_v8, %v5894_v13  ;;  %v5906_v59 = vrot.slane %v5691_v61, 1  ;;  %v7876_v8 = vld [vmem:[%s11526_s6 + $0x8a8] sm:$0xff]  ;;  %v7878_v61 = vld [vmem:[%s11526_s6 + $0x8b8] sm:$0xff] }
 0x1af   : > { %6236 = vmatprep.mubr.f32.mxu0 %v5887_v63  ;;  %8304 = vmatpush1.bf16.msra.mxu0 %v8303_v39  ;;  %v10991_v39 = vld [vmem:[#allocation2 + $0x280] sm:$0xff]  ;;  %v5686_v63 = vld [vmem:[#allocation2 + $0x150] sm:$0xfe]  ;;  %v2836_v31 = vsel %vm2700_vm3, %v2834_v23, %v2835_v25  ;;  %v5903_v17 = vsel %vm1929_vm2, %v5901_v36, %v5902_v3 }
 0x1b0   : > { %8305 = vmatprep.subr.bf16.mxu0 %v8959_v4  ;;  %v2832_v34 = vrot.slane %v10991_v39, 2  ;;  %v2590_v20 = vld [vmem:[#allocation2 + $0x290] sm:$0x3]  ;;  %v5898_v57 = vrot.slane %v5686_v63, 1  ;;  %v2592_v63 = vld [vmem:[#allocation2 + $0x2a0] sm:$0xfc] }
 0x1b1   : > { %3170 = vmatmul.mubr.f32.gmra.mrb[46].mxu1 %v2818_v11  ;;  %v2591_v11 = vld [vmem:[#allocation2 + $0x298] sm:$0x3] }
 0x1b2   : > { %6237 = vmatmul.mubr.f32.gmra.mrb[14].mxu0 %v5885_v44  ;;  %3174 = vmatprep.mubr.f32.mxu1 %v2826_v16  ;;  %v2828_v44 = vsel %vm2700_vm3, %v2822_v5, %v2827_v42  ;;  %v5899_v16 = vrot.slane %v10819_v29, 1  ;;  %v2839_v6 = vrot.slane %v2591_v11, 2  ;;  %v8312_v5 = vpack.c.bf16 %v7874_v54, %v7873_v45  ;;  %v7875_v29 = vld [vmem:[%s11526_s6 + $0x8a0] sm:$0xff] }
 0x1b3   : > { %6241 = vmatprep.mubr.f32.mxu0 %v5893_v10  ;;  %8307 = vmatpush1.bf16.msra.mxu0 %v8306_v26  ;;  %v5690_v26 = vld [vmem:[#allocation2 + $0x170] sm:$0x1]  ;;  %v2593_v10 = vld [vmem:[#allocation2 + $0x2a8] sm:$0xfc]  ;;  %v2837_v42 = vrot.slane %v2590_v20, 2  ;;  %v8315_v36 = vpack.c.bf16 %v7876_v8, %v7875_v29  ;;  %v5907_v11 = vsel %vm1929_vm2, %v5902_v3, %v5906_v59  ;;  %v5911_v45 = vrot.slane %v5693_v58, 1 }
 0x1b4   : > { %8308 = vmatprep.subr.bf16.mxu0 %v8959_v4  ;;  %v5904_v13 = vrot.slane %v5690_v26, 1  ;;  %v2844_v23 = vrot.slane %v2593_v10, 2  ;;  %v5912_v54 = vrot.slane %v10831_v51, 1  ;;  %v2841_v51 = vrot.slane %v2592_v63, 2  ;;  %v11038_v8 = vld [vmem:[#allocation2 + $0x2e8] sm:$0xff] }
 0x1b5   : > { %3175 = vmatmul.mubr.f32.gmra.mrb[48].mxu1 %v2823_v7  ;;  %v2833_v7 = vsel %vm2700_vm3, %v2831_v55, %v2832_v34  ;;  %v5697_v55 = vld [vmem:[#allocation2 + $0x1a8] sm:$0x1]  ;;  %v5699_v58 = vld [vmem:[#allocation2 + $0x1b8] sm:$0xfe]  ;;  %v2855_v63 = vrot.slane %v11038_v8, 2 }
 0x1b6   : > { %6242 = vmatmul.mubr.f32.gmra.mrb[16].mxu0 %v5890_v50  ;;  %3179 = vmatprep.mubr.f32.mxu1 %v2830_v47  ;;  %v5900_v50 = vsel %vm1929_vm2, %v5898_v57, %v5899_v16  ;;  %v2840_v47 = vsel %vm2700_vm3, %v2835_v25, %v2839_v6  ;;  %v7877_v25 = vld [vmem:[%s11526_s6 + $0x8b0] sm:$0xff]  ;;  %v5905_v3 = vsel %vm1929_vm2, %v5899_v16, %v5904_v13  ;;  %v2596_v57 = vld [vmem:[#allocation2 + $0x2c0] sm:$0x3]  ;;  %v5916_v29 = vrot.slane %v5697_v55, 1  ;;  %v7880_v16 = vld [vmem:[%s11526_s6 + $0x8c8] sm:$0xff] }
 0x1b7   : > { %6246 = vmatprep.mubr.f32.mxu0 %v5897_v12  ;;  %8310 = vmatpush1.bf16.msra.mxu0 %v8309_v40  ;;  %v11021_v40 = vld [vmem:[#allocation2 + $0x2b0] sm:$0xff]  ;;  %v5692_v12 = vld [vmem:[#allocation2 + $0x180] sm:$0xfe]  ;;  %v2846_v6 = vsel %vm2700_vm3, %v2844_v23, %v2845_v14  ;;  %v5913_v59 = vsel %vm1929_vm2, %v5911_v45, %v5912_v54  ;;  %v7882_v55 = vld [vmem:[%s11526_s6 + $0x8d8] sm:$0xff] }
 0x1b8   : > { %8311 = vmatprep.subr.bf16.mxu0 %v8959_v4  ;;  %v2842_v20 = vrot.slane %v11021_v40, 2  ;;  %v5908_v26 = vrot.slane %v5692_v12, 1  ;;  %v2598_v12 = vld [vmem:[#allocation2 + $0x2d0] sm:$0xfc] }
 0x1b9   : > { %3180 = vmatmul.mubr.f32.gmra.mrb[50].mxu1 %v2828_v44  ;;  %v2597_v44 = vld [vmem:[#allocation2 + $0x2c8] sm:$0x3] }
 0x1ba   : > { %6247 = vmatmul.mubr.f32.gmra.mrb[18].mxu0 %v5895_v38  ;;  %3184 = vmatprep.mubr.f32.mxu1 %v2836_v31  ;;  %v2838_v38 = vsel %vm2700_vm3, %v2832_v34, %v2837_v42  ;;  %v5909_v31 = vrot.slane %v10843_v62, 1  ;;  %v2849_v10 = vrot.slane %v2597_v44, 2  ;;  %v8318_v34 = vpack.c.bf16 %v7878_v61, %v7877_v25  ;;  %v7879_v62 = vld [vmem:[%s11526_s6 + $0x8c0] sm:$0xff] }
 0x1bb   : > { %6251 = vmatprep.mubr.f32.mxu0 %v5903_v17  ;;  %8313 = vmatpush1.bf16.msra.mxu0 %v8312_v5  ;;  %v5696_v5 = vld [vmem:[#allocation2 + $0x1a0] sm:$0x1]  ;;  %v2599_v17 = vld [vmem:[#allocation2 + $0x2d8] sm:$0xfc]  ;;  %v2847_v42 = vrot.slane %v2596_v57, 2  ;;  %v8321_v45 = vpack.c.bf16 %v7880_v16, %v7879_v62  ;;  %v5917_v44 = vsel %vm1929_vm2, %v5912_v54, %v5916_v29  ;;  %v5921_v25 = vrot.slane %v5699_v58, 1 }
 0x1bc   : > { %8314 = vmatprep.subr.bf16.mxu0 %v8959_v4  ;;  %v5914_v13 = vrot.slane %v5696_v5, 1  ;;  %v2854_v23 = vrot.slane %v2599_v17, 2  ;;  %v5922_v61 = vrot.slane %v10864_v0, 1  ;;  %v2851_v0 = vrot.slane %v2598_v12, 2  ;;  %v2602_v17 = vld [vmem:[#allocation2 + $0x2f0] sm:$0x3] }
 0x1bd   : > { %3185 = vmatmul.mubr.f32.gmra.mrb[52].mxu1 %v2833_v7  ;;  %v2843_v7 = vsel %vm2700_vm3, %v2841_v51, %v2842_v20  ;;  %v5703_v51 = vld [vmem:[#allocation2 + $0x1d8] sm:$0x1]  ;;  %v5702_v29 = vld [vmem:[#allocation2 + $0x1d0] sm:$0x1]  ;;  %v5705_v62 = vld [vmem:[#allocation2 + $0x1e8] sm:$0xfe] }
 0x1be   : > { %6252 = vmatmul.mubr.f32.gmra.mrb[20].mxu0 %v5900_v50  ;;  %3189 = vmatprep.mubr.f32.mxu1 %v2840_v47  ;;  %v5910_v50 = vsel %vm1929_vm2, %v5908_v26, %v5909_v31  ;;  %v2850_v47 = vsel %vm2700_vm3, %v2845_v14, %v2849_v10  ;;  %v7881_v14 = vld [vmem:[%s11526_s6 + $0x8d0] sm:$0xff]  ;;  %v5915_v54 = vsel %vm1929_vm2, %v5909_v31, %v5914_v13  ;;  %v7883_v31 = vld [vmem:[%s11526_s6 + $0x8e0] sm:$0xff]  ;;  %v5924_v13 = vrot.slane %v5702_v29, 1 }
 0x1bf   : > { %6256 = vmatprep.mubr.f32.mxu0 %v5907_v11  ;;  %8316 = vmatpush1.bf16.msra.mxu0 %v8315_v36  ;;  %v11051_v36 = vld [vmem:[#allocation2 + $0x2e0] sm:$0xff]  ;;  %v5698_v11 = vld [vmem:[#allocation2 + $0x1b0] sm:$0xfe]  ;;  %v2856_v26 = vsel %vm2700_vm3, %v2854_v23, %v2855_v63  ;;  %v5932_v12 = vrot.slane %v10889_v18, 1 }
 0x1c0   : > { %8317 = vmatprep.subr.bf16.mxu0 %v8959_v4  ;;  %v2852_v57 = vrot.slane %v11051_v36, 2  ;;  %v5918_v10 = vrot.slane %v5698_v11, 1  ;;  %v5704_v11 = vld [vmem:[#allocation2 + $0x1e0] sm:$0xfe] }
 0x1c1   : > { %3190 = vmatmul.mubr.f32.gmra.mrb[54].mxu1 %v2838_v38  ;;  %v2603_v38 = vld [vmem:[#allocation2 + $0x2f8] sm:$0x3] }
 0x1c2   : > { %6257 = vmatmul.mubr.f32.gmra.mrb[22].mxu0 %v5905_v3  ;;  %3194 = vmatprep.mubr.f32.mxu1 %v2846_v6  ;;  %v2848_v3 = vsel %vm2700_vm3, %v2842_v20, %v2847_v42  ;;  %v5919_v6 = vrot.slane %v10871_v35, 1  ;;  %v2859_v5 = vrot.slane %v2603_v38, 2  ;;  %v5923_v20 = vsel %vm1929_vm2, %v5921_v25, %v5922_v61  ;;  %v7884_v35 = vld [vmem:[%s11526_s6 + $0x8e8] sm:$0xff] }
 0x1c3   : > { %6261 = vmatprep.mubr.f32.mxu0 %v5913_v59  ;;  %8319 = vmatpush1.bf16.msra.mxu0 %v8318_v34  ;;  %v8324_v34 = vpack.c.bf16 %v7882_v55, %v7881_v14  ;;  %v5926_v59 = vrot.slane %v5703_v51, 1  ;;  %v2853_v16 = vsel %vm2700_vm3, %v2851_v0, %v2852_v57  ;;  %v2857_v42 = vrot.slane %v2602_v17, 2  ;;  %v5711_v0 = vld [vmem:[#allocation2 + $0x218] sm:$0xfe] }
 0x1c4   : > { %8320 = vmatprep.subr.bf16.mxu0 %v8959_v4  ;;  %v5920_v58 = vsel %vm1929_vm2, %v5918_v10, %v5919_v6  ;;  %v8327_v23 = vpack.c.bf16 %v7884_v35, %v7883_v31  ;;  %v5925_v18 = vsel %vm1929_vm2, %v5919_v6, %v5924_v13  ;;  %v5928_v38 = vrot.slane %v5704_v11, 1  ;;  %v3282_v10 = vld [vmem:[#allocation2 + $0x48] sm:$0xff]  ;;  %v11102_v13 = vld [vmem:[#allocation2 + $0x78] sm:$0xff] }
 0x1c5   : > { %3195 = vmatmul.mubr.f32.gmra.mrb[56].mxu1 %v2843_v7  ;;  %v2860_v7 = vsel %vm2700_vm3, %v2855_v63, %v2859_v5  ;;  %v5709_v63 = vld [vmem:[#allocation2 + $0x208] sm:$0x1]  ;;  %v2858_v25 = vsel %vm2700_vm3, %v2852_v57, %v2857_v42  ;;  %v5929_v14 = vrot.slane %v10901_v28, 1  ;;  %v3279_v57 = vld [vmem:[#allocation2 + $0x30] sm:$0xff]  ;;  %v5941_v5 = vrot.slane %v5711_v0, 1 }
 0x1c6   : > { %6262 = vmatmul.mubr.f32.gmra.mrb[24].mxu0 %v5910_v50  ;;  %3199 = vmatprep.mubr.f32.mxu1 %v2850_v47  ;;  %v5927_v50 = vsel %vm1929_vm2, %v5922_v61, %v5926_v59  ;;  %v5931_v47 = vrot.slane %v5705_v62, 1  ;;  %v3280_v61 = vld [vmem:[#allocation2 + $0x38] sm:$0xff]  ;;  %v5936_v51 = vrot.slane %v5709_v63, 1  ;;  %v5942_v17 = vrot.slane %v10918_v53, 1  ;;  %v3281_v59 = vld [vmem:[#allocation2 + $0x40] sm:$0xff]  ;;  %v3284_v31 = vld [vmem:[#allocation2 + $0x68] sm:$0xff] }
 0x1c7   : > { %6266 = vmatprep.mubr.f32.mxu0 %v5917_v44  ;;  %8322 = vmatpush1.bf16.msra.mxu0 %v8321_v45  ;;  %v7885_v45 = vld [vmem:[%s11526_s6 + $0x8f0] sm:$0xff]  ;;  %v7886_v44 = vld [vmem:[%s11526_s6 + $0x8f8] sm:$0xff]  ;;  %v5930_v6 = vsel %vm1929_vm2, %v5928_v38, %v5929_v14  ;;  %v5939_v62 = vrot.slane %v10931_v60, 1  ;;  %v5721_v11 = vld [vmem:[#allocation2 + $0x268] sm:$0x1] }
 0x1c8   : > { %8323 = vmatprep.subr.bf16.mxu0 %v8959_v4  ;;  %v8330_v55 = vpack.c.bf16 %v7886_v44, %v7885_v45  ;;  %v5937_v28 = vsel %vm1929_vm2, %v5932_v12, %v5936_v51  ;;  %v5714_v42 = vld [vmem:[#allocation2 + $0x230] sm:$0x1]  ;;  %v3288_v44 = vld [vmem:[#allocation2 + $0x98] sm:$0xff]  ;;  %v5722_v0 = vld [vmem:[#allocation2 + $0x270] sm:$0xfe] }
 0x1c9   : > { %3200 = vmatmul.mubr.f32.gmra.mrb[58].mxu1 %v2848_v3  ;;  %v5933_v3 = vsel %vm1929_vm2, %v5931_v47, %v5932_v12  ;;  %v5952_v47 = vrot.slane %v10948_v37, 1  ;;  %v5716_v12 = vld [vmem:[#allocation2 + $0x240] sm:$0xfe]  ;;  %v11108_v45 = vld [vmem:[#allocation2 + $0x70] sm:$0xff]  ;;  %v5723_v38 = vld [vmem:[#allocation2 + $0x278] sm:$0xfe] }
 0x1ca   : > { %6267 = vmatmul.mubr.f32.gmra.mrb[26].mxu0 %v5915_v54  ;;  %3204 = vmatprep.mubr.f32.mxu1 %v2856_v26  ;;  %v5708_v54 = vld [vmem:[#allocation2 + $0x200] sm:$0x1]  ;;  %v5948_v63 = vrot.slane %v5716_v12, 1  ;;  %v5961_v51 = vrot.slane %v5723_v38, 1  ;;  %v11149_v12 = vld [vmem:[#allocation2 + $0x108] sm:$0xff] }
 0x1cb   : > { %6271 = vmatprep.mubr.f32.mxu0 %v5923_v20  ;;  %8325 = vmatpush1.bf16.msra.mxu0 %v8324_v34  ;;  %v5934_v26 = vrot.slane %v5708_v54, 1  ;;  %v5710_v34 = vld [vmem:[#allocation2 + $0x210] sm:$0xfe]  ;;  %v5715_v20 = vld [vmem:[#allocation2 + $0x238] sm:$0x1]  ;;  %v5962_v54 = vrot.slane %v10978_v30, 1 }
 0x1cc   : > { %8326 = vmatprep.subr.bf16.mxu0 %v8959_v4  ;;  %v5938_v35 = vrot.slane %v5710_v34, 1  ;;  %v5946_v53 = vrot.slane %v5715_v20, 1  ;;  %v5729_v34 = vld [vmem:[#allocation2 + $0x2a8] sm:$0xfe]  ;;  %v3291_v20 = vld [vmem:[#allocation2 + $0xc0] sm:$0xff] }
 0x1cd   : > { %3205 = vmatmul.mubr.f32.gmra.mrb[60].mxu1 %v2853_v16  ;;  %v5935_v29 = vsel %vm1929_vm2, %v5929_v14, %v5934_v26  ;;  %v5943_v16 = vsel %vm1929_vm2, %v5941_v5, %v5942_v17  ;;  %v3287_v14 = vld [vmem:[#allocation2 + $0x90] sm:$0xff]  ;;  %v5963_v30 = vsel %vm1929_vm2, %v5961_v51, %v5962_v54 }
 0x1ce   : > { %6272 = vmatmul.mubr.f32.gmra.mrb[28].mxu0 %v5920_v58  ;;  %3209 = vmatprep.mubr.f32.mxu1 %v2860_v7  ;;  %v5717_v58 = vld [vmem:[#allocation2 + $0x248] sm:$0xfe]  ;;  %v5940_v7 = vsel %vm1929_vm2, %v5938_v35, %v5939_v62  ;;  %v5947_v60 = vsel %vm1929_vm2, %v5942_v17, %v5946_v53  ;;  %v5726_v17 = vld [vmem:[#allocation2 + $0x290] sm:$0x1]  ;;  %v5972_v35 = vrot.slane %v11008_v49, 1 }
 0x1cf   : > { %6276 = vmatprep.mubr.f32.mxu0 %v5927_v50  ;;  %8328 = vmatpush1.bf16.msra.mxu0 %v8327_v23  ;;  %v5944_v23 = vrot.slane %v5714_v42, 1  ;;  %v5951_v50 = vrot.slane %v5717_v58, 1  ;;  %v11140_v53 = vld [vmem:[#allocation2 + $0xd0] sm:$0xff]  ;;  %v3296_v58 = vld [vmem:[#allocation2 + $0xf8] sm:$0xff] }
 0x1d0   : > { %8329 = vmatprep.subr.bf16.mxu0 %v8959_v4 }
 0x1d1   : > { %3210 = vmatmul.mubr.f32.gmra.mrb[62].mxu1 %v2858_v25  ;;  %v5949_v25 = vrot.slane %v10961_v32, 1  ;;  %v5953_v37 = vsel %vm1929_vm2, %v5951_v50, %v5952_v47  ;;  %v3295_v50 = vld [vmem:[#allocation2 + $0xf0] sm:$0xff] }
 0x1d2   : > { %6277 = vmatmul.mubr.f32.gmra.mrb[30].mxu0 %v5925_v18  ;;  %3472 = vmatprep.mubr.f32.mxu1 %v3280_v61  ;;  %v5956_v18 = vrot.slane %v5721_v11, 1  ;;  %v5720_v61 = vld [vmem:[#allocation2 + $0x260] sm:$0x1] }
 0x1d3   : > { %6281 = vmatprep.mubr.f32.mxu0 %v5933_v3  ;;  %8331 = vmatpush1.bf16.msra.mxu0 %v8330_v55  ;;  %v5950_v55 = vsel %vm1929_vm2, %v5948_v63, %v5949_v25  ;;  %v11117_v3 = vld [vmem:[#allocation2 + $0xa8] sm:$0xff]  ;;  %v5954_v32 = vrot.slane %v5720_v61, 1  ;;  %v5739_v63 = vld [vmem:[#allocation2 + $0x2f8] sm:$0x1]  ;;  %v5979_v61 = vrot.slane %v11051_v36, 1 }
 0x1d4   : > { %v5986_v38 = vrot.slane %v5739_v63, 1  ;;  %v11167_v36 = vld [vmem:[#allocation2 + $0x138] sm:$0xff] }
 0x1d5   : > { %3473 = vmatmul.mubr.f32.vlgmr.msra.gmra.mrb[0].mxu1 %v3279_v57  ;;  %v5727_v57 = vld [vmem:[#allocation2 + $0x298] sm:$0x1]  ;;  %v5955_v26 = vsel %vm1929_vm2, %v5949_v25, %v5954_v32  ;;  %v11156_v25 = vld [vmem:[#allocation2 + $0x100] sm:$0xff] }
 0x1d6   : > { %6282 = vmatmul.mubr.f32.gmra.mrb[32].mxu0 %v5930_v6  ;;  %8348 = vmatpush1.bf16.msra.mxu1 %v9051_v9  ;;  %v3283_v9 = vld [vmem:[#allocation2 + $0x60] sm:$0xff]  ;;  %v5966_v5 = vrot.slane %v5727_v57, 1  ;;  %v11164_v32 = vld [vmem:[#allocation2 + $0x318] sm:$0xff] }
 0x1d7   : > { %3477 = vmatprep.mubr.f32.mxu1 %v3282_v10  ;;  %6286 = vmatprep.mubr.f32.mxu0 %v5937_v28  ;;  %v11124_v6 = vld [vmem:[#allocation2 + $0xa0] sm:$0xff]  ;;  %v3292_v10 = vld [vmem:[#allocation2 + $0xc8] sm:$0xff]  ;;  %v5959_v28 = vrot.slane %v10991_v39, 1  ;;  %v5964_v39 = vrot.slane %v5726_v17, 1  ;;  %v5992_v57 = vrot.slane %v11164_v32, 1  ;;  %v11199_v63 = vld [vmem:[#allocation2 + $0x198] sm:$0xff] }
 0x1d8   : > { %8333 = vmatprep.subr.bf16.mxu1 %v8959_v4 }
 0x1d9   : > { %3478 = vmatmul.mubr.f32.gmra.mrb[2].mxu1 %v3281_v59  ;;  %v5965_v42 = vsel %vm1929_vm2, %v5959_v28, %v5964_v39  ;;  %v5747_v39 = vld [vmem:[#allocation2 + $0x338] sm:$0xfe] }
 0x1da   : > { %6287 = vmatmul.mubr.f32.gmra.mrb[34].mxu0 %v5935_v29  ;;  %3482 = vmatprep.mubr.f32.mxu1 %v3284_v31  ;;  %v11133_v29 = vld [vmem:[#allocation2 + $0xd8] sm:$0xff]  ;;  %v5971_v31 = vrot.slane %v5729_v34, 1 }
 0x1db   : > { %6291 = vmatprep.mubr.f32.mxu0 %v5943_v16  ;;  %8349 = vmatpush1.bf16.msra.mxu1 %v9137_v15  ;;  %v5945_v15 = vsel %vm1929_vm2, %v5939_v62, %v5944_v23  ;;  %v5728_v62 = vld [vmem:[#allocation2 + $0x2a0] sm:$0xfe]  ;;  %v5733_v16 = vld [vmem:[#allocation2 + $0x2c8] sm:$0x1]  ;;  %v5732_v23 = vld [vmem:[#allocation2 + $0x2c0] sm:$0x1] }
 0x1dc   : > { %8334 = vmatprep.subr.bf16.mxu1 %v8959_v4  ;;  %v5973_v49 = vsel %vm1929_vm2, %v5971_v31, %v5972_v35  ;;  %v3303_v31 = vld [vmem:[#allocation2 + $0x150] sm:$0xff] }
 0x1dd   : > { %3483 = vmatmul.mubr.f32.gmra.mrb[4].mxu1 %v3283_v9  ;;  %v5969_v9 = vrot.slane %v11021_v40, 1  ;;  %v5974_v40 = vrot.slane %v5732_v23, 1 }
 0x1de   : > { %6292 = vmatmul.mubr.f32.gmra.mrb[36].mxu0 %v5940_v7  ;;  %3487 = vmatprep.mubr.f32.mxu1 %v11102_v13  ;;  %v5976_v7 = vrot.slane %v5733_v16, 1 }
 0x1df   : > { %6296 = vmatprep.mubr.f32.mxu0 %v5947_v60  ;;  %8350 = vmatpush1.bf16.msra.mxu1 %v9155_v21  ;;  %v5957_v21 = vsel %vm1929_vm2, %v5952_v47, %v5956_v18  ;;  %v5735_v60 = vld [vmem:[#allocation2 + $0x2d8] sm:$0xfe]  ;;  %v3300_v18 = vld [vmem:[#allocation2 + $0x128] sm:$0xff] }
 0x1e0   : > { %8335 = vmatprep.subr.bf16.mxu1 %v8959_v4  ;;  %v5981_v11 = vrot.slane %v5735_v60, 1  ;;  %v3308_v60 = vld [vmem:[#allocation2 + $0x188] sm:$0xff] }
 0x1e1   : > { %3488 = vmatmul.mubr.f32.gmra.mrb[6].mxu1 %v11108_v45 }
 0x1e2   : > { %6297 = vmatmul.mubr.f32.gmra.mrb[38].mxu0 %v5945_v15  ;;  %3492 = vmatprep.mubr.f32.mxu1 %v3288_v44  ;;  %v5982_v15 = vrot.slane %v11038_v8, 1  ;;  %v5734_v44 = vld [vmem:[#allocation2 + $0x2d0] sm:$0xfe] }
 0x1e3   : > { %6301 = vmatprep.mubr.f32.mxu0 %v5953_v37  ;;  %8351 = vmatpush1.bf16.msra.mxu1 %v9175_v27  ;;  %v5958_v27 = vrot.slane %v5722_v0, 1  ;;  %v5975_v37 = vsel %vm1929_vm2, %v5969_v9, %v5974_v40 }
 0x1e4   : > { %8336 = vmatprep.subr.bf16.mxu1 %v8959_v4  ;;  %v5983_v8 = vsel %vm1929_vm2, %v5981_v11, %v5982_v15  ;;  %v6427_v11 = vld [vmem:[#allocation2 + $0x68] sm:$0xfc] }
 0x1e5   : > { %3493 = vmatmul.mubr.f32.gmra.mrb[8].mxu1 %v3287_v14  ;;  %v5960_v59 = vsel %vm1929_vm2, %v5958_v27, %v5959_v28  ;;  %v5738_v14 = vld [vmem:[#allocation2 + $0x2f0] sm:$0x1]  ;;  %v5745_v27 = vld [vmem:[#allocation2 + $0x328] sm:$0x1] }
 0x1e6   : > { %6302 = vmatmul.mubr.f32.gmra.mrb[40].mxu0 %v5950_v55  ;;  %3497 = vmatprep.mubr.f32.mxu1 %v11117_v3  ;;  %v5741_v55 = vld [vmem:[#allocation2 + $0x308] sm:$0xfe]  ;;  %v11176_v28 = vld [vmem:[#allocation2 + $0x130] sm:$0xff] }
 0x1e7   : > { %6306 = vmatprep.mubr.f32.mxu0 %v5957_v21  ;;  %8352 = vmatpush1.bf16.msra.mxu1 %v9195_v33  ;;  %v5967_v33 = vsel %vm1929_vm2, %v5962_v54, %v5966_v5  ;;  %v3299_v21 = vld [vmem:[#allocation2 + $0x120] sm:$0xff]  ;;  %v5987_v54 = vsel %vm1929_vm2, %v5982_v15, %v5986_v38  ;;  %v5991_v0 = vrot.slane %v5741_v55, 1  ;;  %v11206_v38 = vld [vmem:[#allocation2 + $0x190] sm:$0xff]  ;;  %v3312_v55 = vld [vmem:[#allocation2 + $0x1b8] sm:$0xff] }
 0x1e8   : > { %8337 = vmatprep.subr.bf16.mxu1 %v8959_v4  ;;  %v3307_v15 = vld [vmem:[#allocation2 + $0x180] sm:$0xff] }
 0x1e9   : > { %3498 = vmatmul.mubr.f32.gmra.mrb[10].mxu1 %v11124_v6  ;;  %v5993_v34 = vsel %vm1929_vm2, %v5991_v0, %v5992_v57  ;;  %v3311_v0 = vld [vmem:[#allocation2 + $0x1b0] sm:$0xff] }
 0x1ea   : > { %6307 = vmatmul.mubr.f32.gmra.mrb[42].mxu0 %v5955_v26  ;;  %3502 = vmatprep.mubr.f32.mxu1 %v3292_v10  ;;  %v5740_v26 = vld [vmem:[#allocation2 + $0x300] sm:$0xfe]  ;;  %v11172_v10 = vld [vmem:[#allocation2 + $0x310] sm:$0xff] }
 0x1eb   : > { %6311 = vmatprep.mubr.f32.mxu0 %v5963_v30  ;;  %8353 = vmatpush1.bf16.msra.mxu1 %v9232_v41  ;;  %v5968_v41 = vrot.slane %v5728_v62, 1  ;;  %v3304_v30 = vld [vmem:[#allocation2 + $0x158] sm:$0xff]  ;;  %v5988_v5 = vrot.slane %v5740_v26, 1  ;;  %v5989_v17 = vrot.slane %v11172_v10, 1  ;;  %v11185_v62 = vld [vmem:[#allocation2 + $0x168] sm:$0xff] }
 0x1ec   : > { %8338 = vmatprep.subr.bf16.mxu1 %v8959_v4  ;;  %v11215_v26 = vld [vmem:[#allocation2 + $0x1c8] sm:$0xff] }
 0x1ed   : > { %3503 = vmatmul.mubr.f32.gmra.mrb[12].mxu1 %v3291_v20  ;;  %v5970_v47 = vsel %vm1929_vm2, %v5968_v41, %v5969_v9  ;;  %v5996_v20 = vrot.slane %v5745_v27, 1  ;;  %v5746_v41 = vld [vmem:[#allocation2 + $0x330] sm:$0xfe]  ;;  %v5748_v9 = vld [vmem:[#allocation2 + $0x340] sm:$0xff] }
 0x1ee   : > { %6312 = vmatmul.mubr.f32.gmra.mrb[44].mxu0 %v5960_v59  ;;  %3507 = vmatprep.mubr.f32.mxu1 %v11133_v29  ;;  %v5744_v59 = vld [vmem:[#allocation2 + $0x320] sm:$0x1] }
 0x1ef   : > { %6316 = vmatprep.mubr.f32.mxu0 %v5967_v33  ;;  %8354 = vmatpush1.bf16.msra.mxu1 %v9249_v52  ;;  %v5977_v52 = vsel %vm1929_vm2, %v5972_v35, %v5976_v7  ;;  %v5749_v33 = vld [vmem:[#allocation2 + $0x348] sm:$0xff]  ;;  %v5990_v35 = vsel %vm1929_vm2, %v5988_v5, %v5989_v17  ;;  %v5994_v16 = vrot.slane %v5744_v59, 1  ;;  %v11191_v7 = vld [vmem:[#allocation2 + $0x160] sm:$0xff] }
 0x1f0   : > { %8339 = vmatprep.subr.bf16.mxu1 %v8959_v4  ;;  %v11221_v5 = vld [vmem:[#allocation2 + $0x1c0] sm:$0xff] }
 0x1f1   : > { %3508 = vmatmul.mubr.f32.gmra.mrb[14].mxu1 %v11140_v53  ;;  %v5995_v23 = vsel %vm1929_vm2, %v5989_v17, %v5994_v16  ;;  %v11228_v16 = vld [vmem:[#allocation2 + $0x1f8] sm:$0xff] }
 0x1f2   : > { %6317 = vmatmul.mubr.f32.gmra.mrb[46].mxu0 %v5965_v42  ;;  %3512 = vmatprep.mubr.f32.mxu1 %v3296_v58  ;;  %v6001_v42 = vrot.slane %v5747_v39, 1  ;;  %v6002_v58 = vrot.slane %v5749_v33, 1  ;;  %v6436_v33 = vld [vmem:[#allocation2 + $0xb0] sm:$0x3] }
 0x1f3   : > { %6321 = vmatprep.mubr.f32.mxu0 %v5973_v49  ;;  %8355 = vmatpush1.bf16.msra.mxu1 %v9293_v22  ;;  %v5978_v22 = vrot.slane %v5734_v44, 1  ;;  %v5751_v49 = vld [vmem:[#allocation2 + $0x358] sm:$0x1] }
 0x1f4   : > { %8340 = vmatprep.subr.bf16.mxu1 %v8959_v4  ;;  %v6006_v40 = vrot.slane %v5751_v49, 1  ;;  %v11233_v49 = vld [vmem:[#allocation2 + $0x1f0] sm:$0xff] }
 0x1f5   : > { %3513 = vmatmul.mubr.f32.gmra.mrb[16].mxu1 %v3295_v50  ;;  %v5980_v51 = vsel %vm1929_vm2, %v5978_v22, %v5979_v61  ;;  %v5999_v50 = vrot.slane %v5748_v9, 1  ;;  %v6622_v22 = vrot.slane %v11102_v13, 2  ;;  %v6443_v9 = vld [vmem:[#allocation2 + $0xe8] sm:$0x3] }
 0x1f6   : > { %6322 = vmatmul.mubr.f32.gmra.mrb[48].mxu0 %v5970_v47  ;;  %3517 = vmatprep.mubr.f32.mxu1 %v11149_v12  ;;  %v6003_v47 = vsel %vm1929_vm2, %v6001_v42, %v6002_v58 }
 0x1f7   : > { %6326 = vmatprep.mubr.f32.mxu0 %v5977_v52  ;;  %8356 = vmatpush1.bf16.msra.mxu1 %v9323_v43  ;;  %v5984_v43 = vrot.slane %v5738_v14, 1  ;;  %v5750_v52 = vld [vmem:[#allocation2 + $0x350] sm:$0x1] }
 0x1f8   : > { %8341 = vmatprep.subr.bf16.mxu1 %v8959_v4 }
 0x1f9   : > { %3518 = vmatmul.mubr.f32.gmra.mrb[18].mxu1 %v11156_v25 }
 0x1fa   : > { %6327 = vmatmul.mubr.f32.gmra.mrb[50].mxu0 %v5975_v37  ;;  %3522 = vmatprep.mubr.f32.mxu1 %v3300_v18  ;;  %v6004_v37 = vrot.slane %v5750_v52, 1  ;;  %v6621_v18 = vrot.slane %v6427_v11, 2  ;;  %v6442_v52 = vld [vmem:[#allocation2 + $0xe0] sm:$0x3]  ;;  %v3319_v11 = vld [vmem:[#allocation2 + $0x210] sm:$0xff] }
 0x1fb   : > { %6331 = vmatprep.mubr.f32.mxu0 %v5983_v8  ;;  %8357 = vmatpush1.bf16.msra.mxu1 %v9351_v56  ;;  %v5985_v56 = vsel %vm1929_vm2, %v5979_v61, %v5984_v43  ;;  %v6426_v61 = vld [vmem:[#allocation2 + $0x60] sm:$0xfc]  ;;  %v6431_v8 = vld [vmem:[#allocation2 + $0x88] sm:$0x3]  ;;  %v6430_v43 = vld [vmem:[#allocation2 + $0x80] sm:$0x3] }
 0x1fc   : > { %8342 = vmatprep.subr.bf16.mxu1 %v8959_v4  ;;  %v6005_v14 = vsel %vm1929_vm2, %v5999_v50, %v6004_v37  ;;  %v6623_v13 = vsel %vm2700_vm3, %v6621_v18, %v6622_v22  ;;  %v6644_v37 = vrot.slane %v6442_v52, 2  ;;  %v6460_v52 = vld [vmem:[#allocation2 + $0x170] sm:$0x3] }
 0x1fd   : > { %3523 = vmatmul.mubr.f32.gmra.mrb[20].mxu1 %v3299_v21  ;;  %v6619_v21 = vrot.slane %v11108_v45, 2  ;;  %v6624_v45 = vrot.slane %v6430_v43, 2  ;;  %v6448_v43 = vld [vmem:[#allocation2 + $0x110] sm:$0x3] }
 0x1fe   : > { %6332 = vmatmul.mubr.f32.gmra.mrb[52].mxu0 %v5980_v51  ;;  %3527 = vmatprep.mubr.f32.mxu1 %v11167_v36  ;;  %v6626_v51 = vrot.slane %v6431_v8, 2  ;;  %v11245_v8 = vld [vmem:[#allocation2 + $0x220] sm:$0xff] }
 0x1ff   : > { %6336 = vmatprep.mubr.f32.mxu0 %v5987_v54  ;;  %8358 = vmatpush1.bf16.msra.mxu1 %v9370_v1  ;;  %v5997_v1 = vsel %vm1929_vm2, %v5992_v57, %v5996_v20  ;;  %v6433_v54 = vld [vmem:[#allocation2 + $0x98] sm:$0xfc]  ;;  %v6625_v17 = vsel %vm2700_vm3, %v6619_v21, %v6624_v45  ;;  %v6654_v45 = vrot.slane %v6448_v43, 2  ;;  %v6466_v43 = vld [vmem:[#allocation2 + $0x1a0] sm:$0x3] }
 0x200   : > { %8343 = vmatprep.subr.bf16.mxu1 %v8959_v4  ;;  %v6631_v27 = vrot.slane %v6433_v54, 2  ;;  %v3323_v54 = vld [vmem:[#allocation2 + $0x240] sm:$0xff] }
 0x201   : > { %3528 = vmatmul.mubr.f32.gmra.mrb[22].mxu1 %v11176_v28 }
 0x202   : > { %6337 = vmatmul.mubr.f32.gmra.mrb[54].mxu0 %v5985_v56  ;;  %3532 = vmatprep.mubr.f32.mxu1 %v3304_v30  ;;  %v6632_v56 = vrot.slane %v11117_v3, 2  ;;  %v6437_v30 = vld [vmem:[#allocation2 + $0xb8] sm:$0x3]  ;;  %v6439_v3 = vld [vmem:[#allocation2 + $0xc8] sm:$0xfc] }
 0x203   : > { %6341 = vmatprep.mubr.f32.mxu0 %v5993_v34  ;;  %8359 = vmatpush1.bf16.msra.mxu1 %v9399_v24  ;;  %v5998_v24 = vrot.slane %v5746_v41, 1  ;;  %v3316_v34 = vld [vmem:[#allocation2 + $0x1e8] sm:$0xff]  ;;  %v6636_v39 = vrot.slane %v6437_v30, 2  ;;  %v6438_v41 = vld [vmem:[#allocation2 + $0xc0] sm:$0xfc]  ;;  %v11257_v30 = vld [vmem:[#allocation2 + $0x250] sm:$0xff] }
 0x204   : > { %8344 = vmatprep.subr.bf16.mxu1 %v8959_v4  ;;  %v6633_v59 = vsel %vm2700_vm3, %v6631_v27, %v6632_v56 }
 0x205   : > { %3533 = vmatmul.mubr.f32.gmra.mrb[24].mxu1 %v3303_v31  ;;  %v6000_v44 = vsel %vm1929_vm2, %v5998_v24, %v5999_v50  ;;  %v3315_v31 = vld [vmem:[#allocation2 + $0x1e0] sm:$0xff]  ;;  %v6637_v42 = vsel %vm2700_vm3, %v6632_v56, %v6636_v39  ;;  %v6638_v24 = vrot.slane %v6438_v41, 2  ;;  %v6639_v50 = vrot.slane %v11140_v53, 2  ;;  %v6461_v41 = vld [vmem:[#allocation2 + $0x178] sm:$0x3] }
 0x206   : > { %6342 = vmatmul.mubr.f32.gmra.mrb[56].mxu0 %v5990_v35  ;;  %3537 = vmatprep.mubr.f32.mxu1 %v11185_v62  ;;  %v6652_v53 = vrot.slane %v11149_v12, 2  ;;  %v6451_v12 = vld [vmem:[#allocation2 + $0x128] sm:$0xfc]  ;;  %v6450_v56 = vld [vmem:[#allocation2 + $0x120] sm:$0xfc] }
 0x207   : > { %6346 = vmatprep.mubr.f32.mxu0 %v5997_v1  ;;  %8360 = vmatpush1.bf16.msra.mxu1 %v9422_v46  ;;  %v6007_v46 = vsel %vm1929_vm2, %v6002_v58, %v6006_v40  ;;  %v6634_v1 = vrot.slane %v6436_v33, 2  ;;  %v6641_v58 = vrot.slane %v6439_v3, 2  ;;  %v6646_v40 = vrot.slane %v6443_v9, 2  ;;  %v6454_v33 = vld [vmem:[#allocation2 + $0x140] sm:$0x3]  ;;  %v3327_v3 = vld [vmem:[#allocation2 + $0x270] sm:$0xff] }
 0x208   : > { %8345 = vmatprep.subr.bf16.mxu1 %v8959_v4  ;;  %v6661_v27 = vrot.slane %v6451_v12, 2  ;;  %v11269_v9 = vld [vmem:[#allocation2 + $0x280] sm:$0xff]  ;;  %v3335_v12 = vld [vmem:[#allocation2 + $0x2d0] sm:$0xff] }
 0x209   : > { %3538 = vmatmul.mubr.f32.gmra.mrb[26].mxu1 %v11191_v7 }
 0x20a   : > { %6347 = vmatmul.mubr.f32.gmra.mrb[58].mxu0 %v5995_v23  ;;  %3542 = vmatprep.mubr.f32.mxu1 %v3308_v60  ;;  %v3320_v60 = vld [vmem:[#allocation2 + $0x218] sm:$0xff] }
 0x20b   : > { %6351 = vmatprep.mubr.f32.mxu0 %v6003_v47  ;;  %8361 = vmatpush1.bf16.msra.mxu1 %v9450_v2  ;;  %v6618_v2 = vrot.slane %v6426_v61, 2  ;;  %v6449_v61 = vld [vmem:[#allocation2 + $0x118] sm:$0x3] }
 0x20c   : > { %8346 = vmatprep.subr.bf16.mxu1 %v8959_v4 }
 0x20d   : > { %3543 = vmatmul.mubr.f32.gmra.mrb[28].mxu1 %v3307_v15  ;;  %v6620_v57 = vsel %vm2700_vm3, %v6618_v2, %v6619_v21  ;;  %v6640_v15 = vsel %vm2700_vm3, %v6638_v24, %v6639_v50  ;;  %v6649_v21 = vrot.slane %v11156_v25, 2  ;;  %v6662_v25 = vrot.slane %v11167_v36, 2  ;;  %v6457_v36 = vld [vmem:[#allocation2 + $0x158] sm:$0xfc] }
 0x20e   : > { %6352 = vmatmul.mubr.f32.gmra.mrb[60].mxu0 %v6000_v44  ;;  %3547 = vmatprep.mubr.f32.mxu1 %v11199_v63  ;;  %v11240_v44 = vld [vmem:[#allocation2 + $0x228] sm:$0xff] }
 0x20f   : > { %6356 = vmatprep.mubr.f32.mxu0 %v6007_v46  ;;  %8362 = vmatpush1.bf16.msra.mxu1 %v9477_v19  ;;  %v6627_v19 = vsel %vm2700_vm3, %v6622_v22, %v6626_v51  ;;  %v6444_v22 = vld [vmem:[#allocation2 + $0xf0] sm:$0xfc]  ;;  %v6656_v51 = vrot.slane %v6449_v61, 2 }
 0x210   : > { %8347 = vmatprep.subr.bf16.mxu1 %v8959_v4  ;;  %v6432_v4 = vld [vmem:[#allocation2 + $0x90] sm:$0xfc]  ;;  %v6648_v2 = vrot.slane %v6444_v22, 2  ;;  %v6467_v22 = vld [vmem:[#allocation2 + $0x1a8] sm:$0x3] }
 0x211   : > { %3548 = vmatmul.mubr.f32.gmra.mrb[30].mxu1 %v11206_v38  ;;  %v6628_v20 = vrot.slane %v6432_v4, 2  ;;  %v6455_v4 = vld [vmem:[#allocation2 + $0x148] sm:$0x3]  ;;  %v11281_v61 = vld [vmem:[#allocation2 + $0x2b0] sm:$0xff] }
 0x212   : > { %6357 = vmatmul.mubr.f32.gmra.mrb[62].mxu0 %v6005_v14  ;;  %3552 = vmatprep.mubr.f32.mxu1 %v3312_v55  ;;  %v6645_v14 = vsel %vm2700_vm3, %v6639_v50, %v6644_v37  ;;  %v3324_v55 = vld [vmem:[#allocation2 + $0x248] sm:$0xff]  ;;  %v6666_v39 = vrot.slane %v6455_v4, 2  ;;  %v6669_v50 = vrot.slane %v11191_v7, 2  ;;  %v6674_v37 = vrot.slane %v6460_v52, 2  ;;  %v11293_v4 = vld [vmem:[#allocation2 + $0x2e0] sm:$0xff] }
 0x213   : > { %6971 = vmatprep.mubr.f32.mxu0 %v6623_v13  ;;  %8363 = vmatpush1.bf16.msra.mxu1 %v9500_v48  ;;  %v6629_v48 = vrot.slane %v11124_v6, 2  ;;  %v6642_v6 = vrot.slane %v11133_v29, 2  ;;  %v6445_v29 = vld [vmem:[#allocation2 + $0xf8] sm:$0xfc]  ;;  %v6682_v7 = vrot.slane %v11199_v63, 2 }
 0x214   : > { %v6651_v18 = vrot.slane %v6445_v29, 2  ;;  %v3331_v29 = vld [vmem:[#allocation2 + $0x2a0] sm:$0xff]  ;;  %v6469_v63 = vld [vmem:[#allocation2 + $0x1b8] sm:$0xfc] }
 0x215   : > { %3553 = vmatmul.mubr.f32.gmra.mrb[32].mxu1 %v3311_v0  ;;  %v6630_v35 = vsel %vm2700_vm3, %v6628_v20, %v6629_v48  ;;  %v6635_v23 = vsel %vm2700_vm3, %v6629_v48, %v6634_v1  ;;  %v6643_v47 = vsel %vm2700_vm3, %v6641_v58, %v6642_v6  ;;  %v6647_v46 = vsel %vm2700_vm3, %v6642_v6, %v6646_v40  ;;  %v6456_v6 = vld [vmem:[#allocation2 + $0x150] sm:$0xfc] }
 0x216   : > { %6972 = vmatmul.mubr.f32.vlgmr.msra.gmra.mrb[0].mxu0 %v6620_v57  ;;  %3557 = vmatprep.mubr.f32.mxu1 %v11215_v26  ;;  %v6653_v13 = vsel %vm2700_vm3, %v6651_v18, %v6652_v53  ;;  %v6650_v0 = vsel %vm2700_vm3, %v6648_v2, %v6649_v21  ;;  %v11252_v57 = vld [vmem:[#allocation2 + $0x258] sm:$0xff]  ;;  %v6658_v20 = vrot.slane %v6450_v56, 2  ;;  %v6659_v48 = vrot.slane %v11176_v28, 2 }
 0x217   : > { %6976 = vmatprep.mubr.f32.mxu0 %v6627_v19  ;;  %v6657_v19 = vsel %vm2700_vm3, %v6652_v53, %v6656_v51  ;;  %v6664_v1 = vrot.slane %v6454_v33, 2  ;;  %v6671_v58 = vrot.slane %v6457_v36, 2  ;;  %v6672_v28 = vrot.slane %v11185_v62, 2  ;;  %v6463_v62 = vld [vmem:[#allocation2 + $0x188] sm:$0xfc] }
 0x218   : > { %v6668_v24 = vrot.slane %v6456_v6, 2  ;;  %v6676_v40 = vrot.slane %v6461_v41, 2  ;;  %v6681_v18 = vrot.slane %v6463_v62, 2  ;;  %v6462_v53 = vld [vmem:[#allocation2 + $0x180] sm:$0xfc]  ;;  %v6686_v51 = vrot.slane %v6467_v22, 2 }
 0x219   : > { %3558 = vmatmul.mubr.f32.gmra.mrb[34].mxu1 %v11221_v5  ;;  %v6678_v2 = vrot.slane %v6462_v53, 2  ;;  %v6473_v56 = vld [vmem:[#allocation2 + $0x1d8] sm:$0x3]  ;;  %v3745_v6 = vld [vmem:[#allocation2 + $0x1b0] sm:$0xfe]  ;;  %v3970_v62 = vrot.slane %v11221_v5, 1 }
 0x21a   : > { %6977 = vmatmul.mubr.f32.gmra.mrb[2].mxu0 %v6625_v17  ;;  %3562 = vmatprep.mubr.f32.mxu1 %v3316_v34  ;;  %v6655_v17 = vsel %vm2700_vm3, %v6649_v21, %v6654_v45  ;;  %v3328_v34 = vld [vmem:[#allocation2 + $0x278] sm:$0xff]  ;;  %v6679_v21 = vrot.slane %v11206_v38, 2  ;;  %v6684_v45 = vrot.slane %v6466_v43, 2  ;;  %v6692_v38 = vrot.slane %v11215_v26, 2  ;;  %v3752_v22 = vld [vmem:[#allocation2 + $0x1e8] sm:$0xfe] }
 0x21b   : > { %6981 = vmatprep.mubr.f32.mxu0 %v6633_v59  ;;  %v6663_v59 = vsel %vm2700_vm3, %v6661_v27, %v6662_v25  ;;  %v6691_v27 = vrot.slane %v6469_v63, 2  ;;  %v6696_v33 = vrot.slane %v6473_v56, 2  ;;  %v3746_v36 = vld [vmem:[#allocation2 + $0x1b8] sm:$0xfe]  ;;  %v3969_v52 = vrot.slane %v3745_v6, 1 }
 0x21c   : > { %v3751_v43 = vld [vmem:[#allocation2 + $0x1e0] sm:$0xfe]  ;;  %v6480_v63 = vld [vmem:[#allocation2 + $0x210] sm:$0xfc]  ;;  %v3993_v6 = vrot.slane %v11240_v44, 1 }
 0x21d   : > { %3563 = vmatmul.mubr.f32.gmra.mrb[36].mxu1 %v3315_v31  ;;  %v6660_v31 = vsel %vm2700_vm3, %v6658_v20, %v6659_v48  ;;  %v6697_v41 = vsel %vm2700_vm3, %v6692_v38, %v6696_v33  ;;  %v6708_v56 = vrot.slane %v6480_v63, 2  ;;  %v6484_v33 = vld [vmem:[#allocation2 + $0x230] sm:$0x3] }
 0x21e   : > { %6982 = vmatmul.mubr.f32.gmra.mrb[4].mxu0 %v6630_v35  ;;  %3567 = vmatprep.mubr.f32.mxu1 %v11228_v16  ;;  %v11264_v35 = vld [vmem:[#allocation2 + $0x288] sm:$0xff] }
 0x21f   : > { %6986 = vmatprep.mubr.f32.mxu0 %v6637_v42  ;;  %v6667_v42 = vsel %vm2700_vm3, %v6662_v25, %v6666_v39  ;;  %v6468_v25 = vld [vmem:[#allocation2 + $0x1b0] sm:$0xfc]  ;;  %v6693_v39 = vsel %vm2700_vm3, %v6691_v27, %v6692_v38  ;;  %v6485_v27 = vld [vmem:[#allocation2 + $0x238] sm:$0x3]  ;;  %v3979_v38 = vrot.slane %v3751_v43, 1 }
 0x220   : > { %v6688_v20 = vrot.slane %v6468_v25, 2  ;;  %v3980_v25 = vrot.slane %v11233_v49, 1  ;;  %v3763_v43 = vld [vmem:[#allocation2 + $0x240] sm:$0xfe] }
 0x221   : > { %3568 = vmatmul.mubr.f32.gmra.mrb[38].mxu1 %v11233_v49 }
 0x222   : > { %6987 = vmatmul.mubr.f32.gmra.mrb[6].mxu0 %v6635_v23  ;;  %3572 = vmatprep.mubr.f32.mxu1 %v3320_v60  ;;  %v6665_v23 = vsel %vm2700_vm3, %v6659_v48, %v6664_v1  ;;  %v3332_v60 = vld [vmem:[#allocation2 + $0x2a8] sm:$0xff]  ;;  %v6689_v48 = vrot.slane %v11221_v5, 2  ;;  %v3971_v5 = vsel %vm1929_vm2, %v3969_v52, %v3970_v62 }
 0x223   : > { %6991 = vmatprep.mubr.f32.mxu0 %v6643_v47  ;;  %v6673_v47 = vsel %vm2700_vm3, %v6671_v58, %v6672_v28  ;;  %v3972_v58 = vrot.slane %v3746_v36, 1  ;;  %v3758_v36 = vld [vmem:[#allocation2 + $0x218] sm:$0xfe] }
 0x225   : > { %3573 = vmatmul.mubr.f32.gmra.mrb[40].mxu1 %v3319_v11  ;;  %v6670_v11 = vsel %vm2700_vm3, %v6668_v24, %v6669_v50  ;;  %v6474_v24 = vld [vmem:[#allocation2 + $0x1e0] sm:$0xfc] }
 0x226   : > { %6992 = vmatmul.mubr.f32.gmra.mrb[8].mxu0 %v6640_v15  ;;  %3577 = vmatprep.mubr.f32.mxu1 %v11240_v44  ;;  %v11276_v15 = vld [vmem:[#allocation2 + $0x2b8] sm:$0xff] }
 0x227   : > { %6996 = vmatprep.mubr.f32.mxu0 %v6647_v46  ;;  %v6677_v46 = vsel %vm2700_vm3, %v6672_v28, %v6676_v40  ;;  %v3973_v28 = vrot.slane %v11215_v26, 1 }
 0x229   : > { %3578 = vmatmul.mubr.f32.gmra.mrb[42].mxu1 %v11245_v8  ;;  %v3974_v26 = vsel %vm1929_vm2, %v3972_v58, %v3973_v28  ;;  %v6714_v58 = vrot.slane %v6484_v33, 2  ;;  %v3770_v33 = vld [vmem:[#allocation2 + $0x278] sm:$0xfe] }
 0x22a   : > { %6997 = vmatmul.mubr.f32.gmra.mrb[10].mxu0 %v6645_v14  ;;  %3582 = vmatprep.mubr.f32.mxu1 %v3324_v55  ;;  %v6675_v14 = vsel %vm2700_vm3, %v6669_v50, %v6674_v37  ;;  %v3336_v55 = vld [vmem:[#allocation2 + $0x2d8] sm:$0xff]  ;;  %v6699_v37 = vrot.slane %v11233_v49, 2  ;;  %v3981_v49 = vsel %vm1929_vm2, %v3979_v38, %v3980_v25 }
 0x22b   : > { %7001 = vmatprep.mubr.f32.mxu0 %v6653_v13  ;;  %v6683_v13 = vsel %vm2700_vm3, %v6681_v18, %v6682_v7  ;;  %v3750_v50 = vld [vmem:[#allocation2 + $0x1d8] sm:$0x1]  ;;  %v6478_v18 = vld [vmem:[#allocation2 + $0x200] sm:$0x3] }
 0x22d   : > { %3583 = vmatmul.mubr.f32.gmra.mrb[44].mxu1 %v3323_v54  ;;  %v6680_v54 = vsel %vm2700_vm3, %v6678_v2, %v6679_v21 }
 0x22e   : > { %7002 = vmatmul.mubr.f32.gmra.mrb[12].mxu0 %v6650_v0  ;;  %3587 = vmatprep.mubr.f32.mxu1 %v11252_v57  ;;  %v11288_v0 = vld [vmem:[#allocation2 + $0x2e8] sm:$0xff] }
 0x22f   : > { %7006 = vmatprep.mubr.f32.mxu0 %v6657_v19  ;;  %v6687_v19 = vsel %vm2700_vm3, %v6682_v7, %v6686_v51  ;;  %v3983_v51 = vrot.slane %v11228_v16, 1 }
 0x231   : > { %3588 = vmatmul.mubr.f32.gmra.mrb[46].mxu1 %v11257_v30 }
 0x232   : > { %7007 = vmatmul.mubr.f32.gmra.mrb[14].mxu0 %v6655_v17  ;;  %3592 = vmatprep.mubr.f32.mxu1 %v3328_v34  ;;  %v6685_v17 = vsel %vm2700_vm3, %v6679_v21, %v6684_v45  ;;  %v3340_v34 = vld [vmem:[#allocation2 + $0x308] sm:$0xff] }
 0x233   : > { %7011 = vmatprep.mubr.f32.mxu0 %v6663_v59  ;;  %v6472_v59 = vld [vmem:[#allocation2 + $0x1d0] sm:$0x3]  ;;  %v3756_v45 = vld [vmem:[#allocation2 + $0x208] sm:$0x1] }
 0x234   : > { %v6694_v1 = vrot.slane %v6472_v59, 2 }
 0x235   : > { %3593 = vmatmul.mubr.f32.gmra.mrb[48].mxu1 %v3327_v3  ;;  %v6475_v3 = vld [vmem:[#allocation2 + $0x1e8] sm:$0xfc] }
 0x236   : > { %7012 = vmatmul.mubr.f32.gmra.mrb[16].mxu0 %v6660_v31  ;;  %3597 = vmatprep.mubr.f32.mxu1 %v11264_v35  ;;  %v3339_v31 = vld [vmem:[#allocation2 + $0x300] sm:$0xff]  ;;  %v6695_v40 = vsel %vm2700_vm3, %v6689_v48, %v6694_v1 }
 0x237   : > { %7016 = vmatprep.mubr.f32.mxu0 %v6667_v42  ;;  %v6690_v42 = vsel %vm2700_vm3, %v6688_v20, %v6689_v48  ;;  %v3987_v20 = vrot.slane %v3756_v45, 1  ;;  %v3755_v48 = vld [vmem:[#allocation2 + $0x200] sm:$0x1]  ;;  %v3768_v45 = vld [vmem:[#allocation2 + $0x268] sm:$0x1] }
 0x238   : > { %v3985_v1 = vrot.slane %v3755_v48, 1  ;;  %v6496_v48 = vld [vmem:[#allocation2 + $0x290] sm:$0x3] }
 0x239   : > { %3598 = vmatmul.mubr.f32.gmra.mrb[50].mxu1 %v11269_v9 }
 0x23a   : > { %7017 = vmatmul.mubr.f32.gmra.mrb[18].mxu0 %v6665_v23  ;;  %3602 = vmatprep.mubr.f32.mxu1 %v3332_v60  ;;  %v6701_v23 = vrot.slane %v6475_v3, 2  ;;  %v6702_v60 = vrot.slane %v11228_v16, 2  ;;  %v6709_v16 = vrot.slane %v11245_v8, 2  ;;  %v6487_v3 = vld [vmem:[#allocation2 + $0x248] sm:$0xfc]  ;;  %v3986_v52 = vsel %vm1929_vm2, %v3980_v25, %v3985_v1 }
 0x23b   : > { %7021 = vmatprep.mubr.f32.mxu0 %v6673_v47  ;;  %v6479_v47 = vld [vmem:[#allocation2 + $0x208] sm:$0x3]  ;;  %v3999_v25 = vrot.slane %v3763_v43, 1  ;;  %v6504_v43 = vld [vmem:[#allocation2 + $0x2d0] sm:$0xfc] }
 0x23c   : > { %v6703_v7 = vsel %vm2700_vm3, %v6701_v23, %v6702_v60  ;;  %v6706_v53 = vrot.slane %v6479_v47, 2  ;;  %v3762_v47 = vld [vmem:[#allocation2 + $0x238] sm:$0x1] }
 0x23d   : > { %3603 = vmatmul.mubr.f32.gmra.mrb[52].mxu1 %v3331_v29  ;;  %v3749_v29 = vld [vmem:[#allocation2 + $0x1d0] sm:$0x1] }
 0x23e   : > { %7022 = vmatmul.mubr.f32.gmra.mrb[20].mxu0 %v6670_v11  ;;  %3607 = vmatprep.mubr.f32.mxu1 %v11276_v15  ;;  %v6698_v11 = vrot.slane %v6474_v24, 2  ;;  %v6722_v24 = vrot.slane %v11252_v57, 2 }
 0x23f   : > { %7026 = vmatprep.mubr.f32.mxu0 %v6677_v46  ;;  %v3977_v46 = vrot.slane %v3750_v50, 1  ;;  %v6486_v50 = vld [vmem:[#allocation2 + $0x240] sm:$0xfc] }
 0x240   : > { %v6700_v2 = vsel %vm2700_vm3, %v6698_v11, %v6699_v37 }
 0x241   : > { %3608 = vmatmul.mubr.f32.gmra.mrb[54].mxu1 %v11281_v61  ;;  %v3978_v21 = vsel %vm1929_vm2, %v3973_v28, %v3977_v46  ;;  %v3992_v28 = vrot.slane %v3758_v36, 1  ;;  %v3997_v46 = vrot.slane %v3762_v47, 1  ;;  %v6503_v47 = vld [vmem:[#allocation2 + $0x2c8] sm:$0x3] }
 0x242   : > { %7027 = vmatmul.mubr.f32.gmra.mrb[22].mxu0 %v6675_v14  ;;  %3612 = vmatprep.mubr.f32.mxu1 %v3336_v55  ;;  %v6481_v14 = vld [vmem:[#allocation2 + $0x218] sm:$0xfc]  ;;  %v6704_v55 = vrot.slane %v6478_v18, 2  ;;  %v3761_v18 = vld [vmem:[#allocation2 + $0x230] sm:$0x1] }
 0x243   : > { %7031 = vmatprep.mubr.f32.mxu0 %v6683_v13  ;;  %v3982_v13 = vrot.slane %v3752_v22, 1  ;;  %v3994_v11 = vsel %vm1929_vm2, %v3992_v28, %v3993_v6  ;;  %v3769_v28 = vld [vmem:[#allocation2 + $0x270] sm:$0xfe] }
 0x245   : > { %3613 = vmatmul.mubr.f32.gmra.mrb[56].mxu1 %v3335_v12  ;;  %v6707_v12 = vsel %vm2700_vm3, %v6702_v60, %v6706_v53  ;;  %v6721_v60 = vrot.slane %v6487_v3, 2  ;;  %v6499_v3 = vld [vmem:[#allocation2 + $0x2a8] sm:$0xfc] }
 0x246   : > { %7032 = vmatmul.mubr.f32.gmra.mrb[24].mxu0 %v6680_v54  ;;  %3617 = vmatprep.mubr.f32.mxu1 %v11288_v0  ;;  %v6712_v54 = vrot.slane %v11240_v44, 2  ;;  %v6715_v44 = vsel %vm2700_vm3, %v6709_v16, %v6714_v58  ;;  %v4013_v58 = vrot.slane %v11264_v35, 1 }
 0x247   : > { %7036 = vmatprep.mubr.f32.mxu0 %v6687_v19  ;;  %v6723_v53 = vsel %vm2700_vm3, %v6721_v60, %v6722_v24  ;;  %v6742_v60 = vrot.slane %v11276_v15, 2 }
 0x249   : > { %3618 = vmatmul.mubr.f32.gmra.mrb[58].mxu1 %v11293_v4 }
 0x24a   : > { %7037 = vmatmul.mubr.f32.gmra.mrb[26].mxu0 %v6685_v17  ;;  %3622 = vmatprep.mubr.f32.mxu1 %v3340_v34  ;;  %v6705_v17 = vsel %vm2700_vm3, %v6699_v37, %v6704_v55  ;;  %v3984_v34 = vsel %vm1929_vm2, %v3982_v13, %v3983_v51  ;;  %v6718_v37 = vrot.slane %v6486_v50, 2 }
 0x24b   : > { %7041 = vmatprep.mubr.f32.mxu0 %v6693_v39  ;;  %v6716_v39 = vrot.slane %v6485_v27, 2 }
 0x24d   : > { %3623 = vmatmul.mubr.f32.gmra.mrb[60].mxu1 %v3339_v31  ;;  %v6710_v31 = vsel %vm2700_vm3, %v6708_v56, %v6709_v16  ;;  %v6717_v23 = vsel %vm2700_vm3, %v6712_v54, %v6716_v39  ;;  %v4000_v56 = vrot.slane %v11257_v30, 1 }
 0x24e   : > { %7042 = vmatmul.mubr.f32.gmra.mrb[28].mxu0 %v6690_v42  ;;  %3627 = vmatprep.mubr.f32.mxu1 %v11164_v32  ;;  %v3975_v32 = vrot.slane %v3749_v29, 1  ;;  %v3988_v42 = vsel %vm1929_vm2, %v3983_v51, %v3987_v20  ;;  %v3990_v29 = vrot.slane %v11245_v8, 1  ;;  %v4003_v51 = vrot.slane %v11252_v57, 1  ;;  %v3767_v57 = vld [vmem:[#allocation2 + $0x260] sm:$0x1] }
 0x24f   : > { %7046 = vmatprep.mubr.f32.mxu0 %v6697_v41  ;;  %v3757_v41 = vld [vmem:[#allocation2 + $0x210] sm:$0xfe]  ;;  %v4007_v20 = vrot.slane %v3768_v45, 1  ;;  %v4005_v36 = vrot.slane %v3767_v57, 1  ;;  %v4020_v45 = vrot.slane %v11281_v61, 1 }
 0x250   : > { %v3976_v19 = vsel %vm1929_vm2, %v3970_v62, %v3975_v32  ;;  %v3989_v62 = vrot.slane %v3757_v41, 1  ;;  %v3764_v32 = vld [vmem:[#allocation2 + $0x248] sm:$0xfe]  ;;  %v6508_v57 = vld [vmem:[#allocation2 + $0x2f0] sm:$0x3] }
 0x251   : > { %3628 = vmatmul.mubr.f32.gmra.mrb[62].mxu1 %v11172_v10  ;;  %v6711_v10 = vrot.slane %v6481_v14, 2  ;;  %v6493_v14 = vld [vmem:[#allocation2 + $0x278] sm:$0xfc]  ;;  %v4002_v13 = vrot.slane %v3764_v32, 1  ;;  %v4008_v1 = vsel %vm1929_vm2, %v4003_v51, %v4007_v20  ;;  %v4006_v50 = vsel %vm1929_vm2, %v4000_v56, %v4005_v36 }
 0x252   : > { %7047 = vmatmul.mubr.f32.gmra.mrb[30].mxu0 %v6695_v40  ;;  %4322 = vmatprep.mubr.f32.mxu1 %v3974_v26  ;;  %v6491_v40 = vld [vmem:[#allocation2 + $0x268] sm:$0x3]  ;;  %v6719_v26 = vrot.slane %v11257_v30, 2  ;;  %v3991_v8 = vsel %vm1929_vm2, %v3989_v62, %v3990_v29  ;;  %v4001_v30 = vsel %vm1929_vm2, %v3999_v25, %v4000_v56  ;;  %v6748_v25 = vrot.slane %v6504_v43, 2 }
 0x253   : > { %7051 = vmatprep.mubr.f32.mxu0 %v6703_v7  ;;  %v6713_v59 = vsel %vm2700_vm3, %v6711_v10, %v6712_v54  ;;  %v6490_v7 = vld [vmem:[#allocation2 + $0x260] sm:$0x3]  ;;  %v6726_v22 = vrot.slane %v6491_v40, 2  ;;  %v6732_v10 = vrot.slane %v11264_v35, 2  ;;  %v6492_v54 = vld [vmem:[#allocation2 + $0x270] sm:$0xfc]  ;;  %v4004_v16 = vsel %vm1929_vm2, %v4002_v13, %v4003_v51 }
 0x254   : > { %v6724_v55 = vrot.slane %v6490_v7, 2  ;;  %v4009_v40 = vrot.slane %v3769_v28, 1  ;;  %v6739_v35 = vrot.slane %v11281_v61, 2  ;;  %v3776_v7 = vld [vmem:[#allocation2 + $0x2a8] sm:$0xfe]  ;;  %v6752_v51 = vrot.slane %v11288_v0, 2 }
 0x255   : > { %4323 = vmatmul.mubr.f32.vlgmr.msra.gmra.mrb[32].mxu1 %v3971_v5  ;;  %v3995_v5 = vrot.slane %v3761_v18, 1  ;;  %v6727_v63 = vsel %vm2700_vm3, %v6722_v24, %v6726_v22  ;;  %v3774_v24 = vld [vmem:[#allocation2 + $0x298] sm:$0x1]  ;;  %v6502_v18 = vld [vmem:[#allocation2 + $0x2c0] sm:$0x3] }
 0x256   : > { %7052 = vmatmul.mubr.f32.gmra.mrb[32].mxu0 %v6700_v2  ;;  %4327 = vmatprep.mubr.f32.mxu1 %v3978_v21  ;;  %v6720_v2 = vsel %vm2700_vm3, %v6718_v37, %v6719_v26  ;;  %v3998_v21 = vsel %vm1929_vm2, %v3993_v6, %v3997_v46  ;;  %v6725_v38 = vsel %vm2700_vm3, %v6719_v26, %v6724_v55  ;;  %v6498_v6 = vld [vmem:[#allocation2 + $0x2a0] sm:$0xfc]  ;;  %v6746_v46 = vrot.slane %v6503_v47, 2 }
 0x257   : > { %7056 = vmatprep.mubr.f32.mxu0 %v6707_v12  ;;  %v6731_v12 = vrot.slane %v6493_v14, 2  ;;  %v3996_v27 = vsel %vm1929_vm2, %v3990_v29, %v3995_v5  ;;  %v6738_v62 = vrot.slane %v6498_v6, 2  ;;  %v4022_v5 = vrot.slane %v3776_v7, 1  ;;  %v3786_v6 = vld [vmem:[#allocation2 + $0x2f8] sm:$0x1] }
 0x258   : > { %v4023_v55 = vrot.slane %v11276_v15, 1  ;;  %v3779_v15 = vld [vmem:[#allocation2 + $0x2c0] sm:$0x1] }
 0x259   : > { %4328 = vmatmul.mubr.f32.gmra.mrb[34].mxu1 %v3976_v19  ;;  %v6497_v19 = vld [vmem:[#allocation2 + $0x298] sm:$0x3]  ;;  %v6740_v22 = vsel %vm2700_vm3, %v6738_v62, %v6739_v35  ;;  %v4025_v20 = vrot.slane %v3779_v15, 1  ;;  %v3785_v62 = vld [vmem:[#allocation2 + $0x2f0] sm:$0x1] }
 0x25a   : > { %7057 = vmatmul.mubr.f32.gmra.mrb[34].mxu0 %v6705_v17  ;;  %4332 = vmatprep.mubr.f32.mxu1 %v3984_v34  ;;  %v6728_v17 = vrot.slane %v6492_v54, 2  ;;  %v6729_v34 = vrot.slane %v11269_v9, 2  ;;  %v6736_v39 = vrot.slane %v6497_v19, 2  ;;  %v6749_v19 = vrot.slane %v11293_v4, 2  ;;  %v3791_v15 = vld [vmem:[#allocation2 + $0x320] sm:$0x1] }
 0x25b   : > { %7061 = vmatprep.mubr.f32.mxu0 %v6713_v59  ;;  %v6733_v59 = vsel %vm2700_vm3, %v6731_v12, %v6732_v10  ;;  %v6509_v12 = vld [vmem:[#allocation2 + $0x2f8] sm:$0x3] }
 0x25c   : > { %v6737_v41 = vsel %vm2700_vm3, %v6732_v10, %v6736_v39  ;;  %v6754_v39 = vrot.slane %v6508_v57, 2  ;;  %v6750_v36 = vsel %vm2700_vm3, %v6748_v25, %v6749_v19  ;;  %v6520_v25 = vld [vmem:[#allocation2 + $0x350] sm:$0x3]  ;;  %v4045_v57 = vrot.slane %v3791_v15, 1 }
 0x25d   : > { %4333 = vmatmul.mubr.f32.gmra.mrb[36].mxu1 %v3981_v49  ;;  %v6734_v49 = vrot.slane %v6496_v48, 2  ;;  %v6511_v48 = vld [vmem:[#allocation2 + $0x308] sm:$0xfc] }
 0x25e   : > { %7062 = vmatmul.mubr.f32.gmra.mrb[36].mxu0 %v6710_v31  ;;  %4337 = vmatprep.mubr.f32.mxu1 %v3988_v42  ;;  %v6730_v31 = vsel %vm2700_vm3, %v6728_v17, %v6729_v34  ;;  %v4012_v42 = vrot.slane %v3770_v33, 1  ;;  %v6755_v47 = vsel %vm2700_vm3, %v6749_v19, %v6754_v39 }
 0x25f   : > { %7066 = vmatprep.mubr.f32.mxu0 %v6717_v23  ;;  %v6741_v23 = vrot.slane %v6499_v3, 2  ;;  %v6735_v29 = vsel %vm2700_vm3, %v6729_v34, %v6734_v49  ;;  %v6756_v34 = vrot.slane %v6509_v12, 2  ;;  %v3781_v49 = vld [vmem:[#allocation2 + $0x2d0] sm:$0xfe] }
 0x260   : > { %v4014_v26 = vsel %vm1929_vm2, %v4012_v42, %v4013_v58 }
 0x261   : > { %4338 = vmatmul.mubr.f32.gmra.mrb[38].mxu1 %v3986_v52  ;;  %v4010_v52 = vrot.slane %v11269_v9, 1  ;;  %v6743_v37 = vsel %vm2700_vm3, %v6741_v23, %v6742_v60  ;;  %v6757_v42 = vsel %vm2700_vm3, %v6752_v51, %v6756_v34  ;;  %v6515_v23 = vld [vmem:[#allocation2 + $0x328] sm:$0x3]  ;;  %v6774_v34 = vrot.slane %v6520_v25, 2 }
 0x262   : > { %7067 = vmatmul.mubr.f32.gmra.mrb[38].mxu0 %v6715_v44  ;;  %4342 = vmatprep.mubr.f32.mxu1 %v3994_v11  ;;  %v4017_v44 = vrot.slane %v3774_v24, 1  ;;  %v3773_v11 = vld [vmem:[#allocation2 + $0x290] sm:$0x1]  ;;  %v4030_v24 = vrot.slane %v11293_v4, 1 }
 0x263   : > { %7071 = vmatprep.mubr.f32.mxu0 %v6723_v53  ;;  %v6505_v53 = vld [vmem:[#allocation2 + $0x2d8] sm:$0xfc]  ;;  %v4011_v9 = vsel %vm1929_vm2, %v4009_v40, %v4010_v52  ;;  %v4015_v32 = vrot.slane %v3773_v11, 1 }
 0x264   : > { %v4018_v14 = vsel %vm1929_vm2, %v4013_v58, %v4017_v44  ;;  %v6751_v13 = vrot.slane %v6505_v53, 2  ;;  %v6761_v58 = vrot.slane %v6511_v48, 2  ;;  %v3788_v44 = vld [vmem:[#allocation2 + $0x308] sm:$0xfe]  ;;  %v6517_v11 = vld [vmem:[#allocation2 + $0x338] sm:$0xfc] }
 0x265   : > { %4343 = vmatmul.mubr.f32.gmra.mrb[40].mxu1 %v3991_v8  ;;  %v6744_v8 = vrot.slane %v6502_v18, 2  ;;  %v4016_v10 = vsel %vm1929_vm2, %v4010_v52, %v4015_v32  ;;  %v4037_v52 = vrot.slane %v3786_v6, 1  ;;  %v4035_v18 = vrot.slane %v3785_v62, 1 }
 0x266   : > { %7072 = vmatmul.mubr.f32.gmra.mrb[40].mxu0 %v6720_v2  ;;  %4347 = vmatprep.mubr.f32.mxu1 %v3998_v21  ;;  %v3775_v2 = vld [vmem:[#allocation2 + $0x2a0] sm:$0xfe]  ;;  %v6747_v21 = vsel %vm2700_vm3, %v6742_v60, %v6746_v46  ;;  %v6753_v17 = vsel %vm2700_vm3, %v6751_v13, %v6752_v51  ;;  %v4029_v60 = vrot.slane %v3781_v49, 1  ;;  %v6771_v32 = vrot.slane %v6517_v11, 2  ;;  %v6521_v13 = vld [vmem:[#allocation2 + $0x358] sm:$0x3] }
 0x267   : > { %7076 = vmatprep.mubr.f32.mxu0 %v6727_v63  ;;  %v3780_v63 = vld [vmem:[#allocation2 + $0x2c8] sm:$0x1]  ;;  %v4019_v54 = vrot.slane %v3775_v2, 1  ;;  %v6518_v2 = vld [vmem:[#allocation2 + $0x340] sm:$0xff]  ;;  %v4036_v51 = vsel %vm1929_vm2, %v4030_v24, %v4035_v18 }
 0x268   : > { %v4027_v56 = vrot.slane %v3780_v63, 1  ;;  %v4031_v4 = vsel %vm1929_vm2, %v4029_v60, %v4030_v24  ;;  %v11425_v18 = vld [vmem:[%s11527_s7] ss:$0 sm:$0xff] }
 0x269   : > { %4348 = vmatmul.mubr.f32.gmra.mrb[42].mxu1 %v3996_v27  ;;  %v6745_v27 = vsel %vm2700_vm3, %v6739_v35, %v6744_v8  ;;  %v4021_v61 = vsel %vm1929_vm2, %v4019_v54, %v4020_v45  ;;  %v6514_v35 = vld [vmem:[#allocation2 + $0x320] sm:$0x3] }
 0x26a   : > { %7077 = vmatmul.mubr.f32.gmra.mrb[42].mxu0 %v6725_v38  ;;  %4352 = vmatprep.mubr.f32.mxu1 %v4004_v16  ;;  %v4024_v38 = vsel %vm1929_vm2, %v4022_v5, %v4023_v55  ;;  %v3782_v16 = vld [vmem:[#allocation2 + $0x2d8] sm:$0xfe]  ;;  %v4028_v3 = vsel %vm1929_vm2, %v4023_v55, %v4027_v56  ;;  %v6764_v7 = vrot.slane %v6514_v35, 2  ;;  %v6516_v55 = vld [vmem:[#allocation2 + $0x330] sm:$0xfc] }
 0x26b   : > { %7081 = vmatprep.mubr.f32.mxu0 %v6733_v59  ;;  %v11370_v59 = vld [vmem:[#allocation2 + $0x318] sm:$0xff]  ;;  %v4032_v33 = vrot.slane %v3782_v16, 1  ;;  %v6768_v54 = vrot.slane %v6516_v55, 2 }
 0x26c   : > { %v6762_v28 = vrot.slane %v11370_v59, 2 }
 0x26d   : > { %4353 = vmatmul.mubr.f32.gmra.mrb[44].mxu1 %v4001_v30  ;;  %v4033_v30 = vrot.slane %v11288_v0, 1 }
 0x26e   : > { %7082 = vmatmul.mubr.f32.gmra.mrb[44].mxu0 %v6730_v31  ;;  %4357 = vmatprep.mubr.f32.mxu1 %v4008_v1  ;;  %v6510_v31 = vld [vmem:[#allocation2 + $0x300] sm:$0xfc]  ;;  %v11376_v1 = vld [vmem:[#allocation2 + $0x310] sm:$0xff] }
 0x26f   : > { %7086 = vmatprep.mubr.f32.mxu0 %v6737_v41  ;;  %v4026_v41 = vsel %vm1929_vm2, %v4020_v45, %v4025_v20  ;;  %v6758_v0 = vrot.slane %v6510_v31, 2  ;;  %v4034_v40 = vsel %vm1929_vm2, %v4032_v33, %v4033_v30  ;;  %v4038_v53 = vsel %vm1929_vm2, %v4033_v30, %v4037_v52 }
 0x270   : > { %v4040_v12 = vrot.slane %v11376_v1, 1  ;;  %v6769_v45 = vrot.slane %v6518_v2, 2 }
 0x271   : > { %4358 = vmatmul.mubr.f32.gmra.mrb[46].mxu1 %v4006_v50  ;;  %v6759_v50 = vrot.slane %v11376_v1, 2 }
 0x272   : > { %7087 = vmatmul.mubr.f32.gmra.mrb[46].mxu0 %v6735_v29  ;;  %4362 = vmatprep.mubr.f32.mxu1 %v4014_v26  ;;  %v6763_v29 = vsel %vm2700_vm3, %v6761_v58, %v6762_v28  ;;  %v6766_v26 = vrot.slane %v6515_v23, 2  ;;  %v6770_v16 = vsel %vm2700_vm3, %v6768_v54, %v6769_v45  ;;  %v4046_v48 = vsel %vm1929_vm2, %v4040_v12, %v4045_v57 }
 0x273   : > { %7091 = vmatprep.mubr.f32.mxu0 %v6743_v37  ;;  %v6519_v37 = vld [vmem:[#allocation2 + $0x348] sm:$0xff]  ;;  %v6760_v46 = vsel %vm2700_vm3, %v6758_v0, %v6759_v50  ;;  %v6765_v43 = vsel %vm2700_vm3, %v6759_v50, %v6764_v7 }
 0x274   : > { %v6767_v8 = vsel %vm2700_vm3, %v6762_v28, %v6766_v26  ;;  %v6772_v5 = vrot.slane %v6519_v37, 2 }
 0x275   : > { %4363 = vmatmul.mubr.f32.gmra.mrb[48].mxu1 %v4011_v9  ;;  %v4042_v9 = vrot.slane %v3788_v44, 1 }
 0x276   : > { %7092 = vmatmul.mubr.f32.gmra.mrb[48].mxu0 %v6740_v22  ;;  %4367 = vmatprep.mubr.f32.mxu1 %v4018_v14  ;;  %v4043_v22 = vrot.slane %v11370_v59, 1  ;;  %v3787_v14 = vld [vmem:[#allocation2 + $0x300] sm:$0xfe]  ;;  %v6775_v59 = vsel %vm2700_vm3, %v6769_v45, %v6774_v34 }
 0x277   : > { %7096 = vmatprep.mubr.f32.mxu0 %v6747_v21  ;;  %v3792_v21 = vld [vmem:[#allocation2 + $0x328] sm:$0x1]  ;;  %v4039_v63 = vrot.slane %v3787_v14, 1 }
 0x278   : > { %v4047_v19 = vrot.slane %v3792_v21, 1 }
 0x279   : > { %4368 = vmatmul.mubr.f32.gmra.mrb[50].mxu1 %v4016_v10  ;;  %v4044_v10 = vsel %vm1929_vm2, %v4042_v9, %v4043_v22  ;;  %v4041_v56 = vsel %vm1929_vm2, %v4039_v63, %v4040_v12 }
 0x27a   : > { %7097 = vmatmul.mubr.f32.gmra.mrb[50].mxu0 %v6745_v27  ;;  %4372 = vmatprep.mubr.f32.mxu1 %v4024_v38  ;;  %v6773_v27 = vsel %vm2700_vm3, %v6771_v32, %v6772_v5  ;;  %v6776_v38 = vrot.slane %v6521_v13, 2 }
 0x27b   : > { %7101 = vmatprep.mubr.f32.mxu0 %v6753_v17  ;;  %v4048_v17 = vsel %vm1929_vm2, %v4043_v22, %v4047_v19 }
 0x27c   : > { %v6777_v20 = vsel %vm2700_vm3, %v6772_v5, %v6776_v38 }
 0x27d   : > { %4373 = vmatmul.mubr.f32.gmra.mrb[52].mxu1 %v4021_v61 }
 0x27e   : > { %7102 = vmatmul.mubr.f32.gmra.mrb[52].mxu0 %v6750_v36  ;;  %4377 = vmatprep.mubr.f32.mxu1 %v4028_v3 }
 0x27f   : > { %7106 = vmatprep.mubr.f32.mxu0 %v6757_v42 }
 0x281   : > { %4378 = vmatmul.mubr.f32.gmra.mrb[54].mxu1 %v4026_v41 }
 0x282   : > { %7107 = vmatmul.mubr.f32.gmra.mrb[54].mxu0 %v6755_v47  ;;  %4382 = vmatprep.mubr.f32.mxu1 %v4034_v40 }
 0x283   : > { %7111 = vmatprep.mubr.f32.mxu0 %v6763_v29 }
 0x285   : > { %4383 = vmatmul.mubr.f32.gmra.mrb[56].mxu1 %v4031_v4 }
 0x286   : > { %7112 = vmatmul.mubr.f32.gmra.mrb[56].mxu0 %v6760_v46  ;;  %4387 = vmatprep.mubr.f32.mxu1 %v4038_v53 }
 0x287   : > { %7116 = vmatprep.mubr.f32.mxu0 %v6767_v8 }
 0x289   : > { %4388 = vmatmul.mubr.f32.gmra.mrb[58].mxu1 %v4036_v51 }
 0x28a   : > { %7117 = vmatmul.mubr.f32.gmra.mrb[58].mxu0 %v6765_v43  ;;  %4392 = vmatprep.mubr.f32.mxu1 %v4044_v10 }
 0x28b   : > { %7121 = vmatprep.mubr.f32.mxu0 %v6773_v27 }
 0x28d   : > { %4393 = vmatmul.mubr.f32.gmra.mrb[60].mxu1 %v4041_v56 }
 0x28e   : > { %7122 = vmatmul.mubr.f32.gmra.mrb[60].mxu0 %v6770_v16  ;;  %4397 = vmatprep.mubr.f32.mxu1 %v4048_v17 }
 0x28f   : > { %7126 = vmatprep.mubr.f32.mxu0 %v6777_v20 }
 0x291   : > { %4398 = vmatmul.mubr.f32.gmra.mrb[62].mxu1 %v4046_v48 }
 0x292   : > { %7127 = vmatmul.mubr.f32.gmra.mrb[62].mxu0 %v6775_v59 }
 0x2a8   : > { %v3474_v61 = vpop.f32.mrb[0].mxu1 }
 0x2a9   : > { %v3476_v39 = vpop.f32.mrb[1].mxu1  ;;  %v8364_v53 = vadd.f32 %v11425_v18, %v3474_v61 }
 0x2ac   : > { %v3479_v33 = vpop.f32.mrb[2].mxu1 }
 0x2ad   : > { %v3481_v36 = vpop.f32.mrb[3].mxu1  ;;  %v8366_v14 = vadd.f32 %v11425_v18, %v3479_v33 }
 0x2b0   : > { %v3484_v3 = vpop.f32.mrb[4].mxu1 }
 0x2b1   : > { %v3486_v30 = vpop.f32.mrb[5].mxu1  ;;  %v8368_v2 = vadd.f32 %v11425_v18, %v3484_v3 }
 0x2b4   : > { %v3489_v49 = vpop.f32.mrb[6].mxu1 }
 0x2b5   : > { %v3491_v31 = vpop.f32.mrb[7].mxu1  ;;  %v8370_v54 = vadd.f32 %v11425_v18, %v3489_v49 }
 0x2b8   : > { %v3494_v1 = vpop.f32.mrb[8].mxu1 }
 0x2b9   : > { %v3496_v42 = vpop.f32.mrb[9].mxu1  ;;  %v8372_v56 = vadd.f32 %v11425_v18, %v3494_v1 }
 0x2bc   : > { %v3499_v58 = vpop.f32.mrb[10].mxu1 }
 0x2bd   : > { %v3501_v28 = vpop.f32.mrb[11].mxu1  ;;  %v8374_v59 = vadd.f32 %v11425_v18, %v3499_v58 }
 0x2c0   : > { %v11402_v6 = vpop.f32.mrb[12].mxu1 }
 0x2c1   : > { %v3506_v41 = vpop.f32.mrb[13].mxu1  ;;  %v8376_v49 = vadd.f32 %v11425_v18, %v11402_v6 }
 0x2c4   : > { %v11404_v23 = vpop.f32.mrb[14].mxu1 }
 0x2c5   : > { %v3511_v60 = vpop.f32.mrb[15].mxu1  ;;  %v8378_v58 = vadd.f32 %v11425_v18, %v11404_v23 }
 0x2c8   : > { %v11406_v24 = vpop.f32.mrb[16].mxu1 }
 0x2c9   : > { %v3516_v0 = vpop.f32.mrb[17].mxu1  ;;  %v8380_v6 = vadd.f32 %v11425_v18, %v11406_v24 }
 0x2cc   : > { %v11408_v50 = vpop.f32.mrb[18].mxu1 }
 0x2cd   : > { %v3521_v47 = vpop.f32.mrb[19].mxu1  ;;  %v8382_v23 = vadd.f32 %v11425_v18, %v11408_v50 }
 0x2d0   : > { %v11410_v40 = vpop.f32.mrb[20].mxu1 }
 0x2d1   : > { %v3526_v52 = vpop.f32.mrb[21].mxu1  ;;  %v8384_v24 = vadd.f32 %v11425_v18, %v11410_v40 }
 0x2d4   : > { %v11412_v62 = vpop.f32.mrb[22].mxu1 }
 0x2d5   : > { %v3531_v35 = vpop.f32.mrb[23].mxu1  ;;  %v8386_v50 = vadd.f32 %v11425_v18, %v11412_v62 }
 0x2d8   : > { %v11414_v29 = vpop.f32.mrb[24].mxu1 }
 0x2d9   : > { %v3536_v26 = vpop.f32.mrb[25].mxu1  ;;  %v8388_v40 = vadd.f32 %v11425_v18, %v11414_v29 }
 0x2dc   : > { %v11416_v44 = vpop.f32.mrb[26].mxu1 }
 0x2dd   : > { %v3541_v11 = vpop.f32.mrb[27].mxu1  ;;  %v8390_v62 = vadd.f32 %v11425_v18, %v11416_v44 }
 0x2e0   : > { %v11418_v37 = vpop.f32.mrb[28].mxu1 }
 0x2e1   : > { %v3546_v4 = vpop.f32.mrb[29].mxu1  ;;  %v8392_v29 = vadd.f32 %v11425_v18, %v11418_v37 }
 0x2e4   : > { %v11420_v46 = vpop.f32.mrb[30].mxu1 }
 0x2e5   : > { %v3551_v7 = vpop.f32.mrb[31].mxu1  ;;  %v8394_v44 = vadd.f32 %v11425_v18, %v11420_v46 }
 0x2e9   : > { %v6973_v9 = vpop.f32.mrb[0].mxu0 }
 0x2ea   : > { %v8365_v22 = vadd.f32 %v8364_v53, %v6973_v9  ;;  %v6975_v32 = vpop.f32.mrb[1].mxu0 }
 0x2ec   : > { %7336 = vst [vmem:[%s11432_s16] sm:$0xff] %v8365_v22  ;;  %v7266_v21 = vmul.f32 %v8365_v22, %v8365_v22 }
 0x2ed   : > { %v6978_v8 = vpop.f32.mrb[2].mxu0 }
 0x2ee   : > { %v8367_v5 = vadd.f32 %v8366_v14, %v6978_v8  ;;  %v6980_v55 = vpop.f32.mrb[3].mxu0 }
 0x2f0   : > { %v7228_v13 = vadd.f32 %v8367_v5, %v8365_v22  ;;  %v7267_v51 = vmul.f32 %v8367_v5, %v8367_v5  ;;  %7337 = vst [vmem:[%s11432_s16 + $0x8] sm:$0xff] %v8367_v5 }
 0x2f1   : > { %v6983_v43 = vpop.f32.mrb[4].mxu0 }
 0x2f2   : > { %v7298_v63 = vadd.f32 %v7267_v51, %v7266_v21  ;;  %v8369_v12 = vadd.f32 %v8368_v2, %v6983_v43  ;;  %v6985_v10 = vpop.f32.mrb[5].mxu0 }
 0x2f4   : > { %v7229_v45 = vadd.f32 %v8369_v12, %v7228_v13  ;;  %v7268_v19 = vmul.f32 %v8369_v12, %v8369_v12  ;;  %7338 = vst [vmem:[%s11432_s16 + $0x10] sm:$0xff] %v8369_v12 }
 0x2f5   : > { %v6988_v15 = vpop.f32.mrb[6].mxu0 }
 0x2f6   : > { %v7299_v27 = vadd.f32 %v7298_v63, %v7268_v19  ;;  %v8371_v38 = vadd.f32 %v8370_v54, %v6988_v15  ;;  %v6990_v25 = vpop.f32.mrb[7].mxu0 }
 0x2f8   : > { %v7230_v57 = vadd.f32 %v8371_v38, %v7229_v45  ;;  %v7269_v16 = vmul.f32 %v8371_v38, %v8371_v38  ;;  %7339 = vst [vmem:[%s11432_s16 + $0x18] sm:$0xff] %v8371_v38 }
 0x2f9   : > { %v6993_v17 = vpop.f32.mrb[8].mxu0 }
 0x2fa   : > { %v7300_v34 = vadd.f32 %v7299_v27, %v7269_v16  ;;  %v8373_v20 = vadd.f32 %v8372_v56, %v6993_v17  ;;  %v6995_v48 = vpop.f32.mrb[9].mxu0 }
 0x2fc   : > { %v7231_v61 = vadd.f32 %v8373_v20, %v7230_v57  ;;  %v7270_v39 = vmul.f32 %v8373_v20, %v8373_v20  ;;  %7340 = vst [vmem:[%s11432_s16 + $0x20] sm:$0xff] %v8373_v20 }
 0x2fd   : > { %v6998_v33 = vpop.f32.mrb[10].mxu0 }
 0x2fe   : > { %v7301_v36 = vadd.f32 %v7300_v34, %v7270_v39  ;;  %v8375_v3 = vadd.f32 %v8374_v59, %v6998_v33  ;;  %v7000_v30 = vpop.f32.mrb[11].mxu0 }
 0x300   : > { %v7232_v31 = vadd.f32 %v8375_v3, %v7231_v61  ;;  %v7271_v1 = vmul.f32 %v8375_v3, %v8375_v3  ;;  %7341 = vst [vmem:[%s11432_s16 + $0x28] sm:$0xff] %v8375_v3 }
 0x301   : > { %v7003_v42 = vpop.f32.mrb[12].mxu0 }
 0x302   : > { %v7302_v28 = vadd.f32 %v7301_v36, %v7271_v1  ;;  %v8377_v41 = vadd.f32 %v8376_v49, %v7003_v42  ;;  %v7005_v60 = vpop.f32.mrb[13].mxu0 }
 0x304   : > { %v7233_v0 = vadd.f32 %v8377_v41, %v7232_v31  ;;  %v7272_v47 = vmul.f32 %v8377_v41, %v8377_v41  ;;  %7342 = vst [vmem:[%s11432_s16 + $0x30] sm:$0xff] %v8377_v41 }
 0x305   : > { %v7008_v52 = vpop.f32.mrb[14].mxu0 }
 0x306   : > { %v7303_v35 = vadd.f32 %v7302_v28, %v7272_v47  ;;  %v8379_v26 = vadd.f32 %v8378_v58, %v7008_v52  ;;  %v7010_v11 = vpop.f32.mrb[15].mxu0 }
 0x308   : > { %v7234_v4 = vadd.f32 %v8379_v26, %v7233_v0  ;;  %v7273_v7 = vmul.f32 %v8379_v26, %v8379_v26  ;;  %7343 = vst [vmem:[%s11432_s16 + $0x38] sm:$0xff] %v8379_v26 }
 0x309   : > { %v7013_v53 = vpop.f32.mrb[16].mxu0 }
 0x30a   : > { %v7304_v9 = vadd.f32 %v7303_v35, %v7273_v7  ;;  %v8381_v22 = vadd.f32 %v8380_v6, %v7013_v53  ;;  %v7015_v32 = vpop.f32.mrb[17].mxu0 }
 0x30c   : > { %v7235_v14 = vadd.f32 %v8381_v22, %v7234_v4  ;;  %v7274_v8 = vmul.f32 %v8381_v22, %v8381_v22  ;;  %7344 = vst [vmem:[%s11432_s16 + $0x40] sm:$0xff] %v8381_v22 }
 0x30d   : > { %v7018_v5 = vpop.f32.mrb[18].mxu0 }
 0x30e   : > { %v7305_v55 = vadd.f32 %v7304_v9, %v7274_v8  ;;  %v8383_v2 = vadd.f32 %v8382_v23, %v7018_v5  ;;  %v7020_v21 = vpop.f32.mrb[19].mxu0 }
 0x310   : > { %v7236_v13 = vadd.f32 %v8383_v2, %v7235_v14  ;;  %v7275_v51 = vmul.f32 %v8383_v2, %v8383_v2  ;;  %7345 = vst [vmem:[%s11432_s16 + $0x48] sm:$0xff] %v8383_v2 }
 0x311   : > { %v7023_v43 = vpop.f32.mrb[20].mxu0 }
 0x312   : > { %v7306_v63 = vadd.f32 %v7305_v55, %v7275_v51  ;;  %v8385_v12 = vadd.f32 %v8384_v24, %v7023_v43  ;;  %v7025_v10 = vpop.f32.mrb[21].mxu0 }
 0x314   : > { %v7237_v54 = vadd.f32 %v8385_v12, %v7236_v13  ;;  %v7276_v45 = vmul.f32 %v8385_v12, %v8385_v12  ;;  %7346 = vst [vmem:[%s11432_s16 + $0x50] sm:$0xff] %v8385_v12 }
 0x315   : > { %v7028_v19 = vpop.f32.mrb[22].mxu0 }
 0x316   : > { %v7307_v15 = vadd.f32 %v7306_v63, %v7276_v45  ;;  %v8387_v27 = vadd.f32 %v8386_v50, %v7028_v19  ;;  %v7030_v38 = vpop.f32.mrb[23].mxu0 }
 0x318   : > { %v7238_v25 = vadd.f32 %v8387_v27, %v7237_v54  ;;  %v7277_v56 = vmul.f32 %v8387_v27, %v8387_v27  ;;  %7347 = vst [vmem:[%s11432_s16 + $0x58] sm:$0xff] %v8387_v27 }
 0x319   : > { %v7033_v57 = vpop.f32.mrb[24].mxu0 }
 0x31a   : > { %v7308_v16 = vadd.f32 %v7307_v15, %v7277_v56  ;;  %v8389_v17 = vadd.f32 %v8388_v40, %v7033_v57  ;;  %v7035_v34 = vpop.f32.mrb[25].mxu0 }
 0x31c   : > { %v7239_v20 = vadd.f32 %v8389_v17, %v7238_v25  ;;  %v7278_v48 = vmul.f32 %v8389_v17, %v8389_v17  ;;  %7348 = vst [vmem:[%s11432_s16 + $0x60] sm:$0xff] %v8389_v17 }
 0x31d   : > { %v7038_v59 = vpop.f32.mrb[26].mxu0 }
 0x31e   : > { %v7309_v61 = vadd.f32 %v7308_v16, %v7278_v48  ;;  %v8391_v39 = vadd.f32 %v8390_v62, %v7038_v59  ;;  %v7040_v33 = vpop.f32.mrb[27].mxu0 }
 0x320   : > { %v7240_v36 = vadd.f32 %v8391_v39, %v7239_v20  ;;  %v7279_v3 = vmul.f32 %v8391_v39, %v8391_v39  ;;  %7349 = vst [vmem:[%s11432_s16 + $0x68] sm:$0xff] %v8391_v39 }
 0x321   : > { %v7043_v30 = vpop.f32.mrb[28].mxu0 }
 0x322   : > { %v7310_v49 = vadd.f32 %v7309_v61, %v7279_v3  ;;  %v8393_v31 = vadd.f32 %v8392_v29, %v7043_v30  ;;  %v7045_v1 = vpop.f32.mrb[29].mxu0 }
 0x324   : > { %v7241_v42 = vadd.f32 %v8393_v31, %v7240_v36  ;;  %v7280_v28 = vmul.f32 %v8393_v31, %v8393_v31  ;;  %7350 = vst [vmem:[%s11432_s16 + $0x70] sm:$0xff] %v8393_v31 }
 0x325   : > { %v7048_v41 = vpop.f32.mrb[30].mxu0 }
 0x326   : > { %v7311_v60 = vadd.f32 %v7310_v49, %v7280_v28  ;;  %v8395_v58 = vadd.f32 %v8394_v44, %v7048_v41  ;;  %v7050_v0 = vpop.f32.mrb[31].mxu0 }
 0x328   : > { %v7242_v37 = vadd.f32 %v8395_v58, %v7241_v42  ;;  %v7281_v47 = vmul.f32 %v8395_v58, %v8395_v58  ;;  %7351 = vst [vmem:[%s11432_s16 + $0x78] sm:$0xff] %v8395_v58  ;;  %v4324_v52 = vpop.f32.mrb[32].mxu1 }
 0x329   : > { %v8396_v35 = vadd.f32 %v11425_v18, %v4324_v52  ;;  %v7053_v26 = vpop.f32.mrb[32].mxu0  ;;  %v4326_v11 = vpop.f32.mrb[33].mxu1 }
 0x32a   : > { %v7312_v6 = vadd.f32 %v7311_v60, %v7281_v47  ;;  %v7055_v4 = vpop.f32.mrb[33].mxu0 }
 0x32b   : > { %v8397_v46 = vadd.f32 %v8396_v35, %v7053_v26 }
 0x32c   : > { %v4329_v7 = vpop.f32.mrb[34].mxu1 }
 0x32d   : > { %v7243_v53 = vadd.f32 %v8397_v46, %v7242_v37  ;;  %v7282_v9 = vmul.f32 %v8397_v46, %v8397_v46  ;;  %7352 = vst [vmem:[%s11432_s16 + $0x80] sm:$0xff] %v8397_v46  ;;  %v8398_v22 = vadd.f32 %v11425_v18, %v4329_v7  ;;  %v7058_v32 = vpop.f32.mrb[34].mxu0  ;;  %v4331_v23 = vpop.f32.mrb[35].mxu1 }
 0x32e   : > { %v7060_v14 = vpop.f32.mrb[35].mxu0 }
 0x32f   : > { %v7313_v8 = vadd.f32 %v7312_v6, %v7282_v9  ;;  %v8399_v5 = vadd.f32 %v8398_v22, %v7058_v32 }
 0x330   : > { %v4334_v55 = vpop.f32.mrb[36].mxu1 }
 0x331   : > { %v7244_v2 = vadd.f32 %v8399_v5, %v7243_v53  ;;  %v7283_v21 = vmul.f32 %v8399_v5, %v8399_v5  ;;  %7353 = vst [vmem:[%s11432_s16 + $0x88] sm:$0xff] %v8399_v5  ;;  %v8400_v24 = vadd.f32 %v11425_v18, %v4334_v55  ;;  %v7063_v13 = vpop.f32.mrb[36].mxu0  ;;  %v4336_v51 = vpop.f32.mrb[37].mxu1 }
 0x332   : > { %v7065_v43 = vpop.f32.mrb[37].mxu0 }
 0x333   : > { %v7314_v63 = vadd.f32 %v7313_v8, %v7283_v21  ;;  %v8401_v12 = vadd.f32 %v8400_v24, %v7063_v13 }
 0x334   : > { %v4339_v10 = vpop.f32.mrb[38].mxu1 }
 0x335   : > { %v7245_v50 = vadd.f32 %v8401_v12, %v7244_v2  ;;  %v7284_v54 = vmul.f32 %v8401_v12, %v8401_v12  ;;  %7354 = vst [vmem:[%s11432_s16 + $0x90] sm:$0xff] %v8401_v12  ;;  %v8402_v45 = vadd.f32 %v11425_v18, %v4339_v10  ;;  %v7068_v19 = vpop.f32.mrb[38].mxu0  ;;  %v4341_v15 = vpop.f32.mrb[39].mxu1 }
 0x336   : > { %v7070_v27 = vpop.f32.mrb[39].mxu0 }
 0x337   : > { %v7315_v38 = vadd.f32 %v7314_v63, %v7284_v54  ;;  %v8403_v40 = vadd.f32 %v8402_v45, %v7068_v19 }
 0x338   : > { %v4344_v25 = vpop.f32.mrb[40].mxu1 }
 0x339   : > { %v7246_v56 = vadd.f32 %v8403_v40, %v7245_v50  ;;  %v7285_v57 = vmul.f32 %v8403_v40, %v8403_v40  ;;  %7355 = vst [vmem:[%s11432_s16 + $0x98] sm:$0xff] %v8403_v40  ;;  %v8404_v16 = vadd.f32 %v11425_v18, %v4344_v25  ;;  %v7073_v17 = vpop.f32.mrb[40].mxu0  ;;  %v4346_v34 = vpop.f32.mrb[41].mxu1 }
 0x33a   : > { %v7075_v62 = vpop.f32.mrb[41].mxu0 }
 0x33b   : > { %v7316_v20 = vadd.f32 %v7315_v38, %v7285_v57  ;;  %v8405_v48 = vadd.f32 %v8404_v16, %v7073_v17 }
 0x33c   : > { %v4349_v59 = vpop.f32.mrb[42].mxu1 }
 0x33d   : > { %v7247_v61 = vadd.f32 %v8405_v48, %v7246_v56  ;;  %v7286_v39 = vmul.f32 %v8405_v48, %v8405_v48  ;;  %7356 = vst [vmem:[%s11432_s16 + $0xa0] sm:$0xff] %v8405_v48  ;;  %v8406_v33 = vadd.f32 %v11425_v18, %v4349_v59  ;;  %v7078_v29 = vpop.f32.mrb[42].mxu0  ;;  %v4351_v36 = vpop.f32.mrb[43].mxu1 }
 0x33e   : > { %v7080_v3 = vpop.f32.mrb[43].mxu0 }
 0x33f   : > { %v7317_v30 = vadd.f32 %v7316_v20, %v7286_v39  ;;  %v8407_v49 = vadd.f32 %v8406_v33, %v7078_v29 }
 0x340   : > { %v4354_v31 = vpop.f32.mrb[44].mxu1 }
 0x341   : > { %v7248_v1 = vadd.f32 %v8407_v49, %v7247_v61  ;;  %v7287_v44 = vmul.f32 %v8407_v49, %v8407_v49  ;;  %7357 = vst [vmem:[%s11432_s16 + $0xa8] sm:$0xff] %v8407_v49  ;;  %v8408_v42 = vadd.f32 %v11425_v18, %v4354_v31  ;;  %v7083_v28 = vpop.f32.mrb[44].mxu0  ;;  %v4356_v41 = vpop.f32.mrb[45].mxu1 }
 0x342   : > { %v7085_v60 = vpop.f32.mrb[45].mxu0 }
 0x343   : > { %v7318_v58 = vadd.f32 %v7317_v30, %v7287_v44  ;;  %v8409_v0 = vadd.f32 %v8408_v42, %v7083_v28 }
 0x344   : > { %v4359_v37 = vpop.f32.mrb[46].mxu1 }
 0x345   : > { %v7249_v47 = vadd.f32 %v8409_v0, %v7248_v1  ;;  %v7288_v52 = vmul.f32 %v8409_v0, %v8409_v0  ;;  %7358 = vst [vmem:[%s11432_s16 + $0xb0] sm:$0xff] %v8409_v0  ;;  %v8410_v35 = vadd.f32 %v11425_v18, %v4359_v37  ;;  %v7088_v26 = vpop.f32.mrb[46].mxu0  ;;  %v4361_v11 = vpop.f32.mrb[47].mxu1 }
 0x346   : > { %v7090_v6 = vpop.f32.mrb[47].mxu0 }
 0x347   : > { %v7319_v4 = vadd.f32 %v7318_v58, %v7288_v52  ;;  %v8411_v46 = vadd.f32 %v8410_v35, %v7088_v26 }
 0x348   : > { %v4364_v7 = vpop.f32.mrb[48].mxu1 }
 0x349   : > { %v7250_v53 = vadd.f32 %v8411_v46, %v7249_v47  ;;  %v7289_v9 = vmul.f32 %v8411_v46, %v8411_v46  ;;  %7359 = vst [vmem:[%s11432_s16 + $0xb8] sm:$0xff] %v8411_v46  ;;  %v8412_v22 = vadd.f32 %v11425_v18, %v4364_v7  ;;  %v7093_v32 = vpop.f32.mrb[48].mxu0  ;;  %v4366_v23 = vpop.f32.mrb[49].mxu1 }
 0x34a   : > { %v7095_v14 = vpop.f32.mrb[49].mxu0 }
 0x34b   : > { %v7320_v8 = vadd.f32 %v7319_v4, %v7289_v9  ;;  %v8413_v5 = vadd.f32 %v8412_v22, %v7093_v32 }
 0x34c   : > { %v4369_v55 = vpop.f32.mrb[50].mxu1 }
 0x34d   : > { %v7251_v2 = vadd.f32 %v8413_v5, %v7250_v53  ;;  %v7290_v21 = vmul.f32 %v8413_v5, %v8413_v5  ;;  %7360 = vst [vmem:[%s11432_s16 + $0xc0] sm:$0xff] %v8413_v5  ;;  %v8414_v24 = vadd.f32 %v11425_v18, %v4369_v55  ;;  %v7098_v13 = vpop.f32.mrb[50].mxu0  ;;  %v4371_v51 = vpop.f32.mrb[51].mxu1 }
 0x34e   : > { %v7100_v43 = vpop.f32.mrb[51].mxu0 }
 0x34f   : > { %v7321_v63 = vadd.f32 %v7320_v8, %v7290_v21  ;;  %v8415_v12 = vadd.f32 %v8414_v24, %v7098_v13 }
 0x350   : > { %v4374_v10 = vpop.f32.mrb[52].mxu1 }
 0x351   : > { %v7252_v50 = vadd.f32 %v8415_v12, %v7251_v2  ;;  %v7291_v54 = vmul.f32 %v8415_v12, %v8415_v12  ;;  %7361 = vst [vmem:[%s11432_s16 + $0xc8] sm:$0xff] %v8415_v12  ;;  %v8416_v45 = vadd.f32 %v11425_v18, %v4374_v10  ;;  %v7103_v19 = vpop.f32.mrb[52].mxu0  ;;  %v4376_v15 = vpop.f32.mrb[53].mxu1 }
 0x352   : > { %v7105_v27 = vpop.f32.mrb[53].mxu0 }
 0x353   : > { %v7322_v38 = vadd.f32 %v7321_v63, %v7291_v54  ;;  %v8417_v40 = vadd.f32 %v8416_v45, %v7103_v19 }
 0x354   : > { %v4379_v25 = vpop.f32.mrb[54].mxu1 }
 0x355   : > { %v7253_v56 = vadd.f32 %v8417_v40, %v7252_v50  ;;  %v7292_v57 = vmul.f32 %v8417_v40, %v8417_v40  ;;  %7362 = vst [vmem:[%s11432_s16 + $0xd0] sm:$0xff] %v8417_v40  ;;  %v8418_v16 = vadd.f32 %v11425_v18, %v4379_v25  ;;  %v7108_v17 = vpop.f32.mrb[54].mxu0  ;;  %v4381_v34 = vpop.f32.mrb[55].mxu1 }
 0x356   : > { %v7110_v62 = vpop.f32.mrb[55].mxu0 }
 0x357   : > { %v7323_v20 = vadd.f32 %v7322_v38, %v7292_v57  ;;  %v8419_v48 = vadd.f32 %v8418_v16, %v7108_v17 }
 0x358   : > { %v4384_v59 = vpop.f32.mrb[56].mxu1 }
 0x359   : > { %v7254_v61 = vadd.f32 %v8419_v48, %v7253_v56  ;;  %v7293_v39 = vmul.f32 %v8419_v48, %v8419_v48  ;;  %7363 = vst [vmem:[%s11432_s16 + $0xd8] sm:$0xff] %v8419_v48  ;;  %v8420_v33 = vadd.f32 %v11425_v18, %v4384_v59  ;;  %v7113_v29 = vpop.f32.mrb[56].mxu0  ;;  %v4386_v36 = vpop.f32.mrb[57].mxu1 }
 0x35a   : > { %v7115_v3 = vpop.f32.mrb[57].mxu0 }
 0x35b   : > { %v7324_v30 = vadd.f32 %v7323_v20, %v7293_v39  ;;  %v8421_v49 = vadd.f32 %v8420_v33, %v7113_v29 }
 0x35c   : > { %v4389_v31 = vpop.f32.mrb[58].mxu1 }
 0x35d   : > { %v7255_v1 = vadd.f32 %v8421_v49, %v7254_v61  ;;  %v7294_v44 = vmul.f32 %v8421_v49, %v8421_v49  ;;  %7364 = vst [vmem:[%s11432_s16 + $0xe0] sm:$0xff] %v8421_v49  ;;  %v8422_v42 = vadd.f32 %v11425_v18, %v4389_v31  ;;  %v7118_v28 = vpop.f32.mrb[58].mxu0  ;;  %v4391_v41 = vpop.f32.mrb[59].mxu1 }
 0x35e   : > { %v7120_v60 = vpop.f32.mrb[59].mxu0 }
 0x35f   : > { %v7325_v58 = vadd.f32 %v7324_v30, %v7294_v44  ;;  %v8423_v0 = vadd.f32 %v8422_v42, %v7118_v28 }
 0x360   : > { %v4394_v37 = vpop.f32.mrb[60].mxu1 }
 0x361   : > { %v7256_v47 = vadd.f32 %v8423_v0, %v7255_v1  ;;  %v7295_v52 = vmul.f32 %v8423_v0, %v8423_v0  ;;  %7365 = vst [vmem:[%s11432_s16 + $0xe8] sm:$0xff] %v8423_v0  ;;  %v8424_v35 = vadd.f32 %v11425_v18, %v4394_v37  ;;  %v7123_v26 = vpop.f32.mrb[60].mxu0  ;;  %v4396_v11 = vpop.f32.mrb[61].mxu1 }
 0x362   : > { %v7125_v6 = vpop.f32.mrb[61].mxu0 }
 0x363   : > { %v7326_v4 = vadd.f32 %v7325_v58, %v7295_v52  ;;  %v8425_v46 = vadd.f32 %v8424_v35, %v7123_v26 }
 0x364   : > { %v4399_v7 = vpop.f32.mrb[62].mxu1 }
 0x365   : > { %v7257_v53 = vadd.f32 %v8425_v46, %v7256_v47  ;;  %v7296_v9 = vmul.f32 %v8425_v46, %v8425_v46  ;;  %7366 = vst [vmem:[%s11432_s16 + $0xf0] sm:$0xff] %v8425_v46  ;;  %v8426_v22 = vadd.f32 %v11425_v18, %v4399_v7  ;;  %v7128_v32 = vpop.f32.mrb[62].mxu0  ;;  %v4401_v23 = vpop.f32.mrb[63].mxu1 }
 0x366   : > { %v7130_v14 = vpop.f32.mrb[63].mxu0 }
 0x367   : > { %v7327_v8 = vadd.f32 %v7326_v4, %v7296_v9  ;;  %v8427_v5 = vadd.f32 %v8426_v22, %v7128_v32 }
 0x369   : > { %v7258_v55 = vadd.f32 %v8427_v5, %v7257_v53  ;;  %v7297_v2 = vmul.f32 %v8427_v5, %v8427_v5  ;;  %7367 = vst [vmem:[%s11432_s16 + $0xf8] sm:$0xff] %v8427_v5 }
 0x36b   : > { %v7259_v21 = vrot.slane %v7258_v55, 4  ;;  %v7328_v24 = vadd.f32 %v7327_v8, %v7297_v2 }
 0x36d   : > { %v7260_v13 = vadd.f32 %v7259_v21, %v7258_v55  ;;  %v7329_v51 = vrot.slane %v7328_v24, 4 }
 0x36f   : > { %v7261_v43 = vrot.slane %v7260_v13, 2  ;;  %v7330_v63 = vadd.f32 %v7329_v51, %v7328_v24 }
 0x371   : > { %v7262_v12 = vadd.f32 %v7261_v43, %v7260_v13  ;;  %v7331_v10 = vrot.slane %v7330_v63, 2 }
 0x373   : > { %v7263_v50 = vrot.slane %v7262_v12, 1  ;;  %v7332_v54 = vadd.f32 %v7331_v10, %v7330_v63 }
 0x375   : > { %v7264_v18 = vadd.f32 %v7263_v50, %v7262_v12  ;;  %v7333_v45 = vrot.slane %v7332_v54, 1 }
 0x377   : > { %7265 = vst [vmem:[%s682_s20] sm:$0x1] %v7264_v18  ;;  %v7334_v19 = vadd.f32 %v7333_v45, %v7332_v54 }
 0x379   : > { %7335 = vst [vmem:[%s682_s20 + $0x1] sm:$0x1] %v7334_v19 }
 0x37a PF: > { %s20_s11 = sadd.s32 1, %s8957_s11   ;;  %s11532_s30 = smov %s8953_s10 }
 0x37b   : > { %p17_p5 = scmp.ge.s32.totalorder %s20_s11, 4   ;;  %s11533_s10 = smov %s11535_s12 }
 0x37d   :  { %19 = sbr.rel (!%p17_p5) target bundleno = 2 (0x2), region = 155 }

</bundles_post_ra>
